<compile_context>
chip_gen: v5e
topology: v5e:2x2
jax: 0.10.0
libtpu: 0.0.40
codegen_flags: <defaults>
</compile_context>

<pallas_src>
import functools

import jax
import jax.numpy as jnp
from jax.experimental import pallas as pl
from jax.experimental.pallas import tpu as pltpu


# ----------------------------------------------------------------------------
# Fused FPN kernel (one grid step = B batch images)
# ----------------------------------------------------------------------------
def _fpn_fused_kernel(x_ref, cw_ref, cb_ref, pw_ref, pb_ref, o_ref, pad_ref,
                      *, B, H, W, G0):
    # x_ref  : (B, H, W*G0) f32      lane-dense input block
    # cw_ref : (10, 3*WG, WG) bf16   per-conv K-concatenated banded weights
    # cb_ref : (10, 1, WG) f32       per-conv bias (tiled over W)
    # pw_ref : (13*WG, WG) bf16      1x1 compress weights, flat over sources
    # pb_ref : (4, 1, WG) f32        compress biases
    # o_ref  : (B, H, WG) f32
    # pad_ref: (B, H+2, WG) bf16     row-halo scratch for 3x3 convs
    WG = W * G0
    M = B * H
    f32 = jnp.float32
    bf16 = jnp.bfloat16

    # Only the two halo rows per image must be zero (Conv2d zero padding along
    # H); the interior rows are fully overwritten before every use.  Re-zero
    # them each step (2*B short rows, essentially free) so correctness holds
    # even when the grid is split across TensorCores.
    zrow = jnp.zeros((B, 1, WG), bf16)
    pad_ref[:, 0:1, :] = zrow
    pad_ref[:, H + 1:H + 2, :] = zrow

    def conv3x3_relu(act_bf16, idx):
        # act_bf16: (M, WG) bf16  ->  (M, WG) bf16
        pad_ref[:, 1:H + 1, :] = act_bf16.reshape(B, H, WG)
        # Lane-concatenate the three shifted bands -> one K = 3*WG matmul.
        lhs = jnp.concatenate(
            [pad_ref[:, dy:dy + H, :].reshape(M, WG) for dy in range(3)],
            axis=-1)                                            # (M, 3*WG)
        acc = jnp.dot(lhs, cw_ref[idx], preferred_element_type=f32)
        return jnp.maximum(acc + cb_ref[idx], 0.0).astype(bf16)

    def compress1x1(parts_bf16, chunk0, bidx):
        # 1x1 conv over a channel concat == ONE matmul with K = k*WG.
        k = len(parts_bf16)
        lhs = jnp.concatenate(parts_bf16, axis=-1)              # (M, k*WG)
        rhs = pw_ref[chunk0 * WG:(chunk0 + k) * WG, :]          # static slice
        acc = jnp.dot(lhs, rhs, preferred_element_type=f32)
        return acc + pb_ref[bidx]                               # (M, WG) f32

    x_in = x_ref[...].reshape(M, WG)                            # f32

    # ---- forward graph (mirrors the PyTorch module exactly) ----
    x1 = conv3x3_relu(x_in.astype(bf16), 0)
    x2 = conv3x3_relu(x1, 1)
    x3 = conv3x3_relu(x2, 2)
    x4 = conv3x3_relu(x3, 3)
    x11 = x_in + x4.astype(f32)

    x5_res = compress1x1([x1, x2, x3, x4], 0, 0)                # compress_in1
    x5 = conv3x3_relu(x5_res.astype(bf16), 4)
    x6 = conv3x3_relu(x5, 5)
    x7 = conv3x3_relu(x6, 6)
    x12 = x5_res + x7.astype(f32)

    x8_res = compress1x1([x5, x6, x7], 4, 1)                    # compress_in2
    x8 = conv3x3_relu(x8_res.astype(bf16), 7)
    x9 = conv3x3_relu(x8, 8)
    x13 = x8_res + x9.astype(f32)

    x10_res = compress1x1([x8, x9], 7, 2)                       # compress_in3
    x10 = conv3x3_relu(x10_res.astype(bf16), 9)
    x14 = x10_res + x10.astype(f32)

    out = compress1x1([x11.astype(bf16), x12.astype(bf16),
                       x13.astype(bf16), x14.astype(bf16)], 9, 3) + x_in
    o_ref[...] = out.reshape(B, H, WG).astype(o_ref.dtype)


# ----------------------------------------------------------------------------
# Weight packing: fold dx taps + W-padding + channel mixing into lane-space
# matrices and K-concatenate (plain JAX, done once).
# ----------------------------------------------------------------------------
def _kron_lane(S, wt):
    # S: (W, W) pixel-structure; wt: (..., G0, G0) channel mix.
    # Result[..., c*G0+i, w*G0+j] = S[c, w] * wt[..., i, j]
    G0 = wt.shape[-1]
    Wd = S.shape[0]
    out = jnp.einsum("cw,...ij->...ciwj", S, wt)
    return out.reshape(*wt.shape[:-2], Wd * G0, Wd * G0)


def _conv_band_weights(w_hwio, W):
    # (3, 3, G0, G0) HWIO -> (3*WG, WG): per kernel row dy, a lane-space matrix
    # applying all three dx taps with W zero-padding built in; the three dy
    # bands are K-concatenated along rows (matches the in-kernel lane concat).
    bands = []
    for dy in range(3):
        B = sum(_kron_lane(jnp.eye(W, k=1 - dx, dtype=w_hwio.dtype),
                           w_hwio[dy, dx]) for dx in range(3))
        bands.append(B)
    G0 = w_hwio.shape[-1]
    return jnp.stack(bands).reshape(3 * W * G0, W * G0)


def pack_fpn_params(params, W):
    G0 = params["conv1"][0].shape[-1]
    WG = W * G0
    eyeW = jnp.eye(W, dtype=jnp.float32)

    conv_w = jnp.stack([_conv_band_weights(params[f"conv{i + 1}"][0], W)
                        for i in range(10)])                    # (10, 3*WG, WG)
    conv_b = jnp.stack([jnp.tile(params[f"conv{i + 1}"][1], W)
                        for i in range(10)]).reshape(10, 1, WG)

    chunks, cbias = [], []
    for name in ("compress_in1", "compress_in2", "compress_in3", "compress_out"):
        w, b = params[name]                      # w: (k*G0, G0), b: (G0,)
        chunks.append(w.reshape(-1, G0, G0))     # split by concat source
        cbias.append(jnp.tile(b, W))
    comp_w = _kron_lane(eyeW, jnp.concatenate(chunks, axis=0))  # (13, WG, WG)
    comp_w = comp_w.reshape(13 * WG, WG)                        # flat K-concat
    comp_b = jnp.stack(cbias).reshape(4, 1, WG)

    return {
        "conv_w": conv_w.astype(jnp.bfloat16),
        "conv_b": conv_b.astype(jnp.float32),
        "comp_w": comp_w.astype(jnp.bfloat16),
        "comp_b": comp_b.astype(jnp.float32),
    }


# ----------------------------------------------------------------------------
# Deterministic parameter init (Conv2d-style uniform +-1/sqrt(fan_in))
# ----------------------------------------------------------------------------
def _init_conv(key, kh, kw, cin, cout):
    bound = 1.0 / (cin * kh * kw) ** 0.5
    kw_key, kb_key = jax.random.split(key)
    if kh == 1 and kw == 1:
        w = jax.random.uniform(kw_key, (cin, cout), jnp.float32, -bound, bound)
    else:
        w = jax.random.uniform(kw_key, (kh, kw, cin, cout), jnp.float32,
                               -bound, bound)
    b = jax.random.uniform(kb_key, (cout,), jnp.float32, -bound, bound)
    return w, b


def init_fpn_params(key, G0):
    keys = jax.random.split(key, 15)
    p = {}
    for i in range(10):
        p[f"conv{i + 1}"] = _init_conv(keys[i], 3, 3, G0, G0)
    p["compress_in1"] = _init_conv(keys[10], 1, 1, 4 * G0, G0)
    p["compress_in2"] = _init_conv(keys[11], 1, 1, 3 * G0, G0)
    p["compress_in3"] = _init_conv(keys[12], 1, 1, 2 * G0, G0)
    p["compress_in4"] = _init_conv(keys[13], 1, 1, 2 * G0, G0)  # unused in forward (matches PyTorch)
    p["compress_out"] = _init_conv(keys[14], 1, 1, 4 * G0, G0)
    return p


# ----------------------------------------------------------------------------
# Forward wrapper: one fused pallas_call, grid over batch blocks of size B.
# ----------------------------------------------------------------------------
def _pick_batch_block(N, H, target_rows=256):
    # Largest divisor B of N with B*H <= target_rows, keeping grid >= 2 so
    # both v7x TensorCores get work (single TC on v5e/v6e is unaffected).
    best = 1
    for b in range(1, N + 1):
        if N % b:
            continue
        if b * H > target_rows:
            continue
        if N >= 2 and N // b < 2:
            continue
        best = b
    return best


@functools.partial(jax.jit, static_argnames=("batch_block",))
def fpn_forward(x_nchw, packed, *, batch_block):
    N, G0, H, W = x_nchw.shape
    WG = W * G0
    assert WG % 128 == 0, "lane-dense layout requires W*G0 to be a multiple of 128"
    B = batch_block
    assert N % B == 0

    # NCHW -> lane-dense (N, H, W*G0).  If the surrounding model is NHWC this
    # transpose pair can be dropped entirely (saves one HBM round trip).
    x = jnp.transpose(x_nchw, (0, 2, 3, 1)).reshape(N, H, WG)

    out = pl.pallas_call(
        functools.partial(_fpn_fused_kernel, B=B, H=H, W=W, G0=G0),
        out_shape=jax.ShapeDtypeStruct((N, H, WG), jnp.float32),
        grid=(N // B,),
        in_specs=[
            pl.BlockSpec((B, H, WG), lambda n: (n, 0, 0)),
            # Weights: constant index_map -> DMA'd once, stay VMEM resident.
            pl.BlockSpec(packed["conv_w"].shape, lambda n: (0, 0, 0)),
            pl.BlockSpec(packed["conv_b"].shape, lambda n: (0, 0, 0)),
            pl.BlockSpec(packed["comp_w"].shape, lambda n: (0, 0)),
            pl.BlockSpec(packed["comp_b"].shape, lambda n: (0, 0, 0)),
        ],
        out_specs=pl.BlockSpec((B, H, WG), lambda n: (n, 0, 0)),
        scratch_shapes=[pltpu.VMEM((B, H + 2, WG), jnp.bfloat16)],
        compiler_params=pltpu.CompilerParams(
            dimension_semantics=("parallel",)),
    )(x, packed["conv_w"], packed["conv_b"],
      packed["comp_w"], packed["comp_b"])

    return jnp.transpose(out.reshape(N, H, W, G0), (0, 3, 1, 2))  # NHWC -> NCHW


# ----------------------------------------------------------------------------
# Pure-JAX f32 reference (for correctness check of the fused kernel)
# ----------------------------------------------------------------------------
def _conv3x3_relu_ref(x, w, b):
    y = jax.lax.conv_general_dilated(
        x, w, window_strides=(1, 1), padding="SAME",
        dimension_numbers=("NHWC", "HWIO", "NHWC"))
    return jnp.maximum(y + b, 0.0)


def _conv1x1_ref(x, w, b):
    return jnp.einsum("nhwc,cd->nhwd", x, w) + b


def fpn_reference(x_nchw, params):
    x = jnp.transpose(x_nchw, (0, 2, 3, 1))
    c = lambda i, a: _conv3x3_relu_ref(a, *params[f"conv{i}"])
    x1 = c(1, x); x2 = c(2, x1); x3 = c(3, x2); x4 = c(4, x3)
    x11 = x + x4
    x5_res = _conv1x1_ref(jnp.concatenate([x1, x2, x3, x4], -1), *params["compress_in1"])
    x5 = c(5, x5_res); x6 = c(6, x5); x7 = c(7, x6)
    x12 = x5_res + x7
    x8_res = _conv1x1_ref(jnp.concatenate([x5, x6, x7], -1), *params["compress_in2"])
    x8 = c(8, x8_res); x9 = c(9, x8)
    x13 = x8_res + x9
    x10_res = _conv1x1_ref(jnp.concatenate([x8, x9], -1), *params["compress_in3"])
    x10 = c(10, x10_res)
    x14 = x10_res + x10
    out = _conv1x1_ref(jnp.concatenate([x11, x12, x13, x14], -1),
                       *params["compress_out"]) + x
    return jnp.transpose(out, (0, 3, 1, 2))


# ----------------------------------------------------------------------------
if __name__ == "__main__":
    G0 = 8
    N, H, W = 8, 16, 16          # W * G0 == 128 -> exactly lane-dense

    key = jax.random.PRNGKey(0)
    k_x, k_p = jax.random.split(key)
    x = jax.random.normal(k_x, (N, G0, H, W), jnp.float32)   # NCHW like PyTorch
    params = init_fpn_params(k_p, G0)
    packed = pack_fpn_params(params, W)

    B = _pick_batch_block(N, H)                  # -> B=4, grid=(2,), M=64 rows
    out = fpn_forward(x, packed, batch_block=B)
    jax.block_until_ready(out)
    assert out.shape == (N, G0, H, W), out.shape

    # Loose tolerance: MXU operands and long-lived activations are bf16.
    ref = fpn_reference(x, params)
    err = float(jnp.max(jnp.abs(out - ref)))
    assert err < 0.3, f"max abs error vs f32 reference too large: {err}"
    print("KERNEL_OK")
</pallas_src>

<mosaic_0001>
module attributes {stable_mosaic.version = 11 : i64} {
  func.func @_fpn_fused_kernel(%arg0: i32, %arg1: memref<4x16x128xf32, #tpu.memory_space<vmem>>, %arg2: memref<10x384x128xbf16, #tpu.memory_space<vmem>>, %arg3: memref<10x1x128xf32, #tpu.memory_space<vmem>>, %arg4: memref<1664x128xbf16, #tpu.memory_space<vmem>>, %arg5: memref<4x1x128xf32, #tpu.memory_space<vmem>>, %arg6: memref<4x16x128xf32, #tpu.memory_space<vmem>>, %arg7: memref<4x18x128xbf16, #tpu.memory_space<vmem>>) attributes {dimension_semantics = [#tpu.dimension_semantics<parallel>], iteration_bounds = array<i64: 2>, scalar_prefetch = 0 : i64, scratch_operands = 1 : i64, tpu.core_type = #tpu.core_type<tc>, window_params = [{transform_indices = @transform_0, window_bounds = array<i64: 4, 16, 128>}, {pipeline_mode = #tpu.pipeline_mode<synchronous>, transform_indices = @transform_1, window_bounds = array<i64: 10, 384, 128>}, {pipeline_mode = #tpu.pipeline_mode<synchronous>, transform_indices = @transform_2, window_bounds = array<i64: 10, 1, 128>}, {pipeline_mode = #tpu.pipeline_mode<synchronous>, transform_indices = @transform_3, window_bounds = array<i64: 1664, 128>}, {pipeline_mode = #tpu.pipeline_mode<synchronous>, transform_indices = @transform_4, window_bounds = array<i64: 4, 1, 128>}, {transform_indices = @transform_5, window_bounds = array<i64: 4, 16, 128>}]} {
    %cst = arith.constant 0.000000e+00 : bf16
    %0 = vector.broadcast %cst : bf16 to vector<4x1x128xbf16>
    %c0 = arith.constant 0 : index
    %c0_0 = arith.constant 0 : index
    %c0_1 = arith.constant 0 : index
    %1 = vector.load %arg7[%c0, %c0_0, %c0_1] : memref<4x18x128xbf16, #tpu.memory_space<vmem>>, vector<4x1x128xbf16>
    tpu.vector_store %arg7[%c0, %c0_0, %c0_1], %0 {strides = array<i32>} : memref<4x18x128xbf16, #tpu.memory_space<vmem>>, vector<4x1x128xbf16>,
    %c0_2 = arith.constant 0 : index
    %c17 = arith.constant 17 : index
    %c0_3 = arith.constant 0 : index
    %2 = vector.load %arg7[%c0_2, %c17, %c0_3] : memref<4x18x128xbf16, #tpu.memory_space<vmem>>, vector<4x1x128xbf16>
    tpu.vector_store %arg7[%c0_2, %c17, %c0_3], %0 {strides = array<i32>} : memref<4x18x128xbf16, #tpu.memory_space<vmem>>, vector<4x1x128xbf16>,
    %c0_4 = arith.constant 0 : index
    %c0_5 = arith.constant 0 : index
    %c0_6 = arith.constant 0 : index
    %3 = vector.load %arg1[%c0_4, %c0_5, %c0_6] : memref<4x16x128xf32, #tpu.memory_space<vmem>>, vector<4x16x128xf32>
    %4 = vector.shape_cast %3 : vector<4x16x128xf32> to vector<64x128xf32>
    %5 = arith.truncf %4 : vector<64x128xf32> to vector<64x128xbf16>
    %6 = vector.shape_cast %5 : vector<64x128xbf16> to vector<4x16x128xbf16>
    %c0_7 = arith.constant 0 : index
    %c1 = arith.constant 1 : index
    %c0_8 = arith.constant 0 : index
    %7 = vector.load %arg7[%c0_7, %c1, %c0_8] : memref<4x18x128xbf16, #tpu.memory_space<vmem>>, vector<4x16x128xbf16>
    tpu.vector_store %arg7[%c0_7, %c1, %c0_8], %6 {strides = array<i32>} : memref<4x18x128xbf16, #tpu.memory_space<vmem>>, vector<4x16x128xbf16>,
    %c0_9 = arith.constant 0 : index
    %c0_10 = arith.constant 0 : index
    %c0_11 = arith.constant 0 : index
    %8 = vector.load %arg7[%c0_9, %c0_10, %c0_11] : memref<4x18x128xbf16, #tpu.memory_space<vmem>>, vector<4x16x128xbf16>
    %9 = vector.shape_cast %8 : vector<4x16x128xbf16> to vector<64x128xbf16>
    %c0_12 = arith.constant 0 : index
    %c1_13 = arith.constant 1 : index
    %c0_14 = arith.constant 0 : index
    %10 = vector.load %arg7[%c0_12, %c1_13, %c0_14] : memref<4x18x128xbf16, #tpu.memory_space<vmem>>, vector<4x16x128xbf16>
    %11 = vector.shape_cast %10 : vector<4x16x128xbf16> to vector<64x128xbf16>
    %c0_15 = arith.constant 0 : index
    %c2 = arith.constant 2 : index
    %c0_16 = arith.constant 0 : index
    %12 = vector.load %arg7[%c0_15, %c2, %c0_16] : memref<4x18x128xbf16, #tpu.memory_space<vmem>>, vector<4x16x128xbf16>
    %13 = vector.shape_cast %12 : vector<4x16x128xbf16> to vector<64x128xbf16>
    %14 = tpu.concatenate %9, %11, %13 in 1 : vector<64x128xbf16>, vector<64x128xbf16>, vector<64x128xbf16> -> vector<64x384xbf16>
    %c0_17 = arith.constant 0 : index
    %c0_18 = arith.constant 0 : index
    %c0_19 = arith.constant 0 : index
    %15 = vector.load %arg2[%c0_17, %c0_18, %c0_19] : memref<10x384x128xbf16, #tpu.memory_space<vmem>>, vector<1x384x128xbf16>
    %16 = vector.shape_cast %15 : vector<1x384x128xbf16> to vector<384x128xbf16>
    %cst_20 = arith.constant dense<0.000000e+00> : vector<64x128xf32>
    %17 = tpu.matmul %14, %16, %cst_20 {dimension_numbers = #tpu.dot_dimension_numbers<[1], [0], [0], [1], [0, 0, 1, 1], [], []>} : vector<64x384xbf16>, vector<384x128xbf16>, vector<64x128xf32> -> vector<64x128xf32>
    %c0_21 = arith.constant 0 : index
    %c0_22 = arith.constant 0 : index
    %c0_23 = arith.constant 0 : index
    %18 = vector.load %arg3[%c0_21, %c0_22, %c0_23] : memref<10x1x128xf32, #tpu.memory_space<vmem>>, vector<1x1x128xf32>
    %19 = vector.shape_cast %18 : vector<1x1x128xf32> to vector<1x128xf32>
    %20 = vector.broadcast %19 : vector<1x128xf32> to vector<64x128xf32>
    %21 = arith.addf %17, %20 : vector<64x128xf32>
    %cst_24 = arith.constant 0.000000e+00 : f32
    %22 = vector.broadcast %cst_24 : f32 to vector<64x128xf32>
    %23 = arith.maximumf %21, %22 : vector<64x128xf32>
    %24 = arith.truncf %23 : vector<64x128xf32> to vector<64x128xbf16>
    %25 = vector.shape_cast %24 : vector<64x128xbf16> to vector<4x16x128xbf16>
    %c0_25 = arith.constant 0 : index
    %c1_26 = arith.constant 1 : index
    %c0_27 = arith.constant 0 : index
    %26 = vector.load %arg7[%c0_25, %c1_26, %c0_27] : memref<4x18x128xbf16, #tpu.memory_space<vmem>>, vector<4x16x128xbf16>
    tpu.vector_store %arg7[%c0_25, %c1_26, %c0_27], %25 {strides = array<i32>} : memref<4x18x128xbf16, #tpu.memory_space<vmem>>, vector<4x16x128xbf16>,
    %c0_28 = arith.constant 0 : index
    %c0_29 = arith.constant 0 : index
    %c0_30 = arith.constant 0 : index
    %27 = vector.load %arg7[%c0_28, %c0_29, %c0_30] : memref<4x18x128xbf16, #tpu.memory_space<vmem>>, vector<4x16x128xbf16>
    %28 = vector.shape_cast %27 : vector<4x16x128xbf16> to vector<64x128xbf16>
    %c0_31 = arith.constant 0 : index
    %c1_32 = arith.constant 1 : index
    %c0_33 = arith.constant 0 : index
    %29 = vector.load %arg7[%c0_31, %c1_32, %c0_33] : memref<4x18x128xbf16, #tpu.memory_space<vmem>>, vector<4x16x128xbf16>
    %30 = vector.shape_cast %29 : vector<4x16x128xbf16> to vector<64x128xbf16>
    %c0_34 = arith.constant 0 : index
    %c2_35 = arith.constant 2 : index
    %c0_36 = arith.constant 0 : index
    %31 = vector.load %arg7[%c0_34, %c2_35, %c0_36] : memref<4x18x128xbf16, #tpu.memory_space<vmem>>, vector<4x16x128xbf16>
    %32 = vector.shape_cast %31 : vector<4x16x128xbf16> to vector<64x128xbf16>
    %33 = tpu.concatenate %28, %30, %32 in 1 : vector<64x128xbf16>, vector<64x128xbf16>, vector<64x128xbf16> -> vector<64x384xbf16>
    %c1_37 = arith.constant 1 : index
    %c0_38 = arith.constant 0 : index
    %c0_39 = arith.constant 0 : index
    %34 = vector.load %arg2[%c1_37, %c0_38, %c0_39] : memref<10x384x128xbf16, #tpu.memory_space<vmem>>, vector<1x384x128xbf16>
    %35 = vector.shape_cast %34 : vector<1x384x128xbf16> to vector<384x128xbf16>
    %cst_40 = arith.constant dense<0.000000e+00> : vector<64x128xf32>
    %36 = tpu.matmul %33, %35, %cst_40 {dimension_numbers = #tpu.dot_dimension_numbers<[1], [0], [0], [1], [0, 0, 1, 1], [], []>} : vector<64x384xbf16>, vector<384x128xbf16>, vector<64x128xf32> -> vector<64x128xf32>
    %c1_41 = arith.constant 1 : index
    %c0_42 = arith.constant 0 : index
    %c0_43 = arith.constant 0 : index
    %37 = vector.load %arg3[%c1_41, %c0_42, %c0_43] : memref<10x1x128xf32, #tpu.memory_space<vmem>>, vector<1x1x128xf32>
    %38 = vector.shape_cast %37 : vector<1x1x128xf32> to vector<1x128xf32>
    %39 = vector.broadcast %38 : vector<1x128xf32> to vector<64x128xf32>
    %40 = arith.addf %36, %39 : vector<64x128xf32>
    %cst_44 = arith.constant 0.000000e+00 : f32
    %41 = vector.broadcast %cst_44 : f32 to vector<64x128xf32>
    %42 = arith.maximumf %40, %41 : vector<64x128xf32>
    %43 = arith.truncf %42 : vector<64x128xf32> to vector<64x128xbf16>
    %44 = vector.shape_cast %43 : vector<64x128xbf16> to vector<4x16x128xbf16>
    %c0_45 = arith.constant 0 : index
    %c1_46 = arith.constant 1 : index
    %c0_47 = arith.constant 0 : index
    %45 = vector.load %arg7[%c0_45, %c1_46, %c0_47] : memref<4x18x128xbf16, #tpu.memory_space<vmem>>, vector<4x16x128xbf16>
    tpu.vector_store %arg7[%c0_45, %c1_46, %c0_47], %44 {strides = array<i32>} : memref<4x18x128xbf16, #tpu.memory_space<vmem>>, vector<4x16x128xbf16>,
    %c0_48 = arith.constant 0 : index
    %c0_49 = arith.constant 0 : index
    %c0_50 = arith.constant 0 : index
    %46 = vector.load %arg7[%c0_48, %c0_49, %c0_50] : memref<4x18x128xbf16, #tpu.memory_space<vmem>>, vector<4x16x128xbf16>
    %47 = vector.shape_cast %46 : vector<4x16x128xbf16> to vector<64x128xbf16>
    %c0_51 = arith.constant 0 : index
    %c1_52 = arith.constant 1 : index
    %c0_53 = arith.constant 0 : index
    %48 = vector.load %arg7[%c0_51, %c1_52, %c0_53] : memref<4x18x128xbf16, #tpu.memory_space<vmem>>, vector<4x16x128xbf16>
    %49 = vector.shape_cast %48 : vector<4x16x128xbf16> to vector<64x128xbf16>
    %c0_54 = arith.constant 0 : index
    %c2_55 = arith.constant 2 : index
    %c0_56 = arith.constant 0 : index
    %50 = vector.load %arg7[%c0_54, %c2_55, %c0_56] : memref<4x18x128xbf16, #tpu.memory_space<vmem>>, vector<4x16x128xbf16>
    %51 = vector.shape_cast %50 : vector<4x16x128xbf16> to vector<64x128xbf16>
    %52 = tpu.concatenate %47, %49, %51 in 1 : vector<64x128xbf16>, vector<64x128xbf16>, vector<64x128xbf16> -> vector<64x384xbf16>
    %c2_57 = arith.constant 2 : index
    %c0_58 = arith.constant 0 : index
    %c0_59 = arith.constant 0 : index
    %53 = vector.load %arg2[%c2_57, %c0_58, %c0_59] : memref<10x384x128xbf16, #tpu.memory_space<vmem>>, vector<1x384x128xbf16>
    %54 = vector.shape_cast %53 : vector<1x384x128xbf16> to vector<384x128xbf16>
    %cst_60 = arith.constant dense<0.000000e+00> : vector<64x128xf32>
    %55 = tpu.matmul %52, %54, %cst_60 {dimension_numbers = #tpu.dot_dimension_numbers<[1], [0], [0], [1], [0, 0, 1, 1], [], []>} : vector<64x384xbf16>, vector<384x128xbf16>, vector<64x128xf32> -> vector<64x128xf32>
    %c2_61 = arith.constant 2 : index
    %c0_62 = arith.constant 0 : index
    %c0_63 = arith.constant 0 : index
    %56 = vector.load %arg3[%c2_61, %c0_62, %c0_63] : memref<10x1x128xf32, #tpu.memory_space<vmem>>, vector<1x1x128xf32>
    %57 = vector.shape_cast %56 : vector<1x1x128xf32> to vector<1x128xf32>
    %58 = vector.broadcast %57 : vector<1x128xf32> to vector<64x128xf32>
    %59 = arith.addf %55, %58 : vector<64x128xf32>
    %cst_64 = arith.constant 0.000000e+00 : f32
    %60 = vector.broadcast %cst_64 : f32 to vector<64x128xf32>
    %61 = arith.maximumf %59, %60 : vector<64x128xf32>
    %62 = arith.truncf %61 : vector<64x128xf32> to vector<64x128xbf16>
    %63 = vector.shape_cast %62 : vector<64x128xbf16> to vector<4x16x128xbf16>
    %c0_65 = arith.constant 0 : index
    %c1_66 = arith.constant 1 : index
    %c0_67 = arith.constant 0 : index
    %64 = vector.load %arg7[%c0_65, %c1_66, %c0_67] : memref<4x18x128xbf16, #tpu.memory_space<vmem>>, vector<4x16x128xbf16>
    tpu.vector_store %arg7[%c0_65, %c1_66, %c0_67], %63 {strides = array<i32>} : memref<4x18x128xbf16, #tpu.memory_space<vmem>>, vector<4x16x128xbf16>,
    %c0_68 = arith.constant 0 : index
    %c0_69 = arith.constant 0 : index
    %c0_70 = arith.constant 0 : index
    %65 = vector.load %arg7[%c0_68, %c0_69, %c0_70] : memref<4x18x128xbf16, #tpu.memory_space<vmem>>, vector<4x16x128xbf16>
    %66 = vector.shape_cast %65 : vector<4x16x128xbf16> to vector<64x128xbf16>
    %c0_71 = arith.constant 0 : index
    %c1_72 = arith.constant 1 : index
    %c0_73 = arith.constant 0 : index
    %67 = vector.load %arg7[%c0_71, %c1_72, %c0_73] : memref<4x18x128xbf16, #tpu.memory_space<vmem>>, vector<4x16x128xbf16>
    %68 = vector.shape_cast %67 : vector<4x16x128xbf16> to vector<64x128xbf16>
    %c0_74 = arith.constant 0 : index
    %c2_75 = arith.constant 2 : index
    %c0_76 = arith.constant 0 : index
    %69 = vector.load %arg7[%c0_74, %c2_75, %c0_76] : memref<4x18x128xbf16, #tpu.memory_space<vmem>>, vector<4x16x128xbf16>
    %70 = vector.shape_cast %69 : vector<4x16x128xbf16> to vector<64x128xbf16>
    %71 = tpu.concatenate %66, %68, %70 in 1 : vector<64x128xbf16>, vector<64x128xbf16>, vector<64x128xbf16> -> vector<64x384xbf16>
    %c3 = arith.constant 3 : index
    %c0_77 = arith.constant 0 : index
    %c0_78 = arith.constant 0 : index
    %72 = vector.load %arg2[%c3, %c0_77, %c0_78] : memref<10x384x128xbf16, #tpu.memory_space<vmem>>, vector<1x384x128xbf16>
    %73 = vector.shape_cast %72 : vector<1x384x128xbf16> to vector<384x128xbf16>
    %cst_79 = arith.constant dense<0.000000e+00> : vector<64x128xf32>
    %74 = tpu.matmul %71, %73, %cst_79 {dimension_numbers = #tpu.dot_dimension_numbers<[1], [0], [0], [1], [0, 0, 1, 1], [], []>} : vector<64x384xbf16>, vector<384x128xbf16>, vector<64x128xf32> -> vector<64x128xf32>
    %c3_80 = arith.constant 3 : index
    %c0_81 = arith.constant 0 : index
    %c0_82 = arith.constant 0 : index
    %75 = vector.load %arg3[%c3_80, %c0_81, %c0_82] : memref<10x1x128xf32, #tpu.memory_space<vmem>>, vector<1x1x128xf32>
    %76 = vector.shape_cast %75 : vector<1x1x128xf32> to vector<1x128xf32>
    %77 = vector.broadcast %76 : vector<1x128xf32> to vector<64x128xf32>
    %78 = arith.addf %74, %77 : vector<64x128xf32>
    %cst_83 = arith.constant 0.000000e+00 : f32
    %79 = vector.broadcast %cst_83 : f32 to vector<64x128xf32>
    %80 = arith.maximumf %78, %79 : vector<64x128xf32>
    %81 = arith.truncf %80 : vector<64x128xf32> to vector<64x128xbf16>
    %82 = arith.extf %81 : vector<64x128xbf16> to vector<64x128xf32>
    %83 = arith.addf %4, %82 : vector<64x128xf32>
    %84 = tpu.concatenate %24, %43, %62, %81 in 1 : vector<64x128xbf16>, vector<64x128xbf16>, vector<64x128xbf16>, vector<64x128xbf16> -> vector<64x512xbf16>
    %c0_84 = arith.constant 0 : index
    %c0_85 = arith.constant 0 : index
    %85 = vector.load %arg4[%c0_84, %c0_85] : memref<1664x128xbf16, #tpu.memory_space<vmem>>, vector<512x128xbf16>
    %cst_86 = arith.constant dense<0.000000e+00> : vector<64x128xf32>
    %86 = tpu.matmul %84, %85, %cst_86 {dimension_numbers = #tpu.dot_dimension_numbers<[1], [0], [0], [1], [0, 0, 1, 1], [], []>} : vector<64x512xbf16>, vector<512x128xbf16>, vector<64x128xf32> -> vector<64x128xf32>
    %c0_87 = arith.constant 0 : index
    %c0_88 = arith.constant 0 : index
    %c0_89 = arith.constant 0 : index
    %87 = vector.load %arg5[%c0_87, %c0_88, %c0_89] : memref<4x1x128xf32, #tpu.memory_space<vmem>>, vector<1x1x128xf32>
    %88 = vector.shape_cast %87 : vector<1x1x128xf32> to vector<1x128xf32>
    %89 = vector.broadcast %88 : vector<1x128xf32> to vector<64x128xf32>
    %90 = arith.addf %86, %89 : vector<64x128xf32>
    %91 = arith.truncf %90 : vector<64x128xf32> to vector<64x128xbf16>
    %92 = vector.shape_cast %91 : vector<64x128xbf16> to vector<4x16x128xbf16>
    %c0_90 = arith.constant 0 : index
    %c1_91 = arith.constant 1 : index
    %c0_92 = arith.constant 0 : index
    %93 = vector.load %arg7[%c0_90, %c1_91, %c0_92] : memref<4x18x128xbf16, #tpu.memory_space<vmem>>, vector<4x16x128xbf16>
    tpu.vector_store %arg7[%c0_90, %c1_91, %c0_92], %92 {strides = array<i32>} : memref<4x18x128xbf16, #tpu.memory_space<vmem>>, vector<4x16x128xbf16>,
    %c0_93 = arith.constant 0 : index
    %c0_94 = arith.constant 0 : index
    %c0_95 = arith.constant 0 : index
    %94 = vector.load %arg7[%c0_93, %c0_94, %c0_95] : memref<4x18x128xbf16, #tpu.memory_space<vmem>>, vector<4x16x128xbf16>
    %95 = vector.shape_cast %94 : vector<4x16x128xbf16> to vector<64x128xbf16>
    %c0_96 = arith.constant 0 : index
    %c1_97 = arith.constant 1 : index
    %c0_98 = arith.constant 0 : index
    %96 = vector.load %arg7[%c0_96, %c1_97, %c0_98] : memref<4x18x128xbf16, #tpu.memory_space<vmem>>, vector<4x16x128xbf16>
    %97 = vector.shape_cast %96 : vector<4x16x128xbf16> to vector<64x128xbf16>
    %c0_99 = arith.constant 0 : index
    %c2_100 = arith.constant 2 : index
    %c0_101 = arith.constant 0 : index
    %98 = vector.load %arg7[%c0_99, %c2_100, %c0_101] : memref<4x18x128xbf16, #tpu.memory_space<vmem>>, vector<4x16x128xbf16>
    %99 = vector.shape_cast %98 : vector<4x16x128xbf16> to vector<64x128xbf16>
    %100 = tpu.concatenate %95, %97, %99 in 1 : vector<64x128xbf16>, vector<64x128xbf16>, vector<64x128xbf16> -> vector<64x384xbf16>
    %c4 = arith.constant 4 : index
    %c0_102 = arith.constant 0 : index
    %c0_103 = arith.constant 0 : index
    %101 = vector.load %arg2[%c4, %c0_102, %c0_103] : memref<10x384x128xbf16, #tpu.memory_space<vmem>>, vector<1x384x128xbf16>
    %102 = vector.shape_cast %101 : vector<1x384x128xbf16> to vector<384x128xbf16>
    %cst_104 = arith.constant dense<0.000000e+00> : vector<64x128xf32>
    %103 = tpu.matmul %100, %102, %cst_104 {dimension_numbers = #tpu.dot_dimension_numbers<[1], [0], [0], [1], [0, 0, 1, 1], [], []>} : vector<64x384xbf16>, vector<384x128xbf16>, vector<64x128xf32> -> vector<64x128xf32>
    %c4_105 = arith.constant 4 : index
    %c0_106 = arith.constant 0 : index
    %c0_107 = arith.constant 0 : index
    %104 = vector.load %arg3[%c4_105, %c0_106, %c0_107] : memref<10x1x128xf32, #tpu.memory_space<vmem>>, vector<1x1x128xf32>
    %105 = vector.shape_cast %104 : vector<1x1x128xf32> to vector<1x128xf32>
    %106 = vector.broadcast %105 : vector<1x128xf32> to vector<64x128xf32>
    %107 = arith.addf %103, %106 : vector<64x128xf32>
    %cst_108 = arith.constant 0.000000e+00 : f32
    %108 = vector.broadcast %cst_108 : f32 to vector<64x128xf32>
    %109 = arith.maximumf %107, %108 : vector<64x128xf32>
    %110 = arith.truncf %109 : vector<64x128xf32> to vector<64x128xbf16>
    %111 = vector.shape_cast %110 : vector<64x128xbf16> to vector<4x16x128xbf16>
    %c0_109 = arith.constant 0 : index
    %c1_110 = arith.constant 1 : index
    %c0_111 = arith.constant 0 : index
    %112 = vector.load %arg7[%c0_109, %c1_110, %c0_111] : memref<4x18x128xbf16, #tpu.memory_space<vmem>>, vector<4x16x128xbf16>
    tpu.vector_store %arg7[%c0_109, %c1_110, %c0_111], %111 {strides = array<i32>} : memref<4x18x128xbf16, #tpu.memory_space<vmem>>, vector<4x16x128xbf16>,
    %c0_112 = arith.constant 0 : index
    %c0_113 = arith.constant 0 : index
    %c0_114 = arith.constant 0 : index
    %113 = vector.load %arg7[%c0_112, %c0_113, %c0_114] : memref<4x18x128xbf16, #tpu.memory_space<vmem>>, vector<4x16x128xbf16>
    %114 = vector.shape_cast %113 : vector<4x16x128xbf16> to vector<64x128xbf16>
    %c0_115 = arith.constant 0 : index
    %c1_116 = arith.constant 1 : index
    %c0_117 = arith.constant 0 : index
    %115 = vector.load %arg7[%c0_115, %c1_116, %c0_117] : memref<4x18x128xbf16, #tpu.memory_space<vmem>>, vector<4x16x128xbf16>
    %116 = vector.shape_cast %115 : vector<4x16x128xbf16> to vector<64x128xbf16>
    %c0_118 = arith.constant 0 : index
    %c2_119 = arith.constant 2 : index
    %c0_120 = arith.constant 0 : index
    %117 = vector.load %arg7[%c0_118, %c2_119, %c0_120] : memref<4x18x128xbf16, #tpu.memory_space<vmem>>, vector<4x16x128xbf16>
    %118 = vector.shape_cast %117 : vector<4x16x128xbf16> to vector<64x128xbf16>
    %119 = tpu.concatenate %114, %116, %118 in 1 : vector<64x128xbf16>, vector<64x128xbf16>, vector<64x128xbf16> -> vector<64x384xbf16>
    %c5 = arith.constant 5 : index
    %c0_121 = arith.constant 0 : index
    %c0_122 = arith.constant 0 : index
    %120 = vector.load %arg2[%c5, %c0_121, %c0_122] : memref<10x384x128xbf16, #tpu.memory_space<vmem>>, vector<1x384x128xbf16>
    %121 = vector.shape_cast %120 : vector<1x384x128xbf16> to vector<384x128xbf16>
    %cst_123 = arith.constant dense<0.000000e+00> : vector<64x128xf32>
    %122 = tpu.matmul %119, %121, %cst_123 {dimension_numbers = #tpu.dot_dimension_numbers<[1], [0], [0], [1], [0, 0, 1, 1], [], []>} : vector<64x384xbf16>, vector<384x128xbf16>, vector<64x128xf32> -> vector<64x128xf32>
    %c5_124 = arith.constant 5 : index
    %c0_125 = arith.constant 0 : index
    %c0_126 = arith.constant 0 : index
    %123 = vector.load %arg3[%c5_124, %c0_125, %c0_126] : memref<10x1x128xf32, #tpu.memory_space<vmem>>, vector<1x1x128xf32>
    %124 = vector.shape_cast %123 : vector<1x1x128xf32> to vector<1x128xf32>
    %125 = vector.broadcast %124 : vector<1x128xf32> to vector<64x128xf32>
    %126 = arith.addf %122, %125 : vector<64x128xf32>
    %cst_127 = arith.constant 0.000000e+00 : f32
    %127 = vector.broadcast %cst_127 : f32 to vector<64x128xf32>
    %128 = arith.maximumf %126, %127 : vector<64x128xf32>
    %129 = arith.truncf %128 : vector<64x128xf32> to vector<64x128xbf16>
    %130 = vector.shape_cast %129 : vector<64x128xbf16> to vector<4x16x128xbf16>
    %c0_128 = arith.constant 0 : index
    %c1_129 = arith.constant 1 : index
    %c0_130 = arith.constant 0 : index
    %131 = vector.load %arg7[%c0_128, %c1_129, %c0_130] : memref<4x18x128xbf16, #tpu.memory_space<vmem>>, vector<4x16x128xbf16>
    tpu.vector_store %arg7[%c0_128, %c1_129, %c0_130], %130 {strides = array<i32>} : memref<4x18x128xbf16, #tpu.memory_space<vmem>>, vector<4x16x128xbf16>,
    %c0_131 = arith.constant 0 : index
    %c0_132 = arith.constant 0 : index
    %c0_133 = arith.constant 0 : index
    %132 = vector.load %arg7[%c0_131, %c0_132, %c0_133] : memref<4x18x128xbf16, #tpu.memory_space<vmem>>, vector<4x16x128xbf16>
    %133 = vector.shape_cast %132 : vector<4x16x128xbf16> to vector<64x128xbf16>
    %c0_134 = arith.constant 0 : index
    %c1_135 = arith.constant 1 : index
    %c0_136 = arith.constant 0 : index
    %134 = vector.load %arg7[%c0_134, %c1_135, %c0_136] : memref<4x18x128xbf16, #tpu.memory_space<vmem>>, vector<4x16x128xbf16>
    %135 = vector.shape_cast %134 : vector<4x16x128xbf16> to vector<64x128xbf16>
    %c0_137 = arith.constant 0 : index
    %c2_138 = arith.constant 2 : index
    %c0_139 = arith.constant 0 : index
    %136 = vector.load %arg7[%c0_137, %c2_138, %c0_139] : memref<4x18x128xbf16, #tpu.memory_space<vmem>>, vector<4x16x128xbf16>
    %137 = vector.shape_cast %136 : vector<4x16x128xbf16> to vector<64x128xbf16>
    %138 = tpu.concatenate %133, %135, %137 in 1 : vector<64x128xbf16>, vector<64x128xbf16>, vector<64x128xbf16> -> vector<64x384xbf16>
    %c6 = arith.constant 6 : index
    %c0_140 = arith.constant 0 : index
    %c0_141 = arith.constant 0 : index
    %139 = vector.load %arg2[%c6, %c0_140, %c0_141] : memref<10x384x128xbf16, #tpu.memory_space<vmem>>, vector<1x384x128xbf16>
    %140 = vector.shape_cast %139 : vector<1x384x128xbf16> to vector<384x128xbf16>
    %cst_142 = arith.constant dense<0.000000e+00> : vector<64x128xf32>
    %141 = tpu.matmul %138, %140, %cst_142 {dimension_numbers = #tpu.dot_dimension_numbers<[1], [0], [0], [1], [0, 0, 1, 1], [], []>} : vector<64x384xbf16>, vector<384x128xbf16>, vector<64x128xf32> -> vector<64x128xf32>
    %c6_143 = arith.constant 6 : index
    %c0_144 = arith.constant 0 : index
    %c0_145 = arith.constant 0 : index
    %142 = vector.load %arg3[%c6_143, %c0_144, %c0_145] : memref<10x1x128xf32, #tpu.memory_space<vmem>>, vector<1x1x128xf32>
    %143 = vector.shape_cast %142 : vector<1x1x128xf32> to vector<1x128xf32>
    %144 = vector.broadcast %143 : vector<1x128xf32> to vector<64x128xf32>
    %145 = arith.addf %141, %144 : vector<64x128xf32>
    %cst_146 = arith.constant 0.000000e+00 : f32
    %146 = vector.broadcast %cst_146 : f32 to vector<64x128xf32>
    %147 = arith.maximumf %145, %146 : vector<64x128xf32>
    %148 = arith.truncf %147 : vector<64x128xf32> to vector<64x128xbf16>
    %149 = arith.extf %148 : vector<64x128xbf16> to vector<64x128xf32>
    %150 = arith.addf %90, %149 : vector<64x128xf32>
    %151 = tpu.concatenate %110, %129, %148 in 1 : vector<64x128xbf16>, vector<64x128xbf16>, vector<64x128xbf16> -> vector<64x384xbf16>
    %c512 = arith.constant 512 : index
    %c0_147 = arith.constant 0 : index
    %152 = vector.load %arg4[%c512, %c0_147] : memref<1664x128xbf16, #tpu.memory_space<vmem>>, vector<384x128xbf16>
    %cst_148 = arith.constant dense<0.000000e+00> : vector<64x128xf32>
    %153 = tpu.matmul %151, %152, %cst_148 {dimension_numbers = #tpu.dot_dimension_numbers<[1], [0], [0], [1], [0, 0, 1, 1], [], []>} : vector<64x384xbf16>, vector<384x128xbf16>, vector<64x128xf32> -> vector<64x128xf32>
    %c1_149 = arith.constant 1 : index
    %c0_150 = arith.constant 0 : index
    %c0_151 = arith.constant 0 : index
    %154 = vector.load %arg5[%c1_149, %c0_150, %c0_151] : memref<4x1x128xf32, #tpu.memory_space<vmem>>, vector<1x1x128xf32>
    %155 = vector.shape_cast %154 : vector<1x1x128xf32> to vector<1x128xf32>
    %156 = vector.broadcast %155 : vector<1x128xf32> to vector<64x128xf32>
    %157 = arith.addf %153, %156 : vector<64x128xf32>
    %158 = arith.truncf %157 : vector<64x128xf32> to vector<64x128xbf16>
    %159 = vector.shape_cast %158 : vector<64x128xbf16> to vector<4x16x128xbf16>
    %c0_152 = arith.constant 0 : index
    %c1_153 = arith.constant 1 : index
    %c0_154 = arith.constant 0 : index
    %160 = vector.load %arg7[%c0_152, %c1_153, %c0_154] : memref<4x18x128xbf16, #tpu.memory_space<vmem>>, vector<4x16x128xbf16>
    tpu.vector_store %arg7[%c0_152, %c1_153, %c0_154], %159 {strides = array<i32>} : memref<4x18x128xbf16, #tpu.memory_space<vmem>>, vector<4x16x128xbf16>,
    %c0_155 = arith.constant 0 : index
    %c0_156 = arith.constant 0 : index
    %c0_157 = arith.constant 0 : index
    %161 = vector.load %arg7[%c0_155, %c0_156, %c0_157] : memref<4x18x128xbf16, #tpu.memory_space<vmem>>, vector<4x16x128xbf16>
    %162 = vector.shape_cast %161 : vector<4x16x128xbf16> to vector<64x128xbf16>
    %c0_158 = arith.constant 0 : index
    %c1_159 = arith.constant 1 : index
    %c0_160 = arith.constant 0 : index
    %163 = vector.load %arg7[%c0_158, %c1_159, %c0_160] : memref<4x18x128xbf16, #tpu.memory_space<vmem>>, vector<4x16x128xbf16>
    %164 = vector.shape_cast %163 : vector<4x16x128xbf16> to vector<64x128xbf16>
    %c0_161 = arith.constant 0 : index
    %c2_162 = arith.constant 2 : index
    %c0_163 = arith.constant 0 : index
    %165 = vector.load %arg7[%c0_161, %c2_162, %c0_163] : memref<4x18x128xbf16, #tpu.memory_space<vmem>>, vector<4x16x128xbf16>
    %166 = vector.shape_cast %165 : vector<4x16x128xbf16> to vector<64x128xbf16>
    %167 = tpu.concatenate %162, %164, %166 in 1 : vector<64x128xbf16>, vector<64x128xbf16>, vector<64x128xbf16> -> vector<64x384xbf16>
    %c7 = arith.constant 7 : index
    %c0_164 = arith.constant 0 : index
    %c0_165 = arith.constant 0 : index
    %168 = vector.load %arg2[%c7, %c0_164, %c0_165] : memref<10x384x128xbf16, #tpu.memory_space<vmem>>, vector<1x384x128xbf16>
    %169 = vector.shape_cast %168 : vector<1x384x128xbf16> to vector<384x128xbf16>
    %cst_166 = arith.constant dense<0.000000e+00> : vector<64x128xf32>
    %170 = tpu.matmul %167, %169, %cst_166 {dimension_numbers = #tpu.dot_dimension_numbers<[1], [0], [0], [1], [0, 0, 1, 1], [], []>} : vector<64x384xbf16>, vector<384x128xbf16>, vector<64x128xf32> -> vector<64x128xf32>
    %c7_167 = arith.constant 7 : index
    %c0_168 = arith.constant 0 : index
    %c0_169 = arith.constant 0 : index
    %171 = vector.load %arg3[%c7_167, %c0_168, %c0_169] : memref<10x1x128xf32, #tpu.memory_space<vmem>>, vector<1x1x128xf32>
    %172 = vector.shape_cast %171 : vector<1x1x128xf32> to vector<1x128xf32>
    %173 = vector.broadcast %172 : vector<1x128xf32> to vector<64x128xf32>
    %174 = arith.addf %170, %173 : vector<64x128xf32>
    %cst_170 = arith.constant 0.000000e+00 : f32
    %175 = vector.broadcast %cst_170 : f32 to vector<64x128xf32>
    %176 = arith.maximumf %174, %175 : vector<64x128xf32>
    %177 = arith.truncf %176 : vector<64x128xf32> to vector<64x128xbf16>
    %178 = vector.shape_cast %177 : vector<64x128xbf16> to vector<4x16x128xbf16>
    %c0_171 = arith.constant 0 : index
    %c1_172 = arith.constant 1 : index
    %c0_173 = arith.constant 0 : index
    %179 = vector.load %arg7[%c0_171, %c1_172, %c0_173] : memref<4x18x128xbf16, #tpu.memory_space<vmem>>, vector<4x16x128xbf16>
    tpu.vector_store %arg7[%c0_171, %c1_172, %c0_173], %178 {strides = array<i32>} : memref<4x18x128xbf16, #tpu.memory_space<vmem>>, vector<4x16x128xbf16>,
    %c0_174 = arith.constant 0 : index
    %c0_175 = arith.constant 0 : index
    %c0_176 = arith.constant 0 : index
    %180 = vector.load %arg7[%c0_174, %c0_175, %c0_176] : memref<4x18x128xbf16, #tpu.memory_space<vmem>>, vector<4x16x128xbf16>
    %181 = vector.shape_cast %180 : vector<4x16x128xbf16> to vector<64x128xbf16>
    %c0_177 = arith.constant 0 : index
    %c1_178 = arith.constant 1 : index
    %c0_179 = arith.constant 0 : index
    %182 = vector.load %arg7[%c0_177, %c1_178, %c0_179] : memref<4x18x128xbf16, #tpu.memory_space<vmem>>, vector<4x16x128xbf16>
    %183 = vector.shape_cast %182 : vector<4x16x128xbf16> to vector<64x128xbf16>
    %c0_180 = arith.constant 0 : index
    %c2_181 = arith.constant 2 : index
    %c0_182 = arith.constant 0 : index
    %184 = vector.load %arg7[%c0_180, %c2_181, %c0_182] : memref<4x18x128xbf16, #tpu.memory_space<vmem>>, vector<4x16x128xbf16>
    %185 = vector.shape_cast %184 : vector<4x16x128xbf16> to vector<64x128xbf16>
    %186 = tpu.concatenate %181, %183, %185 in 1 : vector<64x128xbf16>, vector<64x128xbf16>, vector<64x128xbf16> -> vector<64x384xbf16>
    %c8 = arith.constant 8 : index
    %c0_183 = arith.constant 0 : index
    %c0_184 = arith.constant 0 : index
    %187 = vector.load %arg2[%c8, %c0_183, %c0_184] : memref<10x384x128xbf16, #tpu.memory_space<vmem>>, vector<1x384x128xbf16>
    %188 = vector.shape_cast %187 : vector<1x384x128xbf16> to vector<384x128xbf16>
    %cst_185 = arith.constant dense<0.000000e+00> : vector<64x128xf32>
    %189 = tpu.matmul %186, %188, %cst_185 {dimension_numbers = #tpu.dot_dimension_numbers<[1], [0], [0], [1], [0, 0, 1, 1], [], []>} : vector<64x384xbf16>, vector<384x128xbf16>, vector<64x128xf32> -> vector<64x128xf32>
    %c8_186 = arith.constant 8 : index
    %c0_187 = arith.constant 0 : index
    %c0_188 = arith.constant 0 : index
    %190 = vector.load %arg3[%c8_186, %c0_187, %c0_188] : memref<10x1x128xf32, #tpu.memory_space<vmem>>, vector<1x1x128xf32>
    %191 = vector.shape_cast %190 : vector<1x1x128xf32> to vector<1x128xf32>
    %192 = vector.broadcast %191 : vector<1x128xf32> to vector<64x128xf32>
    %193 = arith.addf %189, %192 : vector<64x128xf32>
    %cst_189 = arith.constant 0.000000e+00 : f32
    %194 = vector.broadcast %cst_189 : f32 to vector<64x128xf32>
    %195 = arith.maximumf %193, %194 : vector<64x128xf32>
    %196 = arith.truncf %195 : vector<64x128xf32> to vector<64x128xbf16>
    %197 = arith.extf %196 : vector<64x128xbf16> to vector<64x128xf32>
    %198 = arith.addf %157, %197 : vector<64x128xf32>
    %199 = tpu.concatenate %177, %196 in 1 : vector<64x128xbf16>, vector<64x128xbf16> -> vector<64x256xbf16>
    %c896 = arith.constant 896 : index
    %c0_190 = arith.constant 0 : index
    %200 = vector.load %arg4[%c896, %c0_190] : memref<1664x128xbf16, #tpu.memory_space<vmem>>, vector<256x128xbf16>
    %cst_191 = arith.constant dense<0.000000e+00> : vector<64x128xf32>
    %201 = tpu.matmul %199, %200, %cst_191 {dimension_numbers = #tpu.dot_dimension_numbers<[1], [0], [0], [1], [0, 0, 1, 1], [], []>} : vector<64x256xbf16>, vector<256x128xbf16>, vector<64x128xf32> -> vector<64x128xf32>
    %c2_192 = arith.constant 2 : index
    %c0_193 = arith.constant 0 : index
    %c0_194 = arith.constant 0 : index
    %202 = vector.load %arg5[%c2_192, %c0_193, %c0_194] : memref<4x1x128xf32, #tpu.memory_space<vmem>>, vector<1x1x128xf32>
    %203 = vector.shape_cast %202 : vector<1x1x128xf32> to vector<1x128xf32>
    %204 = vector.broadcast %203 : vector<1x128xf32> to vector<64x128xf32>
    %205 = arith.addf %201, %204 : vector<64x128xf32>
    %206 = arith.truncf %205 : vector<64x128xf32> to vector<64x128xbf16>
    %207 = vector.shape_cast %206 : vector<64x128xbf16> to vector<4x16x128xbf16>
    %c0_195 = arith.constant 0 : index
    %c1_196 = arith.constant 1 : index
    %c0_197 = arith.constant 0 : index
    %208 = vector.load %arg7[%c0_195, %c1_196, %c0_197] : memref<4x18x128xbf16, #tpu.memory_space<vmem>>, vector<4x16x128xbf16>
    tpu.vector_store %arg7[%c0_195, %c1_196, %c0_197], %207 {strides = array<i32>} : memref<4x18x128xbf16, #tpu.memory_space<vmem>>, vector<4x16x128xbf16>,
    %c0_198 = arith.constant 0 : index
    %c0_199 = arith.constant 0 : index
    %c0_200 = arith.constant 0 : index
    %209 = vector.load %arg7[%c0_198, %c0_199, %c0_200] : memref<4x18x128xbf16, #tpu.memory_space<vmem>>, vector<4x16x128xbf16>
    %210 = vector.shape_cast %209 : vector<4x16x128xbf16> to vector<64x128xbf16>
    %c0_201 = arith.constant 0 : index
    %c1_202 = arith.constant 1 : index
    %c0_203 = arith.constant 0 : index
    %211 = vector.load %arg7[%c0_201, %c1_202, %c0_203] : memref<4x18x128xbf16, #tpu.memory_space<vmem>>, vector<4x16x128xbf16>
    %212 = vector.shape_cast %211 : vector<4x16x128xbf16> to vector<64x128xbf16>
    %c0_204 = arith.constant 0 : index
    %c2_205 = arith.constant 2 : index
    %c0_206 = arith.constant 0 : index
    %213 = vector.load %arg7[%c0_204, %c2_205, %c0_206] : memref<4x18x128xbf16, #tpu.memory_space<vmem>>, vector<4x16x128xbf16>
    %214 = vector.shape_cast %213 : vector<4x16x128xbf16> to vector<64x128xbf16>
    %215 = tpu.concatenate %210, %212, %214 in 1 : vector<64x128xbf16>, vector<64x128xbf16>, vector<64x128xbf16> -> vector<64x384xbf16>
    %c9 = arith.constant 9 : index
    %c0_207 = arith.constant 0 : index
    %c0_208 = arith.constant 0 : index
    %216 = vector.load %arg2[%c9, %c0_207, %c0_208] : memref<10x384x128xbf16, #tpu.memory_space<vmem>>, vector<1x384x128xbf16>
    %217 = vector.shape_cast %216 : vector<1x384x128xbf16> to vector<384x128xbf16>
    %cst_209 = arith.constant dense<0.000000e+00> : vector<64x128xf32>
    %218 = tpu.matmul %215, %217, %cst_209 {dimension_numbers = #tpu.dot_dimension_numbers<[1], [0], [0], [1], [0, 0, 1, 1], [], []>} : vector<64x384xbf16>, vector<384x128xbf16>, vector<64x128xf32> -> vector<64x128xf32>
    %c9_210 = arith.constant 9 : index
    %c0_211 = arith.constant 0 : index
    %c0_212 = arith.constant 0 : index
    %219 = vector.load %arg3[%c9_210, %c0_211, %c0_212] : memref<10x1x128xf32, #tpu.memory_space<vmem>>, vector<1x1x128xf32>
    %220 = vector.shape_cast %219 : vector<1x1x128xf32> to vector<1x128xf32>
    %221 = vector.broadcast %220 : vector<1x128xf32> to vector<64x128xf32>
    %222 = arith.addf %218, %221 : vector<64x128xf32>
    %cst_213 = arith.constant 0.000000e+00 : f32
    %223 = vector.broadcast %cst_213 : f32 to vector<64x128xf32>
    %224 = arith.maximumf %222, %223 : vector<64x128xf32>
    %225 = arith.truncf %224 : vector<64x128xf32> to vector<64x128xbf16>
    %226 = arith.extf %225 : vector<64x128xbf16> to vector<64x128xf32>
    %227 = arith.addf %205, %226 : vector<64x128xf32>
    %228 = arith.truncf %83 : vector<64x128xf32> to vector<64x128xbf16>
    %229 = arith.truncf %150 : vector<64x128xf32> to vector<64x128xbf16>
    %230 = arith.truncf %198 : vector<64x128xf32> to vector<64x128xbf16>
    %231 = arith.truncf %227 : vector<64x128xf32> to vector<64x128xbf16>
    %232 = tpu.concatenate %228, %229, %230, %231 in 1 : vector<64x128xbf16>, vector<64x128xbf16>, vector<64x128xbf16>, vector<64x128xbf16> -> vector<64x512xbf16>
    %c1152 = arith.constant 1152 : index
    %c0_214 = arith.constant 0 : index
    %233 = vector.load %arg4[%c1152, %c0_214] : memref<1664x128xbf16, #tpu.memory_space<vmem>>, vector<512x128xbf16>
    %cst_215 = arith.constant dense<0.000000e+00> : vector<64x128xf32>
    %234 = tpu.matmul %232, %233, %cst_215 {dimension_numbers = #tpu.dot_dimension_numbers<[1], [0], [0], [1], [0, 0, 1, 1], [], []>} : vector<64x512xbf16>, vector<512x128xbf16>, vector<64x128xf32> -> vector<64x128xf32>
    %c3_216 = arith.constant 3 : index
    %c0_217 = arith.constant 0 : index
    %c0_218 = arith.constant 0 : index
    %235 = vector.load %arg5[%c3_216, %c0_217, %c0_218] : memref<4x1x128xf32, #tpu.memory_space<vmem>>, vector<1x1x128xf32>
    %236 = vector.shape_cast %235 : vector<1x1x128xf32> to vector<1x128xf32>
    %237 = vector.broadcast %236 : vector<1x128xf32> to vector<64x128xf32>
    %238 = arith.addf %234, %237 : vector<64x128xf32>
    %239 = arith.addf %238, %4 : vector<64x128xf32>
    %240 = vector.shape_cast %239 : vector<64x128xf32> to vector<4x16x128xf32>
    %c0_219 = arith.constant 0 : index
    %c0_220 = arith.constant 0 : index
    %c0_221 = arith.constant 0 : index
    %241 = vector.load %arg6[%c0_219, %c0_220, %c0_221] : memref<4x16x128xf32, #tpu.memory_space<vmem>>, vector<4x16x128xf32>
    tpu.vector_store %arg6[%c0_219, %c0_220, %c0_221], %240 {strides = array<i32>} : memref<4x16x128xf32, #tpu.memory_space<vmem>>, vector<4x16x128xf32>,
    return
  }
  func.func @transform_0(%arg0: i32) -> (i32, i32, i32) {
    %c0_i32 = arith.constant 0 : i32
    %c0_i32_0 = arith.constant 0 : i32
    %c0_i32_1 = arith.constant 0 : i32
    return %arg0, %c0_i32, %c0_i32_0 : i32, i32, i32
  }
  func.func @transform_1(%arg0: i32) -> (i32, i32, i32) {
    %c0_i32 = arith.constant 0 : i32
    %c0_i32_0 = arith.constant 0 : i32
    %c0_i32_1 = arith.constant 0 : i32
    %c0_i32_2 = arith.constant 0 : i32
    return %c0_i32, %c0_i32_0, %c0_i32_1 : i32, i32, i32
  }
  func.func @transform_2(%arg0: i32) -> (i32, i32, i32) {
    %c0_i32 = arith.constant 0 : i32
    %c0_i32_0 = arith.constant 0 : i32
    %c0_i32_1 = arith.constant 0 : i32
    %c0_i32_2 = arith.constant 0 : i32
    return %c0_i32, %c0_i32_0, %c0_i32_1 : i32, i32, i32
  }
  func.func @transform_3(%arg0: i32) -> (i32, i32) {
    %c0_i32 = arith.constant 0 : i32
    %c0_i32_0 = arith.constant 0 : i32
    %c0_i32_1 = arith.constant 0 : i32
    return %c0_i32, %c0_i32_0 : i32, i32
  }
  func.func @transform_4(%arg0: i32) -> (i32, i32, i32) {
    %c0_i32 = arith.constant 0 : i32
    %c0_i32_0 = arith.constant 0 : i32
    %c0_i32_1 = arith.constant 0 : i32
    %c0_i32_2 = arith.constant 0 : i32
    return %c0_i32, %c0_i32_0, %c0_i32_1 : i32, i32, i32
  }
  func.func @transform_5(%arg0: i32) -> (i32, i32, i32) {
    %c0_i32 = arith.constant 0 : i32
    %c0_i32_0 = arith.constant 0 : i32
    %c0_i32_1 = arith.constant 0 : i32
    return %arg0, %c0_i32, %c0_i32_0 : i32, i32, i32
  }
}

</mosaic_0001>

<bundles_post_ra>
// kernel: fpn_forward.1
= control target key start
LH: loop header
LB: loop body
LE: loop exit
PB: predicated region body
PF: predicated region fallthrough
CT: control target
= control target key end

     0   :  { %s10661_s18 = smov 0   ;;  %s12988_s0 = inlined_call_operand.vmem [shape: f32[8,16,128], index: 0, kind: input, shape index: {}]   ;;  %s12989_s1 = inlined_call_operand.vmem [shape: bf16[10,384,128], index: 1, kind: input, shape index: {}]   ;;  %s12990_s2 = inlined_call_operand.vmem [shape: f32[10,1,128], index: 2, kind: input, shape index: {}]   ;;  %s12991_s3 = inlined_call_operand.vmem [shape: bf16[1664,128], index: 3, kind: input, shape index: {}]   ;;  %s12992_s4 = inlined_call_operand.vmem [shape: f32[4,1,128], index: 4, kind: input, shape index: {}]   ;;  %s12993_s5 = inlined_call_operand.vmem [shape: f32[8,16,128], index: 5, kind: output, shape index: {}]  }
   0x1 LB: > { %s8142_s19 = sadd.s32 4294967295, %s10629_s18   ;;  %p8146_p0 = scmp.ge.s32.totalorder %s10629_s18, 1  ;;  %s10629_s18 = sphi %s10661_s18, %s15_s18  }
   0x2   : > { %p189_p1 = scmp.lt.s32.totalorder %s10629_s18, 3 }
   0x4   : > { %p190_p2 = pnand %p8146_p0, %p189_p1 }
   0x5   : > { %s8147_s24 = sshll.u32 (!%p190_p2), %s8142_s19, 2 }
   0x6   : > { %193 = sbr.rel (%p190_p2) target bundleno = 2407 (0x967), region = 40  ;;  %p220_p3 = scmp.lt.s32.totalorder (!%p190_p2), %s8147_s24, 7 }
   0xb   : > { %v10188_v0 = vld [vmem:[%s12989_s1 + $0x38] sm:$0xff]  ;;  %v10187_v3 = vld [vmem:[%s12989_s1 + $0x30] sm:$0xff]  ;;  %s13013_s24 = smov (!%p220_p3, %s8147_s24), 7  ;;  %vm234_vm0 = vcmask 1040384   ;;  %vm235_vm1 = vsmask.f32 256 }
   0xc   : > { %v10204_v1 = vld [vmem:[%s12989_s1 + $0xb8] sm:$0xff]  ;;  %797 = vmatpush.bf16.msra.mxu0 %v10188_v0  ;;  %v10203_v4 = vld [vmem:[%s12989_s1 + $0xb0] sm:$0xff]  ;;  %10561 = vmatpush.bf16.msra.mxu3 %v10188_v0  ;;  %s10175_s8 = sshll.u32 %s13013_s24, 4  ;;  %vm249_vm2 = vsmask.f32 7938  ;;  %v10186_v6 = vld [vmem:[%s12989_s1 + $0x28] sm:$0xff] }
   0xd   : > { %v10196_v2 = vld [vmem:[%s12989_s1 + $0x78] sm:$0xff]  ;;  %855 = vmatpush.bf16.msra.mxu2 %v10204_v1  ;;  %v10195_v5 = vld [vmem:[%s12989_s1 + $0x70] sm:$0xff]  ;;  %v10202_v7 = vld [vmem:[%s12989_s1 + $0xa8] sm:$0xff]  ;;  %s10701_s15 = scalar_lea.vmem %s12988_s0, %s10175_s8  ;;  %vm361_vm5 = vcmask 1043456   ;;  %vm279_vm6 = vsmask.f32 4368  ;;  %s12958_s27 = scalar_lea.vmem %s12993_s5, %s10175_s8 }
   0xe   : > { %826 = vmatpush.bf16.msra.mxu1 %v10196_v2  ;;  %v10194_v8 = vld [vmem:[%s12989_s1 + $0x68] sm:$0xff]  ;;  %vm10708_vm3 = vmand %vm234_vm0, %vm235_vm1  ;;  %v10185_v10 = vld [vmem:[%s12989_s1 + $0x20] sm:$0xff]  ;;  %vm518_vm9 = vcmask 1042432   ;;  %vm519_vm10 = vcmask 1046532   ;;  %vm403_vm11 = vsmask.f32 3328 }
   0xf   : > { %v237_v11 = vld [vmem:[#allocation2] sm:$0x1]  ;;  %vm10717_vm4 = vmand %vm234_vm0, %vm249_vm2  ;;  %v251_v13 = vld [vmem:[#allocation2 + $0x8] sm:$0x1]  ;;  %vm404_vm12 = vsmask.f32 7440 }
  0x10   : > { %798 = vmatpush.bf16.msra.mxu0 %v10187_v3  ;;  %10562 = vmatpush.bf16.msra.mxu3 %v10187_v3  ;;  %v238_v14 = vsel %vm10708_vm3, 0, %v237_v11  ;;  %v252_v15 = vsel %vm10717_vm4, 0, %v251_v13  ;;  %v263_v16 = vld [vmem:[%s10701_s15] sm:$0xff]  ;;  %v264_v17 = vld [vmem:[%s10701_s15 + $0x8] sm:$0xff]  ;;  %v254_v24 = vld [vmem:[#allocation2 + $0x14] sm:$0x1] }
  0x11   : > { %856 = vmatpush.bf16.msra.mxu2 %v10203_v4  ;;  %v10201_v18 = vld [vmem:[%s12989_s1 + $0xa0] sm:$0xff]  ;;  %239 = vst [vmem:[#allocation2] sm:$0x1] %v238_v14  ;;  %v271_v20 = vpack.c.bf16 %v263_v16, %v263_v16  ;;  %v272_v21 = vpack.c.bf16 %v264_v17, %v264_v17  ;;  %v240_v22 = vld [vmem:[#allocation2 + $0xc] sm:$0x1]  ;;  %v265_v25 = vld [vmem:[%s10701_s15 + $0x10] sm:$0xff] }
  0x12   : > { %827 = vmatpush.bf16.msra.mxu1 %v10195_v5  ;;  %v10193_v19 = vld [vmem:[%s12989_s1 + $0x60] sm:$0xff]  ;;  %253 = vst [vmem:[#allocation2 + $0x8] sm:$0x1] %v252_v15  ;;  %v241_v23 = vsel %vm10708_vm3, 0, %v240_v22  ;;  %v10184_v26 = vld [vmem:[%s12989_s1 + $0x18] sm:$0xff]  ;;  %v255_v33 = vsel %vm10717_vm4, 0, %v254_v24  ;;  %v273_v35 = vpack.c.bf16 %v265_v25, %v265_v25  ;;  %vm10750_vm7 = vmor %vm235_vm1, %vm279_vm6 }
  0x13   : > { %v10200_v27 = vld [vmem:[%s12989_s1 + $0x98] sm:$0xff]  ;;  %v282_v28 = vshrl.u32 %v271_v20, 16  ;;  %v285_v29 = vshll.u32 %v271_v20, 16  ;;  %v290_v30 = vshrl.u32 %v272_v21, 16  ;;  %v293_v31 = vshll.u32 %v272_v21, 16  ;;  %v267_v43 = vld [vmem:[%s10701_s15 + $0x20] sm:$0xff]  ;;  %vm10759_vm8 = vmand %vm361_vm5, %vm249_vm2 }
  0x14   : > { %799 = vmatpush.bf16.msra.mxu0 %v10186_v6  ;;  %10563 = vmatpush.bf16.msra.mxu3 %v10186_v6  ;;  %242 = vst [vmem:[#allocation2 + $0xc] sm:$0x1] %v241_v23  ;;  %v10192_v32 = vld [vmem:[%s12989_s1 + $0x58] sm:$0xff]  ;;  %v257_v37 = vld [vmem:[#allocation2 + $0x20] sm:$0x1]  ;;  %v299_v45 = vshrl.u32 %v273_v35, 16  ;;  %v275_v49 = vpack.c.bf16 %v267_v43, %v267_v43  ;;  %vm10811_vm13 = vmor %vm518_vm9, %vm519_vm10 }
  0x15   : > { %857 = vmatpush.bf16.msra.mxu2 %v10202_v7  ;;  %v266_v34 = vld [vmem:[%s10701_s15 + $0x18] sm:$0xff]  ;;  %v284_v39 = vrot.slane %v282_v28, 7  ;;  %v292_v40 = vrot.slane %v290_v30, 7  ;;  %256 = vst [vmem:[#allocation2 + $0x14] sm:$0x1] %v255_v33  ;;  %v302_v46 = vshll.u32 %v273_v35, 16  ;;  %vm10830_vm14 = vmor %vm403_vm11, %vm404_vm12 }
  0x16   : > { %828 = vmatpush.bf16.msra.mxu1 %v10194_v8  ;;  %v243_v36 = vld [vmem:[#allocation2 + $0x18] sm:$0x1]  ;;  %v274_v41 = vpack.c.bf16 %v266_v34, %v266_v34  ;;  %v258_v47 = vsel %vm10717_vm4, 0, %v257_v37  ;;  %v268_v48 = vld [vmem:[%s10701_s15 + $0x28] sm:$0xff]  ;;  %v10183_v50 = vld [vmem:[%s12989_s1 + $0x10] sm:$0xff]  ;;  %v301_v58 = vrot.slane %v299_v45, 7 }
  0x17   : > { %v244_v42 = vsel %vm10708_vm3, 0, %v243_v36  ;;  %v10199_v51 = vld [vmem:[%s12989_s1 + $0x90] sm:$0xff]  ;;  %v287_v52 = vor.u32 %v285_v29, %v284_v39  ;;  %v288_v53 = vrot.slane %v284_v39, 4  ;;  %v295_v54 = vor.u32 %v293_v31, %v292_v40  ;;  %259 = vst [vmem:[#allocation2 + $0x20] sm:$0x1] %v258_v47  ;;  %v10182_v13 = vld [vmem:[%s12989_s1 + $0x8] sm:$0xff] }
  0x18   : > { %800 = vmatpush.bf16.msra.mxu0 %v10185_v10  ;;  %10564 = vmatpush.bf16.msra.mxu3 %v10185_v10  ;;  %245 = vst [vmem:[#allocation2 + $0x18] sm:$0x1] %v244_v42  ;;  %v297_v55 = vrot.slane %v292_v40, 4  ;;  %v10191_v56 = vld [vmem:[%s12989_s1 + $0x50] sm:$0xff]  ;;  %v363_v57 = vld [vmem:[#allocation2] sm:$0xf]  ;;  %v276_v61 = vpack.c.bf16 %v268_v48, %v268_v48  ;;  %v304_v4 = vor.u32 %v302_v46, %v301_v58 }
  0x19   : > { %858 = vmatpush.bf16.msra.mxu2 %v10201_v18  ;;  %v307_v59 = vshrl.u32 %v274_v41, 16  ;;  %v310_v60 = vshll.u32 %v274_v41, 16  ;;  %v296_v62 = vsel %vm10750_vm7, %v288_v53, %v295_v54  ;;  %v364_v63 = vsel %vm10759_vm8, %v287_v52, %v363_v57  ;;  %v367_v0 = vld [vmem:[#allocation2 + $0x8] sm:$0x1]  ;;  %v10197_v28 = vld [vmem:[%s12989_s1 + $0x80] sm:$0xff]  ;;  %v12839_v44 = vld [vmem:[%s12991_s3 + $0x2d0] sm:$0xff] }
  0x1a   : > { %829 = vmatpush.bf16.msra.mxu1 %v10193_v19  ;;  %v316_v1 = vshrl.u32 %v275_v49, 16  ;;  %v319_v2 = vshll.u32 %v275_v49, 16  ;;  %365 = vst [vmem:[#allocation2] sm:$0xf] %v364_v63  ;;  %v368_v3 = vsel %vm10708_vm3, %v297_v55, %v367_v0  ;;  %v305_v5 = vrot.slane %v301_v58, 4  ;;  %v10198_v18 = vld [vmem:[%s12989_s1 + $0x88] sm:$0xff] }
  0x1b   : > { %v309_v6 = vrot.slane %v307_v59, 7  ;;  %v370_v7 = vld [vmem:[#allocation2 + $0xc] sm:$0xf]  ;;  %366 = vst [vmem:[#allocation2 + $0x4] sm:$0xf] %v296_v62  ;;  %v324_v10 = vshrl.u32 %v276_v61, 16 }
  0x1c   : > { %801 = vmatpush.bf16.msra.mxu0 %v10184_v26  ;;  %10565 = vmatpush.bf16.msra.mxu3 %v10184_v26  ;;  %v318_v8 = vrot.slane %v316_v1, 7  ;;  %v327_v11 = vshll.u32 %v276_v61, 16  ;;  %369 = vst [vmem:[#allocation2 + $0x8] sm:$0x1] %v368_v3  ;;  %v371_v16 = vsel %vm10759_vm8, %v304_v4, %v370_v7  ;;  %v374_v17 = vld [vmem:[#allocation2 + $0x14] sm:$0x1] }
  0x1d   : > { %859 = vmatpush.bf16.msra.mxu2 %v10200_v27  ;;  %v312_v14 = vor.u32 %v310_v60, %v309_v6  ;;  %v314_v15 = vrot.slane %v309_v6, 4  ;;  %372 = vst [vmem:[#allocation2 + $0xc] sm:$0xf] %v371_v16  ;;  %v326_v20 = vrot.slane %v324_v10, 7  ;;  %v10190_v22 = vld [vmem:[%s12989_s1 + $0x48] sm:$0xff]  ;;  %v269_v26 = vld [vmem:[%s10701_s15 + $0x30] sm:$0xff] }
  0x1e   : > { %830 = vmatpush.bf16.msra.mxu1 %v10192_v32  ;;  %v321_v19 = vor.u32 %v319_v2, %v318_v8  ;;  %v322_v25 = vrot.slane %v318_v8, 4  ;;  %v10181_v27 = vld [vmem:[%s12989_s1] sm:$0xff]  ;;  %v10807_v35 = vpack.c.bf16 %v269_v26, %v269_v26  ;;  %v260_v26 = vld [vmem:[#allocation2 + $0x2c] sm:$0x1]  ;;  %v10560_v1 = vld [vmem:[%s12991_s3 + $0x338] sm:$0xff] }
  0x1f   : > { %v377_v21 = vld [vmem:[#allocation2 + $0x18] sm:$0xf]  ;;  %v313_v23 = vsel %vm10750_vm7, %v305_v5, %v312_v14  ;;  %v375_v24 = vsel %vm10708_vm3, %v314_v15, %v374_v17  ;;  %v329_v29 = vor.u32 %v327_v11, %v326_v20  ;;  %v331_v30 = vrot.slane %v326_v20, 4  ;;  %v381_v32 = vld [vmem:[#allocation2 + $0x20] sm:$0x1] }
  0x20   : > { %802 = vmatpush.bf16.msra.mxu0 %v10183_v50  ;;  %10566 = vmatpush.bf16.msra.mxu3 %v10183_v50  ;;  %373 = vst [vmem:[#allocation2 + $0x10] sm:$0xf] %v313_v23  ;;  %v378_v31 = vsel %vm10759_vm8, %v321_v19, %v377_v21  ;;  %v10189_v40 = vld [vmem:[%s12989_s1 + $0x40] sm:$0xff]  ;;  %v333_v16 = vshrl.u32 %v10807_v35, 16  ;;  %v270_v21 = vld [vmem:[%s10701_s15 + $0x38] sm:$0xff] }
  0x21   : > { %860 = vmatpush.bf16.msra.mxu2 %v10199_v51  ;;  %376 = vst [vmem:[#allocation2 + $0x14] sm:$0x1] %v375_v24  ;;  %v502_v33 = vld [vmem:[#allocation2] sm:$0xe]  ;;  %v330_v43 = vsel %vm10750_vm7, %v322_v25, %v329_v29  ;;  %v246_v45 = vld [vmem:[#allocation2 + $0x24] sm:$0x1]  ;;  %v382_v50 = vsel %vm10708_vm3, %v331_v30, %v381_v32 }
  0x22   : > { %831 = vmatpush.bf16.msra.mxu1 %v10191_v56  ;;  %v10805_v34 = vld [vmem:[#allocation2] sm:$0xf]  ;;  %379 = vst [vmem:[#allocation2 + $0x18] sm:$0xf] %v378_v31  ;;  %v392_v36 = vld [vmem:[#allocation2 + $0x4] sm:$0xf] }
  0x23   : > { %v8153_v39 = vrot.slane %v502_v33, 9  ;;  %v407_v41 = vshrl.u32 %v10805_v34, 16  ;;  %v410_v42 = vshll.u32 %v10805_v34, 16  ;;  %v399_v46 = vld [vmem:[#allocation2 + $0x8] sm:$0x1]  ;;  %v523_v47 = vrot.slane %v392_v36, 5 }
  0x24   : > { %803 = vmatpush.bf16.msra.mxu0 %v10182_v13  ;;  %10567 = vmatpush.bf16.msra.mxu3 %v10182_v13  ;;  %v416_v48 = vshll.u32 %v392_v36, 16  ;;  %v420_v49 = vshrl.u32 %v392_v36, 16  ;;  %v10177_v51 = vld [vmem:[#allocation2] sm:$0xff]  ;;  %v526_v52 = vrot.slane %v399_v46, 5  ;;  %v426_v55 = vshll.u32 %v399_v46, 16 }
  0x25   : > { %861 = vmatpush.bf16.msra.mxu2 %v10198_v18  ;;  %v409_v53 = vrot.slane %v407_v41, 4  ;;  %v412_v54 = vrot.slane %v410_v42, 5  ;;  %v524_v56 = vsel %vm10811_vm13, %v8153_v39, %v523_v47  ;;  %v525_v57 = vrot.slane %v523_v47, 4  ;;  %380 = vst [vmem:[#allocation2 + $0x1c] sm:$0xf] %v330_v43 }
  0x26   : > { %832 = vmatpush.bf16.msra.mxu1 %v10190_v22  ;;  %v418_v58 = vrot.slane %v416_v48, 5  ;;  %v422_v59 = vrot.slane %v420_v49, 4  ;;  %v585_v60 = vunpack.c.l.b16 %v524_v56  ;;  %v503_v63 = vld [vmem:[#allocation2 + $0xc] sm:$0xe]  ;;  %v428_v3 = vrot.slane %v426_v55, 5 }
  0x27   : > { %v413_v61 = vor.u32 %v412_v54, %v409_v53  ;;  %v394_v62 = vld [vmem:[#allocation2 + $0x10] sm:$0xf]  ;;  %v527_v0 = vsel %vm10811_vm13, %v525_v57, %v526_v52  ;;  %383 = vst [vmem:[#allocation2 + $0x20] sm:$0x1] %v382_v50  ;;  %v247_v5 = vsel %vm10708_vm3, 0, %v246_v45  ;;  %v8154_v19 = vrot.slane %v503_v63, 9 }
  0x28   : > { %804 = vmatpush.bf16.msra.mxu0 %v10181_v27  ;;  %10568 = vmatpush.bf16.msra.mxu3 %v10181_v27  ;;  %v423_v2 = vor.u32 %v422_v59, %v418_v58  ;;  %v400_v4 = vld [vmem:[#allocation2 + $0x14] sm:$0x1]  ;;  %v586_v6 = vunpack.c.l.b16 %v527_v0  ;;  %v530_v8 = vrot.slane %v394_v62, 5  ;;  %v393_v10 = vld [vmem:[#allocation2 + $0xc] sm:$0xf]  ;;  %v440_v11 = vshll.u32 %v394_v62, 16 }
  0x29   : > { %862 = vmatpush.bf16.msra.mxu2 %v10197_v28  ;;  %v414_v7 = vrot.slane %v413_v61, 4  ;;  %v431_v14 = vshrl.u32 %v393_v10, 16  ;;  %v444_v15 = vshrl.u32 %v394_v62, 16  ;;  %v434_v20 = vshll.u32 %v393_v10, 16  ;;  %248 = vst [vmem:[#allocation2 + $0x24] sm:$0x1] %v247_v5 }
  0x2a   : > { %833 = vmatpush.bf16.msra.mxu1 %v10189_v40  ;;  %v424_v13 = vrot.slane %v423_v2, 4  ;;  %v593_v17 = vpack.c.b16 %v586_v6, %v585_v60  ;;  %v533_v24 = vrot.slane %v400_v4, 5  ;;  %v532_v28 = vrot.slane %v530_v8, 4  ;;  %v395_v45 = vld [vmem:[#allocation2 + $0x18] sm:$0xf]  ;;  %v10178_v60 = vld [vmem:[#allocation2 + $0xc] sm:$0xff] }
  0x2b   : > { %805 = vmatmul.bf16.vlgmr.msra.gmra.mxu0 %v10177_v51  ;;  %v419_v18 = vsel %vm10830_vm14, %v414_v7, %v418_v58  ;;  %v433_v25 = vrot.slane %v431_v14, 4  ;;  %v436_v30 = vrot.slane %v434_v20, 5  ;;  %v442_v31 = vrot.slane %v440_v11, 5  ;;  %v504_v11 = vld [vmem:[#allocation2 + $0x18] sm:$0xe] }
  0x2c   : > { %v429_v22 = vsel %vm10830_vm14, %v424_v13, %v428_v3  ;;  %v569_v23 = vunpack.c.l.b16 %v419_v18  ;;  %863 = vmatmul.bf16.vlgmr.msra.gmra.mxu2 %v593_v17  ;;  %v10179_v29 = vld [vmem:[#allocation2 + $0x18] sm:$0xff]  ;;  %v446_v32 = vrot.slane %v444_v15, 4  ;;  %v450_v33 = vshll.u32 %v400_v4, 16 }
  0x2d   : > { %v570_v27 = vunpack.c.l.b16 %v429_v22  ;;  %v278_v36 = vpack.c.bf16 %v270_v21, %v270_v21  ;;  %815 = vmatmul.bf16.vlgmr.msra.gmra.mxu3 %v10179_v29  ;;  %v437_v40 = vor.u32 %v436_v30, %v433_v25  ;;  %v261_v41 = vsel %vm10717_vm4, 0, %v260_v26  ;;  %v396_v49 = vld [vmem:[#allocation2 + $0x1c] sm:$0xf] }
  0x2e   : > { %v531_v42 = vsel %vm10811_vm13, %v8154_v19, %v530_v8  ;;  %v447_v43 = vor.u32 %v446_v32, %v442_v31  ;;  %262 = vst [vmem:[#allocation2 + $0x2c] sm:$0x1] %v261_v41  ;;  %v534_v46 = vsel %vm10811_vm13, %v532_v28, %v533_v24  ;;  %v452_v48 = vrot.slane %v450_v33, 5  ;;  %v401_v20 = vld [vmem:[#allocation2 + $0x20] sm:$0x1]  ;;  %v10232_v30 = vld [vmem:[%s12989_s1 + $0x178] sm:$0xff] }
  0x2f   : > { %v577_v39 = vpack.c.b16 %v570_v27, %v569_v23  ;;  %v438_v47 = vrot.slane %v437_v40, 4  ;;  %v335_v50 = vrot.slane %v333_v16, 7  ;;  %v336_v52 = vshll.u32 %v10807_v35, 16  ;;  %1467 = vmatpush.bf16.msrb.mxu1 %v10232_v30  ;;  %v10231_v41 = vld [vmem:[%s12989_s1 + $0x170] sm:$0xff] }
  0x30   : > { %v448_v51 = vrot.slane %v447_v43, 4  ;;  %v341_v53 = vshrl.u32 %v278_v36, 16  ;;  %v384_v12 = vld [vmem:[#allocation2 + $0x24] sm:$0xf]  ;;  %v344_v55 = vshll.u32 %v278_v36, 16  ;;  %v587_v56 = vunpack.c.l.b16 %v531_v42 }
  0x31   : > { %834 = vmatmul.bf16.vlgmr.msra.gmra.mxu1 %v577_v39  ;;  %v339_v54 = vrot.slane %v335_v50, 4  ;;  %v588_v57 = vunpack.c.l.b16 %v534_v46  ;;  %v443_v58 = vsel %vm10830_vm14, %v438_v47, %v442_v31  ;;  %v338_v59 = vor.u32 %v336_v52, %v335_v50 }
  0x32   : > { %v453_v61 = vsel %vm10830_vm14, %v448_v51, %v452_v48  ;;  %v343_v62 = vrot.slane %v341_v53, 7  ;;  %v455_v63 = vshrl.u32 %v395_v45, 16  ;;  %v458_v0 = vshll.u32 %v395_v45, 16 }
  0x33   : > { %v385_v35 = vsel %vm10759_vm8, %v338_v59, %v384_v12  ;;  %v464_v2 = vshll.u32 %v396_v49, 16  ;;  %v468_v3 = vshrl.u32 %v396_v49, 16  ;;  %v594_v7 = vpack.c.b16 %v588_v57, %v587_v56  ;;  %1468 = vmatpush.bf16.msrb.mxu1 %v10231_v41  ;;  %v10209_v41 = vld [vmem:[%s12989_s1 + $0xc0] sm:$0xff] }
  0x34   : > { %v346_v4 = vor.u32 %v344_v55, %v343_v62  ;;  %v348_v5 = vrot.slane %v343_v62, 4  ;;  %386 = vst [vmem:[#allocation2 + $0x24] sm:$0xf] %v385_v35  ;;  %v571_v8 = vunpack.c.l.b16 %v443_v58  ;;  %v572_v10 = vunpack.c.l.b16 %v453_v61 }
  0x35   : > { %v388_v6 = vld [vmem:[#allocation2 + $0x2c] sm:$0x1]  ;;  %v457_v15 = vrot.slane %v455_v63, 4  ;;  %v460_v16 = vrot.slane %v458_v0, 5  ;;  %v537_v17 = vrot.slane %v396_v49, 5  ;;  %v466_v18 = vrot.slane %v464_v2, 5 }
  0x36   : > { %v347_v13 = vsel %vm10750_vm7, %v339_v54, %v346_v4  ;;  %v389_v14 = vsel %vm10708_vm3, %v348_v5, %v388_v6  ;;  %v470_v19 = vrot.slane %v468_v3, 4  ;;  %v578_v21 = vpack.c.b16 %v572_v10, %v571_v8 }
  0x37   : > { %387 = vst [vmem:[#allocation2 + $0x28] sm:$0xf] %v347_v13  ;;  %v8155_v22 = vrot.slane %v504_v11, 9  ;;  %v461_v23 = vor.u32 %v460_v16, %v457_v15  ;;  %v539_v24 = vrot.slane %v537_v17, 4  ;;  %v540_v25 = vrot.slane %v401_v20, 5 }
  0x38   : > { %390 = vst [vmem:[#allocation2 + $0x2c] sm:$0x1] %v389_v14  ;;  %v471_v26 = vor.u32 %v470_v19, %v466_v18  ;;  %v474_v27 = vshll.u32 %v401_v20, 16  ;;  %v10216_v19 = vld [vmem:[%s12989_s1 + $0xf8] sm:$0xff]  ;;  %v10215_v20 = vld [vmem:[%s12989_s1 + $0xf0] sm:$0xff] }
  0x39   : > { %v462_v29 = vrot.slane %v461_v23, 4  ;;  %v538_v31 = vsel %vm10811_vm13, %v8155_v22, %v537_v17  ;;  %v541_v32 = vsel %vm10811_vm13, %v539_v24, %v540_v25  ;;  %1409 = vmatpush.bf16.msrb.mxu3 %v10216_v19  ;;  %v10224_v22 = vld [vmem:[%s12989_s1 + $0x138] sm:$0xff]  ;;  %v10213_v23 = vld [vmem:[%s12989_s1 + $0xe0] sm:$0xff]  ;;  %v10223_v25 = vld [vmem:[%s12989_s1 + $0x130] sm:$0xff] }
  0x3a   : > { %v472_v33 = vrot.slane %v471_v26, 4  ;;  %v476_v36 = vrot.slane %v474_v27, 5  ;;  %v589_v42 = vunpack.c.l.b16 %v538_v31  ;;  %v590_v43 = vunpack.c.l.b16 %v541_v32  ;;  %1438 = vmatpush.bf16.msrb.mxu0 %v10224_v22  ;;  %v10229_v24 = vld [vmem:[%s12989_s1 + $0x160] sm:$0xff]  ;;  %v10212_v26 = vld [vmem:[%s12989_s1 + $0xd8] sm:$0xff]  ;;  %v10222_v27 = vld [vmem:[%s12989_s1 + $0x128] sm:$0xff] }
  0x3b   : > { %810 = vmatmul.bf16.gmra.mxu0 %v10178_v60  ;;  %v397_v39 = vld [vmem:[#allocation2 + $0x24] sm:$0xf]  ;;  %v467_v45 = vsel %vm10830_vm14, %v462_v29, %v466_v18  ;;  %v10230_v18 = vld [vmem:[%s12989_s1 + $0x168] sm:$0xff]  ;;  %v10917_v29 = vld [vmem:[%s12990_s2] ss:$0 sm:$0xff] }
  0x3c   : > { %868 = vmatmul.bf16.gmra.mxu2 %v594_v7  ;;  %v479_v46 = vshrl.u32 %v397_v39, 16  ;;  %v477_v47 = vsel %vm10830_vm14, %v472_v33, %v476_v36  ;;  %v482_v48 = vshll.u32 %v397_v39, 16  ;;  %v595_v51 = vpack.c.b16 %v590_v43, %v589_v42  ;;  %v505_v12 = vld [vmem:[#allocation2 + $0x24] sm:$0xe]  ;;  %1469 = vmatpush.bf16.msrb.mxu1 %v10230_v18  ;;  %v10228_v31 = vld [vmem:[%s12989_s1 + $0x158] sm:$0xff]  ;;  %v10210_v33 = vld [vmem:[%s12989_s1 + $0xc8] sm:$0xff] }
  0x3d   : > { %v573_v52 = vunpack.c.l.b16 %v467_v45  ;;  %v574_v53 = vunpack.c.l.b16 %v477_v47  ;;  %v8156_v61 = vrot.slane %v505_v12, 9  ;;  %1410 = vmatpush.bf16.msrb.mxu3 %v10215_v20  ;;  %v10221_v32 = vld [vmem:[%s12989_s1 + $0x120] sm:$0xff]  ;;  %v10227_v39 = vld [vmem:[%s12989_s1 + $0x150] sm:$0xff] }
  0x3e   : > { %v10180_v28 = vld [vmem:[#allocation2 + $0x24] sm:$0xff]  ;;  %v481_v54 = vrot.slane %v479_v46, 4  ;;  %v484_v57 = vrot.slane %v482_v48, 5  ;;  %1439 = vmatpush.bf16.msrb.mxu0 %v10223_v25  ;;  %v10219_v47 = vld [vmem:[%s12989_s1 + $0x110] sm:$0xff] }
  0x3f   : > { %820 = vmatmul.bf16.gmra.mxu3 %v10180_v28  ;;  %v398_v40 = vld [vmem:[#allocation2 + $0x28] sm:$0xf]  ;;  %v402_v55 = vld [vmem:[#allocation2 + $0x2c] sm:$0x1]  ;;  %v579_v60 = vpack.c.b16 %v574_v53, %v573_v52  ;;  %v10211_v28 = vld [vmem:[%s12989_s1 + $0xd0] sm:$0xff] }
  0x40   : > { %v488_v49 = vshll.u32 %v398_v40, 16  ;;  %v492_v50 = vshrl.u32 %v398_v40, 16  ;;  %v544_v56 = vrot.slane %v398_v40, 5  ;;  %v547_v62 = vrot.slane %v402_v55, 5  ;;  %1470 = vmatpush.bf16.msrb.mxu1 %v10229_v24  ;;  %v10220_v40 = vld [vmem:[%s12989_s1 + $0x118] sm:$0xff]  ;;  %v10226_v46 = vld [vmem:[%s12989_s1 + $0x148] sm:$0xff] }
  0x41   : > { %839 = vmatmul.bf16.gmra.mxu1 %v578_v21  ;;  %v485_v0 = vor.u32 %v484_v57, %v481_v54  ;;  %v498_v2 = vshll.u32 %v402_v55, 16  ;;  %v10214_v21 = vld [vmem:[%s12989_s1 + $0xe8] sm:$0xff]  ;;  %v10225_v52 = vld [vmem:[%s12989_s1 + $0x140] sm:$0xff] }
  0x42   : > { %v490_v58 = vrot.slane %v488_v49, 5  ;;  %v494_v59 = vrot.slane %v492_v50, 4  ;;  %v546_v63 = vrot.slane %v544_v56, 4  ;;  %v545_v3 = vsel %vm10811_vm13, %v8156_v61, %v544_v56  ;;  %1411 = vmatpush.bf16.msrb.mxu3 %v10214_v21  ;;  %1440 = vmatpush.bf16.msrb.mxu0 %v10222_v27  ;;  %v10217_v57 = vld [vmem:[%s12989_s1 + $0x100] sm:$0xff] }
  0x43   : > { %v486_v5 = vrot.slane %v485_v0, 4  ;;  %v500_v7 = vrot.slane %v498_v2, 5  ;;  %v591_v8 = vunpack.c.l.b16 %v545_v3 }
  0x44   : > { %v495_v35 = vor.u32 %v494_v59, %v490_v58  ;;  %v548_v4 = vsel %vm10811_vm13, %v546_v63, %v547_v62  ;;  %1471 = vmatpush.bf16.msrb.mxu1 %v10228_v31 }
  0x45   : > { %v592_v10 = vunpack.c.l.b16 %v548_v4  ;;  %v491_v11 = vsel %vm10830_vm14, %v486_v5, %v490_v58 }
  0x46   : > { %v496_v6 = vrot.slane %v495_v35, 4  ;;  %v575_v15 = vunpack.c.l.b16 %v491_v11  ;;  %1412 = vmatpush.bf16.msrb.mxu3 %v10213_v23  ;;  %1441 = vmatpush.bf16.msrb.mxu0 %v10221_v32 }
  0x47   : > { %v596_v14 = vpack.c.b16 %v592_v10, %v591_v8 }
  0x48   : > { %v501_v13 = vsel %vm10830_vm14, %v496_v6, %v500_v7  ;;  %1472 = vmatpush.bf16.msrb.mxu1 %v10227_v39 }
  0x49   : > { %v576_v16 = vunpack.c.l.b16 %v501_v13 }
  0x4a   : > { %1413 = vmatpush.bf16.msrb.mxu3 %v10212_v26  ;;  %1442 = vmatpush.bf16.msrb.mxu0 %v10220_v40 }
  0x4b   : > { %v580_v17 = vpack.c.b16 %v576_v16, %v575_v15 }
  0x4c   : > { %873 = vmatmul.bf16.gmra.mxu2 %v595_v51  ;;  %1473 = vmatpush.bf16.msrb.mxu1 %v10226_v46  ;;  %v10218_v51 = vld [vmem:[%s12989_s1 + $0x108] sm:$0xff] }
  0x4e   : > { %1414 = vmatpush.bf16.msrb.mxu3 %v10211_v28  ;;  %1443 = vmatpush.bf16.msrb.mxu0 %v10219_v47 }
  0x50   : > { %1474 = vmatpush.bf16.msrb.mxu1 %v10225_v52 }
  0x51   : > { %844 = vmatmul.bf16.gmra.mxu1 %v579_v60 }
  0x52   : > { %1415 = vmatpush.bf16.msrb.mxu3 %v10210_v33  ;;  %1444 = vmatpush.bf16.msrb.mxu0 %v10218_v51 }
  0x56   : > { %1416 = vmatpush.bf16.msrb.mxu3 %v10209_v41  ;;  %1445 = vmatpush.bf16.msrb.mxu0 %v10217_v57 }
  0x5c   : > { %878 = vmatmul.bf16.gmra.mxu2 %v596_v14 }
  0x61   : > { %849 = vmatmul.bf16.gmra.mxu1 %v580_v17  ;;  %v983_v17 = vld [vmem:[#allocation2 + $0x8] sm:$0x1] }
  0xa8   : > { %v806_v30 = vpop.f32.mrf.mxu0 }
  0xa9   : > { %v807_v36 = vadd.f32 %v10917_v29, %v806_v30 }
  0xae   : > { %v835_v42 = vpop.f32.mrf.mxu1 }
  0xaf   : > { %v836_v45 = vadd.f32 %v835_v42, %v807_v36  ;;  %v864_v48 = vpop.f32.mrf.mxu2 }
  0xb0   : > { %v808_v43 = vpop.f32.mrf.mxu0  ;;  %v816_v15 = vpop.f32.mrf.mxu3 }
  0xb1   : > { %v865_v49 = vadd.f32 %v864_v48, %v836_v45  ;;  %v809_v12 = vadd.f32 %v10917_v29, %v808_v43  ;;  %v986_v43 = vld [vmem:[#allocation2 + $0xc] sm:$0xf]  ;;  %v817_v47 = vadd.f32 %v10917_v29, %v816_v15 }
  0xb3   : > { %v884_v50 = vmax.f32 %v865_v49, 0.0 }
  0xb5   : > { %v892_v53 = vpack.c.bf16 %v884_v50, %v884_v50 }
  0xb6   : > { %v837_v54 = vpop.f32.mrf.mxu1 }
  0xb7   : > { %v901_v55 = vshrl.u32 %v892_v53, 16  ;;  %v838_v56 = vadd.f32 %v837_v54, %v809_v12  ;;  %v866_v58 = vpop.f32.mrf.mxu2  ;;  %v904_v61 = vshll.u32 %v892_v53, 16  ;;  %v2760_v5 = vunpack.c.l.b16 %v892_v53 }
  0xb8   : > { %v811_v59 = vpop.f32.mrf.mxu0  ;;  %v818_v49 = vpop.f32.mrf.mxu3 }
  0xb9   : > { %v903_v60 = vrot.slane %v901_v55, 7  ;;  %v867_v62 = vadd.f32 %v866_v58, %v838_v56  ;;  %v812_v35 = vadd.f32 %v10917_v29, %v811_v59  ;;  %v819_v55 = vadd.f32 %v10917_v29, %v818_v49 }
  0xbb   : > { %v906_v63 = vor.u32 %v904_v61, %v903_v60  ;;  %v885_v0 = vmax.f32 %v867_v62, 0.0  ;;  %v907_v19 = vrot.slane %v903_v60, 4 }
  0xbd   : > { %v980_v2 = vsel %vm10759_vm8, %v906_v63, %v10805_v34  ;;  %v893_v3 = vpack.c.bf16 %v885_v0, %v885_v0 }
  0xbe   : > { %981 = vst [vmem:[#allocation2] sm:$0xf] %v980_v2  ;;  %v840_v4 = vpop.f32.mrf.mxu1 }
  0xbf   : > { %v909_v6 = vshrl.u32 %v893_v3, 16  ;;  %v2761_v7 = vunpack.c.l.b16 %v893_v3  ;;  %v841_v8 = vadd.f32 %v840_v4, %v812_v35  ;;  %v869_v10 = vpop.f32.mrf.mxu2  ;;  %v912_v13 = vshll.u32 %v893_v3, 16 }
  0xc0   : > { %v813_v18 = vpop.f32.mrf.mxu0 }
  0xc1   : > { %v911_v11 = vrot.slane %v909_v6, 7  ;;  %v870_v14 = vadd.f32 %v869_v10, %v841_v8  ;;  %v10958_v16 = vpack.c.b16 %v2761_v7, %v2760_v5  ;;  %v814_v25 = vadd.f32 %v10917_v29, %v813_v18  ;;  %v990_v10 = vld [vmem:[#allocation2 + $0x14] sm:$0x1] }
  0xc3   : > { %v914_v20 = vor.u32 %v912_v13, %v911_v11  ;;  %v916_v21 = vrot.slane %v911_v11, 4  ;;  %v886_v34 = vmax.f32 %v870_v14, 0.0 }
  0xc5   : > { %v915_v22 = vsel %vm10750_vm7, %v907_v19, %v914_v20  ;;  %v984_v23 = vsel %vm10708_vm3, %v916_v21, %v983_v17  ;;  %v10964_v24 = vpack.c.bf16 %v886_v34, %v886_v34  ;;  %v10967_v26 = vld [vmem:[#allocation2] sm:$0xf] }
  0xc6   : > { %982 = vst [vmem:[#allocation2 + $0x4] sm:$0xf] %v915_v22  ;;  %v842_v27 = vpop.f32.mrf.mxu1  ;;  %v1020_v28 = vshrl.u32 %v10967_v26, 16  ;;  %v1023_v30 = vshll.u32 %v10967_v26, 16  ;;  %v1115_v45 = vld [vmem:[#allocation2] sm:$0xe] }
  0xc7   : > { %985 = vst [vmem:[#allocation2 + $0x8] sm:$0x1] %v984_v23  ;;  %v918_v31 = vshrl.u32 %v10964_v24, 16  ;;  %v843_v32 = vadd.f32 %v842_v27, %v814_v25  ;;  %v921_v33 = vshll.u32 %v10964_v24, 16  ;;  %v871_v36 = vpop.f32.mrf.mxu2  ;;  %v8269_v12 = vrot.slane %v1115_v45, 9 }
  0xc8   : > { %v1022_v41 = vrot.slane %v1020_v28, 4  ;;  %v1025_v42 = vrot.slane %v1023_v30, 5  ;;  %v2762_v22 = vunpack.c.l.b16 %v10964_v24 }
  0xc9   : > { %v920_v39 = vrot.slane %v918_v31, 7  ;;  %v872_v40 = vadd.f32 %v871_v36, %v843_v32 }
  0xca   : > { %v1026_v54 = vor.u32 %v1025_v42, %v1022_v41 }
  0xcb   : > { %v923_v46 = vor.u32 %v921_v33, %v920_v39  ;;  %v887_v48 = vmax.f32 %v872_v40, 0.0  ;;  %v924_v60 = vrot.slane %v920_v39, 4  ;;  %v821_v40 = vpop.f32.mrf.mxu3 }
  0xcc   : > { %v1027_v8 = vrot.slane %v1026_v54, 4 }
  0xcd   : > { %v987_v50 = vsel %vm10759_vm8, %v923_v46, %v986_v43  ;;  %v895_v51 = vpack.c.bf16 %v887_v48, %v887_v48  ;;  %v10205_v52 = vld [vmem:[#allocation2] sm:$0xff] }
  0xce   : > { %v1008_v53 = vld [vmem:[#allocation2 + $0x4] sm:$0xf]  ;;  %988 = vst [vmem:[#allocation2 + $0xc] sm:$0xf] %v987_v50  ;;  %v845_v56 = vpop.f32.mrf.mxu1  ;;  %v1015_v57 = vld [vmem:[#allocation2 + $0x8] sm:$0x1]  ;;  %1417 = vmatmul.bf16.vlgmr.msrb.gmra.mxu3 %v10205_v52 }
  0xcf   : > { %v1133_v58 = vrot.slane %v1008_v53, 5  ;;  %v1029_v59 = vshll.u32 %v1008_v53, 16  ;;  %v926_v61 = vshrl.u32 %v895_v51, 16  ;;  %v846_v62 = vadd.f32 %v845_v56, %v817_v47  ;;  %v874_v0 = vpop.f32.mrf.mxu2 }
  0xd0   : > { %v1136_v63 = vrot.slane %v1015_v57, 5  ;;  %v1033_v4 = vshrl.u32 %v1008_v53, 16  ;;  %v929_v6 = vshll.u32 %v895_v51, 16  ;;  %v1039_v15 = vshll.u32 %v1015_v57, 16  ;;  %v993_v53 = vld [vmem:[#allocation2 + $0x18] sm:$0xf] }
  0xd1   : > { %v1134_v35 = vsel %vm10811_vm13, %v8269_v12, %v1133_v58  ;;  %v1135_v2 = vrot.slane %v1133_v58, 4  ;;  %v1031_v3 = vrot.slane %v1029_v59, 5  ;;  %v928_v5 = vrot.slane %v926_v61, 7 }
  0xd2   : > { %v875_v7 = vadd.f32 %v874_v0, %v846_v62  ;;  %v1195_v13 = vunpack.c.l.b16 %v1134_v35  ;;  %v1035_v14 = vrot.slane %v1033_v4, 4  ;;  %v2763_v23 = vunpack.c.l.b16 %v895_v51 }
  0xd3   : > { %v1137_v11 = vsel %vm10811_vm13, %v1135_v2, %v1136_v63  ;;  %v931_v17 = vor.u32 %v929_v6, %v928_v5  ;;  %v933_v18 = vrot.slane %v928_v5, 4  ;;  %v1032_v21 = vsel %vm10830_vm14, %v1027_v8, %v1031_v3 }
  0xd4   : > { %v888_v19 = vmax.f32 %v875_v7, 0.0  ;;  %v1196_v20 = vunpack.c.l.b16 %v1137_v11  ;;  %v1036_v34 = vor.u32 %v1035_v14, %v1031_v3  ;;  %v1041_v36 = vrot.slane %v1039_v15, 5 }
  0xd5   : > { %v932_v25 = vsel %vm10750_vm7, %v924_v60, %v931_v17  ;;  %v991_v27 = vsel %vm10708_vm3, %v933_v18, %v990_v10  ;;  %v1009_v31 = vld [vmem:[#allocation2 + $0xc] sm:$0xf]  ;;  %v10990_v39 = vpack.c.b16 %v2763_v23, %v2762_v22  ;;  %v1179_v47 = vunpack.c.l.b16 %v1032_v21  ;;  %v997_v23 = vld [vmem:[#allocation2 + $0x20] sm:$0x1] }
  0xd6   : > { %v10988_v28 = vpack.c.bf16 %v888_v19, %v888_v19  ;;  %v1203_v30 = vpack.c.b16 %v1196_v20, %v1195_v13  ;;  %989 = vst [vmem:[#allocation2 + $0x10] sm:$0xf] %v932_v25  ;;  %v847_v32 = vpop.f32.mrf.mxu1  ;;  %v1037_v33 = vrot.slane %v1036_v34, 4  ;;  %v1044_v42 = vshrl.u32 %v1009_v31, 16  ;;  %v1116_v12 = vld [vmem:[#allocation2 + $0xc] sm:$0xe]  ;;  %v823_v20 = vpop.f32.mrf.mxu3 }
  0xd7   : > { %992 = vst [vmem:[#allocation2 + $0x14] sm:$0x1] %v991_v27  ;;  %v848_v41 = vadd.f32 %v847_v32, %v819_v55  ;;  %v876_v45 = vpop.f32.mrf.mxu2  ;;  %v1047_v48 = vshll.u32 %v1009_v31, 16  ;;  %v822_v55 = vadd.f32 %v10917_v29, %v821_v40  ;;  %v8270_v35 = vrot.slane %v1116_v12, 9 }
  0xd8   : > { %v935_v24 = vshrl.u32 %v10988_v28, 16  ;;  %1475 = vmatmul.bf16.vlgmr.msrb.gmra.mxu1 %v1203_v30  ;;  %v938_v43 = vshll.u32 %v10988_v28, 16  ;;  %v1042_v46 = vsel %vm10830_vm14, %v1037_v33, %v1041_v36  ;;  %v1046_v52 = vrot.slane %v1044_v42, 4 }
  0xd9   : > { %v877_v50 = vadd.f32 %v876_v45, %v848_v41  ;;  %v1180_v51 = vunpack.c.l.b16 %v1042_v46  ;;  %v1049_v54 = vrot.slane %v1047_v48, 5  ;;  %v2764_v6 = vunpack.c.l.b16 %v10988_v28 }
  0xda   : > { %v937_v49 = vrot.slane %v935_v24, 7  ;;  %v824_v24 = vadd.f32 %v10917_v29, %v823_v20  ;;  %v10243_v20 = vld [vmem:[%s12989_s1 + $0x1b0] sm:$0xff] }
  0xdb   : > { %v889_v57 = vmax.f32 %v877_v50, 0.0  ;;  %v1187_v58 = vpack.c.b16 %v1180_v51, %v1179_v47  ;;  %v1050_v59 = vor.u32 %v1049_v54, %v1046_v52 }
  0xdc   : > { %v940_v56 = vor.u32 %v938_v43, %v937_v49  ;;  %v941_v60 = vrot.slane %v937_v49, 4 }
  0xdd   : > { %v897_v62 = vpack.c.bf16 %v889_v57, %v889_v57  ;;  %1446 = vmatmul.bf16.vlgmr.msrb.gmra.mxu0 %v1187_v58  ;;  %v10206_v63 = vld [vmem:[#allocation2 + $0xc] sm:$0xff]  ;;  %v1051_v5 = vrot.slane %v1050_v59, 4 }
  0xde   : > { %v994_v61 = vsel %vm10759_vm8, %v940_v56, %v993_v53  ;;  %v1010_v0 = vld [vmem:[#allocation2 + $0x10] sm:$0xf]  ;;  %v850_v2 = vpop.f32.mrf.mxu1  ;;  %v1016_v3 = vld [vmem:[#allocation2 + $0x14] sm:$0x1]  ;;  %1422 = vmatmul.bf16.gmra.mxu3 %v10206_v63 }
  0xdf   : > { %995 = vst [vmem:[#allocation2 + $0x18] sm:$0xf] %v994_v61  ;;  %v1140_v4 = vrot.slane %v1010_v0, 5  ;;  %v943_v7 = vshrl.u32 %v897_v62, 16  ;;  %v946_v8 = vshll.u32 %v897_v62, 16  ;;  %v851_v10 = vadd.f32 %v850_v2, %v822_v55  ;;  %v879_v13 = vpop.f32.mrf.mxu2 }
  0xe0   : > { %v1143_v11 = vrot.slane %v1016_v3, 5  ;;  %v1053_v17 = vshll.u32 %v1010_v0, 16  ;;  %v1057_v18 = vshrl.u32 %v1010_v0, 16  ;;  %v1063_v22 = vshll.u32 %v1016_v3, 16  ;;  %v1000_v61 = vld [vmem:[#allocation2 + $0x24] sm:$0xf] }
  0xe1   : > { %v1141_v14 = vsel %vm10811_vm13, %v8270_v35, %v1140_v4  ;;  %v1142_v15 = vrot.slane %v1140_v4, 4  ;;  %v945_v19 = vrot.slane %v943_v7, 7  ;;  %v880_v21 = vadd.f32 %v879_v13, %v851_v10 }
  0xe2   : > { %v1197_v34 = vunpack.c.l.b16 %v1141_v14  ;;  %v1055_v27 = vrot.slane %v1053_v17, 5  ;;  %v1059_v28 = vrot.slane %v1057_v18, 4  ;;  %v2765_v30 = vunpack.c.l.b16 %v897_v62 }
  0xe3   : > { %v1144_v25 = vsel %vm10811_vm13, %v1142_v15, %v1143_v11  ;;  %v948_v31 = vor.u32 %v946_v8, %v945_v19  ;;  %v950_v32 = vrot.slane %v945_v19, 4  ;;  %v890_v33 = vmax.f32 %v880_v21, 0.0  ;;  %v10244_v8 = vld [vmem:[%s12989_s1 + $0x1b8] sm:$0xff] }
  0xe4   : > { %v1198_v36 = vunpack.c.l.b16 %v1144_v25  ;;  %v1056_v40 = vsel %vm10830_vm14, %v1051_v5, %v1055_v27  ;;  %v1060_v41 = vor.u32 %v1059_v28, %v1055_v27  ;;  %v11007_v42 = vpack.c.b16 %v2765_v30, %v2764_v6  ;;  %2021 = vmatpush.bf16.msrb.mxu2 %v10244_v8  ;;  %v10252_v19 = vld [vmem:[%s12989_s1 + $0x1f8] sm:$0xff] }
  0xe5   : > { %v949_v43 = vsel %vm10750_vm7, %v941_v60, %v948_v31  ;;  %v998_v45 = vsel %vm10708_vm3, %v950_v32, %v997_v23  ;;  %v11013_v46 = vpack.c.bf16 %v890_v33, %v890_v33  ;;  %v1065_v29 = vrot.slane %v1063_v22, 5  ;;  %v10260_v25 = vld [vmem:[%s12989_s1 + $0x238] sm:$0xff]  ;;  %2050 = vmatpush.bf16.msra.mxu3 %v10252_v19  ;;  %v10251_v31 = vld [vmem:[%s12989_s1 + $0x1f0] sm:$0xff] }
  0xe6   : > { %v1204_v47 = vpack.c.b16 %v1198_v36, %v1197_v34  ;;  %v1011_v48 = vld [vmem:[#allocation2 + $0x18] sm:$0xf]  ;;  %996 = vst [vmem:[#allocation2 + $0x1c] sm:$0xf] %v949_v43  ;;  %v852_v49 = vpop.f32.mrf.mxu1  ;;  %v1061_v50 = vrot.slane %v1060_v41, 4  ;;  %v1181_v55 = vunpack.c.l.b16 %v1056_v40  ;;  %2079 = vmatpush.bf16.msra.mxu0 %v10260_v25 }
  0xe7   : > { %v1068_v51 = vshrl.u32 %v1011_v48, 16  ;;  %999 = vst [vmem:[#allocation2 + $0x20] sm:$0x1] %v998_v45  ;;  %v952_v52 = vshrl.u32 %v11013_v46, 16  ;;  %v853_v53 = vadd.f32 %v852_v49, %v824_v24  ;;  %v1071_v12 = vshll.u32 %v1011_v48, 16  ;;  %v881_v54 = vpop.f32.mrf.mxu2 }
  0xe8   : > { %1480 = vmatmul.bf16.gmra.mxu1 %v1204_v47  ;;  %v1066_v56 = vsel %vm10830_vm14, %v1061_v50, %v1065_v29  ;;  %v955_v58 = vshll.u32 %v11013_v46, 16  ;;  %v1117_v2 = vld [vmem:[#allocation2 + $0x18] sm:$0xe]  ;;  %v1004_v36 = vld [vmem:[#allocation2 + $0x2c] sm:$0x1]  ;;  %v2766_v41 = vunpack.c.l.b16 %v11013_v46  ;;  %2022 = vmatpush.bf16.msrb.mxu2 %v10243_v20 }
  0xe9   : > { %v954_v57 = vrot.slane %v952_v52, 7  ;;  %v882_v59 = vadd.f32 %v881_v54, %v853_v53  ;;  %v1182_v60 = vunpack.c.l.b16 %v1066_v56  ;;  %v1070_v62 = vrot.slane %v1068_v51, 4  ;;  %2051 = vmatpush.bf16.msra.mxu3 %v10251_v31 }
  0xea   : > { %v1073_v3 = vrot.slane %v1071_v12, 5  ;;  %v8271_v11 = vrot.slane %v1117_v2, 9 }
  0xeb   : > { %v957_v63 = vor.u32 %v955_v58, %v954_v57  ;;  %v891_v0 = vmax.f32 %v882_v59, 0.0  ;;  %v1188_v35 = vpack.c.b16 %v1182_v60, %v1181_v55  ;;  %v958_v33 = vrot.slane %v954_v57, 4 }
  0xec   : > { %v1074_v17 = vor.u32 %v1073_v3, %v1070_v62 }
  0xed   : > { %v1001_v4 = vsel %vm10759_vm8, %v957_v63, %v1000_v61  ;;  %v899_v5 = vpack.c.bf16 %v891_v0, %v891_v0  ;;  %1451 = vmatmul.bf16.gmra.mxu0 %v1188_v35  ;;  %v10207_v6 = vld [vmem:[#allocation2 + $0x18] sm:$0xff] }
  0xee   : > { %v1012_v7 = vld [vmem:[#allocation2 + $0x1c] sm:$0xf]  ;;  %1002 = vst [vmem:[#allocation2 + $0x24] sm:$0xf] %v1001_v4  ;;  %v1017_v10 = vld [vmem:[#allocation2 + $0x20] sm:$0x1]  ;;  %1427 = vmatmul.bf16.gmra.mxu3 %v10207_v6 }
  0xef   : > { %v1147_v13 = vrot.slane %v1012_v7, 5  ;;  %v960_v14 = vshrl.u32 %v899_v5, 16  ;;  %v963_v15 = vshll.u32 %v899_v5, 16  ;;  %v1077_v18 = vshll.u32 %v1012_v7, 16 }
  0xf0   : > { %v1150_v22 = vrot.slane %v1017_v10, 5  ;;  %v1081_v23 = vshrl.u32 %v1012_v7, 16  ;;  %v1087_v30 = vshll.u32 %v1017_v10, 16  ;;  %v2767_v32 = vunpack.c.l.b16 %v899_v5 }
  0xf1   : > { %v1148_v21 = vsel %vm10811_vm13, %v8271_v11, %v1147_v13  ;;  %v1149_v34 = vrot.slane %v1147_v13, 4  ;;  %v962_v27 = vrot.slane %v960_v14, 7  ;;  %v1079_v28 = vrot.slane %v1077_v18, 5 }
  0xf2   : > { %v1083_v40 = vrot.slane %v1081_v23, 4  ;;  %v1199_v47 = vunpack.c.l.b16 %v1148_v21  ;;  %v1075_v49 = vrot.slane %v1074_v17, 4  ;;  %v11041_v29 = vpack.c.b16 %v2767_v32, %v2766_v41  ;;  %v10249_v41 = vld [vmem:[%s12989_s1 + $0x1e0] sm:$0xff] }
  0xf3   : > { %v1151_v24 = vsel %vm10811_vm13, %v1149_v34, %v1150_v22  ;;  %v965_v43 = vor.u32 %v963_v15, %v962_v27  ;;  %v967_v45 = vrot.slane %v962_v27, 4  ;;  %v1089_v12 = vrot.slane %v1087_v30, 5 }
  0xf4   : > { %v1200_v48 = vunpack.c.l.b16 %v1151_v24  ;;  %v1084_v50 = vor.u32 %v1083_v40, %v1079_v28  ;;  %v1080_v46 = vsel %vm10830_vm14, %v1075_v49, %v1079_v28  ;;  %v10259_v24 = vld [vmem:[%s12989_s1 + $0x230] sm:$0xff]  ;;  %v10241_v40 = vld [vmem:[%s12989_s1 + $0x1a0] sm:$0xff] }
  0xf5   : > { %v966_v51 = vsel %vm10750_vm7, %v958_v33, %v965_v43  ;;  %v1005_v52 = vsel %vm10708_vm3, %v967_v45, %v1004_v36  ;;  %v1013_v54 = vld [vmem:[#allocation2 + $0x24] sm:$0xf]  ;;  %v1183_v59 = vunpack.c.l.b16 %v1080_v46  ;;  %v10242_v33 = vld [vmem:[%s12989_s1 + $0x1a8] sm:$0xff]  ;;  %2080 = vmatpush.bf16.msra.mxu0 %v10259_v24  ;;  %v10240_v45 = vld [vmem:[%s12989_s1 + $0x198] sm:$0xff] }
  0xf6   : > { %v1205_v53 = vpack.c.b16 %v1200_v48, %v1199_v47  ;;  %1003 = vst [vmem:[#allocation2 + $0x28] sm:$0xf] %v966_v51  ;;  %v1085_v56 = vrot.slane %v1084_v50, 4  ;;  %v1092_v55 = vshrl.u32 %v1013_v54, 16  ;;  %v1095_v57 = vshll.u32 %v1013_v54, 16  ;;  %v10250_v36 = vld [vmem:[%s12989_s1 + $0x1e8] sm:$0xff]  ;;  %2023 = vmatpush.bf16.msrb.mxu2 %v10242_v33 }
  0xf7   : > { %1006 = vst [vmem:[#allocation2 + $0x2c] sm:$0x1] %v1005_v52  ;;  %v1118_v61 = vld [vmem:[#allocation2 + $0x24] sm:$0xe]  ;;  %2052 = vmatpush.bf16.msra.mxu3 %v10250_v36  ;;  %v10258_v43 = vld [vmem:[%s12989_s1 + $0x228] sm:$0xff]  ;;  %v10239_v48 = vld [vmem:[%s12989_s1 + $0x190] sm:$0xff] }
  0xf8   : > { %1485 = vmatmul.bf16.gmra.mxu1 %v1205_v53  ;;  %v1090_v58 = vsel %vm10830_vm14, %v1085_v56, %v1089_v12  ;;  %v1094_v62 = vrot.slane %v1092_v55, 4  ;;  %v1097_v63 = vrot.slane %v1095_v57, 5  ;;  %v8272_v3 = vrot.slane %v1118_v61, 9  ;;  %v10257_v47 = vld [vmem:[%s12989_s1 + $0x220] sm:$0xff]  ;;  %v10248_v50 = vld [vmem:[%s12989_s1 + $0x1d8] sm:$0xff]  ;;  %v10238_v53 = vld [vmem:[%s12989_s1 + $0x188] sm:$0xff] }
  0xf9   : > { %v1184_v60 = vunpack.c.l.b16 %v1090_v58  ;;  %2081 = vmatpush.bf16.msra.mxu0 %v10258_v43  ;;  %v10256_v52 = vld [vmem:[%s12989_s1 + $0x218] sm:$0xff]  ;;  %v11098_v12 = vld [vmem:[%s12990_s2 + $0x1] ss:$0 sm:$0xff]  ;;  %v10255_v54 = vld [vmem:[%s12989_s1 + $0x210] sm:$0xff] }
  0xfa   : > { %v1098_v6 = vor.u32 %v1097_v63, %v1094_v62  ;;  %2024 = vmatpush.bf16.msrb.mxu2 %v10241_v40  ;;  %v10237_v46 = vld [vmem:[%s12989_s1 + $0x180] sm:$0xff]  ;;  %v10247_v58 = vld [vmem:[%s12989_s1 + $0x1d0] sm:$0xff]  ;;  %v10254_v61 = vld [vmem:[%s12989_s1 + $0x208] sm:$0xff] }
  0xfb   : > { %v1189_v0 = vpack.c.b16 %v1184_v60, %v1183_v59  ;;  %2053 = vmatpush.bf16.msra.mxu3 %v10249_v41  ;;  %v1595_v41 = vld [vmem:[#allocation2 + $0x8] sm:$0x1] }
  0xfc   : > { %v1099_v19 = vrot.slane %v1098_v6, 4 }
  0xfd   : > { %1456 = vmatmul.bf16.gmra.mxu0 %v1189_v0  ;;  %v10208_v35 = vld [vmem:[#allocation2 + $0x24] sm:$0xff] }
  0xfe   : > { %v1014_v2 = vld [vmem:[#allocation2 + $0x28] sm:$0xf]  ;;  %v1018_v4 = vld [vmem:[#allocation2 + $0x2c] sm:$0x1]  ;;  %1432 = vmatmul.bf16.gmra.mxu3 %v10208_v35  ;;  %2025 = vmatpush.bf16.msrb.mxu2 %v10240_v45  ;;  %v10253_v35 = vld [vmem:[%s12989_s1 + $0x200] sm:$0xff] }
  0xff   : > { %v1154_v5 = vrot.slane %v1014_v2, 5  ;;  %v1101_v7 = vshll.u32 %v1014_v2, 16  ;;  %v1105_v8 = vshrl.u32 %v1014_v2, 16  ;;  %v1157_v10 = vrot.slane %v1018_v4, 5  ;;  %2082 = vmatpush.bf16.msra.mxu0 %v10257_v47  ;;  %2054 = vmatpush.bf16.msra.mxu3 %v10248_v50  ;;  %v10246_v0 = vld [vmem:[%s12989_s1 + $0x1c8] sm:$0xff] }
 0x100   : > { %v1111_v11 = vshll.u32 %v1018_v4, 16 }
 0x101   : > { %v1155_v13 = vsel %vm10811_vm13, %v8272_v3, %v1154_v5  ;;  %v1156_v14 = vrot.slane %v1154_v5, 4  ;;  %v1103_v15 = vrot.slane %v1101_v7, 5  ;;  %v1107_v17 = vrot.slane %v1105_v8, 4 }
 0x102   : > { %v1201_v21 = vunpack.c.l.b16 %v1155_v13  ;;  %v1113_v25 = vrot.slane %v1111_v11, 5  ;;  %2026 = vmatpush.bf16.msrb.mxu2 %v10239_v48 }
 0x103   : > { %v1158_v18 = vsel %vm10811_vm13, %v1156_v14, %v1157_v10  ;;  %v1108_v20 = vor.u32 %v1107_v17, %v1103_v15  ;;  %v1104_v22 = vsel %vm10830_vm14, %v1099_v19, %v1103_v15  ;;  %2083 = vmatpush.bf16.msra.mxu0 %v10256_v52  ;;  %2055 = vmatpush.bf16.msra.mxu3 %v10247_v58  ;;  %v10245_v10 = vld [vmem:[%s12989_s1 + $0x1c0] sm:$0xff] }
 0x104   : > { %v1202_v34 = vunpack.c.l.b16 %v1158_v18  ;;  %v1185_v30 = vunpack.c.l.b16 %v1104_v22 }
 0x105   : > { %v1109_v23 = vrot.slane %v1108_v20, 4 }
 0x106   : > { %v1206_v27 = vpack.c.b16 %v1202_v34, %v1201_v21  ;;  %2027 = vmatpush.bf16.msrb.mxu2 %v10238_v53 }
 0x107   : > { %v1114_v28 = vsel %vm10830_vm14, %v1109_v23, %v1113_v25  ;;  %2084 = vmatpush.bf16.msra.mxu0 %v10255_v54  ;;  %2056 = vmatpush.bf16.msra.mxu3 %v10246_v0  ;;  %v1598_v0 = vld [vmem:[#allocation2 + $0xc] sm:$0xf] }
 0x108   : > { %1490 = vmatmul.bf16.gmra.mxu1 %v1206_v27  ;;  %v1186_v31 = vunpack.c.l.b16 %v1114_v28 }
 0x10a   : > { %v1190_v32 = vpack.c.b16 %v1186_v31, %v1185_v30  ;;  %2028 = vmatpush.bf16.msrb.mxu2 %v10237_v46 }
 0x10b   : > { %2085 = vmatpush.bf16.msra.mxu0 %v10254_v61  ;;  %2057 = vmatpush.bf16.msra.mxu3 %v10245_v10 }
 0x10d   : > { %1461 = vmatmul.bf16.gmra.mxu0 %v1190_v32 }
 0x10f   : > { %2086 = vmatpush.bf16.msra.mxu0 %v10253_v35 }
 0x151   : > { %v1418_v49 = vpop.f32.mrf.mxu3 }
 0x152   : > { %v1419_v56 = vadd.f32 %v11098_v12, %v1418_v49 }
 0x155   : > { %v1476_v51 = vpop.f32.mrf.mxu1 }
 0x159   : > { %v1420_v57 = vpop.f32.mrf.mxu3 }
 0x15a   : > { %v1447_v55 = vpop.f32.mrf.mxu0  ;;  %v1421_v3 = vadd.f32 %v11098_v12, %v1420_v57 }
 0x15b   : > { %v1448_v59 = vadd.f32 %v1447_v55, %v1419_v56 }
 0x15d   : > { %v1478_v60 = vpop.f32.mrf.mxu1  ;;  %v1477_v62 = vadd.f32 %v1476_v51, %v1448_v59 }
 0x15f   : > { %v1496_v63 = vmax.f32 %v1477_v62, 0.0 }
 0x161   : > { %v1504_v2 = vpack.c.bf16 %v1496_v63, %v1496_v63  ;;  %v1423_v5 = vpop.f32.mrf.mxu3 }
 0x162   : > { %v1449_v4 = vpop.f32.mrf.mxu0  ;;  %v1424_v20 = vadd.f32 %v11098_v12, %v1423_v5 }
 0x163   : > { %v1513_v6 = vshrl.u32 %v1504_v2, 16  ;;  %v1450_v7 = vadd.f32 %v1449_v4, %v1421_v3  ;;  %v1516_v13 = vshll.u32 %v1504_v2, 16  ;;  %v2784_v22 = vunpack.c.l.b16 %v1504_v2 }
 0x165   : > { %v1481_v8 = vpop.f32.mrf.mxu1  ;;  %v1515_v11 = vrot.slane %v1513_v6, 7  ;;  %v1479_v14 = vadd.f32 %v1478_v60, %v1450_v7 }
 0x167   : > { %v1518_v15 = vor.u32 %v1516_v13, %v1515_v11  ;;  %v1497_v17 = vmax.f32 %v1479_v14, 0.0  ;;  %v1519_v36 = vrot.slane %v1515_v11, 4 }
 0x169   : > { %v1592_v18 = vsel %vm10759_vm8, %v1518_v15, %v10967_v26  ;;  %v1505_v19 = vpack.c.bf16 %v1497_v17, %v1497_v17  ;;  %v1425_v34 = vpop.f32.mrf.mxu3 }
 0x16a   : > { %1593 = vst [vmem:[#allocation2] sm:$0xf] %v1592_v18  ;;  %v1452_v21 = vpop.f32.mrf.mxu0  ;;  %v1426_v48 = vadd.f32 %v11098_v12, %v1425_v34 }
 0x16b   : > { %v1521_v23 = vshrl.u32 %v1505_v19, 16  ;;  %v2785_v25 = vunpack.c.l.b16 %v1505_v19  ;;  %v1453_v27 = vadd.f32 %v1452_v21, %v1424_v20  ;;  %v1524_v31 = vshll.u32 %v1505_v19, 16 }
 0x16d   : > { %v1483_v28 = vpop.f32.mrf.mxu1  ;;  %v1523_v30 = vrot.slane %v1521_v23, 7  ;;  %v11127_v32 = vpack.c.b16 %v2785_v25, %v2784_v22  ;;  %v1482_v33 = vadd.f32 %v1481_v8, %v1453_v27 }
 0x16f   : > { %v1526_v24 = vor.u32 %v1524_v31, %v1523_v30  ;;  %v1528_v40 = vrot.slane %v1523_v30, 4  ;;  %v1498_v26 = vmax.f32 %v1482_v33, 0.0 }
 0x171   : > { %v1527_v43 = vsel %vm10750_vm7, %v1519_v36, %v1526_v24  ;;  %v1596_v45 = vsel %vm10708_vm3, %v1528_v40, %v1595_v41  ;;  %v1506_v47 = vpack.c.bf16 %v1498_v26, %v1498_v26  ;;  %v11134_v49 = vld [vmem:[#allocation2] sm:$0xf]  ;;  %v1428_v51 = vpop.f32.mrf.mxu3 }
 0x172   : > { %1594 = vst [vmem:[#allocation2 + $0x4] sm:$0xf] %v1527_v43  ;;  %v1454_v50 = vpop.f32.mrf.mxu0  ;;  %v1632_v52 = vshrl.u32 %v11134_v49, 16  ;;  %v1635_v53 = vshll.u32 %v11134_v49, 16  ;;  %v1727_v61 = vld [vmem:[#allocation2] sm:$0xe]  ;;  %v1429_v4 = vadd.f32 %v11098_v12, %v1428_v51 }
 0x173   : > { %1597 = vst [vmem:[#allocation2 + $0x8] sm:$0x1] %v1596_v45  ;;  %v1530_v54 = vshrl.u32 %v1506_v47, 16  ;;  %v1455_v46 = vadd.f32 %v1454_v50, %v1426_v48  ;;  %v1533_v58 = vshll.u32 %v1506_v47, 16  ;;  %v8434_v7 = vrot.slane %v1727_v61, 9 }
 0x174   : > { %v1634_v56 = vrot.slane %v1632_v52, 4  ;;  %v1637_v55 = vrot.slane %v1635_v53, 5  ;;  %v2786_v19 = vunpack.c.l.b16 %v1506_v47  ;;  %v1602_v43 = vld [vmem:[#allocation2 + $0x14] sm:$0x1] }
 0x175   : > { %v1532_v57 = vrot.slane %v1530_v54, 7  ;;  %v1484_v59 = vadd.f32 %v1483_v28, %v1455_v46  ;;  %v1486_v60 = vpop.f32.mrf.mxu1 }
 0x176   : > { %v1638_v35 = vor.u32 %v1637_v55, %v1634_v56 }
 0x177   : > { %v1535_v62 = vor.u32 %v1533_v58, %v1532_v57  ;;  %v1499_v63 = vmax.f32 %v1484_v59, 0.0  ;;  %v1536_v15 = vrot.slane %v1532_v57, 4 }
 0x178   : > { %v1639_v22 = vrot.slane %v1638_v35, 4 }
 0x179   : > { %v1599_v2 = vsel %vm10759_vm8, %v1535_v62, %v1598_v0  ;;  %v1507_v3 = vpack.c.bf16 %v1499_v63, %v1499_v63  ;;  %v10233_v5 = vld [vmem:[#allocation2] sm:$0xff]  ;;  %v1430_v10 = vpop.f32.mrf.mxu3  ;;  %v10296_v0 = vld [vmem:[%s12991_s3 + $0x38] sm:$0xff] }
 0x17a   : > { %v1620_v6 = vld [vmem:[#allocation2 + $0x4] sm:$0xf]  ;;  %1600 = vst [vmem:[#allocation2 + $0xc] sm:$0xf] %v1599_v2  ;;  %v1457_v8 = vpop.f32.mrf.mxu0  ;;  %v1627_v11 = vld [vmem:[#allocation2 + $0x8] sm:$0x1]  ;;  %2029 = vmatmul.bf16.vlgmr.msrb.gmra.mxu2 %v10233_v5  ;;  %v1431_v45 = vadd.f32 %v11098_v12, %v1430_v10  ;;  %3108 = vmatpush.bf16.msrb.mxu0 %v10296_v0 }
 0x17b   : > { %v1745_v13 = vrot.slane %v1620_v6, 5  ;;  %v1641_v14 = vshll.u32 %v1620_v6, 16  ;;  %v1538_v17 = vshrl.u32 %v1507_v3, 16  ;;  %v1458_v18 = vadd.f32 %v1457_v8, %v1429_v4  ;;  %v1609_v0 = vld [vmem:[#allocation2 + $0x20] sm:$0x1] }
 0x17c   : > { %v1748_v34 = vrot.slane %v1627_v11, 5  ;;  %v1541_v25 = vshll.u32 %v1507_v3, 16  ;;  %v1645_v28 = vshrl.u32 %v1620_v6, 16  ;;  %v2787_v36 = vunpack.c.l.b16 %v1507_v3 }
 0x17d   : > { %v1746_v20 = vsel %vm10811_vm13, %v8434_v7, %v1745_v13  ;;  %v1747_v21 = vrot.slane %v1745_v13, 4  ;;  %v1540_v23 = vrot.slane %v1538_v17, 7  ;;  %v1487_v27 = vadd.f32 %v1486_v60, %v1458_v18  ;;  %v1488_v47 = vpop.f32.mrf.mxu1  ;;  %v1605_v17 = vld [vmem:[#allocation2 + $0x18] sm:$0xf] }
 0x17e   : > { %v1807_v31 = vunpack.c.l.b16 %v1746_v20  ;;  %v1643_v33 = vrot.slane %v1641_v14, 5  ;;  %v1647_v48 = vrot.slane %v1645_v28, 4  ;;  %v1651_v50 = vshll.u32 %v1627_v11, 16 }
 0x17f   : > { %v1749_v30 = vsel %vm10811_vm13, %v1747_v21, %v1748_v34  ;;  %v1543_v24 = vor.u32 %v1541_v25, %v1540_v23  ;;  %v1545_v40 = vrot.slane %v1540_v23, 4  ;;  %v1500_v26 = vmax.f32 %v1487_v27, 0.0 }
 0x180   : > { %v1808_v41 = vunpack.c.l.b16 %v1749_v30  ;;  %v11146_v51 = vpack.c.b16 %v2787_v36, %v2786_v19  ;;  %v1648_v57 = vor.u32 %v1647_v48, %v1643_v33  ;;  %v1644_v63 = vsel %vm10830_vm14, %v1639_v22, %v1643_v33 }
 0x181   : > { %v1544_v52 = vsel %vm10750_vm7, %v1536_v15, %v1543_v24  ;;  %v1603_v53 = vsel %vm10708_vm3, %v1545_v40, %v1602_v43  ;;  %v11152_v54 = vpack.c.bf16 %v1500_v26, %v1500_v26  ;;  %v1621_v56 = vld [vmem:[#allocation2 + $0xc] sm:$0xf]  ;;  %v1433_v62 = vpop.f32.mrf.mxu3  ;;  %v1653_v2 = vrot.slane %v1651_v50, 5  ;;  %v10295_v26 = vld [vmem:[%s12991_s3 + $0x30] sm:$0xff] }
 0x182   : > { %v1815_v46 = vpack.c.b16 %v1808_v41, %v1807_v31  ;;  %1601 = vst [vmem:[#allocation2 + $0x10] sm:$0xf] %v1544_v52  ;;  %v1459_v55 = vpop.f32.mrf.mxu0  ;;  %v1656_v58 = vshrl.u32 %v1621_v56, 16  ;;  %v1659_v59 = vshll.u32 %v1621_v56, 16  ;;  %v1649_v35 = vrot.slane %v1648_v57, 4  ;;  %3109 = vmatpush.bf16.msrb.mxu0 %v10295_v26 }
 0x183   : > { %1604 = vst [vmem:[#allocation2 + $0x14] sm:$0x1] %v1603_v53  ;;  %v1547_v60 = vshrl.u32 %v11152_v54, 16  ;;  %v1460_v61 = vadd.f32 %v1459_v55, %v1431_v45  ;;  %v1550_v6 = vshll.u32 %v11152_v54, 16  ;;  %v1728_v8 = vld [vmem:[#allocation2 + $0xc] sm:$0xe]  ;;  %v1791_v14 = vunpack.c.l.b16 %v1644_v63 }
 0x184   : > { %2087 = vmatmul.bf16.vlgmr.msra.gmra.mxu0 %v1815_v46  ;;  %v1658_v3 = vrot.slane %v1656_v58, 4  ;;  %v1661_v4 = vrot.slane %v1659_v59, 5  ;;  %v1654_v10 = vsel %vm10830_vm14, %v1649_v35, %v1653_v2  ;;  %v8435_v18 = vrot.slane %v1728_v8, 9  ;;  %v10294_v55 = vld [vmem:[%s12991_s3 + $0x28] sm:$0xff] }
 0x185   : > { %v1549_v5 = vrot.slane %v1547_v60, 7  ;;  %v1489_v7 = vadd.f32 %v1488_v47, %v1460_v61  ;;  %v1792_v15 = vunpack.c.l.b16 %v1654_v10  ;;  %v1434_v34 = vadd.f32 %v11098_v12, %v1433_v62  ;;  %v1491_v27 = vpop.f32.mrf.mxu1 }
 0x186   : > { %v1662_v19 = vor.u32 %v1661_v4, %v1658_v3  ;;  %v2788_v41 = vunpack.c.l.b16 %v11152_v54  ;;  %3110 = vmatpush.bf16.msrb.mxu0 %v10294_v55 }
 0x187   : > { %v1552_v11 = vor.u32 %v1550_v6, %v1549_v5  ;;  %v1501_v13 = vmax.f32 %v1489_v7, 0.0  ;;  %v1799_v22 = vpack.c.b16 %v1792_v15, %v1791_v14  ;;  %v1553_v36 = vrot.slane %v1549_v5, 4 }
 0x188   : > { %v1663_v48 = vrot.slane %v1662_v19, 4 }
 0x189   : > { %v1606_v20 = vsel %vm10759_vm8, %v1552_v11, %v1605_v17  ;;  %v1509_v21 = vpack.c.bf16 %v1501_v13, %v1501_v13  ;;  %v10234_v23 = vld [vmem:[#allocation2 + $0xc] sm:$0xff]  ;;  %2058 = vmatmul.bf16.vlgmr.msra.gmra.mxu3 %v1799_v22  ;;  %v1435_v46 = vpop.f32.mrf.mxu3  ;;  %v10293_v11 = vld [vmem:[%s12991_s3 + $0x20] sm:$0xff] }
 0x18a   : > { %v1622_v25 = vld [vmem:[#allocation2 + $0x10] sm:$0xf]  ;;  %1607 = vst [vmem:[#allocation2 + $0x18] sm:$0xf] %v1606_v20  ;;  %v1462_v28 = vpop.f32.mrf.mxu0  ;;  %v1628_v30 = vld [vmem:[#allocation2 + $0x14] sm:$0x1]  ;;  %2034 = vmatmul.bf16.gmra.mxu2 %v10234_v23  ;;  %v1436_v35 = vadd.f32 %v11098_v12, %v1435_v46  ;;  %3111 = vmatpush.bf16.msrb.mxu0 %v10293_v11 }
 0x18b   : > { %v1752_v31 = vrot.slane %v1622_v25, 5  ;;  %v1665_v33 = vshll.u32 %v1622_v25, 16  ;;  %v1555_v24 = vshrl.u32 %v1509_v21, 16  ;;  %v1463_v40 = vadd.f32 %v1462_v28, %v1434_v34 }
 0x18c   : > { %v1755_v47 = vrot.slane %v1628_v30, 5  ;;  %v1558_v52 = vshll.u32 %v1509_v21, 16  ;;  %v1669_v56 = vshrl.u32 %v1622_v25, 16  ;;  %v2789_v59 = vunpack.c.l.b16 %v1509_v21 }
 0x18d   : > { %v1753_v43 = vsel %vm10811_vm13, %v8435_v18, %v1752_v31  ;;  %v1754_v45 = vrot.slane %v1752_v31, 4  ;;  %v1557_v50 = vrot.slane %v1555_v24, 7  ;;  %v1492_v53 = vadd.f32 %v1491_v27, %v1463_v40  ;;  %v1493_v20 = vpop.f32.mrf.mxu1  ;;  %v10292_v27 = vld [vmem:[%s12991_s3 + $0x18] sm:$0xff] }
 0x18e   : > { %v1809_v54 = vunpack.c.l.b16 %v1753_v43  ;;  %v1667_v58 = vrot.slane %v1665_v33, 5  ;;  %v1671_v2 = vrot.slane %v1669_v56, 4  ;;  %v1675_v3 = vshll.u32 %v1628_v30, 16  ;;  %3112 = vmatpush.bf16.msrb.mxu0 %v10292_v27 }
 0x18f   : > { %v1756_v57 = vsel %vm10811_vm13, %v1754_v45, %v1755_v47  ;;  %v1560_v60 = vor.u32 %v1558_v52, %v1557_v50  ;;  %v1562_v61 = vrot.slane %v1557_v50, 4  ;;  %v1502_v62 = vmax.f32 %v1492_v53, 0.0 }
 0x190   : > { %v1810_v63 = vunpack.c.l.b16 %v1756_v57  ;;  %v11178_v4 = vpack.c.b16 %v2789_v59, %v2788_v41  ;;  %v1672_v13 = vor.u32 %v1671_v2, %v1667_v58  ;;  %v1668_v18 = vsel %vm10830_vm14, %v1663_v48, %v1667_v58  ;;  %v1612_v41 = vld [vmem:[#allocation2 + $0x24] sm:$0xf]  ;;  %v10291_v59 = vld [vmem:[%s12991_s3 + $0x10] sm:$0xff] }
 0x191   : > { %v1561_v5 = vsel %vm10750_vm7, %v1553_v36, %v1560_v60  ;;  %v1610_v6 = vsel %vm10708_vm3, %v1562_v61, %v1609_v0  ;;  %v11184_v7 = vpack.c.bf16 %v1502_v62, %v1502_v62  ;;  %v1623_v10 = vld [vmem:[#allocation2 + $0x18] sm:$0xf]  ;;  %v1677_v34 = vrot.slane %v1675_v3, 5  ;;  %v10290_v3 = vld [vmem:[%s12991_s3 + $0x8] sm:$0xff] }
 0x192   : > { %v1816_v8 = vpack.c.b16 %v1810_v63, %v1809_v54  ;;  %1608 = vst [vmem:[#allocation2 + $0x1c] sm:$0xf] %v1561_v5  ;;  %v1464_v12 = vpop.f32.mrf.mxu0  ;;  %v1680_v14 = vshrl.u32 %v1623_v10, 16  ;;  %v1683_v19 = vshll.u32 %v1623_v10, 16  ;;  %v1673_v21 = vrot.slane %v1672_v13, 4  ;;  %3113 = vmatpush.bf16.msrb.mxu0 %v10291_v59 }
 0x193   : > { %1611 = vst [vmem:[#allocation2 + $0x20] sm:$0x1] %v1610_v6  ;;  %v1564_v15 = vshrl.u32 %v11184_v7, 16  ;;  %v1465_v17 = vadd.f32 %v1464_v12, %v1436_v35  ;;  %v1567_v23 = vshll.u32 %v11184_v7, 16  ;;  %v1793_v30 = vunpack.c.l.b16 %v1668_v18  ;;  %v1729_v31 = vld [vmem:[#allocation2 + $0x18] sm:$0xe] }
 0x194   : > { %2092 = vmatmul.bf16.gmra.mxu0 %v1816_v8  ;;  %v1678_v28 = vsel %vm10830_vm14, %v1673_v21, %v1677_v34  ;;  %v1682_v33 = vrot.slane %v1680_v14, 4  ;;  %v1685_v26 = vrot.slane %v1683_v19, 5  ;;  %v8436_v52 = vrot.slane %v1729_v31, 9 }
 0x195   : > { %v1566_v22 = vrot.slane %v1564_v15, 7  ;;  %v1494_v25 = vadd.f32 %v1493_v20, %v1465_v17  ;;  %v1794_v40 = vunpack.c.l.b16 %v1678_v28  ;;  %v2790_v11 = vunpack.c.l.b16 %v11184_v7  ;;  %v1616_v17 = vld [vmem:[#allocation2 + $0x2c] sm:$0x1]  ;;  %v10289_v7 = vld [vmem:[%s12991_s3] sm:$0xff] }
 0x196   : > { %v1686_v54 = vor.u32 %v1685_v26, %v1682_v33  ;;  %3114 = vmatpush.bf16.msrb.mxu0 %v10290_v3 }
 0x197   : > { %v1569_v36 = vor.u32 %v1567_v23, %v1566_v22  ;;  %v1503_v24 = vmax.f32 %v1494_v25, 0.0  ;;  %v1800_v47 = vpack.c.b16 %v1794_v40, %v1793_v30  ;;  %v1570_v6 = vrot.slane %v1566_v22, 4 }
 0x198   : > { %v1687_v18 = vrot.slane %v1686_v54, 4 }
 0x199   : > { %v1613_v43 = vsel %vm10759_vm8, %v1569_v36, %v1612_v41  ;;  %v1511_v45 = vpack.c.bf16 %v1503_v24, %v1503_v24  ;;  %v10235_v48 = vld [vmem:[#allocation2 + $0x18] sm:$0xff]  ;;  %2063 = vmatmul.bf16.gmra.mxu3 %v1800_v47 }
 0x19a   : > { %v1624_v50 = vld [vmem:[#allocation2 + $0x1c] sm:$0xf]  ;;  %1614 = vst [vmem:[#allocation2 + $0x24] sm:$0xf] %v1613_v43  ;;  %v1629_v53 = vld [vmem:[#allocation2 + $0x20] sm:$0x1]  ;;  %2039 = vmatmul.bf16.gmra.mxu2 %v10235_v48  ;;  %3115 = vmatpush.bf16.msrb.mxu0 %v10289_v7 }
 0x19b   : > { %v1759_v46 = vrot.slane %v1624_v50, 5  ;;  %v1689_v56 = vshll.u32 %v1624_v50, 16  ;;  %v1572_v55 = vshrl.u32 %v1511_v45, 16  ;;  %v1762_v57 = vrot.slane %v1629_v53, 5 }
 0x19c   : > { %v1693_v58 = vshrl.u32 %v1624_v50, 16  ;;  %v1699_v63 = vshll.u32 %v1629_v53, 16  ;;  %v1575_v35 = vshll.u32 %v1511_v45, 16  ;;  %v2791_v5 = vunpack.c.l.b16 %v1511_v45 }
 0x19d   : > { %v1760_v60 = vsel %vm10811_vm13, %v8436_v52, %v1759_v46  ;;  %v1761_v61 = vrot.slane %v1759_v46, 4  ;;  %v1691_v62 = vrot.slane %v1689_v56, 5  ;;  %v1574_v0 = vrot.slane %v1572_v55, 7 }
 0x19e   : > { %v1695_v2 = vrot.slane %v1693_v58, 4  ;;  %v1811_v10 = vunpack.c.l.b16 %v1760_v60  ;;  %v1701_v19 = vrot.slane %v1699_v63, 5  ;;  %v11211_v20 = vpack.c.b16 %v2791_v5, %v2790_v11 }
 0x19f   : > { %v1763_v8 = vsel %vm10811_vm13, %v1761_v61, %v1762_v57  ;;  %v1577_v12 = vor.u32 %v1575_v35, %v1574_v0  ;;  %v1579_v13 = vrot.slane %v1574_v0, 4  ;;  %v1692_v27 = vsel %vm10830_vm14, %v1687_v18, %v1691_v62  ;;  %v10286_v18 = vld [vmem:[%s12989_s1 + $0x2e8] sm:$0xff] }
 0x1a0   : > { %v1812_v14 = vunpack.c.l.b16 %v1763_v8  ;;  %v1696_v15 = vor.u32 %v1695_v2, %v1691_v62  ;;  %v1795_v36 = vunpack.c.l.b16 %v1692_v27  ;;  %v10276_v27 = vld [vmem:[%s12989_s1 + $0x298] sm:$0xff] }
 0x1a1   : > { %v1578_v21 = vsel %vm10750_vm7, %v1570_v6, %v1577_v12  ;;  %v1617_v34 = vsel %vm10708_vm3, %v1579_v13, %v1616_v17  ;;  %v1625_v25 = vld [vmem:[#allocation2 + $0x24] sm:$0xf]  ;;  %v10280_v12 = vld [vmem:[%s12989_s1 + $0x2b8] sm:$0xff]  ;;  %v10278_v17 = vld [vmem:[%s12989_s1 + $0x2a8] sm:$0xff] }
 0x1a2   : > { %v1817_v22 = vpack.c.b16 %v1812_v14, %v1811_v10  ;;  %v1697_v23 = vrot.slane %v1696_v15, 4  ;;  %1615 = vst [vmem:[#allocation2 + $0x28] sm:$0xf] %v1578_v21  ;;  %v1704_v30 = vshrl.u32 %v1625_v25, 16  ;;  %v1707_v31 = vshll.u32 %v1625_v25, 16  ;;  %v10288_v13 = vld [vmem:[%s12989_s1 + $0x2f8] sm:$0xff]  ;;  %2662 = vmatpush.bf16.msra.mxu2 %v10280_v12 }
 0x1a3   : > { %1618 = vst [vmem:[#allocation2 + $0x2c] sm:$0x1] %v1617_v34  ;;  %v1730_v40 = vld [vmem:[#allocation2 + $0x24] sm:$0xe]  ;;  %v10272_v14 = vld [vmem:[%s12989_s1 + $0x278] sm:$0xff]  ;;  %2691 = vmatpush.bf16.msrb.mxu3 %v10288_v13  ;;  %v10271_v15 = vld [vmem:[%s12989_s1 + $0x270] sm:$0xff] }
 0x1a4   : > { %2097 = vmatmul.bf16.gmra.mxu0 %v1817_v22  ;;  %v1702_v28 = vsel %vm10830_vm14, %v1697_v23, %v1701_v19  ;;  %v1706_v26 = vrot.slane %v1704_v30, 4  ;;  %v1709_v41 = vrot.slane %v1707_v31, 5  ;;  %v8437_v48 = vrot.slane %v1730_v40, 9  ;;  %2633 = vmatpush.bf16.msra.mxu1 %v10272_v14  ;;  %v10270_v19 = vld [vmem:[%s12989_s1 + $0x268] sm:$0xff]  ;;  %v10277_v34 = vld [vmem:[%s12989_s1 + $0x2a0] sm:$0xff]  ;;  %v10267_v25 = vld [vmem:[%s12989_s1 + $0x250] sm:$0xff] }
 0x1a5   : > { %v1796_v33 = vunpack.c.l.b16 %v1702_v28  ;;  %v10285_v22 = vld [vmem:[%s12989_s1 + $0x2e0] sm:$0xff]  ;;  %v10284_v28 = vld [vmem:[%s12989_s1 + $0x2d8] sm:$0xff]  ;;  %v10266_v30 = vld [vmem:[%s12989_s1 + $0x248] sm:$0xff] }
 0x1a6   : > { %v1710_v56 = vor.u32 %v1709_v41, %v1706_v26  ;;  %v11290_v31 = vld [vmem:[%s12990_s2 + $0x2] ss:$0 sm:$0xff] }
 0x1a7   : > { %v1801_v24 = vpack.c.b16 %v1796_v33, %v1795_v36  ;;  %v10283_v36 = vld [vmem:[%s12989_s1 + $0x2d0] sm:$0xff] }
 0x1a8   : > { %v1711_v0 = vrot.slane %v1710_v56, 4  ;;  %2634 = vmatpush.bf16.msra.mxu1 %v10271_v15 }
 0x1a9   : > { %v10236_v43 = vld [vmem:[#allocation2 + $0x24] sm:$0xff]  ;;  %2068 = vmatmul.bf16.gmra.mxu3 %v1801_v24 }
 0x1aa   : > { %v1626_v45 = vld [vmem:[#allocation2 + $0x28] sm:$0xf]  ;;  %v1630_v47 = vld [vmem:[#allocation2 + $0x2c] sm:$0x1]  ;;  %2044 = vmatmul.bf16.gmra.mxu2 %v10236_v43  ;;  %v10265_v24 = vld [vmem:[%s12989_s1 + $0x240] sm:$0xff] }
 0x1ab   : > { %v1766_v50 = vrot.slane %v1626_v45, 5  ;;  %v1713_v52 = vshll.u32 %v1626_v45, 16  ;;  %v1717_v53 = vshrl.u32 %v1626_v45, 16  ;;  %v1769_v46 = vrot.slane %v1630_v47, 5  ;;  %v10275_v43 = vld [vmem:[%s12989_s1 + $0x290] sm:$0xff] }
 0x1ac   : > { %v1723_v55 = vshll.u32 %v1630_v47, 16  ;;  %2635 = vmatpush.bf16.msra.mxu1 %v10270_v19  ;;  %v10282_v47 = vld [vmem:[%s12989_s1 + $0x2c8] sm:$0xff] }
 0x1ad   : > { %v1767_v57 = vsel %vm10811_vm13, %v8437_v48, %v1766_v50  ;;  %v1768_v54 = vrot.slane %v1766_v50, 4  ;;  %v1715_v58 = vrot.slane %v1713_v52, 5  ;;  %v1719_v59 = vrot.slane %v1717_v53, 4  ;;  %v10274_v52 = vld [vmem:[%s12989_s1 + $0x288] sm:$0xff]  ;;  %v10281_v53 = vld [vmem:[%s12989_s1 + $0x2c0] sm:$0xff] }
 0x1ae   : > { %v1813_v62 = vunpack.c.l.b16 %v1767_v57  ;;  %v1725_v2 = vrot.slane %v1723_v55, 5 }
 0x1af   : > { %v1770_v60 = vsel %vm10811_vm13, %v1768_v54, %v1769_v46  ;;  %v1720_v61 = vor.u32 %v1719_v59, %v1715_v58  ;;  %v1716_v5 = vsel %vm10830_vm14, %v1711_v0, %v1715_v58 }
 0x1b0   : > { %v1814_v63 = vunpack.c.l.b16 %v1770_v60  ;;  %v1797_v10 = vunpack.c.l.b16 %v1716_v5  ;;  %v10273_v60 = vld [vmem:[%s12989_s1 + $0x280] sm:$0xff] }
 0x1b1   : > { %v1721_v35 = vrot.slane %v1720_v61, 4 }
 0x1b2   : > { %v1818_v3 = vpack.c.b16 %v1814_v63, %v1813_v62 }
 0x1b3   : > { %v1726_v6 = vsel %vm10830_vm14, %v1721_v35, %v1725_v2 }
 0x1b4   : > { %2102 = vmatmul.bf16.gmra.mxu0 %v1818_v3  ;;  %v1798_v8 = vunpack.c.l.b16 %v1726_v6 }
 0x1b6   : > { %v1802_v11 = vpack.c.b16 %v1798_v8, %v1797_v10 }
 0x1b9   : > { %2073 = vmatmul.bf16.gmra.mxu3 %v1802_v11 }
 0x1c4   : > { %3116 = vmatmul.bf16.vlgmr.msrb.gmra.mxu0 %v10958_v16  ;;  %v10279_v16 = vld [vmem:[%s12989_s1 + $0x2b0] sm:$0xff] }
 0x1c5   : > { %2663 = vmatpush.bf16.msra.mxu2 %v10279_v16 }
 0x1c9   : > { %2664 = vmatpush.bf16.msra.mxu2 %v10278_v17 }
 0x1cd   : > { %2665 = vmatpush.bf16.msra.mxu2 %v10277_v34 }
 0x1d1   : > { %2666 = vmatpush.bf16.msra.mxu2 %v10276_v27 }
 0x1d4   : > { %3121 = vmatmul.bf16.gmra.mxu0 %v10990_v39  ;;  %v10287_v39 = vld [vmem:[%s12989_s1 + $0x2f0] sm:$0xff] }
 0x1d5   : > { %2692 = vmatpush.bf16.msrb.mxu3 %v10287_v39  ;;  %2667 = vmatpush.bf16.msra.mxu2 %v10275_v43 }
 0x1d9   : > { %2693 = vmatpush.bf16.msrb.mxu3 %v10286_v18  ;;  %2668 = vmatpush.bf16.msra.mxu2 %v10274_v52  ;;  %v2210_v52 = vld [vmem:[#allocation2 + $0xc] sm:$0xf] }
 0x1dd   : > { %2694 = vmatpush.bf16.msrb.mxu3 %v10285_v22  ;;  %2669 = vmatpush.bf16.msra.mxu2 %v10273_v60 }
 0x1e1   : > { %2695 = vmatpush.bf16.msrb.mxu3 %v10284_v28 }
 0x1e4   : > { %3126 = vmatmul.bf16.gmra.mxu0 %v11007_v42  ;;  %v10269_v42 = vld [vmem:[%s12989_s1 + $0x260] sm:$0xff] }
 0x1e5   : > { %2636 = vmatpush.bf16.msra.mxu1 %v10269_v42  ;;  %2696 = vmatpush.bf16.msrb.mxu3 %v10283_v36 }
 0x1e9   : > { %2697 = vmatpush.bf16.msrb.mxu3 %v10282_v47 }
 0x1ed   : > { %2698 = vmatpush.bf16.msrb.mxu3 %v10281_v53 }
 0x1f4   : > { %3131 = vmatmul.bf16.gmra.mxu0 %v11041_v29  ;;  %v10268_v29 = vld [vmem:[%s12989_s1 + $0x258] sm:$0xff] }
 0x1f5   : > { %2637 = vmatpush.bf16.msra.mxu1 %v10268_v29 }
 0x1f9   : > { %2638 = vmatpush.bf16.msra.mxu1 %v10267_v25 }
 0x1fd   : > { %v2030_v21 = vpop.f32.mrf.mxu2  ;;  %2639 = vmatpush.bf16.msra.mxu1 %v10266_v30 }
 0x1fe   : > { %v2031_v40 = vadd.f32 %v11290_v31, %v2030_v21  ;;  %v2207_v21 = vld [vmem:[#allocation2 + $0x8] sm:$0x1] }
 0x201   : > { %v2088_v23 = vpop.f32.mrf.mxu0  ;;  %2640 = vmatpush.bf16.msra.mxu1 %v10265_v24 }
 0x205   : > { %v2032_v7 = vpop.f32.mrf.mxu2 }
 0x206   : > { %v2033_v46 = vadd.f32 %v11290_v31, %v2032_v7 }
 0x209   : > { %v2090_v33 = vpop.f32.mrf.mxu0 }
 0x20c   : > { %v2059_v26 = vpop.f32.mrf.mxu3 }
 0x20d   : > { %v2035_v41 = vpop.f32.mrf.mxu2  ;;  %v2060_v45 = vadd.f32 %v2059_v26, %v2031_v40 }
 0x20e   : > { %v2036_v3 = vadd.f32 %v11290_v31, %v2035_v41 }
 0x20f   : > { %v2089_v48 = vadd.f32 %v2088_v23, %v2060_v45 }
 0x211   : > { %v2108_v50 = vmax.f32 %v2089_v48, 0.0  ;;  %v2093_v55 = vpop.f32.mrf.mxu0 }
 0x213   : > { %v2116_v56 = vpack.c.bf16 %v2108_v50, %v2108_v50 }
 0x214   : > { %v2061_v57 = vpop.f32.mrf.mxu3 }
 0x215   : > { %v2037_v54 = vpop.f32.mrf.mxu2  ;;  %v2125_v58 = vshrl.u32 %v2116_v56, 16  ;;  %v2062_v59 = vadd.f32 %v2061_v57, %v2033_v46  ;;  %v2128_v62 = vshll.u32 %v2116_v56, 16  ;;  %v2808_v10 = vunpack.c.l.b16 %v2116_v56 }
 0x216   : > { %v2038_v29 = vadd.f32 %v11290_v31, %v2037_v54 }
 0x217   : > { %v2127_v61 = vrot.slane %v2125_v58, 7  ;;  %v2091_v63 = vadd.f32 %v2090_v33, %v2062_v59 }
 0x219   : > { %v2130_v0 = vor.u32 %v2128_v62, %v2127_v61  ;;  %v2109_v35 = vmax.f32 %v2091_v63, 0.0  ;;  %v2095_v14 = vpop.f32.mrf.mxu0  ;;  %v2131_v18 = vrot.slane %v2127_v61, 4 }
 0x21b   : > { %v2204_v2 = vsel %vm10759_vm8, %v2130_v0, %v11134_v49  ;;  %v2117_v5 = vpack.c.bf16 %v2109_v35, %v2109_v35 }
 0x21c   : > { %2205 = vst [vmem:[#allocation2] sm:$0xf] %v2204_v2  ;;  %v2064_v6 = vpop.f32.mrf.mxu3 }
 0x21d   : > { %v2040_v8 = vpop.f32.mrf.mxu2  ;;  %v2133_v11 = vshrl.u32 %v2117_v5, 16  ;;  %v2809_v12 = vunpack.c.l.b16 %v2117_v5  ;;  %v2065_v13 = vadd.f32 %v2064_v6, %v2036_v3  ;;  %v2136_v39 = vshll.u32 %v2117_v5, 16 }
 0x21e   : > { %v2041_v46 = vadd.f32 %v11290_v31, %v2040_v8 }
 0x21f   : > { %v2135_v16 = vrot.slane %v2133_v11, 7  ;;  %v11319_v15 = vpack.c.b16 %v2809_v12, %v2808_v10  ;;  %v2094_v17 = vadd.f32 %v2093_v55, %v2065_v13 }
 0x221   : > { %v2138_v19 = vor.u32 %v2136_v39, %v2135_v16  ;;  %v2140_v42 = vrot.slane %v2135_v16, 4  ;;  %v2110_v49 = vmax.f32 %v2094_v17, 0.0  ;;  %v2098_v41 = vpop.f32.mrf.mxu0  ;;  %v10304_v17 = vld [vmem:[%s12991_s3 + $0x78] sm:$0xff] }
 0x222   : > { %3137 = vmatpush.bf16.msrb.mxu1 %v10304_v17 }
 0x223   : > { %v2139_v34 = vsel %vm10750_vm7, %v2131_v18, %v2138_v19  ;;  %v2208_v22 = vsel %vm10708_vm3, %v2140_v42, %v2207_v21  ;;  %v2118_v23 = vpack.c.bf16 %v2110_v49, %v2110_v49  ;;  %v11326_v25 = vld [vmem:[#allocation2] sm:$0xf] }
 0x224   : > { %2206 = vst [vmem:[#allocation2 + $0x4] sm:$0xf] %v2139_v34  ;;  %v2066_v7 = vpop.f32.mrf.mxu3  ;;  %v2244_v33 = vshrl.u32 %v11326_v25, 16  ;;  %v2247_v36 = vshll.u32 %v11326_v25, 16  ;;  %v2339_v43 = vld [vmem:[#allocation2] sm:$0xe] }
 0x225   : > { %2209 = vst [vmem:[#allocation2 + $0x8] sm:$0x1] %v2208_v22  ;;  %v2142_v27 = vshrl.u32 %v2118_v23, 16  ;;  %v2067_v28 = vadd.f32 %v2066_v7, %v2038_v29  ;;  %v2042_v30 = vpop.f32.mrf.mxu2  ;;  %v2145_v40 = vshll.u32 %v2118_v23, 16  ;;  %v8599_v54 = vrot.slane %v2339_v43, 9 }
 0x226   : > { %v2246_v48 = vrot.slane %v2244_v33, 4  ;;  %v2249_v50 = vrot.slane %v2247_v36, 5  ;;  %v2810_v35 = vunpack.c.l.b16 %v2118_v23  ;;  %v2214_v34 = vld [vmem:[#allocation2 + $0x14] sm:$0x1]  ;;  %v2043_v22 = vadd.f32 %v11290_v31, %v2042_v30 }
 0x227   : > { %v2144_v24 = vrot.slane %v2142_v27, 7  ;;  %v2096_v26 = vadd.f32 %v2095_v14, %v2067_v28 }
 0x228   : > { %v2250_v0 = vor.u32 %v2249_v50, %v2246_v48 }
 0x229   : > { %v2147_v45 = vor.u32 %v2145_v40, %v2144_v24  ;;  %v2111_v47 = vmax.f32 %v2096_v26, 0.0  ;;  %v2148_v2 = vrot.slane %v2144_v24, 4  ;;  %v2100_v29 = vpop.f32.mrf.mxu0 }
 0x22b   : > { %v2211_v53 = vsel %vm10759_vm8, %v2147_v45, %v2210_v52  ;;  %v2119_v56 = vpack.c.bf16 %v2111_v47, %v2111_v47  ;;  %v10261_v55 = vld [vmem:[#allocation2] sm:$0xff]  ;;  %v10303_v47 = vld [vmem:[%s12991_s3 + $0x70] sm:$0xff] }
 0x22c   : > { %v2232_v57 = vld [vmem:[#allocation2 + $0x4] sm:$0xf]  ;;  %2212 = vst [vmem:[#allocation2 + $0xc] sm:$0xf] %v2211_v53  ;;  %v2069_v58 = vpop.f32.mrf.mxu3  ;;  %v2239_v59 = vld [vmem:[#allocation2 + $0x8] sm:$0x1]  ;;  %2641 = vmatmul.bf16.vlgmr.msra.gmra.mxu1 %v10261_v55 }
 0x22d   : > { %v2357_v60 = vrot.slane %v2232_v57, 5  ;;  %v2253_v61 = vshll.u32 %v2232_v57, 16  ;;  %v2150_v62 = vshrl.u32 %v2119_v56, 16  ;;  %v2070_v63 = vadd.f32 %v2069_v58, %v2041_v46  ;;  %v2045_v12 = vpop.f32.mrf.mxu2  ;;  %3138 = vmatpush.bf16.msrb.mxu1 %v10303_v47  ;;  %v10302_v55 = vld [vmem:[%s12991_s3 + $0x68] sm:$0xff] }
 0x22e   : > { %v2360_v6 = vrot.slane %v2239_v59, 5  ;;  %v2153_v10 = vshll.u32 %v2119_v56, 16  ;;  %v2257_v13 = vshrl.u32 %v2232_v57, 16  ;;  %v2811_v18 = vunpack.c.l.b16 %v2119_v56 }
 0x22f   : > { %v2358_v3 = vsel %vm10811_vm13, %v8599_v54, %v2357_v60  ;;  %v2359_v5 = vrot.slane %v2357_v60, 4  ;;  %v2152_v8 = vrot.slane %v2150_v62, 7  ;;  %v2099_v11 = vadd.f32 %v2098_v41, %v2070_v63 }
 0x230   : > { %v2419_v16 = vunpack.c.l.b16 %v2358_v3  ;;  %v2255_v39 = vrot.slane %v2253_v61, 5  ;;  %v2259_v23 = vrot.slane %v2257_v13, 4  ;;  %v2263_v7 = vshll.u32 %v2239_v59, 16  ;;  %v2217_v3 = vld [vmem:[#allocation2 + $0x18] sm:$0xf] }
 0x231   : > { %v2361_v14 = vsel %vm10811_vm13, %v2359_v5, %v2360_v6  ;;  %v2155_v19 = vor.u32 %v2153_v10, %v2152_v8  ;;  %v2157_v42 = vrot.slane %v2152_v8, 4  ;;  %v2112_v49 = vmax.f32 %v2099_v11, 0.0  ;;  %3139 = vmatpush.bf16.msrb.mxu1 %v10302_v55  ;;  %v2221_v55 = vld [vmem:[#allocation2 + $0x20] sm:$0x1] }
 0x232   : > { %v2420_v21 = vunpack.c.l.b16 %v2361_v14  ;;  %v11341_v27 = vpack.c.b16 %v2811_v18, %v2810_v35  ;;  %v2251_v41 = vrot.slane %v2250_v0, 4  ;;  %v2260_v30 = vor.u32 %v2259_v23, %v2255_v39 }
 0x233   : > { %v2156_v28 = vsel %vm10750_vm7, %v2148_v2, %v2155_v19  ;;  %v2215_v33 = vsel %vm10708_vm3, %v2157_v42, %v2214_v34  ;;  %v11347_v36 = vpack.c.bf16 %v2112_v49, %v2112_v49  ;;  %v2233_v40 = vld [vmem:[#allocation2 + $0xc] sm:$0xf]  ;;  %v2265_v56 = vrot.slane %v2263_v7, 5 }
 0x234   : > { %v2427_v24 = vpack.c.b16 %v2420_v21, %v2419_v16  ;;  %2213 = vst [vmem:[#allocation2 + $0x10] sm:$0xf] %v2156_v28  ;;  %v2071_v26 = vpop.f32.mrf.mxu3  ;;  %v2268_v43 = vshrl.u32 %v2233_v40, 16  ;;  %v2271_v45 = vshll.u32 %v2233_v40, 16  ;;  %v2256_v53 = vsel %vm10830_vm14, %v2251_v41, %v2255_v39  ;;  %v2340_v58 = vld [vmem:[#allocation2 + $0xc] sm:$0xe]  ;;  %v2103_v39 = vpop.f32.mrf.mxu0 }
 0x235   : > { %2216 = vst [vmem:[#allocation2 + $0x14] sm:$0x1] %v2215_v33  ;;  %v2159_v48 = vshrl.u32 %v11347_v36, 16  ;;  %v2072_v50 = vadd.f32 %v2071_v26, %v2043_v22  ;;  %v2162_v52 = vshll.u32 %v11347_v36, 16  ;;  %v2261_v46 = vrot.slane %v2260_v30, 4  ;;  %v2047_v0 = vpop.f32.mrf.mxu2  ;;  %v10311_v30 = vld [vmem:[%s12991_s3 + $0xb0] sm:$0xff] }
 0x236   : > { %2699 = vmatmul.bf16.vlgmr.msrb.gmra.mxu3 %v2427_v24  ;;  %v2270_v59 = vrot.slane %v2268_v43, 4  ;;  %v2273_v60 = vrot.slane %v2271_v45, 5  ;;  %v2403_v35 = vunpack.c.l.b16 %v2256_v53  ;;  %v2046_v5 = vadd.f32 %v11290_v31, %v2045_v12 }
 0x237   : > { %v11359_v57 = vrot.slane %v2159_v48, 7  ;;  %v2101_v54 = vadd.f32 %v2100_v29, %v2072_v50  ;;  %v2266_v61 = vsel %vm10830_vm14, %v2261_v46, %v2265_v56  ;;  %v8600_v6 = vrot.slane %v2340_v58, 9  ;;  %v10312_v29 = vld [vmem:[%s12991_s3 + $0xb8] sm:$0xff] }
 0x238   : > { %v2404_v2 = vunpack.c.l.b16 %v2266_v61  ;;  %v2274_v16 = vor.u32 %v2273_v60, %v2270_v59  ;;  %v2048_v17 = vadd.f32 %v11290_v31, %v2047_v0  ;;  %v10301_v31 = vld [vmem:[%s12991_s3 + $0x60] sm:$0xff]  ;;  %3166 = vmatpush.bf16.msrb.mxu2 %v10312_v29  ;;  %v10300_v50 = vld [vmem:[%s12991_s3 + $0x58] sm:$0xff]  ;;  %v2812_v58 = vunpack.c.l.b16 %v11347_v36 }
 0x239   : > { %v2164_v62 = vor.u32 %v2162_v52, %v11359_v57  ;;  %v2113_v63 = vmax.f32 %v2101_v54, 0.0  ;;  %v2165_v12 = vrot.slane %v11359_v57, 4  ;;  %3140 = vmatpush.bf16.msrb.mxu1 %v10301_v31 }
 0x23a   : > { %v2411_v11 = vpack.c.b16 %v2404_v2, %v2403_v35  ;;  %v2275_v41 = vrot.slane %v2274_v16, 4  ;;  %v10310_v35 = vld [vmem:[%s12991_s3 + $0xa8] sm:$0xff] }
 0x23b   : > { %v2218_v8 = vsel %vm10759_vm8, %v2164_v62, %v2217_v3  ;;  %v11367_v10 = vpack.c.bf16 %v2113_v63, %v2113_v63  ;;  %v10262_v13 = vld [vmem:[#allocation2 + $0xc] sm:$0xff] }
 0x23c   : > { %v2234_v14 = vld [vmem:[#allocation2 + $0x10] sm:$0xf]  ;;  %2219 = vst [vmem:[#allocation2 + $0x18] sm:$0xf] %v2218_v8  ;;  %v2074_v18 = vpop.f32.mrf.mxu3  ;;  %v2240_v19 = vld [vmem:[#allocation2 + $0x14] sm:$0x1]  ;;  %2670 = vmatmul.bf16.vlgmr.msra.gmra.mxu2 %v2411_v11  ;;  %2646 = vmatmul.bf16.gmra.mxu1 %v10262_v13 }
 0x23d   : > { %v2364_v42 = vrot.slane %v2234_v14, 5  ;;  %v2277_v49 = vshll.u32 %v2234_v14, 16  ;;  %v2167_v21 = vshrl.u32 %v11367_v10, 16  ;;  %v2075_v34 = vadd.f32 %v2074_v18, %v2046_v5  ;;  %3167 = vmatpush.bf16.msrb.mxu2 %v10311_v30  ;;  %3141 = vmatpush.bf16.msrb.mxu1 %v10300_v50 }
 0x23e   : > { %v2367_v22 = vrot.slane %v2240_v19, 5  ;;  %v2281_v33 = vshrl.u32 %v2234_v14, 16  ;;  %v2170_v40 = vshll.u32 %v11367_v10, 16  ;;  %v2287_v48 = vshll.u32 %v2240_v19, 16  ;;  %v2105_v14 = vpop.f32.mrf.mxu0 }
 0x23f   : > { %v2365_v23 = vsel %vm10811_vm13, %v8600_v6, %v2364_v42  ;;  %v2366_v7 = vrot.slane %v2364_v42, 4  ;;  %v2279_v28 = vrot.slane %v2277_v49, 5  ;;  %v2169_v24 = vrot.slane %v2167_v21, 7  ;;  %v10299_v6 = vld [vmem:[%s12991_s3 + $0x50] sm:$0xff] }
 0x240   : > { %v2104_v26 = vadd.f32 %v2103_v39, %v2075_v34  ;;  %v2421_v45 = vunpack.c.l.b16 %v2365_v23  ;;  %v2283_v47 = vrot.slane %v2281_v33, 4  ;;  %v2813_v59 = vunpack.c.l.b16 %v11367_v10  ;;  %v10298_v34 = vld [vmem:[%s12991_s3 + $0x48] sm:$0xff] }
 0x241   : > { %v2368_v43 = vsel %vm10811_vm13, %v2366_v7, %v2367_v22  ;;  %v2172_v52 = vor.u32 %v2170_v40, %v2169_v24  ;;  %v2174_v53 = vrot.slane %v2169_v24, 4  ;;  %v2280_v57 = vsel %vm10830_vm14, %v2275_v41, %v2279_v28  ;;  %3168 = vmatpush.bf16.msrb.mxu2 %v10310_v35  ;;  %3142 = vmatpush.bf16.msrb.mxu1 %v10299_v6  ;;  %v2224_v7 = vld [vmem:[#allocation2 + $0x24] sm:$0xf] }
 0x242   : > { %v2114_v46 = vmax.f32 %v2104_v26, 0.0  ;;  %v2422_v56 = vunpack.c.l.b16 %v2368_v43  ;;  %v2284_v54 = vor.u32 %v2283_v47, %v2279_v28  ;;  %v2289_v3 = vrot.slane %v2287_v48, 5 }
 0x243   : > { %v2173_v60 = vsel %vm10750_vm7, %v2165_v12, %v2172_v52  ;;  %v2222_v61 = vsel %vm10708_vm3, %v2174_v53, %v2221_v55  ;;  %v2235_v0 = vld [vmem:[#allocation2 + $0x18] sm:$0xf]  ;;  %v11406_v13 = vpack.c.b16 %v2813_v59, %v2812_v58  ;;  %v2405_v39 = vunpack.c.l.b16 %v2280_v57  ;;  %v10309_v12 = vld [vmem:[%s12991_s3 + $0xa0] sm:$0xff] }
 0x244   : > { %v11397_v62 = vpack.c.bf16 %v2114_v46, %v2114_v46  ;;  %v2428_v63 = vpack.c.b16 %v2422_v56, %v2421_v45  ;;  %2220 = vst [vmem:[#allocation2 + $0x1c] sm:$0xf] %v2173_v60  ;;  %v2076_v2 = vpop.f32.mrf.mxu3  ;;  %v2285_v36 = vrot.slane %v2284_v54, 4  ;;  %v2292_v5 = vshrl.u32 %v2235_v0, 16  ;;  %v10308_v52 = vld [vmem:[%s12991_s3 + $0x98] sm:$0xff]  ;;  %v10297_v53 = vld [vmem:[%s12991_s3 + $0x40] sm:$0xff] }
 0x245   : > { %2223 = vst [vmem:[#allocation2 + $0x20] sm:$0x1] %v2222_v61  ;;  %v2077_v10 = vadd.f32 %v2076_v2, %v2048_v17  ;;  %v2295_v11 = vshll.u32 %v2235_v0, 16  ;;  %v2341_v17 = vld [vmem:[#allocation2 + $0x18] sm:$0xe]  ;;  %3169 = vmatpush.bf16.msrb.mxu2 %v10309_v12  ;;  %3143 = vmatpush.bf16.msrb.mxu1 %v10298_v34  ;;  %v10307_v60 = vld [vmem:[%s12991_s3 + $0x90] sm:$0xff] }
 0x246   : > { %v2176_v8 = vshrl.u32 %v11397_v62, 16  ;;  %2704 = vmatmul.bf16.gmra.mxu3 %v2428_v63  ;;  %v2290_v16 = vsel %vm10830_vm14, %v2285_v36, %v2289_v3  ;;  %v2179_v19 = vshll.u32 %v11397_v62, 16  ;;  %v2294_v21 = vrot.slane %v2292_v5, 4 }
 0x247   : > { %v2106_v42 = vadd.f32 %v2105_v14, %v2077_v10  ;;  %v2406_v49 = vunpack.c.l.b16 %v2290_v16  ;;  %v2297_v23 = vrot.slane %v2295_v11, 5  ;;  %v8601_v26 = vrot.slane %v2341_v17, 9 }
 0x248   : > { %v2178_v18 = vrot.slane %v2176_v8, 7  ;;  %v2814_v61 = vunpack.c.l.b16 %v11397_v62  ;;  %v2228_v8 = vld [vmem:[#allocation2 + $0x2c] sm:$0x1] }
 0x249   : > { %v2115_v29 = vmax.f32 %v2106_v42, 0.0  ;;  %v2412_v31 = vpack.c.b16 %v2406_v49, %v2405_v39  ;;  %v2298_v48 = vor.u32 %v2297_v23, %v2294_v21  ;;  %3170 = vmatpush.bf16.msrb.mxu2 %v10308_v52  ;;  %3144 = vmatpush.bf16.msrb.mxu1 %v10297_v53  ;;  %v10306_v42 = vld [vmem:[%s12991_s3 + $0x88] sm:$0xff] }
 0x24a   : > { %v2181_v22 = vor.u32 %v2179_v19, %v2178_v18  ;;  %v2182_v63 = vrot.slane %v2178_v18, 4 }
 0x24b   : > { %v2123_v33 = vpack.c.bf16 %v2115_v29, %v2115_v29  ;;  %v10263_v24 = vld [vmem:[#allocation2 + $0x18] sm:$0xff]  ;;  %v2299_v10 = vrot.slane %v2298_v48, 4  ;;  %v10305_v29 = vld [vmem:[%s12991_s3 + $0x80] sm:$0xff] }
 0x24c   : > { %v2225_v28 = vsel %vm10759_vm8, %v2181_v22, %v2224_v7  ;;  %v2236_v40 = vld [vmem:[#allocation2 + $0x1c] sm:$0xf]  ;;  %v2241_v41 = vld [vmem:[#allocation2 + $0x20] sm:$0x1]  ;;  %2675 = vmatmul.bf16.gmra.mxu2 %v2412_v31  ;;  %2651 = vmatmul.bf16.gmra.mxu1 %v10263_v24 }
 0x24d   : > { %2226 = vst [vmem:[#allocation2 + $0x24] sm:$0xf] %v2225_v28  ;;  %v2371_v30 = vrot.slane %v2236_v40, 5  ;;  %v2301_v43 = vshll.u32 %v2236_v40, 16  ;;  %v2184_v45 = vshrl.u32 %v2123_v33, 16  ;;  %v2374_v47 = vrot.slane %v2241_v41, 5  ;;  %3171 = vmatpush.bf16.msrb.mxu2 %v10307_v60 }
 0x24e   : > { %v2305_v50 = vshrl.u32 %v2236_v40, 16  ;;  %v2311_v57 = vshll.u32 %v2241_v41, 16  ;;  %v2187_v58 = vshll.u32 %v2123_v33, 16  ;;  %v2815_v2 = vunpack.c.l.b16 %v2123_v33 }
 0x24f   : > { %v2372_v46 = vsel %vm10811_vm13, %v8601_v26, %v2371_v30  ;;  %v2373_v56 = vrot.slane %v2371_v30, 4  ;;  %v2303_v55 = vrot.slane %v2301_v43, 5  ;;  %v2186_v54 = vrot.slane %v2184_v45, 7 }
 0x250   : > { %v2307_v59 = vrot.slane %v2305_v50, 4  ;;  %v2423_v35 = vunpack.c.l.b16 %v2372_v46  ;;  %v2313_v11 = vrot.slane %v2311_v57, 5  ;;  %v11433_v14 = vpack.c.b16 %v2815_v2, %v2814_v61 }
 0x251   : > { %v2375_v0 = vsel %vm10811_vm13, %v2373_v56, %v2374_v47  ;;  %v2189_v36 = vor.u32 %v2187_v58, %v2186_v54  ;;  %v2191_v3 = vrot.slane %v2186_v54, 4  ;;  %v2304_v49 = vsel %vm10830_vm14, %v2299_v10, %v2303_v55  ;;  %3172 = vmatpush.bf16.msrb.mxu2 %v10306_v42 }
 0x252   : > { %v2424_v5 = vunpack.c.l.b16 %v2375_v0  ;;  %v2308_v6 = vor.u32 %v2307_v59, %v2303_v55  ;;  %v2407_v22 = vunpack.c.l.b16 %v2304_v49 }
 0x253   : > { %v2190_v16 = vsel %vm10750_vm7, %v2182_v63, %v2189_v36  ;;  %v2229_v62 = vsel %vm10708_vm3, %v2191_v3, %v2228_v8  ;;  %v10320_v3 = vld [vmem:[%s12991_s3 + $0xf8] sm:$0xff]  ;;  %v10313_v8 = vld [vmem:[%s12991_s3 + $0xc0] sm:$0xff] }
 0x254   : > { %v2429_v39 = vpack.c.b16 %v2424_v5, %v2423_v35  ;;  %v2309_v18 = vrot.slane %v2308_v6, 4  ;;  %v2237_v19 = vld [vmem:[#allocation2 + $0x24] sm:$0xf]  ;;  %2227 = vst [vmem:[#allocation2 + $0x28] sm:$0xf] %v2190_v16  ;;  %3195 = vmatpush.bf16.msra.mxu3 %v10320_v3  ;;  %v10319_v5 = vld [vmem:[%s12991_s3 + $0xf0] sm:$0xff] }
 0x255   : > { %2230 = vst [vmem:[#allocation2 + $0x2c] sm:$0x1] %v2229_v62  ;;  %v2316_v17 = vshrl.u32 %v2237_v19, 16  ;;  %v2319_v21 = vshll.u32 %v2237_v19, 16  ;;  %v2342_v23 = vld [vmem:[#allocation2 + $0x24] sm:$0xe]  ;;  %3173 = vmatpush.bf16.msrb.mxu2 %v10305_v29 }
 0x256   : > { %2709 = vmatmul.bf16.gmra.mxu3 %v2429_v39  ;;  %v2314_v12 = vsel %vm10830_vm14, %v2309_v18, %v2313_v11  ;;  %v8602_v26 = vrot.slane %v2342_v23, 9  ;;  %v10318_v6 = vld [vmem:[%s12991_s3 + $0xe8] sm:$0xff] }
 0x257   : > { %v2408_v34 = vunpack.c.l.b16 %v2314_v12  ;;  %v2318_v7 = vrot.slane %v2316_v17, 4  ;;  %v2321_v28 = vrot.slane %v2319_v21, 5 }
 0x258   : > { %3196 = vmatpush.bf16.msra.mxu3 %v10319_v5  ;;  %v10609_v5 = vld [vmem:[%s10701_s15 + $0x10] sm:$0xff] }
 0x259   : > { %v2413_v31 = vpack.c.b16 %v2408_v34, %v2407_v22  ;;  %v2322_v47 = vor.u32 %v2321_v28, %v2318_v7  ;;  %v10607_v7 = vld [vmem:[%s10701_s15] sm:$0xff] }
 0x25b   : > { %v10264_v33 = vld [vmem:[#allocation2 + $0x24] sm:$0xff]  ;;  %v2323_v58 = vrot.slane %v2322_v47, 4 }
 0x25c   : > { %v2238_v24 = vld [vmem:[#allocation2 + $0x28] sm:$0xf]  ;;  %v2242_v40 = vld [vmem:[#allocation2 + $0x2c] sm:$0x1]  ;;  %2680 = vmatmul.bf16.gmra.mxu2 %v2413_v31  ;;  %2656 = vmatmul.bf16.gmra.mxu1 %v10264_v33 }
 0x25d   : > { %v2378_v41 = vrot.slane %v2238_v24, 5  ;;  %v2325_v30 = vshll.u32 %v2238_v24, 16  ;;  %v2329_v43 = vshrl.u32 %v2238_v24, 16  ;;  %v2381_v45 = vrot.slane %v2242_v40, 5  ;;  %3197 = vmatpush.bf16.msra.mxu3 %v10318_v6  ;;  %v10608_v47 = vld [vmem:[%s10701_s15 + $0x8] sm:$0xff] }
 0x25e   : > { %v2335_v48 = vshll.u32 %v2242_v40, 16 }
 0x25f   : > { %v2379_v50 = vsel %vm10811_vm13, %v8602_v26, %v2378_v41  ;;  %v2380_v52 = vrot.slane %v2378_v41, 4  ;;  %v2327_v53 = vrot.slane %v2325_v30, 5  ;;  %v2331_v46 = vrot.slane %v2329_v43, 4 }
 0x260   : > { %v2425_v57 = vunpack.c.l.b16 %v2379_v50  ;;  %v2337_v60 = vrot.slane %v2335_v48, 5 }
 0x261   : > { %v2382_v56 = vsel %vm10811_vm13, %v2380_v52, %v2381_v45  ;;  %v2332_v55 = vor.u32 %v2331_v46, %v2327_v53  ;;  %v2328_v63 = vsel %vm10830_vm14, %v2323_v58, %v2327_v53 }
 0x262   : > { %v2426_v54 = vunpack.c.l.b16 %v2382_v56  ;;  %v2409_v2 = vunpack.c.l.b16 %v2328_v63 }
 0x263   : > { %v2333_v59 = vrot.slane %v2332_v55, 4 }
 0x264   : > { %v2430_v61 = vpack.c.b16 %v2426_v54, %v2425_v57 }
 0x265   : > { %v2338_v0 = vsel %vm10830_vm14, %v2333_v59, %v2337_v60 }
 0x266   : > { %2714 = vmatmul.bf16.gmra.mxu3 %v2430_v61  ;;  %v2410_v35 = vunpack.c.l.b16 %v2338_v0 }
 0x268   : > { %v2414_v36 = vpack.c.b16 %v2410_v35, %v2409_v2 }
 0x26c   : > { %2685 = vmatmul.bf16.gmra.mxu2 %v2414_v36  ;;  %3145 = vmatmul.bf16.vlgmr.msrb.gmra.mxu1 %v11127_v32  ;;  %v10317_v32 = vld [vmem:[%s12991_s3 + $0xe0] sm:$0xff] }
 0x26d   : > { %3198 = vmatpush.bf16.msra.mxu3 %v10317_v32 }
 0x27c   : > { %3174 = vmatmul.bf16.vlgmr.msrb.gmra.mxu2 %v11319_v15  ;;  %3150 = vmatmul.bf16.gmra.mxu1 %v11146_v51  ;;  %v10316_v51 = vld [vmem:[%s12991_s3 + $0xd8] sm:$0xff]  ;;  %v10315_v15 = vld [vmem:[%s12991_s3 + $0xd0] sm:$0xff] }
 0x27d   : > { %3199 = vmatpush.bf16.msra.mxu3 %v10316_v51 }
 0x281   : > { %3200 = vmatpush.bf16.msra.mxu3 %v10315_v15 }
 0x28c   : > { %3179 = vmatmul.bf16.gmra.mxu2 %v11341_v27  ;;  %3155 = vmatmul.bf16.gmra.mxu1 %v11178_v4  ;;  %v10314_v27 = vld [vmem:[%s12991_s3 + $0xc8] sm:$0xff] }
 0x28d   : > { %3201 = vmatpush.bf16.msra.mxu3 %v10314_v27 }
 0x291   : > { %3202 = vmatpush.bf16.msra.mxu3 %v10313_v8 }
 0x29c   : > { %3184 = vmatmul.bf16.gmra.mxu2 %v11406_v13  ;;  %3160 = vmatmul.bf16.gmra.mxu1 %v11211_v20  ;;  %v11492_v13 = vld [vmem:[%s12990_s2 + $0x3] ss:$0 sm:$0xff] }
 0x2a9   : > { %v2642_v4 = vpop.f32.mrf.mxu1 }
 0x2aa   : > { %v2643_v20 = vadd.f32 %v11492_v13, %v2642_v4 }
 0x2ac   : > { %3189 = vmatmul.bf16.gmra.mxu2 %v11433_v14 }
 0x2b1   : > { %v2644_v10 = vpop.f32.mrf.mxu1 }
 0x2b2   : > { %v2645_v42 = vadd.f32 %v11492_v13, %v2644_v10 }
 0x2b9   : > { %v2700_v11 = vpop.f32.mrf.mxu3  ;;  %v2647_v39 = vpop.f32.mrf.mxu1 }
 0x2ba   : > { %v2648_v23 = vadd.f32 %v11492_v13, %v2647_v39 }
 0x2bf   : > { %v2671_v14 = vpop.f32.mrf.mxu2 }
 0x2c0   : > { %v2672_v62 = vadd.f32 %v2671_v14, %v2643_v20  ;;  %v10610_v20 = vld [vmem:[%s10701_s15 + $0x18] sm:$0xff] }
 0x2c1   : > { %v2702_v16 = vpop.f32.mrf.mxu3  ;;  %v2649_v29 = vpop.f32.mrf.mxu1 }
 0x2c2   : > { %v2701_v18 = vadd.f32 %v2700_v11, %v2672_v62  ;;  %v2650_v57 = vadd.f32 %v11492_v13, %v2649_v29 }
 0x2c4   : > { %v2720_v19 = vmax.f32 %v2701_v18, 0.0 }
 0x2c6   : > { %v2728_v49 = vpack.c.bf16 %v2720_v19, %v2720_v19 }
 0x2c7   : > { %v2673_v12 = vpop.f32.mrf.mxu2 }
 0x2c8   : > { %v2674_v21 = vadd.f32 %v2673_v12, %v2645_v42  ;;  %v2736_v34 = vunpack.c.l.bf16 %v2728_v49  ;;  %v2832_v40 = vunpack.c.l.b16 %v2728_v49 }
 0x2c9   : > { %v2705_v17 = vpop.f32.mrf.mxu3  ;;  %v2652_v56 = vpop.f32.mrf.mxu1 }
 0x2ca   : > { %v2703_v22 = vadd.f32 %v2702_v16, %v2674_v21  ;;  %v2744_v28 = vadd.f32 %v10607_v7, %v2736_v34  ;;  %v2653_v36 = vadd.f32 %v11492_v13, %v2652_v56 }
 0x2cc   : > { %v2721_v31 = vmax.f32 %v2703_v22, 0.0  ;;  %v7563_v45 = vpack.c.bf16 %v2744_v28, %v2744_v28 }
 0x2ce   : > { %v2729_v33 = vpack.c.bf16 %v2721_v31, %v2721_v31  ;;  %v11499_v55 = vunpack.c.l.b16 %v7563_v45 }
 0x2cf   : > { %v2676_v24 = vpop.f32.mrf.mxu2 }
 0x2d0   : > { %v2737_v26 = vunpack.c.l.bf16 %v2729_v33  ;;  %v2833_v41 = vunpack.c.l.b16 %v2729_v33  ;;  %v2677_v30 = vadd.f32 %v2676_v24, %v2648_v23  ;;  %v10611_v33 = vld [vmem:[%s10701_s15 + $0x20] sm:$0xff] }
 0x2d1   : > { %v2707_v43 = vpop.f32.mrf.mxu3  ;;  %v2654_v32 = vpop.f32.mrf.mxu1 }
 0x2d2   : > { %v2745_v48 = vadd.f32 %v10608_v47, %v2737_v26  ;;  %v2840_v50 = vpack.c.b16 %v2833_v41, %v2832_v40  ;;  %v2706_v52 = vadd.f32 %v2705_v17, %v2677_v30  ;;  %v2655_v19 = vadd.f32 %v11492_v13, %v2654_v32 }
 0x2d4   : > { %v7564_v53 = vpack.c.bf16 %v2745_v48, %v2745_v48  ;;  %v2722_v46 = vmax.f32 %v2706_v52, 0.0  ;;  %3203 = vmatmul.bf16.vlgmr.msra.gmra.mxu3 %v2840_v50  ;;  %v10612_v50 = vld [vmem:[%s10701_s15 + $0x28] sm:$0xff] }
 0x2d6   : > { %v11502_v54 = vunpack.c.l.b16 %v7564_v53  ;;  %v2730_v58 = vpack.c.bf16 %v2722_v46, %v2722_v46 }
 0x2d7   : > { %v2678_v59 = vpop.f32.mrf.mxu2 }
 0x2d8   : > { %v7611_v60 = vpack.c.b16 %v11502_v54, %v11499_v55  ;;  %v2679_v61 = vadd.f32 %v2678_v59, %v2650_v57  ;;  %v2738_v63 = vunpack.c.l.bf16 %v2730_v58  ;;  %v2834_v15 = vunpack.c.l.b16 %v2730_v58  ;;  %v10511_v55 = vld [vmem:[%s12989_s1 + $0x6f0] sm:$0xff] }
 0x2d9   : > { %v2710_v35 = vpop.f32.mrf.mxu3  ;;  %v2657_v22 = vpop.f32.mrf.mxu1  ;;  %v10519_v54 = vld [vmem:[%s12989_s1 + $0x730] sm:$0xff] }
 0x2da   : > { %v2708_v0 = vadd.f32 %v2707_v43, %v2679_v61  ;;  %v2746_v6 = vadd.f32 %v10609_v5, %v2738_v63  ;;  %v2658_v7 = vadd.f32 %v11492_v13, %v2657_v22  ;;  %v10339_v22 = vld [vmem:[%s12989_s1 + $0x370] sm:$0xff] }
 0x2dc   : > { %v2723_v2 = vmax.f32 %v2708_v0, 0.0  ;;  %v7565_v16 = vpack.c.bf16 %v2746_v6, %v2746_v6 }
 0x2de   : > { %v2731_v3 = vpack.c.bf16 %v2723_v2, %v2723_v2  ;;  %v11510_v49 = vunpack.c.l.b16 %v7565_v16 }
 0x2df   : > { %v2681_v51 = vpop.f32.mrf.mxu2 }
 0x2e0   : > { %v2739_v4 = vunpack.c.l.bf16 %v2731_v3  ;;  %v2682_v27 = vadd.f32 %v2681_v51, %v2653_v36  ;;  %v2835_v8 = vunpack.c.l.b16 %v2731_v3  ;;  %v10613_v51 = vld [vmem:[%s10701_s15 + $0x30] sm:$0xff] }
 0x2e1   : > { %v2712_v18 = vpop.f32.mrf.mxu3  ;;  %v2659_v46 = vpop.f32.mrf.mxu1 }
 0x2e2   : > { %v2711_v10 = vadd.f32 %v2710_v35, %v2682_v27  ;;  %v2841_v11 = vpack.c.b16 %v2835_v8, %v2834_v15  ;;  %v2747_v14 = vadd.f32 %v10610_v20, %v2739_v4  ;;  %v2660_v58 = vadd.f32 %v11492_v13, %v2659_v46 }
 0x2e4   : > { %v2724_v62 = vmax.f32 %v2711_v10, 0.0  ;;  %3208 = vmatmul.bf16.gmra.mxu3 %v2841_v11  ;;  %v7566_v39 = vpack.c.bf16 %v2747_v14, %v2747_v14  ;;  %v10614_v10 = vld [vmem:[%s10701_s15 + $0x38] sm:$0xff] }
 0x2e6   : > { %v2732_v42 = vpack.c.bf16 %v2724_v62, %v2724_v62  ;;  %v11512_v12 = vunpack.c.l.b16 %v7566_v39 }
 0x2e7   : > { %v2683_v17 = vpop.f32.mrf.mxu2 }
 0x2e8   : > { %v2684_v21 = vadd.f32 %v2683_v17, %v2655_v19  ;;  %v7612_v34 = vpack.c.b16 %v11512_v12, %v11510_v49  ;;  %v2740_v29 = vunpack.c.l.bf16 %v2732_v42  ;;  %v2836_v41 = vunpack.c.l.b16 %v2732_v42  ;;  %v10332_v19 = vld [vmem:[%s12989_s1 + $0x338] sm:$0xff]  ;;  %v10347_v17 = vld [vmem:[%s12989_s1 + $0x3b0] sm:$0xff]  ;;  %v10518_v49 = vld [vmem:[%s12989_s1 + $0x728] sm:$0xff] }
 0x2e9   : > { %v2715_v40 = vpop.f32.mrf.mxu3  ;;  %v10340_v42 = vld [vmem:[%s12989_s1 + $0x378] sm:$0xff]  ;;  %3741 = vmatpush.bf16.msra.mxu0 %v10332_v19  ;;  %v10525_v12 = vld [vmem:[%s12989_s1 + $0x760] sm:$0xff] }
 0x2ea   : > { %v2713_v31 = vadd.f32 %v2712_v18, %v2684_v21  ;;  %v2748_v24 = vadd.f32 %v10611_v33, %v2740_v29  ;;  %v10348_v18 = vld [vmem:[%s12989_s1 + $0x3b8] sm:$0xff]  ;;  %v10331_v21 = vld [vmem:[%s12989_s1 + $0x330] sm:$0xff]  ;;  %3770 = vmatpush.bf16.msra.mxu1 %v10340_v42  ;;  %v10346_v29 = vld [vmem:[%s12989_s1 + $0x3a8] sm:$0xff]  ;;  %v3117_v33 = vpop.f32.mrf.mxu0 }
 0x2eb   : > { %3799 = vmatpush.bf16.msra.mxu2 %v10348_v18 }
 0x2ec   : > { %v2725_v23 = vmax.f32 %v2713_v31, 0.0  ;;  %v7567_v53 = vpack.c.bf16 %v2748_v24, %v2748_v24  ;;  %v10330_v31 = vld [vmem:[%s12989_s1 + $0x328] sm:$0xff]  ;;  %v3146_v24 = vpop.f32.mrf.mxu1 }
 0x2ed   : > { %3742 = vmatpush.bf16.msra.mxu0 %v10331_v21 }
 0x2ee   : > { %v2733_v28 = vpack.c.bf16 %v2725_v23, %v2725_v23  ;;  %v11520_v61 = vunpack.c.l.b16 %v7567_v53  ;;  %3771 = vmatpush.bf16.msra.mxu1 %v10339_v22  ;;  %v10338_v23 = vld [vmem:[%s12989_s1 + $0x368] sm:$0xff]  ;;  %v11591_v53 = vld [vmem:[%s12992_s4] ss:$0 sm:$0xff] }
 0x2ef   : > { %v2686_v26 = vpop.f32.mrf.mxu2  ;;  %3800 = vmatpush.bf16.msra.mxu2 %v10347_v17 }
 0x2f0   : > { %v2741_v30 = vunpack.c.l.bf16 %v2733_v28  ;;  %v2687_v43 = vadd.f32 %v2686_v26, %v2658_v7  ;;  %v2837_v45 = vunpack.c.l.b16 %v2733_v28  ;;  %v10345_v7 = vld [vmem:[%s12989_s1 + $0x3a0] sm:$0xff]  ;;  %v10344_v26 = vld [vmem:[%s12989_s1 + $0x398] sm:$0xff] }
 0x2f1   : > { %v2717_v36 = vpop.f32.mrf.mxu3  ;;  %3743 = vmatpush.bf16.msra.mxu0 %v10330_v31  ;;  %v10329_v28 = vld [vmem:[%s12989_s1 + $0x320] sm:$0xff] }
 0x2f2   : > { %v2716_v47 = vadd.f32 %v2715_v40, %v2687_v43  ;;  %v2842_v48 = vpack.c.b16 %v2837_v45, %v2836_v41  ;;  %v2749_v52 = vadd.f32 %v10612_v50, %v2741_v30  ;;  %3772 = vmatpush.bf16.msra.mxu1 %v10338_v23  ;;  %v10337_v40 = vld [vmem:[%s12989_s1 + $0x360] sm:$0xff]  ;;  %v10328_v41 = vld [vmem:[%s12989_s1 + $0x318] sm:$0xff]  ;;  %v3119_v43 = vpop.f32.mrf.mxu0  ;;  %v10327_v45 = vld [vmem:[%s12989_s1 + $0x310] sm:$0xff] }
 0x2f3   : > { %3801 = vmatpush.bf16.msra.mxu2 %v10346_v29  ;;  %v10343_v50 = vld [vmem:[%s12989_s1 + $0x390] sm:$0xff] }
 0x2f4   : > { %v2726_v56 = vmax.f32 %v2716_v47, 0.0  ;;  %3213 = vmatmul.bf16.gmra.mxu3 %v2842_v48  ;;  %v7568_v57 = vpack.c.bf16 %v2749_v52, %v2749_v52  ;;  %v3148_v47 = vpop.f32.mrf.mxu1  ;;  %v10336_v48 = vld [vmem:[%s12989_s1 + $0x358] sm:$0xff]  ;;  %v10326_v52 = vld [vmem:[%s12989_s1 + $0x308] sm:$0xff] }
 0x2f5   : > { %3744 = vmatpush.bf16.msra.mxu0 %v10329_v28 }
 0x2f6   : > { %v2734_v59 = vpack.c.bf16 %v2726_v56, %v2726_v56  ;;  %v11522_v63 = vunpack.c.l.b16 %v7568_v57  ;;  %3773 = vmatpush.bf16.msra.mxu1 %v10337_v40  ;;  %v10325_v57 = vld [vmem:[%s12989_s1 + $0x300] sm:$0xff] }
 0x2f7   : > { %v2688_v0 = vpop.f32.mrf.mxu2  ;;  %3802 = vmatpush.bf16.msra.mxu2 %v10345_v7 }
 0x2f8   : > { %v2689_v35 = vadd.f32 %v2688_v0, %v2660_v58  ;;  %v2742_v3 = vunpack.c.l.bf16 %v2734_v59  ;;  %v2838_v4 = vunpack.c.l.b16 %v2734_v59  ;;  %v3118_v58 = vadd.f32 %v11591_v53, %v3117_v33  ;;  %v10335_v59 = vld [vmem:[%s12989_s1 + $0x350] sm:$0xff]  ;;  %v10342_v0 = vld [vmem:[%s12989_s1 + $0x388] sm:$0xff] }
 0x2f9   : > { %3745 = vmatpush.bf16.msra.mxu0 %v10328_v41 }
 0x2fa   : > { %v2718_v5 = vadd.f32 %v2717_v36, %v2689_v35  ;;  %v2750_v15 = vadd.f32 %v10613_v51, %v2742_v3  ;;  %3774 = vmatpush.bf16.msra.mxu1 %v10336_v48  ;;  %v3122_v56 = vpop.f32.mrf.mxu0  ;;  %v3147_v35 = vadd.f32 %v3146_v24, %v3118_v58 }
 0x2fb   : > { %3803 = vmatpush.bf16.msra.mxu2 %v10344_v26  ;;  %v3123_v22 = vadd.f32 %v11591_v53, %v3122_v56 }
 0x2fc   : > { %v2727_v6 = vmax.f32 %v2718_v5, 0.0  ;;  %v7569_v20 = vpack.c.bf16 %v2750_v15, %v2750_v15  ;;  %v3151_v36 = vpop.f32.mrf.mxu1  ;;  %v10334_v15 = vld [vmem:[%s12989_s1 + $0x348] sm:$0xff] }
 0x2fd   : > { %3746 = vmatpush.bf16.msra.mxu0 %v10327_v45  ;;  %v3152_v28 = vadd.f32 %v3151_v36, %v3123_v22 }
 0x2fe   : > { %v2735_v32 = vpack.c.bf16 %v2727_v6, %v2727_v6  ;;  %v11528_v16 = vunpack.c.l.b16 %v7569_v20  ;;  %3775 = vmatpush.bf16.msra.mxu1 %v10335_v59 }
 0x2ff   : > { %v3175_v30 = vpop.f32.mrf.mxu2  ;;  %3804 = vmatpush.bf16.msra.mxu2 %v10343_v50  ;;  %v3315_v50 = vld [vmem:[#allocation2 + $0x8] sm:$0x1] }
 0x300   : > { %v2743_v13 = vunpack.c.l.bf16 %v2735_v32  ;;  %v2839_v27 = vunpack.c.l.b16 %v2735_v32  ;;  %v3176_v3 = vadd.f32 %v3175_v30, %v3147_v35 }
 0x301   : > { %3747 = vmatpush.bf16.msra.mxu0 %v10326_v52 }
 0x302   : > { %v2843_v8 = vpack.c.b16 %v2839_v27, %v2838_v4  ;;  %v2751_v11 = vadd.f32 %v10614_v10, %v2743_v13  ;;  %v3124_v51 = vpop.f32.mrf.mxu0  ;;  %v10341_v4 = vld [vmem:[%s12989_s1 + $0x380] sm:$0xff]  ;;  %v3120_v13 = vadd.f32 %v11591_v53, %v3119_v43  ;;  %3776 = vmatpush.bf16.msra.mxu1 %v10334_v15 }
 0x303   : > { %3805 = vmatpush.bf16.msra.mxu2 %v10342_v0 }
 0x304   : > { %3218 = vmatmul.bf16.gmra.mxu3 %v2843_v8  ;;  %v7570_v14 = vpack.c.bf16 %v2751_v11, %v2751_v11  ;;  %v3149_v8 = vadd.f32 %v3148_v47, %v3120_v13  ;;  %v10333_v11 = vld [vmem:[%s12989_s1 + $0x340] sm:$0xff]  ;;  %v3153_v20 = vpop.f32.mrf.mxu1 }
 0x305   : > { %3748 = vmatpush.bf16.msra.mxu0 %v10325_v57 }
 0x306   : > { %v11530_v62 = vunpack.c.l.b16 %v7570_v14  ;;  %3777 = vmatpush.bf16.msra.mxu1 %v10333_v11 }
 0x307   : > { %v3177_v46 = vpop.f32.mrf.mxu2  ;;  %3806 = vmatpush.bf16.msra.mxu2 %v10341_v4 }
 0x308   : > { %v3178_v14 = vadd.f32 %v3177_v46, %v3149_v8 }
 0x30a   : > { %v3127_v7 = vpop.f32.mrf.mxu0 }
 0x30b   : > { %v3128_v8 = vadd.f32 %v11591_v53, %v3127_v7 }
 0x30c   : > { %v3156_v30 = vpop.f32.mrf.mxu1 }
 0x30f   : > { %v3180_v6 = vpop.f32.mrf.mxu2 }
 0x310   : > { %v3181_v24 = vadd.f32 %v3180_v6, %v3152_v28 }
 0x317   : > { %v3182_v29 = vpop.f32.mrf.mxu2 }
 0x31f   : > { %v3185_v35 = vpop.f32.mrf.mxu2 }
 0x357   : > { %v3204_v5 = vpop.f32.mrf.mxu3 }
 0x358   : > { %v11603_v32 = vadd.f32 %v3204_v5, %v3176_v3  ;;  %v3129_v3 = vpop.f32.mrf.mxu0 }
 0x35a   : > { %v3224_v27 = vpack.c.bf16 %v11603_v32, %v11603_v32 }
 0x35c   : > { %v3233_v10 = vshrl.u32 %v3224_v27, 16  ;;  %v3236_v19 = vshll.u32 %v3224_v27, 16 }
 0x35e   : > { %v3235_v18 = vrot.slane %v3233_v10, 7 }
 0x35f   : > { %v3206_v42 = vpop.f32.mrf.mxu3 }
 0x360   : > { %v3238_v17 = vor.u32 %v3236_v19, %v3235_v18  ;;  %v11617_v21 = vadd.f32 %v3206_v42, %v3178_v14  ;;  %v3239_v43 = vrot.slane %v3235_v18, 4  ;;  %v3318_v14 = vld [vmem:[#allocation2 + $0xc] sm:$0xf]  ;;  %v3157_v18 = vadd.f32 %v3156_v30, %v3128_v8  ;;  %v3158_v19 = vpop.f32.mrf.mxu1 }
 0x362   : > { %v3312_v31 = vsel %vm10759_vm8, %v3238_v17, %v11326_v25  ;;  %v3225_v23 = vpack.c.bf16 %v11617_v21, %v11617_v21  ;;  %v3125_v25 = vadd.f32 %v11591_v53, %v3124_v51 }
 0x363   : > { %3313 = vst [vmem:[#allocation2] sm:$0xf] %v3312_v31 }
 0x364   : > { %v3241_v33 = vshrl.u32 %v3225_v23, 16  ;;  %v3244_v26 = vshll.u32 %v3225_v23, 16  ;;  %v3154_v0 = vadd.f32 %v3153_v20, %v3125_v25 }
 0x366   : > { %v3243_v40 = vrot.slane %v3241_v33, 7  ;;  %v3183_v5 = vadd.f32 %v3182_v29, %v3154_v0  ;;  %v3130_v33 = vadd.f32 %v11591_v53, %v3129_v3 }
 0x367   : > { %v3209_v41 = vpop.f32.mrf.mxu3 }
 0x368   : > { %v3246_v45 = vor.u32 %v3244_v26, %v3243_v40  ;;  %v3248_v47 = vrot.slane %v3243_v40, 4  ;;  %v11625_v48 = vadd.f32 %v3209_v41, %v3181_v24  ;;  %v3186_v24 = vadd.f32 %v3185_v35, %v3157_v18 }
 0x36a   : > { %v3247_v52 = vsel %vm10750_vm7, %v3239_v43, %v3246_v45  ;;  %v3316_v46 = vsel %vm10708_vm3, %v3248_v47, %v3315_v50  ;;  %v3226_v56 = vpack.c.bf16 %v11625_v48, %v11625_v48  ;;  %v11634_v57 = vld [vmem:[#allocation2] sm:$0xf]  ;;  %v3187_v47 = vpop.f32.mrf.mxu2 }
 0x36b   : > { %3314 = vst [vmem:[#allocation2 + $0x4] sm:$0xf] %v3247_v52  ;;  %v3352_v58 = vshrl.u32 %v11634_v57, 16  ;;  %v3355_v59 = vshll.u32 %v11634_v57, 16  ;;  %v3447_v4 = vld [vmem:[#allocation2] sm:$0xe] }
 0x36c   : > { %3317 = vst [vmem:[#allocation2 + $0x8] sm:$0x1] %v3316_v46  ;;  %v3250_v36 = vshrl.u32 %v3226_v56, 16  ;;  %v3253_v51 = vshll.u32 %v3226_v56, 16  ;;  %v8892_v29 = vrot.slane %v3447_v4, 9  ;;  %v3132_v56 = vpop.f32.mrf.mxu0  ;;  %v3159_v4 = vadd.f32 %v3158_v19, %v3130_v33 }
 0x36d   : > { %v3354_v13 = vrot.slane %v3352_v58, 4  ;;  %v3357_v27 = vrot.slane %v3355_v59, 5 }
 0x36e   : > { %v3252_v6 = vrot.slane %v3250_v36, 7 }
 0x36f   : > { %v3211_v15 = vpop.f32.mrf.mxu3  ;;  %v3358_v28 = vor.u32 %v3357_v27, %v3354_v13  ;;  %v3322_v13 = vld [vmem:[#allocation2 + $0x14] sm:$0x1] }
 0x370   : > { %v3255_v10 = vor.u32 %v3253_v51, %v3252_v6  ;;  %v11639_v11 = vadd.f32 %v3211_v15, %v3183_v5  ;;  %v3256_v50 = vrot.slane %v3252_v6, 4 }
 0x371   : > { %v3359_v35 = vrot.slane %v3358_v28, 4 }
 0x372   : > { %v3319_v20 = vsel %vm10759_vm8, %v3255_v10, %v3318_v14  ;;  %v3227_v42 = vpack.c.bf16 %v11639_v11, %v11639_v11  ;;  %v10321_v17 = vld [vmem:[#allocation2] sm:$0xff] }
 0x373   : > { %v3340_v22 = vld [vmem:[#allocation2 + $0x4] sm:$0xf]  ;;  %3320 = vst [vmem:[#allocation2 + $0xc] sm:$0xf] %v3319_v20  ;;  %v3347_v31 = vld [vmem:[#allocation2 + $0x8] sm:$0x1]  ;;  %3749 = vmatmul.bf16.vlgmr.msra.gmra.mxu0 %v10321_v17 }
 0x374   : > { %v3465_v23 = vrot.slane %v3340_v22, 5  ;;  %v3361_v7 = vshll.u32 %v3340_v22, 16  ;;  %v3258_v40 = vshrl.u32 %v3227_v42, 16  ;;  %v3365_v26 = vshrl.u32 %v3340_v22, 16 }
 0x375   : > { %v3468_v43 = vrot.slane %v3347_v31, 5  ;;  %v3261_v52 = vshll.u32 %v3227_v42, 16  ;;  %v3371_v36 = vshll.u32 %v3347_v31, 16 }
 0x376   : > { %v3466_v41 = vsel %vm10811_vm13, %v8892_v29, %v3465_v23  ;;  %v3467_v30 = vrot.slane %v3465_v23, 4  ;;  %v3363_v45 = vrot.slane %v3361_v7, 5  ;;  %v3260_v25 = vrot.slane %v3258_v40, 7  ;;  %v3161_v29 = vpop.f32.mrf.mxu1 }
 0x377   : > { %v3367_v46 = vrot.slane %v3365_v26, 4  ;;  %v3214_v58 = vpop.f32.mrf.mxu3  ;;  %v3527_v0 = vunpack.c.l.b16 %v3466_v41  ;;  %v3373_v17 = vrot.slane %v3371_v36, 5  ;;  %v3188_v23 = vadd.f32 %v3187_v47, %v3159_v4  ;;  %v3325_v47 = vld [vmem:[#allocation2 + $0x18] sm:$0xf] }
 0x378   : > { %v3469_v59 = vsel %vm10811_vm13, %v3467_v30, %v3468_v43  ;;  %v3263_v3 = vor.u32 %v3261_v52, %v3260_v25  ;;  %v3265_v5 = vrot.slane %v3260_v25, 4  ;;  %v11650_v51 = vadd.f32 %v3214_v58, %v3186_v24  ;;  %v3134_v58 = vpop.f32.mrf.mxu0 }
 0x379   : > { %v3528_v15 = vunpack.c.l.b16 %v3469_v59  ;;  %v3364_v6 = vsel %vm10830_vm14, %v3359_v35, %v3363_v45  ;;  %v3368_v27 = vor.u32 %v3367_v46, %v3363_v45  ;;  %v3133_v45 = vadd.f32 %v11591_v53, %v3132_v56 }
 0x37a   : > { %v3264_v8 = vsel %vm10750_vm7, %v3256_v50, %v3263_v3  ;;  %v3323_v10 = vsel %vm10708_vm3, %v3265_v5, %v3322_v13  ;;  %v3228_v14 = vpack.c.bf16 %v11650_v51, %v11650_v51  ;;  %v3341_v20 = vld [vmem:[#allocation2 + $0xc] sm:$0xf]  ;;  %v3511_v24 = vunpack.c.l.b16 %v3364_v6  ;;  %v3190_v50 = vpop.f32.mrf.mxu2 }
 0x37b   : > { %v3535_v18 = vpack.c.b16 %v3528_v15, %v3527_v0  ;;  %3321 = vst [vmem:[#allocation2 + $0x10] sm:$0xf] %v3264_v8  ;;  %v3369_v42 = vrot.slane %v3368_v27, 4  ;;  %v3376_v19 = vshrl.u32 %v3341_v20, 16  ;;  %v3379_v22 = vshll.u32 %v3341_v20, 16 }
 0x37c   : > { %3324 = vst [vmem:[#allocation2 + $0x14] sm:$0x1] %v3323_v10  ;;  %v3267_v31 = vshrl.u32 %v3228_v14, 16  ;;  %v3270_v33 = vshll.u32 %v3228_v14, 16  ;;  %v3448_v41 = vld [vmem:[#allocation2 + $0xc] sm:$0xe]  ;;  %v3162_v59 = vadd.f32 %v3161_v29, %v3133_v45  ;;  %v3135_v6 = vadd.f32 %v11591_v53, %v3134_v58 }
 0x37d   : > { %3807 = vmatmul.bf16.vlgmr.msra.gmra.mxu2 %v3535_v18  ;;  %v3374_v28 = vsel %vm10830_vm14, %v3369_v42, %v3373_v17  ;;  %v3378_v30 = vrot.slane %v3376_v19, 4  ;;  %v3381_v43 = vrot.slane %v3379_v22, 5  ;;  %v8893_v5 = vrot.slane %v3448_v41, 9  ;;  %v3329_v45 = vld [vmem:[#allocation2 + $0x20] sm:$0x1] }
 0x37e   : > { %v3269_v7 = vrot.slane %v3267_v31, 7  ;;  %v3512_v40 = vunpack.c.l.b16 %v3374_v28  ;;  %v3191_v27 = vadd.f32 %v3190_v50, %v3162_v59  ;;  %v3163_v17 = vpop.f32.mrf.mxu1 }
 0x37f   : > { %v3216_v26 = vpop.f32.mrf.mxu3  ;;  %v3382_v4 = vor.u32 %v3381_v43, %v3378_v30  ;;  %v3164_v43 = vadd.f32 %v3163_v17, %v3135_v6 }
 0x380   : > { %v3272_v25 = vor.u32 %v3270_v33, %v3269_v7  ;;  %v11663_v52 = vadd.f32 %v3216_v26, %v3188_v23  ;;  %v3519_v46 = vpack.c.b16 %v3512_v40, %v3511_v24  ;;  %v3273_v19 = vrot.slane %v3269_v7, 4 }
 0x381   : > { %v3383_v33 = vrot.slane %v3382_v4, 4 }
 0x382   : > { %v3326_v0 = vsel %vm10759_vm8, %v3272_v25, %v3325_v47  ;;  %v3229_v35 = vpack.c.bf16 %v11663_v52, %v11663_v52  ;;  %3778 = vmatmul.bf16.vlgmr.msra.gmra.mxu1 %v3519_v46  ;;  %v10322_v36 = vld [vmem:[#allocation2 + $0xc] sm:$0xff]  ;;  %v3192_v25 = vpop.f32.mrf.mxu2 }
 0x383   : > { %v3342_v3 = vld [vmem:[#allocation2 + $0x10] sm:$0xf]  ;;  %3327 = vst [vmem:[#allocation2 + $0x18] sm:$0xf] %v3326_v0  ;;  %v3348_v56 = vld [vmem:[#allocation2 + $0x14] sm:$0x1]  ;;  %3754 = vmatmul.bf16.gmra.mxu0 %v10322_v36 }
 0x384   : > { %v3472_v15 = vrot.slane %v3342_v3, 5  ;;  %v3385_v13 = vshll.u32 %v3342_v3, 16  ;;  %v3275_v8 = vshrl.u32 %v3229_v35, 16  ;;  %v3389_v10 = vshrl.u32 %v3342_v3, 16 }
 0x385   : > { %v3475_v20 = vrot.slane %v3348_v56, 5  ;;  %v3278_v29 = vshll.u32 %v3229_v35, 16  ;;  %v3395_v24 = vshll.u32 %v3348_v56, 16 }
 0x386   : > { %v3473_v14 = vsel %vm10811_vm13, %v8893_v5, %v3472_v15  ;;  %v3474_v18 = vrot.slane %v3472_v15, 4  ;;  %v3387_v42 = vrot.slane %v3385_v13, 5  ;;  %v3277_v22 = vrot.slane %v3275_v8, 7 }
 0x387   : > { %v3391_v31 = vrot.slane %v3389_v10, 4  ;;  %v3219_v23 = vpop.f32.mrf.mxu3  ;;  %v3529_v53 = vunpack.c.l.b16 %v3473_v14  ;;  %v3397_v36 = vrot.slane %v3395_v24, 5  ;;  %v3193_v15 = vadd.f32 %v3192_v25, %v3164_v43  ;;  %v10368_v25 = vld [vmem:[%s12989_s1 + $0x438] sm:$0xff] }
 0x388   : > { %v3476_v28 = vsel %vm10811_vm13, %v3474_v18, %v3475_v20  ;;  %v3280_v40 = vor.u32 %v3278_v29, %v3277_v22  ;;  %v3282_v26 = vrot.slane %v3277_v22, 4  ;;  %v11674_v41 = vadd.f32 %v3219_v23, %v3191_v27  ;;  %v3332_v22 = vld [vmem:[#allocation2 + $0x24] sm:$0xf]  ;;  %4382 = vmatpush.bf16.msrb.mxu0 %v10368_v25 }
 0x389   : > { %v3530_v30 = vunpack.c.l.b16 %v3476_v28  ;;  %v3388_v7 = vsel %vm10830_vm14, %v3383_v33, %v3387_v42  ;;  %v3392_v50 = vor.u32 %v3391_v31, %v3387_v42  ;;  %v10360_v33 = vld [vmem:[%s12989_s1 + $0x3f8] sm:$0xff] }
 0x38a   : > { %v3281_v46 = vsel %vm10750_vm7, %v3273_v19, %v3280_v40  ;;  %v3330_v58 = vsel %vm10708_vm3, %v3282_v26, %v3329_v45  ;;  %v3230_v47 = vpack.c.bf16 %v11674_v41, %v11674_v41  ;;  %v3343_v0 = vld [vmem:[#allocation2 + $0x18] sm:$0xf]  ;;  %v3513_v27 = vunpack.c.l.b16 %v3388_v7  ;;  %4353 = vmatpush.bf16.msrb.mxu3 %v10360_v33 }
 0x38b   : > { %v3536_v59 = vpack.c.b16 %v3530_v30, %v3529_v53  ;;  %3328 = vst [vmem:[#allocation2 + $0x1c] sm:$0xf] %v3281_v46  ;;  %v3393_v35 = vrot.slane %v3392_v50, 4  ;;  %v3400_v3 = vshrl.u32 %v3343_v0, 16  ;;  %v3403_v5 = vshll.u32 %v3343_v0, 16  ;;  %v10359_v50 = vld [vmem:[%s12989_s1 + $0x3f0] sm:$0xff] }
 0x38c   : > { %3331 = vst [vmem:[#allocation2 + $0x20] sm:$0x1] %v3330_v58  ;;  %v3284_v56 = vshrl.u32 %v3230_v47, 16  ;;  %v3287_v6 = vshll.u32 %v3230_v47, 16  ;;  %v3449_v14 = vld [vmem:[#allocation2 + $0x18] sm:$0xe] }
 0x38d   : > { %3812 = vmatmul.bf16.gmra.mxu2 %v3536_v59  ;;  %v3398_v4 = vsel %vm10830_vm14, %v3393_v35, %v3397_v36  ;;  %v3402_v18 = vrot.slane %v3400_v3, 4  ;;  %v3405_v20 = vrot.slane %v3403_v5, 5  ;;  %v8894_v53 = vrot.slane %v3449_v14, 9  ;;  %v10376_v0 = vld [vmem:[%s12989_s1 + $0x478] sm:$0xff]  ;;  %v3336_v14 = vld [vmem:[#allocation2 + $0x2c] sm:$0x1] }
 0x38e   : > { %v3286_v13 = vrot.slane %v3284_v56, 7  ;;  %v3514_v8 = vunpack.c.l.b16 %v3398_v4  ;;  %4411 = vmatpush.bf16.msrb.mxu1 %v10376_v0  ;;  %4354 = vmatpush.bf16.msrb.mxu3 %v10359_v50 }
 0x38f   : > { %v3221_v10 = vpop.f32.mrf.mxu3  ;;  %v3406_v26 = vor.u32 %v3405_v20, %v3402_v18 }
 0x390   : > { %v3289_v42 = vor.u32 %v3287_v6, %v3286_v13  ;;  %v11686_v17 = vadd.f32 %v3221_v10, %v3193_v15  ;;  %v3520_v19 = vpack.c.b16 %v3514_v8, %v3513_v27  ;;  %v3290_v5 = vrot.slane %v3286_v13, 4 }
 0x391   : > { %v3407_v4 = vrot.slane %v3406_v26, 4 }
 0x392   : > { %v3333_v29 = vsel %vm10759_vm8, %v3289_v42, %v3332_v22  ;;  %v3231_v31 = vpack.c.bf16 %v11686_v17, %v11686_v17  ;;  %3783 = vmatmul.bf16.gmra.mxu1 %v3520_v19  ;;  %v10323_v23 = vld [vmem:[#allocation2 + $0x18] sm:$0xff] }
 0x393   : > { %v3344_v28 = vld [vmem:[#allocation2 + $0x1c] sm:$0xf]  ;;  %3334 = vst [vmem:[#allocation2 + $0x24] sm:$0xf] %v3333_v29  ;;  %v3349_v24 = vld [vmem:[#allocation2 + $0x20] sm:$0x1]  ;;  %3759 = vmatmul.bf16.gmra.mxu0 %v10323_v23 }
 0x394   : > { %v3479_v40 = vrot.slane %v3344_v28, 5  ;;  %v3409_v30 = vshll.u32 %v3344_v28, 16  ;;  %v3292_v43 = vshrl.u32 %v3231_v31, 16  ;;  %v3482_v45 = vrot.slane %v3349_v24, 5 }
 0x395   : > { %v3413_v7 = vshrl.u32 %v3344_v28, 16  ;;  %v3419_v59 = vshll.u32 %v3349_v24, 16  ;;  %v3295_v36 = vshll.u32 %v3231_v31, 16 }
 0x396   : > { %v3480_v46 = vsel %vm10811_vm13, %v8894_v53, %v3479_v40  ;;  %v3481_v58 = vrot.slane %v3479_v40, 4  ;;  %v3411_v47 = vrot.slane %v3409_v30, 5  ;;  %v3294_v35 = vrot.slane %v3292_v43, 7 }
 0x397   : > { %v3415_v3 = vrot.slane %v3413_v7, 4  ;;  %v3531_v15 = vunpack.c.l.b16 %v3480_v46  ;;  %v3421_v20 = vrot.slane %v3419_v59, 5 }
 0x398   : > { %v3483_v56 = vsel %vm10811_vm13, %v3481_v58, %v3482_v45  ;;  %v3297_v6 = vor.u32 %v3295_v36, %v3294_v35  ;;  %v3299_v27 = vrot.slane %v3294_v35, 4  ;;  %v3412_v18 = vsel %vm10830_vm14, %v3407_v4, %v3411_v47 }
 0x399   : > { %v3532_v8 = vunpack.c.l.b16 %v3483_v56  ;;  %v3416_v10 = vor.u32 %v3415_v3, %v3411_v47  ;;  %v3515_v53 = vunpack.c.l.b16 %v3412_v18 }
 0x39a   : > { %v3298_v42 = vsel %vm10750_vm7, %v3290_v5, %v3297_v6  ;;  %v3337_v13 = vsel %vm10708_vm3, %v3299_v27, %v3336_v14  ;;  %v3345_v29 = vld [vmem:[#allocation2 + $0x24] sm:$0xf] }
 0x39b   : > { %v3537_v19 = vpack.c.b16 %v3532_v8, %v3531_v15  ;;  %v3417_v22 = vrot.slane %v3416_v10, 4  ;;  %3335 = vst [vmem:[#allocation2 + $0x28] sm:$0xf] %v3298_v42  ;;  %v3424_v31 = vshrl.u32 %v3345_v29, 16  ;;  %v3427_v23 = vshll.u32 %v3345_v29, 16  ;;  %v10367_v29 = vld [vmem:[%s12989_s1 + $0x430] sm:$0xff] }
 0x39c   : > { %3338 = vst [vmem:[#allocation2 + $0x2c] sm:$0x1] %v3337_v13  ;;  %v3450_v40 = vld [vmem:[#allocation2 + $0x24] sm:$0xe]  ;;  %4383 = vmatpush.bf16.msrb.mxu0 %v10367_v29 }
 0x39d   : > { %3817 = vmatmul.bf16.gmra.mxu2 %v3537_v19  ;;  %v3422_v28 = vsel %vm10830_vm14, %v3417_v22, %v3421_v20  ;;  %v3426_v26 = vrot.slane %v3424_v31, 4  ;;  %v3429_v30 = vrot.slane %v3427_v23, 5  ;;  %v8895_v7 = vrot.slane %v3450_v40, 9  ;;  %v10358_v22 = vld [vmem:[%s12989_s1 + $0x3e8] sm:$0xff]  ;;  %v10375_v31 = vld [vmem:[%s12989_s1 + $0x470] sm:$0xff]  ;;  %v10357_v23 = vld [vmem:[%s12989_s1 + $0x3e0] sm:$0xff] }
 0x39e   : > { %v3516_v33 = vunpack.c.l.b16 %v3422_v28  ;;  %4355 = vmatpush.bf16.msrb.mxu3 %v10358_v22  ;;  %4412 = vmatpush.bf16.msrb.mxu1 %v10375_v31  ;;  %v10366_v28 = vld [vmem:[%s12989_s1 + $0x428] sm:$0xff]  ;;  %v10373_v40 = vld [vmem:[%s12989_s1 + $0x460] sm:$0xff] }
 0x39f   : > { %v3430_v46 = vor.u32 %v3429_v30, %v3426_v26  ;;  %v10355_v30 = vld [vmem:[%s12989_s1 + $0x3d0] sm:$0xff] }
 0x3a0   : > { %v3521_v24 = vpack.c.b16 %v3516_v33, %v3515_v53  ;;  %v10374_v53 = vld [vmem:[%s12989_s1 + $0x468] sm:$0xff]  ;;  %4384 = vmatpush.bf16.msrb.mxu0 %v10366_v28  ;;  %v10356_v33 = vld [vmem:[%s12989_s1 + $0x3d8] sm:$0xff] }
 0x3a1   : > { %v3431_v15 = vrot.slane %v3430_v46, 4  ;;  %v10371_v46 = vld [vmem:[%s12989_s1 + $0x450] sm:$0xff] }
 0x3a2   : > { %3788 = vmatmul.bf16.gmra.mxu1 %v3521_v24  ;;  %v10324_v43 = vld [vmem:[#allocation2 + $0x24] sm:$0xff]  ;;  %4356 = vmatpush.bf16.msrb.mxu3 %v10357_v23 }
 0x3a3   : > { %v3346_v45 = vld [vmem:[#allocation2 + $0x28] sm:$0xf]  ;;  %v3350_v50 = vld [vmem:[#allocation2 + $0x2c] sm:$0x1]  ;;  %3764 = vmatmul.bf16.gmra.mxu0 %v10324_v43  ;;  %4413 = vmatpush.bf16.msrb.mxu1 %v10374_v53  ;;  %v10365_v24 = vld [vmem:[%s12989_s1 + $0x420] sm:$0xff] }
 0x3a4   : > { %v3486_v25 = vrot.slane %v3346_v45, 5  ;;  %v3433_v58 = vshll.u32 %v3346_v45, 16  ;;  %v3437_v47 = vshrl.u32 %v3346_v45, 16  ;;  %v3489_v59 = vrot.slane %v3350_v50, 5  ;;  %4385 = vmatpush.bf16.msrb.mxu0 %v10365_v24  ;;  %v10364_v43 = vld [vmem:[%s12989_s1 + $0x418] sm:$0xff] }
 0x3a5   : > { %v3443_v0 = vshll.u32 %v3350_v50, 16  ;;  %v10372_v45 = vld [vmem:[%s12989_s1 + $0x458] sm:$0xff] }
 0x3a6   : > { %v3487_v35 = vsel %vm10811_vm13, %v8895_v7, %v3486_v25  ;;  %v3488_v36 = vrot.slane %v3486_v25, 4  ;;  %v3435_v3 = vrot.slane %v3433_v58, 5  ;;  %v3439_v5 = vrot.slane %v3437_v47, 4  ;;  %4357 = vmatpush.bf16.msrb.mxu3 %v10356_v33  ;;  %v10354_v7 = vld [vmem:[%s12989_s1 + $0x3c8] sm:$0xff]  ;;  %v11766_v25 = vld [vmem:[%s12990_s2 + $0x4] ss:$0 sm:$0xff] }
 0x3a7   : > { %v3533_v6 = vunpack.c.l.b16 %v3487_v35  ;;  %v3445_v14 = vrot.slane %v3443_v0, 5  ;;  %4414 = vmatpush.bf16.msrb.mxu1 %v10373_v40  ;;  %v10353_v58 = vld [vmem:[%s12989_s1 + $0x3c0] sm:$0xff]  ;;  %v10363_v35 = vld [vmem:[%s12989_s1 + $0x410] sm:$0xff] }
 0x3a8   : > { %v3490_v56 = vsel %vm10811_vm13, %v3488_v36, %v3489_v59  ;;  %v3440_v4 = vor.u32 %v3439_v5, %v3435_v3  ;;  %v3436_v8 = vsel %vm10830_vm14, %v3431_v15, %v3435_v3  ;;  %4386 = vmatpush.bf16.msrb.mxu0 %v10364_v43  ;;  %v10370_v3 = vld [vmem:[%s12989_s1 + $0x448] sm:$0xff] }
 0x3a9   : > { %v3534_v27 = vunpack.c.l.b16 %v3490_v56  ;;  %v3517_v42 = vunpack.c.l.b16 %v3436_v8 }
 0x3aa   : > { %v3441_v10 = vrot.slane %v3440_v4, 4  ;;  %4358 = vmatpush.bf16.msrb.mxu3 %v10355_v30  ;;  %v10362_v4 = vld [vmem:[%s12989_s1 + $0x408] sm:$0xff] }
 0x3ab   : > { %v3538_v18 = vpack.c.b16 %v3534_v27, %v3533_v6  ;;  %4415 = vmatpush.bf16.msrb.mxu1 %v10372_v45  ;;  %v10369_v6 = vld [vmem:[%s12989_s1 + $0x440] sm:$0xff] }
 0x3ac   : > { %v3446_v20 = vsel %vm10830_vm14, %v3441_v10, %v3445_v14  ;;  %4387 = vmatpush.bf16.msrb.mxu0 %v10363_v35 }
 0x3ad   : > { %3822 = vmatmul.bf16.gmra.mxu2 %v3538_v18  ;;  %v3518_v13 = vunpack.c.l.b16 %v3446_v20 }
 0x3ae   : > { %4359 = vmatpush.bf16.msrb.mxu3 %v10354_v7 }
 0x3af   : > { %v3522_v19 = vpack.c.b16 %v3518_v13, %v3517_v42  ;;  %4416 = vmatpush.bf16.msrb.mxu1 %v10371_v46  ;;  %v10361_v42 = vld [vmem:[%s12989_s1 + $0x400] sm:$0xff] }
 0x3b0   : > { %4388 = vmatpush.bf16.msrb.mxu0 %v10362_v4 }
 0x3b2   : > { %3793 = vmatmul.bf16.gmra.mxu1 %v3522_v19  ;;  %4360 = vmatpush.bf16.msrb.mxu3 %v10353_v58 }
 0x3b3   : > { %4417 = vmatpush.bf16.msrb.mxu1 %v10370_v3 }
 0x3b4   : > { %4389 = vmatpush.bf16.msrb.mxu0 %v10361_v42 }
 0x3b7   : > { %4418 = vmatpush.bf16.msrb.mxu1 %v10369_v6 }
 0x3f0   : > { %v3750_v26 = vpop.f32.mrf.mxu0 }
 0x3f1   : > { %v3751_v47 = vadd.f32 %v11766_v25, %v3750_v26 }
 0x3f8   : > { %v3752_v50 = vpop.f32.mrf.mxu0 }
 0x3f9   : > { %v3753_v27 = vadd.f32 %v11766_v25, %v3752_v50 }
 0x3ff   : > { %v3779_v59 = vpop.f32.mrf.mxu1 }
 0x400   : > { %v3808_v0 = vpop.f32.mrf.mxu2  ;;  %v3780_v36 = vadd.f32 %v3779_v59, %v3751_v47  ;;  %v3755_v5 = vpop.f32.mrf.mxu0 }
 0x401   : > { %v3756_v53 = vadd.f32 %v11766_v25, %v3755_v5 }
 0x402   : > { %v3809_v56 = vadd.f32 %v3808_v0, %v3780_v36  ;;  %v3927_v36 = vld [vmem:[#allocation2 + $0x8] sm:$0x1] }
 0x404   : > { %v3828_v15 = vmax.f32 %v3809_v56, 0.0 }
 0x406   : > { %v3836_v8 = vpack.c.bf16 %v3828_v15, %v3828_v15 }
 0x407   : > { %v3781_v10 = vpop.f32.mrf.mxu1 }
 0x408   : > { %v3810_v14 = vpop.f32.mrf.mxu2  ;;  %v3845_v18 = vshrl.u32 %v3836_v8, 16  ;;  %v3782_v20 = vadd.f32 %v3781_v10, %v3753_v27  ;;  %v3848_v19 = vshll.u32 %v3836_v8, 16  ;;  %v3757_v29 = vpop.f32.mrf.mxu0  ;;  %v5092_v26 = vunpack.c.l.b16 %v3836_v8 }
 0x409   : > { %v3758_v56 = vadd.f32 %v11766_v25, %v3757_v29 }
 0x40a   : > { %v3847_v13 = vrot.slane %v3845_v18, 7  ;;  %v3811_v22 = vadd.f32 %v3810_v14, %v3782_v20 }
 0x40c   : > { %v3850_v31 = vor.u32 %v3848_v19, %v3847_v13  ;;  %v3829_v23 = vmax.f32 %v3811_v22, 0.0  ;;  %v3851_v47 = vrot.slane %v3847_v13, 4 }
 0x40e   : > { %v3924_v28 = vsel %vm10759_vm8, %v3850_v31, %v11634_v57  ;;  %v3837_v33 = vpack.c.bf16 %v3829_v23, %v3829_v23 }
 0x40f   : > { %3925 = vst [vmem:[#allocation2] sm:$0xf] %v3924_v28  ;;  %v3784_v24 = vpop.f32.mrf.mxu1  ;;  %v3930_v28 = vld [vmem:[#allocation2 + $0xc] sm:$0xf] }
 0x410   : > { %v3813_v40 = vpop.f32.mrf.mxu2  ;;  %v3853_v30 = vshrl.u32 %v3837_v33, 16  ;;  %v5093_v43 = vunpack.c.l.b16 %v3837_v33  ;;  %v3785_v45 = vadd.f32 %v3784_v24, %v3756_v53  ;;  %v3856_v50 = vshll.u32 %v3837_v33, 16  ;;  %v3760_v57 = vpop.f32.mrf.mxu0 }
 0x411   : > { %v3761_v53 = vadd.f32 %v11766_v25, %v3760_v57 }
 0x412   : > { %v3855_v7 = vrot.slane %v3853_v30, 7  ;;  %v11795_v46 = vpack.c.b16 %v5093_v43, %v5092_v26  ;;  %v3814_v58 = vadd.f32 %v3813_v40, %v3785_v45 }
 0x414   : > { %v3858_v59 = vor.u32 %v3856_v50, %v3855_v7  ;;  %v3860_v0 = vrot.slane %v3855_v7, 4  ;;  %v3830_v35 = vmax.f32 %v3814_v58, 0.0 }
 0x416   : > { %v3859_v3 = vsel %vm10750_vm7, %v3851_v47, %v3858_v59  ;;  %v3928_v5 = vsel %vm10708_vm3, %v3860_v0, %v3927_v36  ;;  %v11802_v15 = vpack.c.bf16 %v3830_v35, %v3830_v35  ;;  %v11804_v4 = vld [vmem:[#allocation2] sm:$0xf] }
 0x417   : > { %3926 = vst [vmem:[#allocation2 + $0x4] sm:$0xf] %v3859_v3  ;;  %v3786_v6 = vpop.f32.mrf.mxu1  ;;  %v3964_v8 = vshrl.u32 %v11804_v4, 16  ;;  %v3967_v10 = vshll.u32 %v11804_v4, 16  ;;  %v4059_v29 = vld [vmem:[#allocation2] sm:$0xe] }
 0x418   : > { %v3815_v27 = vpop.f32.mrf.mxu2  ;;  %3929 = vst [vmem:[#allocation2 + $0x8] sm:$0x1] %v3928_v5  ;;  %v3862_v14 = vshrl.u32 %v11802_v15, 16  ;;  %v3787_v18 = vadd.f32 %v3786_v6, %v3758_v56  ;;  %v3865_v20 = vshll.u32 %v11802_v15, 16  ;;  %v3762_v40 = vpop.f32.mrf.mxu0  ;;  %v9057_v43 = vrot.slane %v4059_v29, 9 }
 0x419   : > { %v3966_v19 = vrot.slane %v3964_v8, 4  ;;  %v3969_v22 = vrot.slane %v3967_v10, 5  ;;  %v5094_v0 = vunpack.c.l.b16 %v11802_v15 }
 0x41a   : > { %v3864_v42 = vrot.slane %v3862_v14, 7  ;;  %v3816_v13 = vadd.f32 %v3815_v27, %v3787_v18 }
 0x41b   : > { %v3970_v45 = vor.u32 %v3969_v22, %v3966_v19 }
 0x41c   : > { %v3867_v31 = vor.u32 %v3865_v20, %v3864_v42  ;;  %v3831_v23 = vmax.f32 %v3816_v13, 0.0  ;;  %v3868_v35 = vrot.slane %v3864_v42, 4 }
 0x41d   : > { %v3971_v18 = vrot.slane %v3970_v45, 4 }
 0x41e   : > { %v3931_v33 = vsel %vm10759_vm8, %v3867_v31, %v3930_v28  ;;  %v3839_v24 = vpack.c.bf16 %v3831_v23, %v3831_v23  ;;  %v10349_v26 = vld [vmem:[#allocation2] sm:$0xff]  ;;  %v3934_v23 = vld [vmem:[#allocation2 + $0x14] sm:$0x1]  ;;  %v3763_v28 = vadd.f32 %v11766_v25, %v3762_v40 }
 0x41f   : > { %v3952_v30 = vld [vmem:[#allocation2 + $0x4] sm:$0xf]  ;;  %3932 = vst [vmem:[#allocation2 + $0xc] sm:$0xf] %v3931_v33  ;;  %v3789_v7 = vpop.f32.mrf.mxu1  ;;  %v3959_v58 = vld [vmem:[#allocation2 + $0x8] sm:$0x1]  ;;  %4361 = vmatmul.bf16.vlgmr.msrb.gmra.mxu3 %v10349_v26 }
 0x420   : > { %v3818_v50 = vpop.f32.mrf.mxu2  ;;  %v4077_v47 = vrot.slane %v3952_v30, 5  ;;  %v3973_v59 = vshll.u32 %v3952_v30, 16  ;;  %v3870_v36 = vshrl.u32 %v3839_v24, 16  ;;  %v3790_v57 = vadd.f32 %v3789_v7, %v3761_v53 }
 0x421   : > { %v4080_v3 = vrot.slane %v3959_v58, 5  ;;  %v3977_v27 = vshrl.u32 %v3952_v30, 16  ;;  %v3873_v10 = vshll.u32 %v3839_v24, 16  ;;  %v3983_v42 = vshll.u32 %v3959_v58, 16 }
 0x422   : > { %v4078_v5 = vsel %vm10811_vm13, %v9057_v43, %v4077_v47  ;;  %v4079_v56 = vrot.slane %v4077_v47, 4  ;;  %v3975_v6 = vrot.slane %v3973_v59, 5  ;;  %v3872_v8 = vrot.slane %v3870_v36, 7 }
 0x423   : > { %v3819_v14 = vadd.f32 %v3818_v50, %v3790_v57  ;;  %v4139_v13 = vunpack.c.l.b16 %v4078_v5  ;;  %v3979_v15 = vrot.slane %v3977_v27, 4  ;;  %v5095_v26 = vunpack.c.l.b16 %v3839_v24 }
 0x424   : > { %v4081_v20 = vsel %vm10811_vm13, %v4079_v56, %v4080_v3  ;;  %v3875_v19 = vor.u32 %v3873_v10, %v3872_v8  ;;  %v3877_v22 = vrot.slane %v3872_v8, 4  ;;  %v3976_v53 = vsel %vm10830_vm14, %v3971_v18, %v3975_v6  ;;  %v3765_v3 = vpop.f32.mrf.mxu0 }
 0x425   : > { %v3832_v29 = vmax.f32 %v3819_v14, 0.0  ;;  %v4140_v31 = vunpack.c.l.b16 %v4081_v20  ;;  %v3980_v33 = vor.u32 %v3979_v15, %v3975_v6  ;;  %v3985_v40 = vrot.slane %v3983_v42, 5 }
 0x426   : > { %v3876_v30 = vsel %vm10750_vm7, %v3868_v35, %v3875_v19  ;;  %v3935_v43 = vsel %vm10708_vm3, %v3877_v22, %v3934_v23  ;;  %v3953_v50 = vld [vmem:[#allocation2 + $0xc] sm:$0xf]  ;;  %v10412_v35 = vld [vmem:[%s12991_s3 + $0x138] sm:$0xff]  ;;  %v11831_v56 = vpack.c.b16 %v5095_v26, %v5094_v0  ;;  %v4123_v27 = vunpack.c.l.b16 %v3976_v53 }
 0x427   : > { %v11825_v45 = vpack.c.bf16 %v3832_v29, %v3832_v29  ;;  %v4147_v7 = vpack.c.b16 %v4140_v31, %v4139_v13  ;;  %3933 = vst [vmem:[#allocation2 + $0x10] sm:$0xf] %v3876_v30  ;;  %v3791_v58 = vpop.f32.mrf.mxu1  ;;  %v3981_v59 = vrot.slane %v3980_v33, 4  ;;  %v3988_v36 = vshrl.u32 %v3953_v50, 16  ;;  %5353 = vmatpush.bf16.msra.mxu1 %v10412_v35  ;;  %v4060_v15 = vld [vmem:[#allocation2 + $0xc] sm:$0xe] }
 0x428   : > { %v3820_v47 = vpop.f32.mrf.mxu2  ;;  %v3991_v57 = vshll.u32 %v3953_v50, 16  ;;  %3936 = vst [vmem:[#allocation2 + $0x14] sm:$0x1] %v3935_v43  ;;  %v3792_v5 = vadd.f32 %v3791_v58, %v3763_v28  ;;  %v3937_v31 = vld [vmem:[#allocation2 + $0x18] sm:$0xf]  ;;  %v3766_v0 = vadd.f32 %v11766_v25, %v3765_v3  ;;  %v9058_v30 = vrot.slane %v4060_v15, 9 }
 0x429   : > { %v3879_v24 = vshrl.u32 %v11825_v45, 16  ;;  %4419 = vmatmul.bf16.vlgmr.msrb.gmra.mxu1 %v4147_v7  ;;  %v3986_v6 = vsel %vm10830_vm14, %v3981_v59, %v3985_v40  ;;  %v3990_v8 = vrot.slane %v3988_v36, 4  ;;  %v3882_v18 = vshll.u32 %v11825_v45, 16  ;;  %v10411_v43 = vld [vmem:[%s12991_s3 + $0x130] sm:$0xff] }
 0x42a   : > { %v3993_v10 = vrot.slane %v3991_v57, 5  ;;  %v3821_v20 = vadd.f32 %v3820_v47, %v3792_v5  ;;  %v4124_v13 = vunpack.c.l.b16 %v3986_v6  ;;  %v5096_v40 = vunpack.c.l.b16 %v11825_v45  ;;  %v10410_v5 = vld [vmem:[%s12991_s3 + $0x128] sm:$0xff] }
 0x42b   : > { %v3881_v14 = vrot.slane %v3879_v24, 7  ;;  %5354 = vmatpush.bf16.msra.mxu1 %v10411_v43  ;;  %v10409_v43 = vld [vmem:[%s12991_s3 + $0x120] sm:$0xff] }
 0x42c   : > { %v3833_v19 = vmax.f32 %v3821_v20, 0.0  ;;  %v4131_v22 = vpack.c.b16 %v4124_v13, %v4123_v27  ;;  %v3994_v29 = vor.u32 %v3993_v10, %v3990_v8 }
 0x42d   : > { %v3884_v42 = vor.u32 %v3882_v18, %v3881_v14  ;;  %v3885_v23 = vrot.slane %v3881_v14, 4  ;;  %v3767_v18 = vpop.f32.mrf.mxu0 }
 0x42e   : > { %v3841_v53 = vpack.c.bf16 %v3833_v19, %v3833_v19  ;;  %4390 = vmatmul.bf16.vlgmr.msrb.gmra.mxu0 %v4131_v22  ;;  %v10350_v33 = vld [vmem:[#allocation2 + $0xc] sm:$0xff]  ;;  %v3995_v3 = vrot.slane %v3994_v29, 4 }
 0x42f   : > { %v3938_v28 = vsel %vm10759_vm8, %v3884_v42, %v3937_v31  ;;  %v3954_v26 = vld [vmem:[#allocation2 + $0x10] sm:$0xf]  ;;  %v3794_v7 = vpop.f32.mrf.mxu1  ;;  %v3960_v58 = vld [vmem:[#allocation2 + $0x14] sm:$0x1]  ;;  %4366 = vmatmul.bf16.gmra.mxu3 %v10350_v33  ;;  %5355 = vmatpush.bf16.msra.mxu1 %v10410_v5  ;;  %v3768_v33 = vadd.f32 %v11766_v25, %v3767_v18 }
 0x430   : > { %3939 = vst [vmem:[#allocation2 + $0x18] sm:$0xf] %v3938_v28  ;;  %v3823_v50 = vpop.f32.mrf.mxu2  ;;  %v4084_v47 = vrot.slane %v3954_v26, 5  ;;  %v3997_v59 = vshll.u32 %v3954_v26, 16  ;;  %v3887_v36 = vshrl.u32 %v3841_v53, 16  ;;  %v3795_v57 = vadd.f32 %v3794_v7, %v3766_v0 }
 0x431   : > { %v4087_v24 = vrot.slane %v3960_v58, 5  ;;  %v4001_v8 = vshrl.u32 %v3954_v26, 16  ;;  %v3890_v14 = vshll.u32 %v3841_v53, 16  ;;  %v4007_v42 = vshll.u32 %v3960_v58, 16  ;;  %v3941_v28 = vld [vmem:[#allocation2 + $0x20] sm:$0x1] }
 0x432   : > { %v4085_v35 = vsel %vm10811_vm13, %v9058_v30, %v4084_v47  ;;  %v4086_v6 = vrot.slane %v4084_v47, 4  ;;  %v3999_v27 = vrot.slane %v3997_v59, 5  ;;  %v3889_v10 = vrot.slane %v3887_v36, 7 }
 0x433   : > { %v3824_v45 = vadd.f32 %v3823_v50, %v3795_v57  ;;  %v4141_v20 = vunpack.c.l.b16 %v4085_v35  ;;  %v4003_v15 = vrot.slane %v4001_v8, 4  ;;  %v5097_v19 = vunpack.c.l.b16 %v3841_v53  ;;  %5356 = vmatpush.bf16.msra.mxu1 %v10409_v43 }
 0x434   : > { %v4088_v13 = vsel %vm10811_vm13, %v4086_v6, %v4087_v24  ;;  %v3892_v22 = vor.u32 %v3890_v14, %v3889_v10  ;;  %v3894_v29 = vrot.slane %v3889_v10, 4  ;;  %v4000_v26 = vsel %vm10830_vm14, %v3995_v3, %v3999_v27 }
 0x435   : > { %v3834_v31 = vmax.f32 %v3824_v45, 0.0  ;;  %v4142_v0 = vunpack.c.l.b16 %v4088_v13  ;;  %v4004_v30 = vor.u32 %v4003_v15, %v3999_v27  ;;  %v11856_v7 = vpack.c.b16 %v5097_v19, %v5096_v40  ;;  %v10408_v27 = vld [vmem:[%s12991_s3 + $0x118] sm:$0xff] }
 0x436   : > { %v3893_v53 = vsel %vm10750_vm7, %v3885_v23, %v3892_v22  ;;  %v3942_v50 = vsel %vm10708_vm3, %v3894_v29, %v3941_v28  ;;  %v4009_v24 = vrot.slane %v4007_v42, 5  ;;  %v4125_v6 = vunpack.c.l.b16 %v4000_v26  ;;  %v3944_v22 = vld [vmem:[#allocation2 + $0x24] sm:$0xf]  ;;  %v10407_v26 = vld [vmem:[%s12991_s3 + $0x110] sm:$0xff] }
 0x437   : > { %v11862_v58 = vpack.c.bf16 %v3834_v31, %v3834_v31  ;;  %v4148_v47 = vpack.c.b16 %v4142_v0, %v4141_v20  ;;  %v3955_v25 = vld [vmem:[#allocation2 + $0x18] sm:$0xf]  ;;  %3940 = vst [vmem:[#allocation2 + $0x1c] sm:$0xf] %v3893_v53  ;;  %v3796_v59 = vpop.f32.mrf.mxu1  ;;  %v4005_v57 = vrot.slane %v4004_v30, 4  ;;  %5357 = vmatpush.bf16.msra.mxu1 %v10408_v27 }
 0x438   : > { %v3825_v36 = vpop.f32.mrf.mxu2  ;;  %v4012_v3 = vshrl.u32 %v3955_v25, 16  ;;  %v4015_v5 = vshll.u32 %v3955_v25, 16  ;;  %3943 = vst [vmem:[#allocation2 + $0x20] sm:$0x1] %v3942_v50  ;;  %v3797_v35 = vadd.f32 %v3796_v59, %v3768_v33  ;;  %v4061_v45 = vld [vmem:[#allocation2 + $0x18] sm:$0xe] }
 0x439   : > { %v3896_v40 = vshrl.u32 %v11862_v58, 16  ;;  %4424 = vmatmul.bf16.gmra.mxu1 %v4148_v47  ;;  %v4010_v23 = vsel %vm10830_vm14, %v4005_v57, %v4009_v24  ;;  %v3899_v10 = vshll.u32 %v11862_v58, 16  ;;  %v9059_v33 = vrot.slane %v4061_v45, 9 }
 0x43a   : > { %v3826_v14 = vadd.f32 %v3825_v36, %v3797_v35  ;;  %v4126_v18 = vunpack.c.l.b16 %v4010_v23  ;;  %v4014_v20 = vrot.slane %v4012_v3, 4  ;;  %v4017_v13 = vrot.slane %v4015_v5, 5 }
 0x43b   : > { %v3898_v8 = vrot.slane %v3896_v40, 7  ;;  %v5098_v36 = vunpack.c.l.b16 %v11862_v58  ;;  %5358 = vmatpush.bf16.msra.mxu1 %v10407_v26  ;;  %v10406_v40 = vld [vmem:[%s12991_s3 + $0x108] sm:$0xff] }
 0x43c   : > { %v3835_v42 = vmax.f32 %v3826_v14, 0.0  ;;  %v4132_v19 = vpack.c.b16 %v4126_v18, %v4125_v6  ;;  %v4018_v53 = vor.u32 %v4017_v13, %v4014_v20 }
 0x43d   : > { %v3901_v15 = vor.u32 %v3899_v10, %v3898_v8  ;;  %v3902_v10 = vrot.slane %v3898_v8, 4 }
 0x43e   : > { %v3843_v31 = vpack.c.bf16 %v3835_v42, %v3835_v42  ;;  %4395 = vmatmul.bf16.gmra.mxu0 %v4132_v19  ;;  %v10351_v0 = vld [vmem:[#allocation2 + $0x18] sm:$0xff]  ;;  %v4019_v18 = vrot.slane %v4018_v53, 4  ;;  %v3948_v42 = vld [vmem:[#allocation2 + $0x2c] sm:$0x1] }
 0x43f   : > { %v3945_v29 = vsel %vm10759_vm8, %v3901_v15, %v3944_v22  ;;  %v3956_v28 = vld [vmem:[#allocation2 + $0x1c] sm:$0xf]  ;;  %v3961_v30 = vld [vmem:[#allocation2 + $0x20] sm:$0x1]  ;;  %4371 = vmatmul.bf16.gmra.mxu3 %v10351_v0  ;;  %5359 = vmatpush.bf16.msra.mxu1 %v10406_v40 }
 0x440   : > { %3946 = vst [vmem:[#allocation2 + $0x24] sm:$0xf] %v3945_v29  ;;  %v4091_v43 = vrot.slane %v3956_v28, 5  ;;  %v4021_v50 = vshll.u32 %v3956_v28, 16  ;;  %v3904_v47 = vshrl.u32 %v3843_v31, 16  ;;  %v4094_v25 = vrot.slane %v3961_v30, 5 }
 0x441   : > { %v4025_v59 = vshrl.u32 %v3956_v28, 16  ;;  %v4031_v5 = vshll.u32 %v3961_v30, 16  ;;  %v3907_v23 = vshll.u32 %v3843_v31, 16  ;;  %v5099_v27 = vunpack.c.l.b16 %v3843_v31  ;;  %v10405_v29 = vld [vmem:[%s12991_s3 + $0x100] sm:$0xff] }
 0x442   : > { %v4092_v57 = vsel %vm10811_vm13, %v9059_v33, %v4091_v43  ;;  %v4093_v24 = vrot.slane %v4091_v43, 4  ;;  %v4023_v3 = vrot.slane %v4021_v50, 5  ;;  %v3906_v35 = vrot.slane %v3904_v47, 7 }
 0x443   : > { %v4027_v6 = vrot.slane %v4025_v59, 4  ;;  %v4143_v58 = vunpack.c.l.b16 %v4092_v57  ;;  %v4033_v22 = vrot.slane %v4031_v5, 5  ;;  %v11889_v8 = vpack.c.b16 %v5099_v27, %v5098_v36  ;;  %5360 = vmatpush.bf16.msra.mxu1 %v10405_v29 }
 0x444   : > { %v4095_v14 = vsel %vm10811_vm13, %v4093_v24, %v4094_v25  ;;  %v3909_v45 = vor.u32 %v3907_v23, %v3906_v35  ;;  %v3911_v20 = vrot.slane %v3906_v35, 4  ;;  %v4024_v19 = vsel %vm10830_vm14, %v4019_v18, %v4023_v3 }
 0x445   : > { %v4144_v13 = vunpack.c.l.b16 %v4095_v14  ;;  %v4028_v15 = vor.u32 %v4027_v6, %v4023_v3  ;;  %v4127_v50 = vunpack.c.l.b16 %v4024_v19 }
 0x446   : > { %v3910_v31 = vsel %vm10750_vm7, %v3902_v10, %v3909_v45  ;;  %v3949_v0 = vsel %vm10708_vm3, %v3911_v20, %v3948_v42 }
 0x447   : > { %v4149_v28 = vpack.c.b16 %v4144_v13, %v4143_v58  ;;  %v4029_v33 = vrot.slane %v4028_v15, 4  ;;  %v3957_v26 = vld [vmem:[#allocation2 + $0x24] sm:$0xf]  ;;  %3947 = vst [vmem:[#allocation2 + $0x28] sm:$0xf] %v3910_v31 }
 0x448   : > { %v4036_v30 = vshrl.u32 %v3957_v26, 16  ;;  %v4039_v43 = vshll.u32 %v3957_v26, 16  ;;  %3950 = vst [vmem:[#allocation2 + $0x2c] sm:$0x1] %v3949_v0  ;;  %v4062_v59 = vld [vmem:[#allocation2 + $0x24] sm:$0xe] }
 0x449   : > { %4429 = vmatmul.bf16.gmra.mxu1 %v4149_v28  ;;  %v4034_v53 = vsel %vm10830_vm14, %v4029_v33, %v4033_v22  ;;  %v9060_v5 = vrot.slane %v4062_v59, 9  ;;  %v10386_v59 = vld [vmem:[%s12989_s1 + $0x4a8] sm:$0xff] }
 0x44a   : > { %v4128_v47 = vunpack.c.l.b16 %v4034_v53  ;;  %v4038_v36 = vrot.slane %v4036_v30, 4  ;;  %v4041_v57 = vrot.slane %v4039_v43, 5  ;;  %v10388_v53 = vld [vmem:[%s12989_s1 + $0x4b8] sm:$0xff] }
 0x44b   : > { %4965 = vmatpush.bf16.msrb.mxu2 %v10388_v53 }
 0x44c   : > { %v4133_v25 = vpack.c.b16 %v4128_v47, %v4127_v50  ;;  %v4042_v23 = vor.u32 %v4041_v57, %v4038_v36  ;;  %v10396_v50 = vld [vmem:[%s12989_s1 + $0x4f8] sm:$0xff]  ;;  %v10387_v47 = vld [vmem:[%s12989_s1 + $0x4b0] sm:$0xff]  ;;  %v10385_v57 = vld [vmem:[%s12989_s1 + $0x4a0] sm:$0xff] }
 0x44d   : > { %4994 = vmatpush.bf16.msra.mxu3 %v10396_v50  ;;  %v10403_v36 = vld [vmem:[%s12989_s1 + $0x530] sm:$0xff] }
 0x44e   : > { %4400 = vmatmul.bf16.gmra.mxu0 %v4133_v25  ;;  %v10352_v24 = vld [vmem:[#allocation2 + $0x24] sm:$0xff]  ;;  %v4043_v15 = vrot.slane %v4042_v23, 4  ;;  %v10404_v25 = vld [vmem:[%s12989_s1 + $0x538] sm:$0xff] }
 0x44f   : > { %v3958_v3 = vld [vmem:[#allocation2 + $0x28] sm:$0xf]  ;;  %v3962_v40 = vld [vmem:[#allocation2 + $0x2c] sm:$0x1]  ;;  %4376 = vmatmul.bf16.gmra.mxu3 %v10352_v24  ;;  %4966 = vmatpush.bf16.msrb.mxu2 %v10387_v47  ;;  %v10393_v24 = vld [vmem:[%s12989_s1 + $0x4e0] sm:$0xff] }
 0x450   : > { %v4098_v35 = vrot.slane %v3958_v3, 5  ;;  %v4045_v6 = vshll.u32 %v3958_v3, 16  ;;  %v4049_v27 = vshrl.u32 %v3958_v3, 16  ;;  %v4101_v10 = vrot.slane %v3962_v40, 5  ;;  %5023 = vmatpush.bf16.msra.mxu0 %v10404_v25  ;;  %v10402_v3 = vld [vmem:[%s12989_s1 + $0x528] sm:$0xff] }
 0x451   : > { %v4055_v14 = vshll.u32 %v3962_v40, 16  ;;  %v10383_v40 = vld [vmem:[%s12989_s1 + $0x490] sm:$0xff] }
 0x452   : > { %v4099_v58 = vsel %vm10811_vm13, %v9060_v5, %v4098_v35  ;;  %v4100_v18 = vrot.slane %v4098_v35, 4  ;;  %v4047_v45 = vrot.slane %v4045_v6, 5  ;;  %v4051_v20 = vrot.slane %v4049_v27, 4  ;;  %v10401_v5 = vld [vmem:[%s12989_s1 + $0x520] sm:$0xff]  ;;  %v10392_v35 = vld [vmem:[%s12989_s1 + $0x4d8] sm:$0xff] }
 0x453   : > { %v4145_v19 = vunpack.c.l.b16 %v4099_v58  ;;  %v4057_v0 = vrot.slane %v4055_v14, 5  ;;  %4967 = vmatpush.bf16.msrb.mxu2 %v10386_v59  ;;  %v11957_v6 = vld [vmem:[%s12990_s2 + $0x5] ss:$0 sm:$0xff]  ;;  %v10400_v27 = vld [vmem:[%s12989_s1 + $0x518] sm:$0xff] }
 0x454   : > { %v4102_v13 = vsel %vm10811_vm13, %v4100_v18, %v4101_v10  ;;  %v4052_v42 = vor.u32 %v4051_v20, %v4047_v45  ;;  %v4048_v29 = vsel %vm10830_vm14, %v4043_v15, %v4047_v45  ;;  %5024 = vmatpush.bf16.msra.mxu0 %v10403_v36  ;;  %v10382_v10 = vld [vmem:[%s12989_s1 + $0x488] sm:$0xff]  ;;  %v10391_v45 = vld [vmem:[%s12989_s1 + $0x4d0] sm:$0xff]  ;;  %v10389_v59 = vld [vmem:[%s12989_s1 + $0x4c0] sm:$0xff] }
 0x455   : > { %v4146_v22 = vunpack.c.l.b16 %v4102_v13  ;;  %v4129_v26 = vunpack.c.l.b16 %v4048_v29  ;;  %v10399_v20 = vld [vmem:[%s12989_s1 + $0x510] sm:$0xff]  ;;  %v10381_v13 = vld [vmem:[%s12989_s1 + $0x480] sm:$0xff] }
 0x456   : > { %v4053_v31 = vrot.slane %v4052_v42, 4 }
 0x457   : > { %v4150_v28 = vpack.c.b16 %v4146_v22, %v4145_v19  ;;  %4968 = vmatpush.bf16.msrb.mxu2 %v10385_v57  ;;  %v10398_v22 = vld [vmem:[%s12989_s1 + $0x508] sm:$0xff] }
 0x458   : > { %v4058_v33 = vsel %vm10830_vm14, %v4053_v31, %v4057_v0  ;;  %5025 = vmatpush.bf16.msra.mxu0 %v10402_v3 }
 0x459   : > { %4434 = vmatmul.bf16.gmra.mxu1 %v4150_v28  ;;  %v4130_v30 = vunpack.c.l.b16 %v4058_v33 }
 0x45b   : > { %v4134_v43 = vpack.c.b16 %v4130_v30, %v4129_v26  ;;  %v10390_v26 = vld [vmem:[%s12989_s1 + $0x4c8] sm:$0xff]  ;;  %v10397_v30 = vld [vmem:[%s12989_s1 + $0x500] sm:$0xff] }
 0x45c   : > { %5026 = vmatpush.bf16.msra.mxu0 %v10401_v5 }
 0x45e   : > { %4405 = vmatmul.bf16.gmra.mxu0 %v4134_v43 }
 0x460   : > { %5027 = vmatpush.bf16.msra.mxu0 %v10400_v27 }
 0x464   : > { %5028 = vmatpush.bf16.msra.mxu0 %v10399_v20 }
 0x468   : > { %5029 = vmatpush.bf16.msra.mxu0 %v10398_v22 }
 0x469   : > { %5361 = vmatmul.bf16.vlgmr.msra.gmra.mxu1 %v11795_v46  ;;  %v10395_v46 = vld [vmem:[%s12989_s1 + $0x4f0] sm:$0xff] }
 0x46a   : > { %4995 = vmatpush.bf16.msra.mxu3 %v10395_v46 }
 0x46c   : > { %5030 = vmatpush.bf16.msra.mxu0 %v10397_v30 }
 0x479   : > { %5366 = vmatmul.bf16.gmra.mxu1 %v11831_v56  ;;  %v10394_v56 = vld [vmem:[%s12989_s1 + $0x4e8] sm:$0xff] }
 0x47a   : > { %4996 = vmatpush.bf16.msra.mxu3 %v10394_v56 }
 0x47e   : > { %4997 = vmatpush.bf16.msra.mxu3 %v10393_v24 }
 0x482   : > { %4998 = vmatpush.bf16.msra.mxu3 %v10392_v35 }
 0x486   : > { %4999 = vmatpush.bf16.msra.mxu3 %v10391_v45 }
 0x489   : > { %5371 = vmatmul.bf16.gmra.mxu1 %v11856_v7  ;;  %v10384_v7 = vld [vmem:[%s12989_s1 + $0x498] sm:$0xff] }
 0x48a   : > { %4969 = vmatpush.bf16.msrb.mxu2 %v10384_v7  ;;  %5000 = vmatpush.bf16.msra.mxu3 %v10390_v26 }
 0x48e   : > { %4970 = vmatpush.bf16.msrb.mxu2 %v10383_v40  ;;  %5001 = vmatpush.bf16.msra.mxu3 %v10389_v59 }
 0x492   : > { %4971 = vmatpush.bf16.msrb.mxu2 %v10382_v10 }
 0x496   : > { %4972 = vmatpush.bf16.msrb.mxu2 %v10381_v13 }
 0x499   : > { %5376 = vmatmul.bf16.gmra.mxu1 %v11889_v8 }
 0x4a2   : > { %v4362_v8 = vpop.f32.mrf.mxu3 }
 0x4a3   : > { %v4363_v14 = vadd.f32 %v11957_v6, %v4362_v8 }
 0x4a6   : > { %v4420_v23 = vpop.f32.mrf.mxu1 }
 0x4aa   : > { %v4364_v18 = vpop.f32.mrf.mxu3 }
 0x4ab   : > { %v4391_v58 = vpop.f32.mrf.mxu0  ;;  %v4365_v0 = vadd.f32 %v11957_v6, %v4364_v18 }
 0x4ac   : > { %v4392_v15 = vadd.f32 %v4391_v58, %v4363_v14 }
 0x4ae   : > { %v4422_v42 = vpop.f32.mrf.mxu1  ;;  %v4421_v19 = vadd.f32 %v4420_v23, %v4392_v15  ;;  %v4539_v15 = vld [vmem:[#allocation2 + $0x8] sm:$0x1] }
 0x4b0   : > { %v4440_v29 = vmax.f32 %v4421_v19, 0.0 }
 0x4b2   : > { %v4448_v31 = vpack.c.bf16 %v4440_v29, %v4440_v29  ;;  %v4367_v33 = vpop.f32.mrf.mxu3 }
 0x4b3   : > { %v4393_v28 = vpop.f32.mrf.mxu0  ;;  %v4368_v3 = vadd.f32 %v11957_v6, %v4367_v33 }
 0x4b4   : > { %v4457_v43 = vshrl.u32 %v4448_v31, 16  ;;  %v4394_v53 = vadd.f32 %v4393_v28, %v4365_v0  ;;  %v4460_v46 = vshll.u32 %v4448_v31, 16  ;;  %v5116_v5 = vunpack.c.l.b16 %v4448_v31 }
 0x4b6   : > { %v4425_v50 = vpop.f32.mrf.mxu1  ;;  %v4459_v47 = vrot.slane %v4457_v43, 7  ;;  %v4423_v25 = vadd.f32 %v4422_v42, %v4394_v53 }
 0x4b8   : > { %v4462_v56 = vor.u32 %v4460_v46, %v4459_v47  ;;  %v4441_v36 = vmax.f32 %v4423_v25, 0.0  ;;  %v4463_v45 = vrot.slane %v4459_v47, 4 }
 0x4ba   : > { %v4536_v57 = vsel %vm10759_vm8, %v4462_v56, %v11804_v4  ;;  %v4449_v24 = vpack.c.bf16 %v4441_v36, %v4441_v36  ;;  %v4369_v8 = vpop.f32.mrf.mxu3 }
 0x4bb   : > { %4537 = vst [vmem:[#allocation2] sm:$0xf] %v4536_v57  ;;  %v4396_v7 = vpop.f32.mrf.mxu0  ;;  %v4370_v29 = vadd.f32 %v11957_v6, %v4369_v8 }
 0x4bc   : > { %v4465_v40 = vshrl.u32 %v4449_v24, 16  ;;  %v5117_v35 = vunpack.c.l.b16 %v4449_v24  ;;  %v4397_v23 = vadd.f32 %v4396_v7, %v4368_v3  ;;  %v4468_v14 = vshll.u32 %v4449_v24, 16  ;;  %v4542_v24 = vld [vmem:[#allocation2 + $0xc] sm:$0xf] }
 0x4be   : > { %v4427_v27 = vpop.f32.mrf.mxu1  ;;  %v4467_v10 = vrot.slane %v4465_v40, 7  ;;  %v11992_v58 = vpack.c.b16 %v5117_v35, %v5116_v5  ;;  %v4426_v18 = vadd.f32 %v4425_v50, %v4397_v23 }
 0x4c0   : > { %v4470_v20 = vor.u32 %v4468_v14, %v4467_v10  ;;  %v4472_v13 = vrot.slane %v4467_v10, 4  ;;  %v4442_v4 = vmax.f32 %v4426_v18, 0.0 }
 0x4c2   : > { %v4471_v42 = vsel %vm10750_vm7, %v4463_v45, %v4470_v20  ;;  %v4540_v19 = vsel %vm10708_vm3, %v4472_v13, %v4539_v15  ;;  %v11998_v22 = vpack.c.bf16 %v4442_v4, %v4442_v4  ;;  %v12001_v31 = vld [vmem:[#allocation2] sm:$0xf]  ;;  %v4372_v28 = vpop.f32.mrf.mxu3 }
 0x4c3   : > { %4538 = vst [vmem:[#allocation2 + $0x4] sm:$0xf] %v4471_v42  ;;  %v4398_v0 = vpop.f32.mrf.mxu0  ;;  %v4576_v33 = vshrl.u32 %v12001_v31, 16  ;;  %v4579_v26 = vshll.u32 %v12001_v31, 16  ;;  %v4671_v56 = vld [vmem:[#allocation2] sm:$0xe]  ;;  %v4373_v5 = vadd.f32 %v11957_v6, %v4372_v28 }
 0x4c4   : > { %4541 = vst [vmem:[#allocation2 + $0x8] sm:$0x1] %v4540_v19  ;;  %v4474_v30 = vshrl.u32 %v11998_v22, 16  ;;  %v4399_v43 = vadd.f32 %v4398_v0, %v4370_v29  ;;  %v4477_v46 = vshll.u32 %v11998_v22, 16  ;;  %v9222_v23 = vrot.slane %v4671_v56, 9 }
 0x4c5   : > { %v4578_v53 = vrot.slane %v4576_v33, 4  ;;  %v4581_v50 = vrot.slane %v4579_v26, 5  ;;  %v5118_v15 = vunpack.c.l.b16 %v11998_v22 }
 0x4c6   : > { %v4476_v47 = vrot.slane %v4474_v30, 7  ;;  %v4428_v25 = vadd.f32 %v4427_v27, %v4399_v43  ;;  %v4430_v59 = vpop.f32.mrf.mxu1 }
 0x4c7   : > { %v4582_v3 = vor.u32 %v4581_v50, %v4578_v53 }
 0x4c8   : > { %v4479_v36 = vor.u32 %v4477_v46, %v4476_v47  ;;  %v4443_v57 = vmax.f32 %v4428_v25, 0.0  ;;  %v4480_v20 = vrot.slane %v4476_v47, 4  ;;  %v10420_v47 = vld [vmem:[%s12991_s3 + $0x178] sm:$0xff] }
 0x4c9   : > { %v4583_v0 = vrot.slane %v4582_v3, 4  ;;  %5382 = vmatpush.bf16.msra.mxu2 %v10420_v47 }
 0x4ca   : > { %v4543_v7 = vsel %vm10759_vm8, %v4479_v36, %v4542_v24  ;;  %v4451_v8 = vpack.c.bf16 %v4443_v57, %v4443_v57  ;;  %v10377_v40 = vld [vmem:[#allocation2] sm:$0xff]  ;;  %v4374_v14 = vpop.f32.mrf.mxu3  ;;  %v4546_v57 = vld [vmem:[#allocation2 + $0x14] sm:$0x1] }
 0x4cb   : > { %v4564_v35 = vld [vmem:[#allocation2 + $0x4] sm:$0xf]  ;;  %4544 = vst [vmem:[#allocation2 + $0xc] sm:$0xf] %v4543_v7  ;;  %v4401_v10 = vpop.f32.mrf.mxu0  ;;  %v4571_v18 = vld [vmem:[#allocation2 + $0x8] sm:$0x1]  ;;  %4973 = vmatmul.bf16.vlgmr.msrb.gmra.mxu2 %v10377_v40  ;;  %v4375_v24 = vadd.f32 %v11957_v6, %v4374_v14 }
 0x4cc   : > { %v4689_v27 = vrot.slane %v4564_v35, 5  ;;  %v4585_v45 = vshll.u32 %v4564_v35, 16  ;;  %v4482_v13 = vshrl.u32 %v4451_v8, 16  ;;  %v4402_v4 = vadd.f32 %v4401_v10, %v4373_v5 }
 0x4cd   : > { %v4692_v29 = vrot.slane %v4571_v18, 5  ;;  %v4485_v33 = vshll.u32 %v4451_v8, 16  ;;  %v4589_v30 = vshrl.u32 %v4564_v35, 16  ;;  %v5119_v22 = vunpack.c.l.b16 %v4451_v8 }
 0x4ce   : > { %v4690_v42 = vsel %vm10811_vm13, %v9222_v23, %v4689_v27  ;;  %v4691_v19 = vrot.slane %v4689_v27, 4  ;;  %v4484_v28 = vrot.slane %v4482_v13, 7  ;;  %v4431_v26 = vadd.f32 %v4430_v59, %v4402_v4  ;;  %v4432_v3 = vpop.f32.mrf.mxu1 }
 0x4cf   : > { %v4751_v53 = vunpack.c.l.b16 %v4690_v42  ;;  %v4587_v50 = vrot.slane %v4585_v45, 5  ;;  %v4591_v59 = vrot.slane %v4589_v30, 4  ;;  %v4595_v7 = vshll.u32 %v4571_v18, 16  ;;  %v10419_v18 = vld [vmem:[%s12991_s3 + $0x170] sm:$0xff] }
 0x4d0   : > { %v4693_v43 = vsel %vm10811_vm13, %v4691_v19, %v4692_v29  ;;  %v4487_v46 = vor.u32 %v4485_v33, %v4484_v28  ;;  %v4489_v25 = vrot.slane %v4484_v28, 4  ;;  %v4444_v56 = vmax.f32 %v4431_v26, 0.0  ;;  %5383 = vmatpush.bf16.msra.mxu2 %v10419_v18  ;;  %v10418_v26 = vld [vmem:[%s12991_s3 + $0x168] sm:$0xff] }
 0x4d1   : > { %v4752_v36 = vunpack.c.l.b16 %v4693_v43  ;;  %v12019_v5 = vpack.c.b16 %v5119_v22, %v5118_v15  ;;  %v4592_v45 = vor.u32 %v4591_v59, %v4587_v50  ;;  %v4588_v42 = vsel %vm10830_vm14, %v4583_v0, %v4587_v50 }
 0x4d2   : > { %v4488_v40 = vsel %vm10750_vm7, %v4480_v20, %v4487_v46  ;;  %v4547_v35 = vsel %vm10708_vm3, %v4489_v25, %v4546_v57  ;;  %v12025_v8 = vpack.c.bf16 %v4444_v56, %v4444_v56  ;;  %v4565_v10 = vld [vmem:[#allocation2 + $0xc] sm:$0xf]  ;;  %v4377_v15 = vpop.f32.mrf.mxu3  ;;  %v4597_v29 = vrot.slane %v4595_v7, 5  ;;  %v4549_v56 = vld [vmem:[#allocation2 + $0x18] sm:$0xf] }
 0x4d3   : > { %v4759_v23 = vpack.c.b16 %v4752_v36, %v4751_v53  ;;  %4545 = vst [vmem:[#allocation2 + $0x10] sm:$0xf] %v4488_v40  ;;  %v4403_v27 = vpop.f32.mrf.mxu0  ;;  %v4600_v14 = vshrl.u32 %v4565_v10, 16  ;;  %v4603_v13 = vshll.u32 %v4565_v10, 16  ;;  %v4593_v19 = vrot.slane %v4592_v45, 4 }
 0x4d4   : > { %4548 = vst [vmem:[#allocation2 + $0x14] sm:$0x1] %v4547_v35  ;;  %v4491_v4 = vshrl.u32 %v12025_v8, 16  ;;  %v4404_v20 = vadd.f32 %v4403_v27, %v4375_v24  ;;  %v4494_v43 = vshll.u32 %v12025_v8, 16  ;;  %v4672_v47 = vld [vmem:[#allocation2 + $0xc] sm:$0xe]  ;;  %v4735_v0 = vunpack.c.l.b16 %v4588_v42  ;;  %5384 = vmatpush.bf16.msra.mxu2 %v10418_v26 }
 0x4d5   : > { %5031 = vmatmul.bf16.vlgmr.msra.gmra.mxu0 %v4759_v23  ;;  %v4602_v28 = vrot.slane %v4600_v14, 4  ;;  %v4605_v33 = vrot.slane %v4603_v13, 5  ;;  %v4598_v22 = vsel %vm10830_vm14, %v4593_v19, %v4597_v29  ;;  %v9223_v36 = vrot.slane %v4672_v47, 9  ;;  %v10416_v47 = vld [vmem:[%s12991_s3 + $0x158] sm:$0xff] }
 0x4d6   : > { %v4493_v30 = vrot.slane %v4491_v4, 7  ;;  %v4433_v53 = vadd.f32 %v4432_v3, %v4404_v20  ;;  %v4736_v50 = vunpack.c.l.b16 %v4598_v22  ;;  %v4378_v7 = vadd.f32 %v11957_v6, %v4377_v15  ;;  %v4435_v23 = vpop.f32.mrf.mxu1  ;;  %v10417_v20 = vld [vmem:[%s12991_s3 + $0x160] sm:$0xff] }
 0x4d7   : > { %v4606_v57 = vor.u32 %v4605_v33, %v4602_v28  ;;  %v5120_v15 = vunpack.c.l.b16 %v12025_v8 }
 0x4d8   : > { %v4496_v46 = vor.u32 %v4494_v43, %v4493_v30  ;;  %v4445_v25 = vmax.f32 %v4433_v53, 0.0  ;;  %v4743_v40 = vpack.c.b16 %v4736_v50, %v4735_v0  ;;  %v4497_v13 = vrot.slane %v4493_v30, 4  ;;  %5385 = vmatpush.bf16.msra.mxu2 %v10417_v20 }
 0x4d9   : > { %v4607_v28 = vrot.slane %v4606_v57, 4  ;;  %v4553_v57 = vld [vmem:[#allocation2 + $0x20] sm:$0x1] }
 0x4da   : > { %v4550_v24 = vsel %vm10759_vm8, %v4496_v46, %v4549_v56  ;;  %v4453_v59 = vpack.c.bf16 %v4445_v25, %v4445_v25  ;;  %v10378_v3 = vld [vmem:[#allocation2 + $0xc] sm:$0xff]  ;;  %5002 = vmatmul.bf16.vlgmr.msra.gmra.mxu3 %v4743_v40  ;;  %v4379_v30 = vpop.f32.mrf.mxu3 }
 0x4db   : > { %v4566_v35 = vld [vmem:[#allocation2 + $0x10] sm:$0xf]  ;;  %4551 = vst [vmem:[#allocation2 + $0x18] sm:$0xf] %v4550_v24  ;;  %v4406_v10 = vpop.f32.mrf.mxu0  ;;  %v4572_v27 = vld [vmem:[#allocation2 + $0x14] sm:$0x1]  ;;  %4978 = vmatmul.bf16.gmra.mxu2 %v10378_v3  ;;  %v4380_v24 = vadd.f32 %v11957_v6, %v4379_v30 }
 0x4dc   : > { %v4696_v45 = vrot.slane %v4566_v35, 5  ;;  %v4609_v14 = vshll.u32 %v4566_v35, 16  ;;  %v4499_v18 = vshrl.u32 %v4453_v59, 16  ;;  %v4407_v4 = vadd.f32 %v4406_v10, %v4378_v7  ;;  %5386 = vmatpush.bf16.msra.mxu2 %v10416_v47  ;;  %v10414_v30 = vld [vmem:[%s12991_s3 + $0x148] sm:$0xff] }
 0x4dd   : > { %v4699_v29 = vrot.slane %v4572_v27, 5  ;;  %v4502_v26 = vshll.u32 %v4453_v59, 16  ;;  %v4613_v53 = vshrl.u32 %v4566_v35, 16  ;;  %v5121_v25 = vunpack.c.l.b16 %v4453_v59 }
 0x4de   : > { %v4697_v42 = vsel %vm10811_vm13, %v9223_v36, %v4696_v45  ;;  %v4698_v19 = vrot.slane %v4696_v45, 4  ;;  %v4501_v33 = vrot.slane %v4499_v18, 7  ;;  %v4436_v43 = vadd.f32 %v4435_v23, %v4407_v4 }
 0x4df   : > { %v4753_v8 = vunpack.c.l.b16 %v4697_v42  ;;  %v4611_v46 = vrot.slane %v4609_v14, 5  ;;  %v4615_v7 = vrot.slane %v4613_v53, 4  ;;  %v4619_v40 = vshll.u32 %v4572_v27, 16  ;;  %v10415_v14 = vld [vmem:[%s12991_s3 + $0x150] sm:$0xff]  ;;  %v4437_v42 = vpop.f32.mrf.mxu1 }
 0x4e0   : > { %v4700_v22 = vsel %vm10811_vm13, %v4698_v19, %v4699_v29  ;;  %v4504_v0 = vor.u32 %v4502_v26, %v4501_v33  ;;  %v4506_v50 = vrot.slane %v4501_v33, 4  ;;  %v4446_v56 = vmax.f32 %v4436_v43, 0.0  ;;  %5387 = vmatpush.bf16.msra.mxu2 %v10415_v14 }
 0x4e1   : > { %v4754_v36 = vunpack.c.l.b16 %v4700_v22  ;;  %v12054_v3 = vpack.c.b16 %v5121_v25, %v5120_v15  ;;  %v4616_v27 = vor.u32 %v4615_v7, %v4611_v46  ;;  %v4612_v20 = vsel %vm10830_vm14, %v4607_v28, %v4611_v46 }
 0x4e2   : > { %v4505_v35 = vsel %vm10750_vm7, %v4497_v13, %v4504_v0  ;;  %v4554_v23 = vsel %vm10708_vm3, %v4506_v50, %v4553_v57  ;;  %v12060_v10 = vpack.c.bf16 %v4446_v56, %v4446_v56  ;;  %v4567_v45 = vld [vmem:[#allocation2 + $0x18] sm:$0xf]  ;;  %v4621_v29 = vrot.slane %v4619_v40, 5  ;;  %v4556_v50 = vld [vmem:[#allocation2 + $0x24] sm:$0xf] }
 0x4e3   : > { %v4760_v59 = vpack.c.b16 %v4754_v36, %v4753_v8  ;;  %4552 = vst [vmem:[#allocation2 + $0x1c] sm:$0xf] %v4505_v35  ;;  %v4408_v6 = vpop.f32.mrf.mxu0  ;;  %v4624_v18 = vshrl.u32 %v4567_v45, 16  ;;  %v4627_v15 = vshll.u32 %v4567_v45, 16  ;;  %v4617_v19 = vrot.slane %v4616_v27, 4 }
 0x4e4   : > { %4555 = vst [vmem:[#allocation2 + $0x20] sm:$0x1] %v4554_v23  ;;  %v4508_v4 = vshrl.u32 %v12060_v10, 16  ;;  %v4409_v13 = vadd.f32 %v4408_v6, %v4380_v24  ;;  %v4511_v26 = vshll.u32 %v12060_v10, 16  ;;  %v4737_v47 = vunpack.c.l.b16 %v4612_v20  ;;  %v4673_v22 = vld [vmem:[#allocation2 + $0x18] sm:$0xe]  ;;  %5388 = vmatpush.bf16.msra.mxu2 %v10414_v30 }
 0x4e5   : > { %5036 = vmatmul.bf16.gmra.mxu0 %v4760_v59  ;;  %v4622_v53 = vsel %vm10830_vm14, %v4617_v19, %v4621_v29  ;;  %v4626_v8 = vrot.slane %v4624_v18, 4  ;;  %v4629_v0 = vrot.slane %v4627_v15, 5  ;;  %v9224_v40 = vrot.slane %v4673_v22, 9  ;;  %v10413_v18 = vld [vmem:[%s12991_s3 + $0x140] sm:$0xff] }
 0x4e6   : > { %v4510_v33 = vrot.slane %v4508_v4, 7  ;;  %v4438_v43 = vadd.f32 %v4437_v42, %v4409_v13  ;;  %v4738_v25 = vunpack.c.l.b16 %v4622_v53 }
 0x4e7   : > { %v4630_v6 = vor.u32 %v4629_v0, %v4626_v8 }
 0x4e8   : > { %v4513_v28 = vor.u32 %v4511_v26, %v4510_v33  ;;  %v4447_v46 = vmax.f32 %v4438_v43, 0.0  ;;  %v4744_v57 = vpack.c.b16 %v4738_v25, %v4737_v47  ;;  %5389 = vmatpush.bf16.msra.mxu2 %v10413_v18  ;;  %v5122_v26 = vunpack.c.l.b16 %v12060_v10  ;;  %v4560_v25 = vld [vmem:[#allocation2 + $0x2c] sm:$0x1] }
 0x4e9   : > { %v4514_v43 = vrot.slane %v4510_v33, 4  ;;  %v4631_v0 = vrot.slane %v4630_v6, 4 }
 0x4ea   : > { %v4557_v56 = vsel %vm10759_vm8, %v4513_v28, %v4556_v50  ;;  %v4455_v36 = vpack.c.bf16 %v4447_v46, %v4447_v46  ;;  %v10379_v24 = vld [vmem:[#allocation2 + $0x18] sm:$0xff]  ;;  %5007 = vmatmul.bf16.gmra.mxu3 %v4744_v57 }
 0x4eb   : > { %v4568_v7 = vld [vmem:[#allocation2 + $0x1c] sm:$0xf]  ;;  %4558 = vst [vmem:[#allocation2 + $0x24] sm:$0xf] %v4557_v56  ;;  %v4573_v35 = vld [vmem:[#allocation2 + $0x20] sm:$0x1]  ;;  %4983 = vmatmul.bf16.gmra.mxu2 %v10379_v24 }
 0x4ec   : > { %v4703_v23 = vrot.slane %v4568_v7, 5  ;;  %v4633_v59 = vshll.u32 %v4568_v7, 16  ;;  %v4516_v45 = vshrl.u32 %v4455_v36, 16  ;;  %v4706_v14 = vrot.slane %v4573_v35, 5 }
 0x4ed   : > { %v4637_v27 = vshrl.u32 %v4568_v7, 16  ;;  %v4643_v15 = vshll.u32 %v4573_v35, 16  ;;  %v4519_v19 = vshll.u32 %v4455_v36, 16  ;;  %v5123_v47 = vunpack.c.l.b16 %v4455_v36 }
 0x4ee   : > { %v4704_v4 = vsel %vm10811_vm13, %v9224_v40, %v4703_v23  ;;  %v4705_v13 = vrot.slane %v4703_v23, 4  ;;  %v4635_v20 = vrot.slane %v4633_v59, 5  ;;  %v4518_v42 = vrot.slane %v4516_v45, 7 }
 0x4ef   : > { %v4639_v29 = vrot.slane %v4637_v27, 4  ;;  %v4755_v53 = vunpack.c.l.b16 %v4704_v4  ;;  %v4645_v50 = vrot.slane %v4643_v15, 5  ;;  %v12084_v56 = vpack.c.b16 %v5123_v47, %v5122_v26 }
 0x4f0   : > { %v4707_v30 = vsel %vm10811_vm13, %v4705_v13, %v4706_v14  ;;  %v4521_v22 = vor.u32 %v4519_v19, %v4518_v42  ;;  %v4523_v8 = vrot.slane %v4518_v42, 4  ;;  %v4636_v36 = vsel %vm10830_vm14, %v4631_v0, %v4635_v20 }
 0x4f1   : > { %v4756_v28 = vunpack.c.l.b16 %v4707_v30  ;;  %v4640_v46 = vor.u32 %v4639_v29, %v4635_v20  ;;  %v4739_v45 = vunpack.c.l.b16 %v4636_v36 }
 0x4f2   : > { %v4522_v57 = vsel %vm10750_vm7, %v4514_v43, %v4521_v22  ;;  %v4561_v10 = vsel %vm10708_vm3, %v4523_v8, %v4560_v25  ;;  %v4569_v7 = vld [vmem:[#allocation2 + $0x24] sm:$0xf] }
 0x4f3   : > { %v4761_v33 = vpack.c.b16 %v4756_v28, %v4755_v53  ;;  %v4641_v24 = vrot.slane %v4640_v46, 4  ;;  %4559 = vst [vmem:[#allocation2 + $0x28] sm:$0xf] %v4522_v57  ;;  %v4648_v35 = vshrl.u32 %v4569_v7, 16  ;;  %v4651_v23 = vshll.u32 %v4569_v7, 16 }
 0x4f4   : > { %4562 = vst [vmem:[#allocation2 + $0x2c] sm:$0x1] %v4561_v10  ;;  %v4674_v6 = vld [vmem:[#allocation2 + $0x24] sm:$0xe] }
 0x4f5   : > { %5041 = vmatmul.bf16.gmra.mxu0 %v4761_v33  ;;  %v4646_v40 = vsel %vm10830_vm14, %v4641_v24, %v4645_v50  ;;  %v4650_v27 = vrot.slane %v4648_v35, 4  ;;  %v4653_v18 = vrot.slane %v4651_v23, 5  ;;  %v9225_v42 = vrot.slane %v4674_v6, 9  ;;  %v10428_v23 = vld [vmem:[%s12991_s3 + $0x1b8] sm:$0xff]  ;;  %v10422_v6 = vld [vmem:[%s12991_s3 + $0x188] sm:$0xff] }
 0x4f6   : > { %v4740_v59 = vunpack.c.l.b16 %v4646_v40  ;;  %5411 = vmatpush.bf16.msrb.mxu3 %v10428_v23 }
 0x4f7   : > { %v4654_v43 = vor.u32 %v4653_v18, %v4650_v27 }
 0x4f8   : > { %v4745_v14 = vpack.c.b16 %v4740_v59, %v4739_v45  ;;  %v10427_v59 = vld [vmem:[%s12991_s3 + $0x1b0] sm:$0xff]  ;;  %v10426_v45 = vld [vmem:[%s12991_s3 + $0x1a8] sm:$0xff] }
 0x4f9   : > { %v4655_v50 = vrot.slane %v4654_v43, 4 }
 0x4fa   : > { %v10380_v4 = vld [vmem:[#allocation2 + $0x24] sm:$0xff]  ;;  %5012 = vmatmul.bf16.gmra.mxu3 %v4745_v14  ;;  %v10424_v14 = vld [vmem:[%s12991_s3 + $0x198] sm:$0xff] }
 0x4fb   : > { %v4570_v13 = vld [vmem:[#allocation2 + $0x28] sm:$0xf]  ;;  %v4574_v15 = vld [vmem:[#allocation2 + $0x2c] sm:$0x1]  ;;  %4988 = vmatmul.bf16.gmra.mxu2 %v10380_v4  ;;  %5412 = vmatpush.bf16.msrb.mxu3 %v10427_v59 }
 0x4fc   : > { %v4710_v19 = vrot.slane %v4570_v13, 5  ;;  %v4657_v29 = vshll.u32 %v4570_v13, 16  ;;  %v4661_v20 = vshrl.u32 %v4570_v13, 16  ;;  %v4713_v26 = vrot.slane %v4574_v15, 5  ;;  %v12133_v13 = vld [vmem:[%s12990_s2 + $0x6] ss:$0 sm:$0xff] }
 0x4fd   : > { %v4667_v30 = vshll.u32 %v4574_v15, 16 }
 0x4fe   : > { %v4711_v53 = vsel %vm10811_vm13, %v9225_v42, %v4710_v19  ;;  %v4712_v47 = vrot.slane %v4710_v19, 4  ;;  %v4659_v22 = vrot.slane %v4657_v29, 5  ;;  %v4663_v8 = vrot.slane %v4661_v20, 4 }
 0x4ff   : > { %v4757_v25 = vunpack.c.l.b16 %v4711_v53  ;;  %v4669_v10 = vrot.slane %v4667_v30, 5  ;;  %5413 = vmatpush.bf16.msrb.mxu3 %v10426_v45 }
 0x500   : > { %v4714_v28 = vsel %vm10811_vm13, %v4712_v47, %v4713_v26  ;;  %v4664_v46 = vor.u32 %v4663_v8, %v4659_v22  ;;  %v4660_v24 = vsel %vm10830_vm14, %v4655_v50, %v4659_v22 }
 0x501   : > { %v4758_v0 = vunpack.c.l.b16 %v4714_v28  ;;  %v4741_v40 = vunpack.c.l.b16 %v4660_v24 }
 0x502   : > { %v4665_v57 = vrot.slane %v4664_v46, 4 }
 0x503   : > { %v4762_v33 = vpack.c.b16 %v4758_v0, %v4757_v25 }
 0x504   : > { %v4670_v7 = vsel %vm10830_vm14, %v4665_v57, %v4669_v10 }
 0x505   : > { %5046 = vmatmul.bf16.gmra.mxu0 %v4762_v33  ;;  %v4742_v36 = vunpack.c.l.b16 %v4670_v7 }
 0x507   : > { %v4746_v35 = vpack.c.b16 %v4742_v36, %v4741_v40 }
 0x50a   : > { %5017 = vmatmul.bf16.gmra.mxu3 %v4746_v35 }
 0x50b   : > { %5390 = vmatmul.bf16.vlgmr.msra.gmra.mxu2 %v11992_v58  ;;  %v10425_v58 = vld [vmem:[%s12991_s3 + $0x1a0] sm:$0xff] }
 0x50c   : > { %5414 = vmatpush.bf16.msrb.mxu3 %v10425_v58 }
 0x510   : > { %5415 = vmatpush.bf16.msrb.mxu3 %v10424_v14 }
 0x51b   : > { %5395 = vmatmul.bf16.gmra.mxu2 %v12019_v5  ;;  %v10423_v5 = vld [vmem:[%s12991_s3 + $0x190] sm:$0xff] }
 0x51c   : > { %5416 = vmatpush.bf16.msrb.mxu3 %v10423_v5 }
 0x520   : > { %5417 = vmatpush.bf16.msrb.mxu3 %v10422_v6 }
 0x52b   : > { %5400 = vmatmul.bf16.gmra.mxu2 %v12054_v3  ;;  %v10421_v3 = vld [vmem:[%s12991_s3 + $0x180] sm:$0xff] }
 0x52c   : > { %5418 = vmatpush.bf16.msrb.mxu3 %v10421_v3 }
 0x53b   : > { %5405 = vmatmul.bf16.gmra.mxu2 %v12084_v56 }
 0x54e   : > { %v4974_v27 = vpop.f32.mrf.mxu2 }
 0x54f   : > { %v4975_v56 = vadd.f32 %v12133_v13, %v4974_v27 }
 0x552   : > { %v5032_v18 = vpop.f32.mrf.mxu0 }
 0x556   : > { %v4976_v4 = vpop.f32.mrf.mxu2 }
 0x557   : > { %v4977_v43 = vadd.f32 %v12133_v13, %v4976_v4 }
 0x55a   : > { %v5034_v15 = vpop.f32.mrf.mxu0 }
 0x55d   : > { %v5003_v42 = vpop.f32.mrf.mxu3 }
 0x55e   : > { %v5004_v19 = vadd.f32 %v5003_v42, %v4975_v56  ;;  %v4979_v29 = vpop.f32.mrf.mxu2 }
 0x55f   : > { %v4980_v50 = vadd.f32 %v12133_v13, %v4979_v29 }
 0x560   : > { %v5033_v20 = vadd.f32 %v5032_v18, %v5004_v19 }
 0x562   : > { %v5052_v26 = vmax.f32 %v5033_v20, 0.0  ;;  %v5037_v53 = vpop.f32.mrf.mxu0 }
 0x564   : > { %v5060_v30 = vpack.c.bf16 %v5052_v26, %v5052_v26 }
 0x565   : > { %v5005_v47 = vpop.f32.mrf.mxu3 }
 0x566   : > { %v5006_v22 = vadd.f32 %v5005_v47, %v4977_v43  ;;  %v5068_v8 = vunpack.c.l.bf16 %v5060_v30  ;;  %v4981_v46 = vpop.f32.mrf.mxu2  ;;  %v5140_v33 = vunpack.c.l.b16 %v5060_v30 }
 0x567   : > { %v4982_v27 = vadd.f32 %v12133_v13, %v4981_v46 }
 0x568   : > { %v5035_v28 = vadd.f32 %v5034_v15, %v5006_v22  ;;  %v5076_v0 = vadd.f32 %v5068_v8, %v11603_v32 }
 0x56a   : > { %v5053_v25 = vmax.f32 %v5035_v28, 0.0  ;;  %v5039_v40 = vpop.f32.mrf.mxu0  ;;  %v7571_v35 = vpack.c.bf16 %v5076_v0, %v5076_v0 }
 0x56c   : > { %v5061_v57 = vpack.c.bf16 %v5053_v25, %v5053_v25  ;;  %v12140_v6 = vunpack.c.l.b16 %v7571_v35 }
 0x56d   : > { %v5008_v10 = vpop.f32.mrf.mxu3 }
 0x56e   : > { %v5069_v24 = vunpack.c.l.bf16 %v5061_v57  ;;  %v5141_v7 = vunpack.c.l.b16 %v5061_v57  ;;  %v5009_v36 = vadd.f32 %v5008_v10, %v4980_v50  ;;  %v4984_v5 = vpop.f32.mrf.mxu2 }
 0x56f   : > { %v4985_v29 = vadd.f32 %v12133_v13, %v4984_v5 }
 0x570   : > { %v5077_v23 = vadd.f32 %v5069_v24, %v11617_v21  ;;  %v5148_v59 = vpack.c.b16 %v5141_v7, %v5140_v33  ;;  %v5038_v45 = vadd.f32 %v5037_v53, %v5009_v36 }
 0x572   : > { %v7572_v58 = vpack.c.bf16 %v5077_v23, %v5077_v23  ;;  %v5054_v14 = vmax.f32 %v5038_v45, 0.0  ;;  %5419 = vmatmul.bf16.vlgmr.msrb.gmra.mxu3 %v5148_v59  ;;  %v5042_v42 = vpop.f32.mrf.mxu0 }
 0x574   : > { %v12142_v32 = vunpack.c.l.b16 %v7572_v58  ;;  %v5062_v3 = vpack.c.bf16 %v5054_v14, %v5054_v14 }
 0x575   : > { %v5010_v18 = vpop.f32.mrf.mxu3 }
 0x576   : > { %v5011_v15 = vadd.f32 %v5010_v18, %v4982_v27  ;;  %v5070_v21 = vunpack.c.l.bf16 %v5062_v3  ;;  %v4986_v26 = vpop.f32.mrf.mxu2  ;;  %v5142_v53 = vunpack.c.l.b16 %v5062_v3 }
 0x577   : > { %v4987_v33 = vadd.f32 %v12133_v13, %v4986_v26 }
 0x578   : > { %v5040_v56 = vadd.f32 %v5039_v40, %v5011_v15  ;;  %v5078_v30 = vadd.f32 %v5070_v21, %v11625_v48 }
 0x57a   : > { %v5055_v19 = vmax.f32 %v5040_v56, 0.0  ;;  %v7573_v0 = vpack.c.bf16 %v5078_v30, %v5078_v30  ;;  %v5044_v10 = vpop.f32.mrf.mxu0 }
 0x57c   : > { %v5063_v20 = vpack.c.bf16 %v5055_v19, %v5055_v19  ;;  %v12153_v48 = vunpack.c.l.b16 %v7573_v0 }
 0x57d   : > { %v5013_v43 = vpop.f32.mrf.mxu3 }
 0x57e   : > { %v5071_v47 = vunpack.c.l.bf16 %v5063_v20  ;;  %v5014_v22 = vadd.f32 %v5013_v43, %v4985_v29  ;;  %v5143_v8 = vunpack.c.l.b16 %v5063_v20  ;;  %v4989_v35 = vpop.f32.mrf.mxu2 }
 0x57f   : > { %v4990_v58 = vadd.f32 %v12133_v13, %v4989_v35 }
 0x580   : > { %v5043_v28 = vadd.f32 %v5042_v42, %v5014_v22  ;;  %v5149_v46 = vpack.c.b16 %v5143_v8, %v5142_v53  ;;  %v5079_v25 = vadd.f32 %v5071_v47, %v11639_v11 }
 0x582   : > { %v5056_v50 = vmax.f32 %v5043_v28, 0.0  ;;  %5424 = vmatmul.bf16.gmra.mxu3 %v5149_v46  ;;  %v7574_v57 = vpack.c.bf16 %v5079_v25, %v5079_v25  ;;  %v5047_v5 = vpop.f32.mrf.mxu0 }
 0x584   : > { %v12151_v24 = vunpack.c.l.b16 %v7574_v57  ;;  %v5064_v7 = vpack.c.bf16 %v5056_v50, %v5056_v50 }
 0x585   : > { %v5015_v36 = vpop.f32.mrf.mxu3 }
 0x586   : > { %v5016_v40 = vadd.f32 %v5015_v36, %v4987_v33  ;;  %v5072_v11 = vunpack.c.l.bf16 %v5064_v7  ;;  %v5144_v18 = vunpack.c.l.b16 %v5064_v7  ;;  %v4991_v20 = vpop.f32.mrf.mxu2 }
 0x587   : > { %v4992_v53 = vadd.f32 %v12133_v13, %v4991_v20  ;;  %v10452_v20 = vld [vmem:[%s12989_s1 + $0x5d8] sm:$0xff] }
 0x588   : > { %v5045_v59 = vadd.f32 %v5044_v10, %v5016_v40  ;;  %v5080_v3 = vadd.f32 %v5072_v11, %v11650_v51 }
 0x58a   : > { %v5057_v45 = vmax.f32 %v5045_v59, 0.0  ;;  %v7575_v26 = vpack.c.bf16 %v5080_v3, %v5080_v3  ;;  %v5049_v46 = vpop.f32.mrf.mxu0  ;;  %v10447_v3 = vld [vmem:[%s12989_s1 + $0x5b0] sm:$0xff] }
 0x58c   : > { %v5065_v14 = vpack.c.bf16 %v5057_v45, %v5057_v45  ;;  %v12163_v51 = vunpack.c.l.b16 %v7575_v26  ;;  %v10436_v26 = vld [vmem:[%s12989_s1 + $0x558] sm:$0xff] }
 0x58d   : > { %v5018_v27 = vpop.f32.mrf.mxu3 }
 0x58e   : > { %v5073_v15 = vunpack.c.l.bf16 %v5065_v14  ;;  %v5019_v56 = vadd.f32 %v5018_v27, %v4990_v58  ;;  %v5145_v21 = vunpack.c.l.b16 %v5065_v14  ;;  %v10456_v58 = vld [vmem:[%s12989_s1 + $0x5f8] sm:$0xff]  ;;  %v10439_v27 = vld [vmem:[%s12989_s1 + $0x570] sm:$0xff] }
 0x58f   : > { %v10448_v14 = vld [vmem:[%s12989_s1 + $0x5b8] sm:$0xff]  ;;  %6015 = vmatpush.bf16.msrb.mxu2 %v10456_v58 }
 0x590   : > { %v5048_v42 = vadd.f32 %v5047_v5, %v5019_v56  ;;  %v5150_v19 = vpack.c.b16 %v5145_v21, %v5144_v18  ;;  %v5081_v29 = vadd.f32 %v5073_v15, %v11663_v52  ;;  %v10455_v5 = vld [vmem:[%s12989_s1 + $0x5f0] sm:$0xff]  ;;  %5986 = vmatpush.bf16.msrb.mxu1 %v10448_v14  ;;  %v10454_v18 = vld [vmem:[%s12989_s1 + $0x5e8] sm:$0xff]  ;;  %v10453_v21 = vld [vmem:[%s12989_s1 + $0x5e0] sm:$0xff] }
 0x591   : > { %v10438_v15 = vld [vmem:[%s12989_s1 + $0x568] sm:$0xff] }
 0x592   : > { %v5058_v43 = vmax.f32 %v5048_v42, 0.0  ;;  %5429 = vmatmul.bf16.gmra.mxu3 %v5150_v19  ;;  %v7576_v30 = vpack.c.bf16 %v5081_v29, %v5081_v29  ;;  %v10446_v56 = vld [vmem:[%s12989_s1 + $0x5a8] sm:$0xff]  ;;  %v10437_v42 = vld [vmem:[%s12989_s1 + $0x560] sm:$0xff]  ;;  %v5362_v19 = vpop.f32.mrf.mxu1 }
 0x593   : > { %6016 = vmatpush.bf16.msrb.mxu2 %v10455_v5  ;;  %v10445_v29 = vld [vmem:[%s12989_s1 + $0x5a0] sm:$0xff] }
 0x594   : > { %v5066_v47 = vpack.c.bf16 %v5058_v43, %v5058_v43  ;;  %v12161_v22 = vunpack.c.l.b16 %v7576_v30  ;;  %5987 = vmatpush.bf16.msrb.mxu1 %v10447_v3  ;;  %v5391_v43 = vpop.f32.mrf.mxu2  ;;  %v10435_v30 = vld [vmem:[%s12989_s1 + $0x550] sm:$0xff]  ;;  %v10441_v5 = vld [vmem:[%s12989_s1 + $0x580] sm:$0xff] }
 0x595   : > { %v5020_v8 = vpop.f32.mrf.mxu3 }
 0x596   : > { %v5021_v28 = vadd.f32 %v5020_v8, %v4992_v53  ;;  %v5074_v0 = vunpack.c.l.bf16 %v5066_v47  ;;  %v5146_v33 = vunpack.c.l.b16 %v5066_v47  ;;  %v10444_v47 = vld [vmem:[%s12989_s1 + $0x598] sm:$0xff]  ;;  %v10451_v8 = vld [vmem:[%s12989_s1 + $0x5d0] sm:$0xff] }
 0x597   : > { %6017 = vmatpush.bf16.msrb.mxu2 %v10454_v18 }
 0x598   : > { %v5050_v52 = vadd.f32 %v5049_v46, %v5021_v28  ;;  %v5082_v10 = vadd.f32 %v5074_v0, %v11674_v41  ;;  %v10440_v41 = vld [vmem:[%s12989_s1 + $0x578] sm:$0xff]  ;;  %5988 = vmatpush.bf16.msrb.mxu1 %v10446_v56  ;;  %v10434_v28 = vld [vmem:[%s12989_s1 + $0x548] sm:$0xff]  ;;  %v12232_v0 = vld [vmem:[%s12992_s4 + $0x1] ss:$0 sm:$0xff] }
 0x599   : > { %5957 = vmatpush.bf16.msrb.mxu0 %v10440_v41 }
 0x59a   : > { %v5059_v50 = vmax.f32 %v5050_v52, 0.0  ;;  %v7577_v35 = vpack.c.bf16 %v5082_v10, %v5082_v10  ;;  %v5364_v53 = vpop.f32.mrf.mxu1  ;;  %v10433_v52 = vld [vmem:[%s12989_s1 + $0x540] sm:$0xff]  ;;  %v5363_v10 = vadd.f32 %v12232_v0, %v5362_v19 }
 0x59b   : > { %6018 = vmatpush.bf16.msrb.mxu2 %v10453_v21  ;;  %v5365_v41 = vadd.f32 %v12232_v0, %v5364_v53 }
 0x59c   : > { %v5067_v57 = vpack.c.bf16 %v5059_v50, %v5059_v50  ;;  %v12169_v11 = vunpack.c.l.b16 %v7577_v35  ;;  %5989 = vmatpush.bf16.msrb.mxu1 %v10445_v29  ;;  %v5393_v46 = vpop.f32.mrf.mxu2  ;;  %v10443_v50 = vld [vmem:[%s12989_s1 + $0x590] sm:$0xff]  ;;  %v10442_v35 = vld [vmem:[%s12989_s1 + $0x588] sm:$0xff] }
 0x59d   : > { %5958 = vmatpush.bf16.msrb.mxu0 %v10439_v27  ;;  %v5394_v3 = vadd.f32 %v5393_v46, %v5365_v41 }
 0x59e   : > { %v5075_v7 = vunpack.c.l.bf16 %v5067_v57  ;;  %v5147_v13 = vunpack.c.l.b16 %v5067_v57  ;;  %v10450_v57 = vld [vmem:[%s12989_s1 + $0x5c8] sm:$0xff] }
 0x59f   : > { %6019 = vmatpush.bf16.msrb.mxu2 %v10452_v20 }
 0x5a0   : > { %v5151_v36 = vpack.c.b16 %v5147_v13, %v5146_v33  ;;  %v5083_v40 = vadd.f32 %v5075_v7, %v11686_v17  ;;  %5990 = vmatpush.bf16.msrb.mxu1 %v10444_v47  ;;  %v5392_v7 = vadd.f32 %v5391_v43, %v5363_v10  ;;  %v5531_v10 = vld [vmem:[#allocation2 + $0x8] sm:$0x1] }
 0x5a1   : > { %5959 = vmatpush.bf16.msrb.mxu0 %v10438_v15 }
 0x5a2   : > { %5434 = vmatmul.bf16.gmra.mxu3 %v5151_v36  ;;  %v7578_v59 = vpack.c.bf16 %v5083_v40, %v5083_v40  ;;  %v5367_v33 = vpop.f32.mrf.mxu1 }
 0x5a3   : > { %6020 = vmatpush.bf16.msrb.mxu2 %v10451_v8 }
 0x5a4   : > { %v12171_v45 = vunpack.c.l.b16 %v7578_v59  ;;  %5991 = vmatpush.bf16.msrb.mxu1 %v10443_v50  ;;  %v5396_v36 = vpop.f32.mrf.mxu2  ;;  %v10449_v59 = vld [vmem:[%s12989_s1 + $0x5c0] sm:$0xff] }
 0x5a5   : > { %5960 = vmatpush.bf16.msrb.mxu0 %v10437_v42 }
 0x5a7   : > { %6021 = vmatpush.bf16.msrb.mxu2 %v10450_v57 }
 0x5a8   : > { %5992 = vmatpush.bf16.msrb.mxu1 %v10442_v35 }
 0x5a9   : > { %5961 = vmatpush.bf16.msrb.mxu0 %v10436_v26  ;;  %v5368_v26 = vadd.f32 %v12232_v0, %v5367_v33 }
 0x5aa   : > { %v5369_v27 = vpop.f32.mrf.mxu1 }
 0x5ab   : > { %6022 = vmatpush.bf16.msrb.mxu2 %v10449_v59  ;;  %v5370_v59 = vadd.f32 %v12232_v0, %v5369_v27 }
 0x5ac   : > { %5993 = vmatpush.bf16.msrb.mxu1 %v10441_v5  ;;  %v5398_v19 = vpop.f32.mrf.mxu2 }
 0x5ad   : > { %5962 = vmatpush.bf16.msrb.mxu0 %v10435_v30  ;;  %v5397_v30 = vadd.f32 %v5396_v36, %v5368_v26  ;;  %v5534_v26 = vld [vmem:[#allocation2 + $0xc] sm:$0xf] }
 0x5b1   : > { %5963 = vmatpush.bf16.msrb.mxu0 %v10434_v28 }
 0x5b2   : > { %v5372_v28 = vpop.f32.mrf.mxu1 }
 0x5b5   : > { %5964 = vmatpush.bf16.msrb.mxu0 %v10433_v52 }
 0x5f5   : > { %v5420_v13 = vpop.f32.mrf.mxu3 }
 0x5f6   : > { %v12244_v40 = vadd.f32 %v5420_v13, %v5392_v7 }
 0x5f8   : > { %v5440_v58 = vpack.c.bf16 %v12244_v40, %v12244_v40 }
 0x5fa   : > { %v5449_v14 = vshrl.u32 %v5440_v58, 16  ;;  %v5452_v15 = vshll.u32 %v5440_v58, 16  ;;  %v5401_v58 = vpop.f32.mrf.mxu2 }
 0x5fc   : > { %v5451_v18 = vrot.slane %v5449_v14, 7  ;;  %v5399_v14 = vadd.f32 %v5398_v19, %v5370_v59 }
 0x5fd   : > { %v5422_v56 = vpop.f32.mrf.mxu3 }
 0x5fe   : > { %v5454_v21 = vor.u32 %v5452_v15, %v5451_v18  ;;  %v12258_v42 = vadd.f32 %v5422_v56, %v5394_v3  ;;  %v5455_v46 = vrot.slane %v5451_v18, 4 }
 0x600   : > { %v5528_v29 = vsel %vm10759_vm8, %v5454_v21, %v12001_v31  ;;  %v5441_v20 = vpack.c.bf16 %v12258_v42, %v12258_v42 }
 0x601   : > { %5529 = vst [vmem:[#allocation2] sm:$0xf] %v5528_v29 }
 0x602   : > { %v5457_v43 = vshrl.u32 %v5441_v20, 16  ;;  %v5460_v47 = vshll.u32 %v5441_v20, 16 }
 0x604   : > { %v5459_v53 = vrot.slane %v5457_v43, 7  ;;  %v5373_v43 = vadd.f32 %v12232_v0, %v5372_v28 }
 0x605   : > { %v5425_v8 = vpop.f32.mrf.mxu3 }
 0x606   : > { %v5462_v52 = vor.u32 %v5460_v47, %v5459_v53  ;;  %v5464_v50 = vrot.slane %v5459_v53, 4  ;;  %v12266_v57 = vadd.f32 %v5425_v8, %v5397_v30  ;;  %v5374_v30 = vpop.f32.mrf.mxu1 }
 0x608   : > { %v5463_v31 = vsel %vm10750_vm7, %v5455_v46, %v5462_v52  ;;  %v5532_v7 = vsel %vm10708_vm3, %v5464_v50, %v5531_v10  ;;  %v5442_v33 = vpack.c.bf16 %v12266_v57, %v12266_v57  ;;  %v12274_v13 = vld [vmem:[#allocation2] sm:$0xf] }
 0x609   : > { %5530 = vst [vmem:[#allocation2 + $0x4] sm:$0xf] %v5463_v31  ;;  %v5568_v36 = vshrl.u32 %v12274_v13, 16  ;;  %v5571_v35 = vshll.u32 %v12274_v13, 16  ;;  %v5663_v15 = vld [vmem:[#allocation2] sm:$0xe]  ;;  %v5402_v31 = vadd.f32 %v5401_v58, %v5373_v43 }
 0x60a   : > { %5533 = vst [vmem:[#allocation2 + $0x8] sm:$0x1] %v5532_v7  ;;  %v5466_v41 = vshrl.u32 %v5442_v33, 16  ;;  %v5469_v3 = vshll.u32 %v5442_v33, 16  ;;  %v9484_v8 = vrot.slane %v5663_v15, 9 }
 0x60b   : > { %v5570_v56 = vrot.slane %v5568_v36, 4  ;;  %v5573_v21 = vrot.slane %v5571_v35, 5 }
 0x60c   : > { %v5468_v5 = vrot.slane %v5466_v41, 7  ;;  %v5403_v41 = vpop.f32.mrf.mxu2 }
 0x60d   : > { %v5427_v18 = vpop.f32.mrf.mxu3  ;;  %v5574_v50 = vor.u32 %v5573_v21, %v5570_v56 }
 0x60e   : > { %v5471_v29 = vor.u32 %v5469_v3, %v5468_v5  ;;  %v12279_v20 = vadd.f32 %v5427_v18, %v5399_v14  ;;  %v5472_v14 = vrot.slane %v5468_v5, 4 }
 0x60f   : > { %v5575_v58 = vrot.slane %v5574_v50, 4 }
 0x610   : > { %v5535_v27 = vsel %vm10759_vm8, %v5471_v29, %v5534_v26  ;;  %v5443_v53 = vpack.c.bf16 %v12279_v20, %v12279_v20  ;;  %v10429_v19 = vld [vmem:[#allocation2] sm:$0xff] }
 0x611   : > { %v5556_v47 = vld [vmem:[#allocation2 + $0x4] sm:$0xf]  ;;  %5536 = vst [vmem:[#allocation2 + $0xc] sm:$0xf] %v5535_v27  ;;  %v5563_v46 = vld [vmem:[#allocation2 + $0x8] sm:$0x1]  ;;  %5965 = vmatmul.bf16.vlgmr.msrb.gmra.mxu0 %v10429_v19 }
 0x612   : > { %v5681_v52 = vrot.slane %v5556_v47, 5  ;;  %v5577_v10 = vshll.u32 %v5556_v47, 16  ;;  %v5474_v7 = vshrl.u32 %v5443_v53, 16  ;;  %v5581_v33 = vshrl.u32 %v5556_v47, 16 }
 0x613   : > { %v5684_v35 = vrot.slane %v5563_v46, 5  ;;  %v5477_v18 = vshll.u32 %v5443_v53, 16  ;;  %v5587_v26 = vshll.u32 %v5563_v46, 16 }
 0x614   : > { %v5682_v28 = vsel %vm10811_vm13, %v9484_v8, %v5681_v52  ;;  %v5683_v36 = vrot.slane %v5681_v52, 4  ;;  %v5579_v59 = vrot.slane %v5577_v10, 5  ;;  %v5476_v3 = vrot.slane %v5474_v7, 7  ;;  %v5538_v52 = vld [vmem:[#allocation2 + $0x14] sm:$0x1] }
 0x615   : > { %v5583_v15 = vrot.slane %v5581_v33, 4  ;;  %v5430_v29 = vpop.f32.mrf.mxu3  ;;  %v5743_v21 = vunpack.c.l.b16 %v5682_v28  ;;  %v5375_v8 = vadd.f32 %v12232_v0, %v5374_v30  ;;  %v5589_v28 = vrot.slane %v5587_v26, 5 }
 0x616   : > { %v5685_v56 = vsel %vm10811_vm13, %v5683_v36, %v5684_v35  ;;  %v5479_v43 = vor.u32 %v5477_v18, %v5476_v3  ;;  %v5481_v27 = vrot.slane %v5476_v3, 4  ;;  %v12290_v19 = vadd.f32 %v5430_v29, %v5402_v31  ;;  %v5377_v35 = vpop.f32.mrf.mxu1 }
 0x617   : > { %v5744_v47 = vunpack.c.l.b16 %v5685_v56  ;;  %v5580_v5 = vsel %vm10830_vm14, %v5575_v58, %v5579_v59  ;;  %v5584_v53 = vor.u32 %v5583_v15, %v5579_v59  ;;  %v5404_v59 = vadd.f32 %v5403_v41, %v5375_v8 }
 0x618   : > { %v5480_v10 = vsel %vm10750_vm7, %v5472_v14, %v5479_v43  ;;  %v5539_v7 = vsel %vm10708_vm3, %v5481_v27, %v5538_v52  ;;  %v5444_v46 = vpack.c.bf16 %v12290_v19, %v12290_v19  ;;  %v5557_v31 = vld [vmem:[#allocation2 + $0xc] sm:$0xf]  ;;  %v5727_v29 = vunpack.c.l.b16 %v5580_v5 }
 0x619   : > { %v5751_v50 = vpack.c.b16 %v5744_v47, %v5743_v21  ;;  %5537 = vst [vmem:[#allocation2 + $0x10] sm:$0xf] %v5480_v10  ;;  %v5585_v33 = vrot.slane %v5584_v53, 4  ;;  %v5592_v30 = vshrl.u32 %v5557_v31, 16  ;;  %v5595_v36 = vshll.u32 %v5557_v31, 16  ;;  %v5406_v47 = vpop.f32.mrf.mxu2 }
 0x61a   : > { %5540 = vst [vmem:[#allocation2 + $0x14] sm:$0x1] %v5539_v7  ;;  %v5483_v3 = vshrl.u32 %v5444_v46, 16  ;;  %v5486_v15 = vshll.u32 %v5444_v46, 16  ;;  %v5664_v21 = vld [vmem:[#allocation2 + $0xc] sm:$0xe]  ;;  %v5378_v7 = vadd.f32 %v12232_v0, %v5377_v35 }
 0x61b   : > { %6023 = vmatmul.bf16.vlgmr.msrb.gmra.mxu2 %v5751_v50  ;;  %v5590_v14 = vsel %vm10830_vm14, %v5585_v33, %v5589_v28  ;;  %v5594_v43 = vrot.slane %v5592_v30, 4  ;;  %v5597_v27 = vrot.slane %v5595_v36, 5  ;;  %v5541_v10 = vld [vmem:[#allocation2 + $0x18] sm:$0xf]  ;;  %v9485_v50 = vrot.slane %v5664_v21, 9 }
 0x61c   : > { %v5485_v18 = vrot.slane %v5483_v3, 7  ;;  %v5728_v56 = vunpack.c.l.b16 %v5590_v14  ;;  %v5407_v36 = vadd.f32 %v5406_v47, %v5378_v7 }
 0x61d   : > { %v5432_v58 = vpop.f32.mrf.mxu3  ;;  %v5598_v28 = vor.u32 %v5597_v27, %v5594_v43 }
 0x61e   : > { %v5488_v26 = vor.u32 %v5486_v15, %v5485_v18  ;;  %v12303_v52 = vadd.f32 %v5432_v58, %v5404_v59  ;;  %v5735_v53 = vpack.c.b16 %v5728_v56, %v5727_v29  ;;  %v5379_v56 = vpop.f32.mrf.mxu1  ;;  %v5489_v58 = vrot.slane %v5485_v18, 4 }
 0x61f   : > { %v5599_v47 = vrot.slane %v5598_v28, 4 }
 0x620   : > { %v5542_v41 = vsel %vm10759_vm8, %v5488_v26, %v5541_v10  ;;  %v5445_v8 = vpack.c.bf16 %v12303_v52, %v12303_v52  ;;  %5994 = vmatmul.bf16.vlgmr.msrb.gmra.mxu1 %v5735_v53  ;;  %v10430_v5 = vld [vmem:[#allocation2 + $0xc] sm:$0xff] }
 0x621   : > { %v5558_v46 = vld [vmem:[#allocation2 + $0x10] sm:$0xf]  ;;  %5543 = vst [vmem:[#allocation2 + $0x18] sm:$0xf] %v5542_v41  ;;  %v5564_v31 = vld [vmem:[#allocation2 + $0x14] sm:$0x1]  ;;  %5970 = vmatmul.bf16.gmra.mxu0 %v10430_v5 }
 0x622   : > { %v5688_v33 = vrot.slane %v5558_v46, 5  ;;  %v5601_v30 = vshll.u32 %v5558_v46, 16  ;;  %v5491_v3 = vshrl.u32 %v5445_v8, 16  ;;  %v5605_v59 = vshrl.u32 %v5558_v46, 16 }
 0x623   : > { %v5691_v15 = vrot.slane %v5564_v31, 5  ;;  %v5494_v53 = vshll.u32 %v5445_v8, 16  ;;  %v5611_v7 = vshll.u32 %v5564_v31, 16 }
 0x624   : > { %v5689_v35 = vsel %vm10811_vm13, %v9485_v50, %v5688_v33  ;;  %v5690_v14 = vrot.slane %v5688_v33, 4  ;;  %v5603_v29 = vrot.slane %v5601_v30, 5  ;;  %v5493_v26 = vrot.slane %v5491_v3, 7  ;;  %v5545_v30 = vld [vmem:[#allocation2 + $0x20] sm:$0x1]  ;;  %v5408_v3 = vpop.f32.mrf.mxu2 }
 0x625   : > { %v5607_v21 = vrot.slane %v5605_v59, 4  ;;  %v5435_v10 = vpop.f32.mrf.mxu3  ;;  %v5745_v27 = vunpack.c.l.b16 %v5689_v35  ;;  %v5380_v33 = vadd.f32 %v12232_v0, %v5379_v56  ;;  %v5613_v0 = vrot.slane %v5611_v7, 5 }
 0x626   : > { %v5692_v43 = vsel %vm10811_vm13, %v5690_v14, %v5691_v15  ;;  %v5496_v41 = vor.u32 %v5494_v53, %v5493_v26  ;;  %v5498_v5 = vrot.slane %v5493_v26, 4  ;;  %v12314_v46 = vadd.f32 %v5435_v10, %v5407_v36 }
 0x627   : > { %v5746_v50 = vunpack.c.l.b16 %v5692_v43  ;;  %v5604_v18 = vsel %vm10830_vm14, %v5599_v47, %v5603_v29  ;;  %v5608_v8 = vor.u32 %v5607_v21, %v5603_v29  ;;  %v5409_v29 = vadd.f32 %v5408_v3, %v5380_v33 }
 0x628   : > { %v5497_v59 = vsel %vm10750_vm7, %v5489_v58, %v5496_v41  ;;  %v5546_v28 = vsel %vm10708_vm3, %v5498_v5, %v5545_v30  ;;  %v5446_v31 = vpack.c.bf16 %v12314_v46, %v12314_v46  ;;  %v5559_v35 = vld [vmem:[#allocation2 + $0x18] sm:$0xf]  ;;  %v5729_v10 = vunpack.c.l.b16 %v5604_v18 }
 0x629   : > { %v5752_v36 = vpack.c.b16 %v5746_v50, %v5745_v27  ;;  %5544 = vst [vmem:[#allocation2 + $0x1c] sm:$0xf] %v5497_v59  ;;  %v5609_v14 = vrot.slane %v5608_v8, 4  ;;  %v5616_v15 = vshrl.u32 %v5559_v35, 16  ;;  %v5619_v56 = vshll.u32 %v5559_v35, 16 }
 0x62a   : > { %5547 = vst [vmem:[#allocation2 + $0x20] sm:$0x1] %v5546_v28  ;;  %v5500_v26 = vshrl.u32 %v5446_v31, 16  ;;  %v5503_v21 = vshll.u32 %v5446_v31, 16  ;;  %v5665_v41 = vld [vmem:[#allocation2 + $0x18] sm:$0xe] }
 0x62b   : > { %6028 = vmatmul.bf16.gmra.mxu2 %v5752_v36  ;;  %v5614_v58 = vsel %vm10830_vm14, %v5609_v14, %v5613_v0  ;;  %v5618_v27 = vrot.slane %v5616_v15, 4  ;;  %v5621_v5 = vrot.slane %v5619_v56, 5  ;;  %v5548_v8 = vld [vmem:[#allocation2 + $0x24] sm:$0xf]  ;;  %v9486_v18 = vrot.slane %v5665_v41, 9  ;;  %v10468_v31 = vld [vmem:[%s12989_s1 + $0x638] sm:$0xff] }
 0x62c   : > { %v5502_v53 = vrot.slane %v5500_v26, 7  ;;  %v5730_v43 = vunpack.c.l.b16 %v5614_v58  ;;  %6569 = vmatpush.bf16.msra.mxu3 %v10468_v31  ;;  %v10476_v58 = vld [vmem:[%s12989_s1 + $0x678] sm:$0xff] }
 0x62d   : > { %v5437_v47 = vpop.f32.mrf.mxu3  ;;  %v5622_v14 = vor.u32 %v5621_v5, %v5618_v27  ;;  %v10484_v41 = vld [vmem:[%s12989_s1 + $0x6b8] sm:$0xff]  ;;  %6598 = vmatpush.bf16.msra.mxu0 %v10476_v58 }
 0x62e   : > { %v5505_v50 = vor.u32 %v5503_v21, %v5502_v53  ;;  %v12327_v30 = vadd.f32 %v5437_v47, %v5409_v29  ;;  %v5736_v7 = vpack.c.b16 %v5730_v43, %v5729_v10  ;;  %v10467_v29 = vld [vmem:[%s12989_s1 + $0x630] sm:$0xff]  ;;  %6627 = vmatpush.bf16.msra.mxu1 %v10484_v41 }
 0x630   : > { %v5549_v59 = vsel %vm10759_vm8, %v5505_v50, %v5548_v8  ;;  %v5447_v33 = vpack.c.bf16 %v12327_v30, %v12327_v30  ;;  %5999 = vmatmul.bf16.gmra.mxu1 %v5736_v7  ;;  %v10431_v3 = vld [vmem:[#allocation2 + $0x18] sm:$0xff]  ;;  %v5506_v7 = vrot.slane %v5502_v53, 4  ;;  %6570 = vmatpush.bf16.msra.mxu3 %v10467_v29 }
 0x631   : > { %v5560_v28 = vld [vmem:[#allocation2 + $0x1c] sm:$0xf]  ;;  %5550 = vst [vmem:[#allocation2 + $0x24] sm:$0xf] %v5549_v59  ;;  %v5565_v36 = vld [vmem:[#allocation2 + $0x20] sm:$0x1]  ;;  %5975 = vmatmul.bf16.gmra.mxu0 %v10431_v3 }
 0x632   : > { %v5695_v35 = vrot.slane %v5560_v28, 5  ;;  %v5625_v0 = vshll.u32 %v5560_v28, 16  ;;  %v5508_v15 = vshrl.u32 %v5447_v33, 16  ;;  %v5698_v56 = vrot.slane %v5565_v36, 5 }
 0x633   : > { %v5629_v26 = vshrl.u32 %v5560_v28, 16  ;;  %v5635_v47 = vshll.u32 %v5565_v36, 16  ;;  %v5511_v5 = vshll.u32 %v5447_v33, 16  ;;  %v5623_v3 = vrot.slane %v5622_v14, 4  ;;  %v5552_v36 = vld [vmem:[#allocation2 + $0x2c] sm:$0x1] }
 0x634   : > { %v5696_v21 = vsel %vm10811_vm13, %v9486_v18, %v5695_v35  ;;  %v5697_v10 = vrot.slane %v5695_v35, 4  ;;  %v5627_v43 = vrot.slane %v5625_v0, 5  ;;  %v5510_v27 = vrot.slane %v5508_v15, 7 }
 0x635   : > { %v5631_v50 = vrot.slane %v5629_v26, 4  ;;  %v5747_v59 = vunpack.c.l.b16 %v5696_v21  ;;  %v5637_v15 = vrot.slane %v5635_v47, 5 }
 0x636   : > { %v5699_v8 = vsel %vm10811_vm13, %v5697_v10, %v5698_v56  ;;  %v5513_v28 = vor.u32 %v5511_v5, %v5510_v27  ;;  %v5515_v18 = vrot.slane %v5510_v27, 4  ;;  %v5628_v0 = vsel %vm10830_vm14, %v5623_v3, %v5627_v43 }
 0x637   : > { %v5748_v31 = vunpack.c.l.b16 %v5699_v8  ;;  %v5632_v35 = vor.u32 %v5631_v50, %v5627_v43  ;;  %v5731_v10 = vunpack.c.l.b16 %v5628_v0 }
 0x638   : > { %v5514_v33 = vsel %vm10750_vm7, %v5506_v7, %v5513_v28  ;;  %v5553_v53 = vsel %vm10708_vm3, %v5515_v18, %v5552_v36  ;;  %v5561_v14 = vld [vmem:[#allocation2 + $0x24] sm:$0xf] }
 0x639   : > { %v5753_v56 = vpack.c.b16 %v5748_v31, %v5747_v59  ;;  %v5633_v26 = vrot.slane %v5632_v35, 4  ;;  %5551 = vst [vmem:[#allocation2 + $0x28] sm:$0xf] %v5514_v33  ;;  %v5640_v58 = vshrl.u32 %v5561_v14, 16  ;;  %v5643_v21 = vshll.u32 %v5561_v14, 16 }
 0x63a   : > { %5554 = vst [vmem:[#allocation2 + $0x2c] sm:$0x1] %v5553_v53  ;;  %v5666_v41 = vld [vmem:[#allocation2 + $0x24] sm:$0xe] }
 0x63b   : > { %6033 = vmatmul.bf16.gmra.mxu2 %v5753_v56  ;;  %v5638_v29 = vsel %vm10830_vm14, %v5633_v26, %v5637_v15  ;;  %v5642_v27 = vrot.slane %v5640_v58, 4  ;;  %v5645_v5 = vrot.slane %v5643_v21, 5  ;;  %v9487_v8 = vrot.slane %v5666_v41, 9 }
 0x63c   : > { %v5732_v43 = vunpack.c.l.b16 %v5638_v29 }
 0x63d   : > { %v5646_v28 = vor.u32 %v5645_v5, %v5642_v27 }
 0x63e   : > { %v5737_v47 = vpack.c.b16 %v5732_v43, %v5731_v10 }
 0x63f   : > { %v5647_v26 = vrot.slane %v5646_v28, 4  ;;  %v10491_v28 = vld [vmem:[%s12991_s3 + $0x1f0] sm:$0xff] }
 0x640   : > { %6004 = vmatmul.bf16.gmra.mxu1 %v5737_v47  ;;  %v10432_v50 = vld [vmem:[#allocation2 + $0x24] sm:$0xff] }
 0x641   : > { %v5562_v7 = vld [vmem:[#allocation2 + $0x28] sm:$0xf]  ;;  %v5566_v59 = vld [vmem:[#allocation2 + $0x2c] sm:$0x1]  ;;  %5980 = vmatmul.bf16.gmra.mxu0 %v10432_v50 }
 0x642   : > { %v5702_v3 = vrot.slane %v5562_v7, 5  ;;  %v5649_v18 = vshll.u32 %v5562_v7, 16  ;;  %v5653_v31 = vshrl.u32 %v5562_v7, 16  ;;  %v5705_v35 = vrot.slane %v5566_v59, 5  ;;  %v10466_v7 = vld [vmem:[%s12989_s1 + $0x628] sm:$0xff] }
 0x643   : > { %v5659_v36 = vshll.u32 %v5566_v59, 16  ;;  %v10492_v59 = vld [vmem:[%s12991_s3 + $0x1f8] sm:$0xff]  ;;  %6571 = vmatpush.bf16.msra.mxu3 %v10466_v7 }
 0x644   : > { %v5703_v0 = vsel %vm10811_vm13, %v9487_v8, %v5702_v3  ;;  %v5704_v15 = vrot.slane %v5702_v3, 4  ;;  %v5651_v33 = vrot.slane %v5649_v18, 5  ;;  %v5655_v53 = vrot.slane %v5653_v31, 4  ;;  %v10475_v8 = vld [vmem:[%s12989_s1 + $0x670] sm:$0xff]  ;;  %6869 = vmatpush.bf16.msra.mxu2 %v10492_v59  ;;  %v10465_v18 = vld [vmem:[%s12989_s1 + $0x620] sm:$0xff]  ;;  %v10474_v31 = vld [vmem:[%s12989_s1 + $0x668] sm:$0xff] }
 0x645   : > { %v5749_v58 = vunpack.c.l.b16 %v5703_v0  ;;  %v5661_v43 = vrot.slane %v5659_v36, 5  ;;  %v10483_v3 = vld [vmem:[%s12989_s1 + $0x6b0] sm:$0xff]  ;;  %6599 = vmatpush.bf16.msra.mxu0 %v10475_v8  ;;  %v10482_v36 = vld [vmem:[%s12989_s1 + $0x6a8] sm:$0xff]  ;;  %v10489_v0 = vld [vmem:[%s12991_s3 + $0x1e0] sm:$0xff] }
 0x646   : > { %v5706_v56 = vsel %vm10811_vm13, %v5704_v15, %v5705_v35  ;;  %v5656_v14 = vor.u32 %v5655_v53, %v5651_v33  ;;  %v5652_v29 = vsel %vm10830_vm14, %v5647_v26, %v5651_v33  ;;  %6628 = vmatpush.bf16.msra.mxu1 %v10483_v3  ;;  %v10490_v35 = vld [vmem:[%s12991_s3 + $0x1e8] sm:$0xff]  ;;  %v10488_v15 = vld [vmem:[%s12991_s3 + $0x1d8] sm:$0xff]  ;;  %v10487_v33 = vld [vmem:[%s12991_s3 + $0x1d0] sm:$0xff] }
 0x647   : > { %v5750_v21 = vunpack.c.l.b16 %v5706_v56  ;;  %v5733_v27 = vunpack.c.l.b16 %v5652_v29  ;;  %6572 = vmatpush.bf16.msra.mxu3 %v10465_v18  ;;  %v10486_v53 = vld [vmem:[%s12991_s3 + $0x1c8] sm:$0xff]  ;;  %v10464_v56 = vld [vmem:[%s12989_s1 + $0x618] sm:$0xff]  ;;  %v10473_v26 = vld [vmem:[%s12989_s1 + $0x660] sm:$0xff] }
 0x648   : > { %v5657_v10 = vrot.slane %v5656_v14, 4  ;;  %6870 = vmatpush.bf16.msra.mxu2 %v10491_v28  ;;  %v10481_v14 = vld [vmem:[%s12989_s1 + $0x6a0] sm:$0xff]  ;;  %v10463_v29 = vld [vmem:[%s12989_s1 + $0x610] sm:$0xff]  ;;  %v10478_v18 = vld [vmem:[%s12989_s1 + $0x688] sm:$0xff] }
 0x649   : > { %v5754_v47 = vpack.c.b16 %v5750_v21, %v5749_v58  ;;  %6600 = vmatpush.bf16.msra.mxu0 %v10474_v31  ;;  %v10485_v58 = vld [vmem:[%s12991_s3 + $0x1c0] sm:$0xff]  ;;  %v10471_v3 = vld [vmem:[%s12989_s1 + $0x650] sm:$0xff] }
 0x64a   : > { %v5662_v41 = vsel %vm10830_vm14, %v5657_v10, %v5661_v43  ;;  %6629 = vmatpush.bf16.msra.mxu1 %v10482_v36  ;;  %v10472_v10 = vld [vmem:[%s12989_s1 + $0x658] sm:$0xff] }
 0x64b   : > { %6038 = vmatmul.bf16.gmra.mxu2 %v5754_v47  ;;  %v5734_v5 = vunpack.c.l.b16 %v5662_v41  ;;  %6573 = vmatpush.bf16.msra.mxu3 %v10464_v56  ;;  %v10480_v43 = vld [vmem:[%s12989_s1 + $0x698] sm:$0xff]  ;;  %v10462_v47 = vld [vmem:[%s12989_s1 + $0x608] sm:$0xff] }
 0x64c   : > { %6871 = vmatpush.bf16.msra.mxu2 %v10490_v35 }
 0x64d   : > { %v5738_v50 = vpack.c.b16 %v5734_v5, %v5733_v27  ;;  %6601 = vmatpush.bf16.msra.mxu0 %v10473_v26  ;;  %v12431_v27 = vld [vmem:[%s12990_s2 + $0x7] ss:$0 sm:$0xff]  ;;  %v10479_v5 = vld [vmem:[%s12989_s1 + $0x690] sm:$0xff] }
 0x64e   : > { %6630 = vmatpush.bf16.msra.mxu1 %v10481_v14 }
 0x64f   : > { %6574 = vmatpush.bf16.msra.mxu3 %v10463_v29 }
 0x650   : > { %6009 = vmatmul.bf16.gmra.mxu1 %v5738_v50  ;;  %6872 = vmatpush.bf16.msra.mxu2 %v10489_v0  ;;  %v10461_v50 = vld [vmem:[%s12989_s1 + $0x600] sm:$0xff]  ;;  %v10470_v0 = vld [vmem:[%s12989_s1 + $0x648] sm:$0xff] }
 0x651   : > { %6602 = vmatpush.bf16.msra.mxu0 %v10472_v10 }
 0x652   : > { %6631 = vmatpush.bf16.msra.mxu1 %v10480_v43 }
 0x653   : > { %6575 = vmatpush.bf16.msra.mxu3 %v10462_v47 }
 0x654   : > { %6873 = vmatpush.bf16.msra.mxu2 %v10488_v15  ;;  %v10477_v15 = vld [vmem:[%s12989_s1 + $0x680] sm:$0xff] }
 0x655   : > { %6603 = vmatpush.bf16.msra.mxu0 %v10471_v3 }
 0x656   : > { %6632 = vmatpush.bf16.msra.mxu1 %v10479_v5 }
 0x657   : > { %6576 = vmatpush.bf16.msra.mxu3 %v10461_v50 }
 0x658   : > { %6874 = vmatpush.bf16.msra.mxu2 %v10487_v33 }
 0x659   : > { %6604 = vmatpush.bf16.msra.mxu0 %v10470_v0 }
 0x65a   : > { %6633 = vmatpush.bf16.msra.mxu1 %v10478_v18 }
 0x65c   : > { %6875 = vmatpush.bf16.msra.mxu2 %v10486_v53 }
 0x65e   : > { %6634 = vmatpush.bf16.msra.mxu1 %v10477_v15 }
 0x660   : > { %6876 = vmatpush.bf16.msra.mxu2 %v10485_v58 }
 0x68e   : > { %v5966_v21 = vpop.f32.mrf.mxu0 }
 0x68f   : > { %v5967_v7 = vadd.f32 %v12431_v27, %v5966_v21  ;;  %v10469_v21 = vld [vmem:[%s12989_s1 + $0x640] sm:$0xff] }
 0x690   : > { %6605 = vmatpush.bf16.msra.mxu0 %v10469_v21 }
 0x696   : > { %v5968_v41 = vpop.f32.mrf.mxu0 }
 0x697   : > { %v5969_v33 = vadd.f32 %v12431_v27, %v5968_v41 }
 0x69d   : > { %v5995_v8 = vpop.f32.mrf.mxu1 }
 0x69e   : > { %v6024_v59 = vpop.f32.mrf.mxu2  ;;  %v5996_v28 = vadd.f32 %v5995_v8, %v5967_v7  ;;  %v5971_v31 = vpop.f32.mrf.mxu0 }
 0x69f   : > { %v5972_v7 = vadd.f32 %v12431_v27, %v5971_v31 }
 0x6a0   : > { %v6025_v35 = vadd.f32 %v6024_v59, %v5996_v28 }
 0x6a2   : > { %v6044_v36 = vmax.f32 %v6025_v35, 0.0 }
 0x6a4   : > { %v6052_v53 = vpack.c.bf16 %v6044_v36, %v6044_v36 }
 0x6a5   : > { %v5997_v56 = vpop.f32.mrf.mxu1 }
 0x6a6   : > { %v6026_v26 = vpop.f32.mrf.mxu2  ;;  %v6061_v14 = vshrl.u32 %v6052_v53, 16  ;;  %v5998_v58 = vadd.f32 %v5997_v56, %v5969_v33  ;;  %v6064_v10 = vshll.u32 %v6052_v53, 16  ;;  %v5973_v47 = vpop.f32.mrf.mxu0  ;;  %v6696_v28 = vunpack.c.l.b16 %v6052_v53 }
 0x6a8   : > { %v6063_v29 = vrot.slane %v6061_v14, 7  ;;  %v6027_v43 = vadd.f32 %v6026_v26, %v5998_v58 }
 0x6aa   : > { %v6066_v5 = vor.u32 %v6064_v10, %v6063_v29  ;;  %v6045_v50 = vmax.f32 %v6027_v43, 0.0  ;;  %v6067_v26 = vrot.slane %v6063_v29, 4  ;;  %v5974_v43 = vadd.f32 %v12431_v27, %v5973_v47 }
 0x6ac   : > { %v6140_v41 = vsel %vm10759_vm8, %v6066_v5, %v12274_v13  ;;  %v6053_v8 = vpack.c.bf16 %v6045_v50, %v6045_v50  ;;  %v6143_v13 = vld [vmem:[#allocation2 + $0x8] sm:$0x1] }
 0x6ad   : > { %6141 = vst [vmem:[#allocation2] sm:$0xf] %v6140_v41  ;;  %v6000_v59 = vpop.f32.mrf.mxu1 }
 0x6ae   : > { %v6029_v3 = vpop.f32.mrf.mxu2  ;;  %v6069_v18 = vshrl.u32 %v6053_v8, 16  ;;  %v6697_v35 = vunpack.c.l.b16 %v6053_v8  ;;  %v6001_v36 = vadd.f32 %v6000_v59, %v5972_v7  ;;  %v6072_v15 = vshll.u32 %v6053_v8, 16  ;;  %v5976_v10 = vpop.f32.mrf.mxu0 }
 0x6b0   : > { %v6071_v0 = vrot.slane %v6069_v18, 7  ;;  %v6704_v33 = vpack.c.b16 %v6697_v35, %v6696_v28  ;;  %v6030_v56 = vadd.f32 %v6029_v3, %v6001_v36 }
 0x6b2   : > { %v6074_v14 = vor.u32 %v6072_v15, %v6071_v0  ;;  %v6076_v58 = vrot.slane %v6071_v0, 4  ;;  %v6046_v21 = vmax.f32 %v6030_v56, 0.0  ;;  %6877 = vmatmul.bf16.vlgmr.msra.gmra.mxu2 %v6704_v33  ;;  %v6146_v56 = vld [vmem:[#allocation2 + $0xc] sm:$0xf] }
 0x6b4   : > { %v6075_v31 = vsel %vm10750_vm7, %v6067_v26, %v6074_v14  ;;  %v6144_v53 = vsel %vm10708_vm3, %v6076_v58, %v6143_v13  ;;  %v6054_v5 = vpack.c.bf16 %v6046_v21, %v6046_v21  ;;  %v12465_v50 = vld [vmem:[#allocation2] sm:$0xf]  ;;  %v5977_v14 = vadd.f32 %v12431_v27, %v5976_v10 }
 0x6b5   : > { %6142 = vst [vmem:[#allocation2 + $0x4] sm:$0xf] %v6075_v31  ;;  %v6002_v41 = vpop.f32.mrf.mxu1  ;;  %v6180_v59 = vshrl.u32 %v12465_v50, 16  ;;  %v6183_v3 = vshll.u32 %v12465_v50, 16  ;;  %v6275_v36 = vld [vmem:[#allocation2] sm:$0xe] }
 0x6b6   : > { %v6031_v29 = vpop.f32.mrf.mxu2  ;;  %6145 = vst [vmem:[#allocation2 + $0x8] sm:$0x1] %v6144_v53  ;;  %v6078_v7 = vshrl.u32 %v6054_v5, 16  ;;  %v6003_v8 = vadd.f32 %v6002_v41, %v5974_v43  ;;  %v6081_v18 = vshll.u32 %v6054_v5, 16  ;;  %v5978_v21 = vpop.f32.mrf.mxu0  ;;  %v9649_v53 = vrot.slane %v6275_v36, 9 }
 0x6b7   : > { %v6182_v47 = vrot.slane %v6180_v59, 4  ;;  %v6185_v33 = vrot.slane %v6183_v3, 5 }
 0x6b8   : > { %v6080_v28 = vrot.slane %v6078_v7, 7  ;;  %v6032_v35 = vadd.f32 %v6031_v29, %v6003_v8  ;;  %v6698_v29 = vunpack.c.l.b16 %v6054_v5 }
 0x6b9   : > { %v6186_v17 = vor.u32 %v6185_v33, %v6182_v47  ;;  %v6150_v47 = vld [vmem:[#allocation2 + $0x14] sm:$0x1]  ;;  %v5979_v33 = vadd.f32 %v12431_v27, %v5978_v21 }
 0x6ba   : > { %v6083_v0 = vor.u32 %v6081_v18, %v6080_v28  ;;  %v6047_v15 = vmax.f32 %v6032_v35, 0.0 }
 0x6bc   : > { %v6147_v26 = vsel %vm10759_vm8, %v6083_v0, %v6146_v56  ;;  %v6055_v58 = vpack.c.bf16 %v6047_v15, %v6047_v15  ;;  %v10457_v13 = vld [vmem:[#allocation2] sm:$0xff]  ;;  %v6084_v0 = vrot.slane %v6080_v28, 4 }
 0x6bd   : > { %v6168_v31 = vld [vmem:[#allocation2 + $0x4] sm:$0xf]  ;;  %6148 = vst [vmem:[#allocation2 + $0xc] sm:$0xf] %v6147_v26  ;;  %v6005_v43 = vpop.f32.mrf.mxu1  ;;  %v6175_v7 = vld [vmem:[#allocation2 + $0x8] sm:$0x1]  ;;  %6577 = vmatmul.bf16.vlgmr.msra.gmra.mxu3 %v10457_v13 }
 0x6be   : > { %v6034_v41 = vpop.f32.mrf.mxu2  ;;  %v6293_v8 = vrot.slane %v6168_v31, 5  ;;  %v6189_v18 = vshll.u32 %v6168_v31, 16  ;;  %v6086_v59 = vshrl.u32 %v6055_v58, 16  ;;  %v6006_v3 = vadd.f32 %v6005_v43, %v5977_v14  ;;  %v5981_v21 = vpop.f32.mrf.mxu0 }
 0x6bf   : > { %v6699_v35 = vunpack.c.l.b16 %v6055_v58  ;;  %v6296_v56 = vrot.slane %v6175_v7, 5  ;;  %v6089_v36 = vshll.u32 %v6055_v58, 16  ;;  %v6193_v2 = vshrl.u32 %v6168_v31, 16 }
 0x6c0   : > { %v6294_v10 = vsel %vm10811_vm13, %v9649_v53, %v6293_v8  ;;  %v6295_v15 = vrot.slane %v6293_v8, 4  ;;  %v6088_v25 = vrot.slane %v6086_v59, 7  ;;  %v6035_v26 = vadd.f32 %v6034_v41, %v6006_v3 }
 0x6c1   : > { %v6705_v23 = vpack.c.b16 %v6699_v35, %v6698_v29  ;;  %v6355_v4 = vunpack.c.l.b16 %v6294_v10  ;;  %v6191_v39 = vrot.slane %v6189_v18, 5  ;;  %v6187_v53 = vrot.slane %v6186_v17, 4 }
 0x6c2   : > { %v6297_v5 = vsel %vm10811_vm13, %v6295_v15, %v6296_v56  ;;  %v6091_v14 = vor.u32 %v6089_v36, %v6088_v25  ;;  %v6093_v13 = vrot.slane %v6088_v25, 4  ;;  %v6048_v43 = vmax.f32 %v6035_v26, 0.0 }
 0x6c3   : > { %6882 = vmatmul.bf16.gmra.mxu2 %v6705_v23  ;;  %v6356_v28 = vunpack.c.l.b16 %v6297_v5  ;;  %v6195_v8 = vrot.slane %v6193_v2, 4  ;;  %v6199_v59 = vshll.u32 %v6175_v7, 16  ;;  %v6192_v2 = vsel %vm10830_vm14, %v6187_v53, %v6191_v39 }
 0x6c4   : > { %v6092_v58 = vsel %vm10750_vm7, %v6084_v0, %v6091_v14  ;;  %v6151_v41 = vsel %vm10708_vm3, %v6093_v13, %v6150_v47  ;;  %v6056_v29 = vpack.c.bf16 %v6048_v43, %v6048_v43  ;;  %v6169_v31 = vld [vmem:[#allocation2 + $0xc] sm:$0xf]  ;;  %v6339_v5 = vunpack.c.l.b16 %v6192_v2 }
 0x6c5   : > { %v6363_v18 = vpack.c.b16 %v6356_v28, %v6355_v4  ;;  %6149 = vst [vmem:[#allocation2 + $0x10] sm:$0xf] %v6092_v58  ;;  %v6007_v25 = vpop.f32.mrf.mxu1  ;;  %v6196_v23 = vor.u32 %v6195_v8, %v6191_v39  ;;  %v6204_v35 = vshrl.u32 %v6169_v31, 16  ;;  %v6201_v0 = vrot.slane %v6199_v59, 5  ;;  %v6276_v14 = vld [vmem:[#allocation2 + $0xc] sm:$0xe] }
 0x6c6   : > { %v6036_v3 = vpop.f32.mrf.mxu2  ;;  %6152 = vst [vmem:[#allocation2 + $0x14] sm:$0x1] %v6151_v41  ;;  %v6095_v10 = vshrl.u32 %v6056_v29, 16  ;;  %v6008_v17 = vadd.f32 %v6007_v25, %v5979_v33  ;;  %v6207_v15 = vshll.u32 %v6169_v31, 16  ;;  %v6098_v36 = vshll.u32 %v6056_v29, 16 }
 0x6c7   : > { %6635 = vmatmul.bf16.vlgmr.msra.gmra.mxu1 %v6363_v18  ;;  %v6197_v7 = vrot.slane %v6196_v23, 4  ;;  %v6206_v13 = vrot.slane %v6204_v35, 4  ;;  %v6153_v8 = vld [vmem:[#allocation2 + $0x18] sm:$0xf]  ;;  %v5982_v58 = vadd.f32 %v12431_v27, %v5981_v21  ;;  %v9650_v31 = vrot.slane %v6276_v14, 9  ;;  %v5983_v14 = vpop.f32.mrf.mxu0 }
 0x6c8   : > { %v6097_v56 = vrot.slane %v6095_v10, 7  ;;  %v6037_v4 = vadd.f32 %v6036_v3, %v6008_v17  ;;  %v6209_v33 = vrot.slane %v6207_v15, 5  ;;  %v6700_v35 = vunpack.c.l.b16 %v6056_v29 }
 0x6c9   : > { %v6202_v26 = vsel %vm10830_vm14, %v6197_v7, %v6201_v0 }
 0x6ca   : > { %v6100_v43 = vor.u32 %v6098_v36, %v6097_v56  ;;  %v6049_v28 = vmax.f32 %v6037_v4, 0.0  ;;  %v6340_v47 = vunpack.c.l.b16 %v6202_v26  ;;  %v6101_v25 = vrot.slane %v6097_v56, 4 }
 0x6cb   : > { %v6210_v0 = vor.u32 %v6209_v33, %v6206_v13 }
 0x6cc   : > { %v6154_v39 = vsel %vm10759_vm8, %v6100_v43, %v6153_v8  ;;  %v6057_v53 = vpack.c.bf16 %v6049_v28, %v6049_v28  ;;  %v6347_v59 = vpack.c.b16 %v6340_v47, %v6339_v5  ;;  %v10458_v41 = vld [vmem:[#allocation2 + $0xc] sm:$0xff] }
 0x6cd   : > { %v6170_v18 = vld [vmem:[#allocation2 + $0x10] sm:$0xf]  ;;  %6155 = vst [vmem:[#allocation2 + $0x18] sm:$0xf] %v6154_v39  ;;  %v6010_v3 = vpop.f32.mrf.mxu1  ;;  %v6176_v10 = vld [vmem:[#allocation2 + $0x14] sm:$0x1]  ;;  %6582 = vmatmul.bf16.gmra.mxu3 %v10458_v41 }
 0x6ce   : > { %v6039_v23 = vpop.f32.mrf.mxu2  ;;  %v6300_v17 = vrot.slane %v6170_v18, 5  ;;  %v6103_v2 = vshrl.u32 %v6057_v53, 16  ;;  %6606 = vmatmul.bf16.vlgmr.msra.gmra.mxu0 %v6347_v59  ;;  %v6011_v7 = vadd.f32 %v6010_v3, %v5982_v58  ;;  %v6701_v21 = vunpack.c.l.b16 %v6057_v53  ;;  %v6157_v41 = vld [vmem:[#allocation2 + $0x20] sm:$0x1] }
 0x6cf   : > { %v6303_v4 = vrot.slane %v6176_v10, 5  ;;  %v6213_v26 = vshll.u32 %v6170_v18, 16  ;;  %v6106_v56 = vshll.u32 %v6057_v53, 16  ;;  %v6217_v58 = vshrl.u32 %v6170_v18, 16 }
 0x6d0   : > { %v6301_v15 = vsel %vm10811_vm13, %v9650_v31, %v6300_v17  ;;  %v6302_v36 = vrot.slane %v6300_v17, 4  ;;  %v6105_v5 = vrot.slane %v6103_v2, 7  ;;  %v6040_v43 = vadd.f32 %v6039_v23, %v6011_v7 }
 0x6d1   : > { %v6706_v28 = vpack.c.b16 %v6701_v21, %v6700_v35  ;;  %v6357_v47 = vunpack.c.l.b16 %v6301_v15  ;;  %v6215_v8 = vrot.slane %v6213_v26, 5  ;;  %v5984_v31 = vadd.f32 %v12431_v27, %v5983_v14 }
 0x6d2   : > { %v6304_v29 = vsel %vm10811_vm13, %v6302_v36, %v6303_v4  ;;  %v6108_v39 = vor.u32 %v6106_v56, %v6105_v5  ;;  %v6110_v59 = vrot.slane %v6105_v5, 4  ;;  %v6050_v13 = vmax.f32 %v6040_v43, 0.0 }
 0x6d3   : > { %6887 = vmatmul.bf16.gmra.mxu2 %v6706_v28  ;;  %v6358_v33 = vunpack.c.l.b16 %v6304_v29  ;;  %v6211_v3 = vrot.slane %v6210_v0, 4  ;;  %v6219_v17 = vrot.slane %v6217_v58, 4  ;;  %v6223_v53 = vshll.u32 %v6176_v10, 16 }
 0x6d4   : > { %v6109_v23 = vsel %vm10750_vm7, %v6101_v25, %v6108_v39  ;;  %v6158_v35 = vsel %vm10708_vm3, %v6110_v59, %v6157_v41  ;;  %v6058_v2 = vpack.c.bf16 %v6050_v13, %v6050_v13  ;;  %v6171_v18 = vld [vmem:[#allocation2 + $0x18] sm:$0xf]  ;;  %v6160_v41 = vld [vmem:[#allocation2 + $0x24] sm:$0xf] }
 0x6d5   : > { %v6364_v7 = vpack.c.b16 %v6358_v33, %v6357_v47  ;;  %6156 = vst [vmem:[#allocation2 + $0x1c] sm:$0xf] %v6109_v23  ;;  %v6012_v21 = vpop.f32.mrf.mxu1  ;;  %v6220_v36 = vor.u32 %v6219_v17, %v6215_v8  ;;  %v6228_v4 = vshrl.u32 %v6171_v18, 16  ;;  %v6216_v10 = vsel %vm10830_vm14, %v6211_v3, %v6215_v8  ;;  %v6277_v13 = vld [vmem:[#allocation2 + $0x18] sm:$0xe] }
 0x6d6   : > { %v6041_v15 = vpop.f32.mrf.mxu2  ;;  %6159 = vst [vmem:[#allocation2 + $0x20] sm:$0x1] %v6158_v35  ;;  %v6112_v26 = vshrl.u32 %v6058_v2, 16  ;;  %v6013_v27 = vadd.f32 %v6012_v21, %v5984_v31  ;;  %v6225_v25 = vrot.slane %v6223_v53, 5  ;;  %v6231_v5 = vshll.u32 %v6171_v18, 16 }
 0x6d7   : > { %6640 = vmatmul.bf16.gmra.mxu1 %v6364_v7  ;;  %v6221_v0 = vrot.slane %v6220_v36, 4  ;;  %v6115_v14 = vshll.u32 %v6058_v2, 16  ;;  %v6341_v29 = vunpack.c.l.b16 %v6216_v10  ;;  %v6230_v47 = vrot.slane %v6228_v4, 4 }
 0x6d8   : > { %v6114_v56 = vrot.slane %v6112_v26, 7  ;;  %v6042_v43 = vadd.f32 %v6041_v15, %v6013_v27  ;;  %v6233_v33 = vrot.slane %v6231_v5, 5  ;;  %v6702_v23 = vunpack.c.l.b16 %v6058_v2  ;;  %v10500_v26 = vld [vmem:[%s12991_s3 + $0x238] sm:$0xff] }
 0x6d9   : > { %v6226_v28 = vsel %vm10830_vm14, %v6221_v0, %v6225_v25  ;;  %v9651_v7 = vrot.slane %v6277_v13, 9  ;;  %6898 = vmatpush.bf16.msrb.mxu3 %v10500_v26 }
 0x6da   : > { %v6117_v58 = vor.u32 %v6115_v14, %v6114_v56  ;;  %v6051_v39 = vmax.f32 %v6042_v43, 0.0  ;;  %v6342_v59 = vunpack.c.l.b16 %v6226_v28  ;;  %v6234_v4 = vor.u32 %v6233_v33, %v6230_v47  ;;  %v10499_v28 = vld [vmem:[%s12991_s3 + $0x230] sm:$0xff] }
 0x6db   : > { %v6118_v2 = vrot.slane %v6114_v56, 4  ;;  %v6164_v56 = vld [vmem:[#allocation2 + $0x2c] sm:$0x1] }
 0x6dc   : > { %v6161_v8 = vsel %vm10759_vm8, %v6117_v58, %v6160_v41  ;;  %v6059_v31 = vpack.c.bf16 %v6051_v39, %v6051_v39  ;;  %v6348_v3 = vpack.c.b16 %v6342_v59, %v6341_v29  ;;  %v10459_v17 = vld [vmem:[#allocation2 + $0x18] sm:$0xff] }
 0x6dd   : > { %v6172_v53 = vld [vmem:[#allocation2 + $0x1c] sm:$0xf]  ;;  %6162 = vst [vmem:[#allocation2 + $0x24] sm:$0xf] %v6161_v8  ;;  %v6177_v35 = vld [vmem:[#allocation2 + $0x20] sm:$0x1]  ;;  %6587 = vmatmul.bf16.gmra.mxu3 %v10459_v17 }
 0x6de   : > { %v6307_v18 = vrot.slane %v6172_v53, 5  ;;  %v6120_v21 = vshrl.u32 %v6059_v31, 16  ;;  %6611 = vmatmul.bf16.gmra.mxu0 %v6348_v3  ;;  %v6703_v15 = vunpack.c.l.b16 %v6059_v31  ;;  %v6310_v36 = vrot.slane %v6177_v35, 5  ;;  %6899 = vmatpush.bf16.msrb.mxu3 %v10499_v28 }
 0x6df   : > { %v6237_v0 = vshll.u32 %v6172_v53, 16  ;;  %v6241_v25 = vshrl.u32 %v6172_v53, 16  ;;  %v6123_v14 = vshll.u32 %v6059_v31, 16  ;;  %v6247_v39 = vshll.u32 %v6177_v35, 16  ;;  %v10498_v35 = vld [vmem:[%s12991_s3 + $0x228] sm:$0xff] }
 0x6e0   : > { %v6308_v27 = vsel %vm10811_vm13, %v9651_v7, %v6307_v18  ;;  %v6309_v10 = vrot.slane %v6307_v18, 4  ;;  %v6122_v5 = vrot.slane %v6120_v21, 7  ;;  %v6707_v43 = vpack.c.b16 %v6703_v15, %v6702_v23 }
 0x6e1   : > { %v6239_v47 = vrot.slane %v6237_v0, 5  ;;  %v6243_v58 = vrot.slane %v6241_v25, 4  ;;  %v6359_v33 = vunpack.c.l.b16 %v6308_v27  ;;  %v6235_v8 = vrot.slane %v6234_v4, 4 }
 0x6e2   : > { %v6311_v29 = vsel %vm10811_vm13, %v6309_v10, %v6310_v36  ;;  %v6125_v59 = vor.u32 %v6123_v14, %v6122_v5  ;;  %v6127_v13 = vrot.slane %v6122_v5, 4  ;;  %v6249_v21 = vrot.slane %v6247_v39, 5  ;;  %6900 = vmatpush.bf16.msrb.mxu3 %v10498_v35  ;;  %v10497_v10 = vld [vmem:[%s12991_s3 + $0x220] sm:$0xff] }
 0x6e3   : > { %6892 = vmatmul.bf16.gmra.mxu2 %v6707_v43  ;;  %v6360_v41 = vunpack.c.l.b16 %v6311_v29  ;;  %v6244_v31 = vor.u32 %v6243_v58, %v6239_v47  ;;  %v6240_v7 = vsel %vm10830_vm14, %v6235_v8, %v6239_v47 }
 0x6e4   : > { %v6126_v3 = vsel %vm10750_vm7, %v6118_v2, %v6125_v59  ;;  %v6165_v17 = vsel %vm10708_vm3, %v6127_v13, %v6164_v56  ;;  %v6173_v23 = vld [vmem:[#allocation2 + $0x24] sm:$0xf]  ;;  %v6343_v26 = vunpack.c.l.b16 %v6240_v7 }
 0x6e5   : > { %v6365_v53 = vpack.c.b16 %v6360_v41, %v6359_v33  ;;  %6163 = vst [vmem:[#allocation2 + $0x28] sm:$0xf] %v6126_v3  ;;  %v6245_v18 = vrot.slane %v6244_v31, 4  ;;  %v6252_v15 = vshrl.u32 %v6173_v23, 16  ;;  %v6255_v36 = vshll.u32 %v6173_v23, 16 }
 0x6e6   : > { %6166 = vst [vmem:[#allocation2 + $0x2c] sm:$0x1] %v6165_v17  ;;  %v6278_v25 = vld [vmem:[#allocation2 + $0x24] sm:$0xe]  ;;  %6901 = vmatpush.bf16.msrb.mxu3 %v10497_v10  ;;  %v10496_v10 = vld [vmem:[%s12991_s3 + $0x218] sm:$0xff] }
 0x6e7   : > { %6645 = vmatmul.bf16.gmra.mxu1 %v6365_v53  ;;  %v6250_v4 = vsel %vm10830_vm14, %v6245_v18, %v6249_v21  ;;  %v6254_v2 = vrot.slane %v6252_v15, 4  ;;  %v6257_v5 = vrot.slane %v6255_v36, 5  ;;  %v9652_v29 = vrot.slane %v6278_v25, 9  ;;  %v10494_v25 = vld [vmem:[%s12991_s3 + $0x208] sm:$0xff] }
 0x6e8   : > { %v6344_v27 = vunpack.c.l.b16 %v6250_v4 }
 0x6e9   : > { %v6258_v13 = vor.u32 %v6257_v5, %v6254_v2  ;;  %v10493_v2 = vld [vmem:[%s12991_s3 + $0x200] sm:$0xff] }
 0x6ea   : > { %v6349_v0 = vpack.c.b16 %v6344_v27, %v6343_v26  ;;  %6902 = vmatpush.bf16.msrb.mxu3 %v10496_v10 }
 0x6eb   : > { %v6259_v35 = vrot.slane %v6258_v13, 4 }
 0x6ec   : > { %v10460_v14 = vld [vmem:[#allocation2 + $0x24] sm:$0xff] }
 0x6ed   : > { %v6174_v43 = vld [vmem:[#allocation2 + $0x28] sm:$0xf]  ;;  %v6178_v28 = vld [vmem:[#allocation2 + $0x2c] sm:$0x1]  ;;  %6592 = vmatmul.bf16.gmra.mxu3 %v10460_v14 }
 0x6ee   : > { %v6314_v47 = vrot.slane %v6174_v43, 5  ;;  %v6261_v58 = vshll.u32 %v6174_v43, 16  ;;  %v6265_v39 = vshrl.u32 %v6174_v43, 16  ;;  %6616 = vmatmul.bf16.gmra.mxu0 %v6349_v0  ;;  %v6317_v59 = vrot.slane %v6178_v28, 5  ;;  %v10495_v0 = vld [vmem:[%s12991_s3 + $0x210] sm:$0xff] }
 0x6ef   : > { %v6271_v33 = vshll.u32 %v6178_v28, 16  ;;  %6903 = vmatpush.bf16.msrb.mxu3 %v10495_v0  ;;  %v12550_v43 = vld [vmem:[%s12990_s2 + $0x8] ss:$0 sm:$0xff] }
 0x6f0   : > { %v6315_v41 = vsel %vm10811_vm13, %v9652_v29, %v6314_v47  ;;  %v6316_v56 = vrot.slane %v6314_v47, 4  ;;  %v6263_v8 = vrot.slane %v6261_v58, 5  ;;  %v6267_v31 = vrot.slane %v6265_v39, 4 }
 0x6f1   : > { %v6361_v53 = vunpack.c.l.b16 %v6315_v41  ;;  %v6273_v18 = vrot.slane %v6271_v33, 5 }
 0x6f2   : > { %v6318_v3 = vsel %vm10811_vm13, %v6316_v56, %v6317_v59  ;;  %v6268_v17 = vor.u32 %v6267_v31, %v6263_v8  ;;  %v6264_v15 = vsel %vm10830_vm14, %v6259_v35, %v6263_v8 }
 0x6f3   : > { %v6362_v23 = vunpack.c.l.b16 %v6318_v3  ;;  %v6345_v26 = vunpack.c.l.b16 %v6264_v15  ;;  %6904 = vmatpush.bf16.msrb.mxu3 %v10494_v25 }
 0x6f4   : > { %v6269_v7 = vrot.slane %v6268_v17, 4 }
 0x6f5   : > { %v6366_v21 = vpack.c.b16 %v6362_v23, %v6361_v53 }
 0x6f6   : > { %v6274_v36 = vsel %vm10830_vm14, %v6269_v7, %v6273_v18 }
 0x6f7   : > { %6650 = vmatmul.bf16.gmra.mxu1 %v6366_v21  ;;  %v6346_v4 = vunpack.c.l.b16 %v6274_v36  ;;  %6905 = vmatpush.bf16.msrb.mxu3 %v10493_v2 }
 0x6f9   : > { %v6350_v27 = vpack.c.b16 %v6346_v4, %v6345_v26 }
 0x6fe   : > { %6621 = vmatmul.bf16.gmra.mxu0 %v6350_v27 }
 0x740   : > { %v6578_v5 = vpop.f32.mrf.mxu3 }
 0x741   : > { %v6579_v29 = vadd.f32 %v12550_v43, %v6578_v5 }
 0x744   : > { %v6636_v14 = vpop.f32.mrf.mxu1 }
 0x748   : > { %v6580_v28 = vpop.f32.mrf.mxu3 }
 0x749   : > { %v6581_v56 = vadd.f32 %v12550_v43, %v6580_v28 }
 0x74b   : > { %v6607_v47 = vpop.f32.mrf.mxu0 }
 0x74c   : > { %v6638_v58 = vpop.f32.mrf.mxu1  ;;  %v6608_v39 = vadd.f32 %v6607_v47, %v6579_v29 }
 0x74e   : > { %v6637_v59 = vadd.f32 %v6636_v14, %v6608_v39 }
 0x750   : > { %v6656_v13 = vmax.f32 %v6637_v59, 0.0  ;;  %v6583_v33 = vpop.f32.mrf.mxu3 }
 0x751   : > { %v6584_v21 = vadd.f32 %v12550_v43, %v6583_v33 }
 0x752   : > { %v6664_v41 = vpack.c.bf16 %v6656_v13, %v6656_v13 }
 0x753   : > { %v6609_v8 = vpop.f32.mrf.mxu0 }
 0x754   : > { %v6641_v31 = vpop.f32.mrf.mxu1  ;;  %v6610_v3 = vadd.f32 %v6609_v8, %v6581_v56  ;;  %v6672_v17 = vunpack.c.l.bf16 %v6664_v41  ;;  %v6720_v36 = vunpack.c.l.b16 %v6664_v41  ;;  %v10535_v41 = vld [vmem:[%s12991_s3 + $0x270] sm:$0xff] }
 0x756   : > { %v6639_v53 = vadd.f32 %v6638_v58, %v6610_v3  ;;  %v6680_v7 = vadd.f32 %v6672_v17, %v12244_v40  ;;  %v10536_v40 = vld [vmem:[%s12991_s3 + $0x278] sm:$0xff]  ;;  %v10534_v17 = vld [vmem:[%s12991_s3 + $0x268] sm:$0xff] }
 0x757   : > { %7952 = vmatpush.bf16.msra.mxu3 %v10536_v40 }
 0x758   : > { %v6657_v23 = vmax.f32 %v6639_v53, 0.0  ;;  %v6585_v35 = vpop.f32.mrf.mxu3  ;;  %v7579_v0 = vpack.c.bf16 %v6680_v7, %v6680_v7 }
 0x759   : > { %v6586_v59 = vadd.f32 %v12550_v43, %v6585_v35 }
 0x75a   : > { %v6665_v18 = vpack.c.bf16 %v6657_v23, %v6657_v23  ;;  %v12560_v47 = vunpack.c.l.b16 %v7579_v0 }
 0x75b   : > { %v6612_v15 = vpop.f32.mrf.mxu0  ;;  %7953 = vmatpush.bf16.msra.mxu3 %v10535_v41 }
 0x75c   : > { %v6673_v4 = vunpack.c.l.bf16 %v6665_v18  ;;  %v6721_v26 = vunpack.c.l.b16 %v6665_v18  ;;  %v6613_v27 = vadd.f32 %v6612_v15, %v6584_v21  ;;  %v6643_v10 = vpop.f32.mrf.mxu1 }
 0x75e   : > { %v6681_v25 = vadd.f32 %v6673_v4, %v12258_v42  ;;  %v6728_v2 = vpack.c.b16 %v6721_v26, %v6720_v36  ;;  %v6642_v5 = vadd.f32 %v6641_v31, %v6613_v27  ;;  %v10533_v26 = vld [vmem:[%s12991_s3 + $0x260] sm:$0xff] }
 0x75f   : > { %7954 = vmatpush.bf16.msra.mxu3 %v10534_v17 }
 0x760   : > { %v7580_v14 = vpack.c.bf16 %v6681_v25, %v6681_v25  ;;  %v6658_v28 = vmax.f32 %v6642_v5, 0.0  ;;  %6906 = vmatmul.bf16.vlgmr.msrb.gmra.mxu3 %v6728_v2  ;;  %v6588_v29 = vpop.f32.mrf.mxu3  ;;  %v10532_v5 = vld [vmem:[%s12991_s3 + $0x258] sm:$0xff] }
 0x761   : > { %v6589_v35 = vadd.f32 %v12550_v43, %v6588_v29 }
 0x762   : > { %v12562_v58 = vunpack.c.l.b16 %v7580_v14  ;;  %v6666_v39 = vpack.c.bf16 %v6658_v28, %v6658_v28 }
 0x763   : > { %v6614_v13 = vpop.f32.mrf.mxu0  ;;  %7955 = vmatpush.bf16.msra.mxu3 %v10533_v26 }
 0x764   : > { %v7659_v42 = vpack.c.b16 %v12562_v58, %v12560_v47  ;;  %v6615_v33 = vadd.f32 %v6614_v13, %v6586_v59  ;;  %v6674_v56 = vunpack.c.l.bf16 %v6666_v39  ;;  %v6646_v31 = vpop.f32.mrf.mxu1  ;;  %v6722_v21 = vunpack.c.l.b16 %v6666_v39 }
 0x766   : > { %v6644_v8 = vadd.f32 %v6643_v10, %v6615_v33  ;;  %v6682_v53 = vadd.f32 %v6674_v56, %v12266_v57 }
 0x767   : > { %7956 = vmatpush.bf16.msra.mxu3 %v10532_v5 }
 0x768   : > { %v6659_v3 = vmax.f32 %v6644_v8, 0.0  ;;  %v6590_v18 = vpop.f32.mrf.mxu3  ;;  %v7581_v27 = vpack.c.bf16 %v6682_v53, %v6682_v53 }
 0x769   : > { %v6591_v39 = vadd.f32 %v12550_v43, %v6590_v18  ;;  %v10529_v18 = vld [vmem:[%s12991_s3 + $0x240] sm:$0xff] }
 0x76a   : > { %v6667_v23 = vpack.c.bf16 %v6659_v3, %v6659_v3  ;;  %v12582_v28 = vunpack.c.l.b16 %v7581_v27 }
 0x76b   : > { %v6617_v7 = vpop.f32.mrf.mxu0 }
 0x76c   : > { %v6675_v15 = vunpack.c.l.bf16 %v6667_v23  ;;  %v6723_v36 = vunpack.c.l.b16 %v6667_v23  ;;  %v6618_v4 = vadd.f32 %v6617_v7, %v6589_v35  ;;  %v6648_v14 = vpop.f32.mrf.mxu1 }
 0x76e   : > { %v6683_v10 = vadd.f32 %v6675_v15, %v12279_v20  ;;  %v6647_v0 = vadd.f32 %v6646_v31, %v6618_v4  ;;  %v6729_v25 = vpack.c.b16 %v6723_v36, %v6722_v21  ;;  %v10531_v20 = vld [vmem:[%s12991_s3 + $0x250] sm:$0xff]  ;;  %v10530_v31 = vld [vmem:[%s12991_s3 + $0x248] sm:$0xff] }
 0x76f   : > { %7957 = vmatpush.bf16.msra.mxu3 %v10531_v20 }
 0x770   : > { %v7582_v57 = vpack.c.bf16 %v6683_v10, %v6683_v10  ;;  %v6660_v2 = vmax.f32 %v6647_v0, 0.0  ;;  %6911 = vmatmul.bf16.gmra.mxu3 %v6729_v25  ;;  %v6593_v41 = vpop.f32.mrf.mxu3 }
 0x771   : > { %v6594_v53 = vadd.f32 %v12550_v43, %v6593_v41 }
 0x772   : > { %v12584_v29 = vunpack.c.l.b16 %v7582_v57  ;;  %v6668_v40 = vpack.c.bf16 %v6660_v2, %v6660_v2 }
 0x773   : > { %v6619_v59 = vpop.f32.mrf.mxu0  ;;  %7958 = vmatpush.bf16.msra.mxu3 %v10530_v31 }
 0x774   : > { %v7660_v13 = vpack.c.b16 %v12584_v29, %v12582_v28  ;;  %v6620_v33 = vadd.f32 %v6619_v59, %v6591_v39  ;;  %v6676_v56 = vunpack.c.l.bf16 %v6668_v40  ;;  %v6651_v35 = vpop.f32.mrf.mxu1  ;;  %v6724_v21 = vunpack.c.l.b16 %v6668_v40  ;;  %v10553_v28 = vld [vmem:[%s12991_s3 + $0x300] sm:$0xff] }
 0x776   : > { %v6649_v8 = vadd.f32 %v6648_v14, %v6620_v33  ;;  %v6684_v23 = vadd.f32 %v6676_v56, %v12290_v19 }
 0x777   : > { %7959 = vmatpush.bf16.msra.mxu3 %v10529_v18 }
 0x778   : > { %v6661_v3 = vmax.f32 %v6649_v8, 0.0  ;;  %v7583_v0 = vpack.c.bf16 %v6684_v23, %v6684_v23  ;;  %v6595_v25 = vpop.f32.mrf.mxu3 }
 0x779   : > { %v6596_v5 = vadd.f32 %v12550_v43, %v6595_v25  ;;  %v10508_v25 = vld [vmem:[%s12989_s1 + $0x6d8] sm:$0xff] }
 0x77a   : > { %v6669_v17 = vpack.c.bf16 %v6661_v3, %v6661_v3  ;;  %v12602_v14 = vunpack.c.l.b16 %v7583_v0  ;;  %v10524_v0 = vld [vmem:[%s12989_s1 + $0x758] sm:$0xff] }
 0x77b   : > { %v6622_v7 = vpop.f32.mrf.mxu0  ;;  %10577 = vmatpush.bf16.msrb.mxu3 %v10560_v1 }
 0x77c   : > { %v6677_v15 = vunpack.c.l.bf16 %v6669_v17  ;;  %v6725_v36 = vunpack.c.l.b16 %v6669_v17  ;;  %v6623_v4 = vadd.f32 %v6622_v7, %v6594_v53  ;;  %v6653_v33 = vpop.f32.mrf.mxu1 }
 0x77e   : > { %v6652_v26 = vadd.f32 %v6651_v35, %v6623_v4  ;;  %v6730_v27 = vpack.c.b16 %v6725_v36, %v6724_v21  ;;  %v6685_v10 = vadd.f32 %v6677_v15, %v12303_v52  ;;  %v10520_v36 = vld [vmem:[%s12989_s1 + $0x738] sm:$0xff]  ;;  %v10527_v4 = vld [vmem:[%s12989_s1 + $0x770] sm:$0xff] }
 0x77f   : > { %7473 = vmatpush.bf16.msrb.mxu1 %v10520_v36 }
 0x780   : > { %v6662_v57 = vmax.f32 %v6652_v26, 0.0  ;;  %6916 = vmatmul.bf16.gmra.mxu3 %v6730_v27  ;;  %v7584_v19 = vpack.c.bf16 %v6685_v10, %v6685_v10  ;;  %v10510_v26 = vld [vmem:[%s12989_s1 + $0x6e8] sm:$0xff]  ;;  %v13006_v27 = vpack.c.b16 %v11522_v63, %v11520_v61  ;;  %v10517_v10 = vld [vmem:[%s12989_s1 + $0x720] sm:$0xff]  ;;  %v10507_v61 = vld [vmem:[%s12989_s1 + $0x6d0] sm:$0xff] }
 0x781   : > { %v10516_v63 = vld [vmem:[%s12989_s1 + $0x718] sm:$0xff] }
 0x782   : > { %v6670_v2 = vpack.c.bf16 %v6662_v57, %v6662_v57  ;;  %v12604_v39 = vunpack.c.l.b16 %v7584_v19  ;;  %v6878_v57 = vpop.f32.mrf.mxu2  ;;  %v13007_v19 = vpack.c.b16 %v11530_v62, %v11528_v16  ;;  %v10506_v16 = vld [vmem:[%s12989_s1 + $0x6c8] sm:$0xff] }
 0x783   : > { %v6624_v40 = vpop.f32.mrf.mxu0  ;;  %7474 = vmatpush.bf16.msrb.mxu1 %v10519_v54 }
 0x784   : > { %v6625_v59 = vadd.f32 %v6624_v40, %v6596_v5  ;;  %v7661_v20 = vpack.c.b16 %v12604_v39, %v12602_v14  ;;  %v6678_v52 = vunpack.c.l.bf16 %v6670_v2  ;;  %v6726_v3 = vunpack.c.l.b16 %v6670_v2  ;;  %v10523_v2 = vld [vmem:[%s12989_s1 + $0x750] sm:$0xff]  ;;  %v10505_v5 = vld [vmem:[%s12989_s1 + $0x6c0] sm:$0xff] }
 0x785   : > { %v12688_v40 = vld [vmem:[%s12992_s4 + $0x2] ss:$0 sm:$0xff] }
 0x786   : > { %v6654_v41 = vadd.f32 %v6653_v33, %v6625_v59  ;;  %v6686_v31 = vadd.f32 %v6678_v52, %v12314_v46  ;;  %v10528_v46 = vld [vmem:[%s12989_s1 + $0x778] sm:$0xff]  ;;  %v10515_v59 = vld [vmem:[%s12989_s1 + $0x710] sm:$0xff]  ;;  %v10522_v33 = vld [vmem:[%s12989_s1 + $0x748] sm:$0xff]  ;;  %v6879_v52 = vadd.f32 %v12688_v40, %v6878_v57 }
 0x787   : > { %7502 = vmatpush.bf16.msrb.mxu2 %v10528_v46  ;;  %7475 = vmatpush.bf16.msrb.mxu1 %v10518_v49  ;;  %v7018_v57 = vld [vmem:[#allocation2 + $0x8] sm:$0x1] }
 0x788   : > { %v6663_v56 = vmax.f32 %v6654_v41, 0.0  ;;  %v7585_v35 = vpack.c.bf16 %v6686_v31, %v6686_v31  ;;  %v10514_v31 = vld [vmem:[%s12989_s1 + $0x708] sm:$0xff] }
 0x78a   : > { %v6671_v8 = vpack.c.bf16 %v6663_v56, %v6663_v56  ;;  %v12610_v18 = vunpack.c.l.b16 %v7585_v35  ;;  %v6880_v62 = vpop.f32.mrf.mxu2 }
 0x78b   : > { %7503 = vmatpush.bf16.msrb.mxu2 %v10527_v4  ;;  %7476 = vmatpush.bf16.msrb.mxu1 %v10517_v10 }
 0x78c   : > { %v6679_v17 = vunpack.c.l.bf16 %v6671_v8  ;;  %v6727_v53 = vunpack.c.l.b16 %v6671_v8 }
 0x78e   : > { %v6731_v43 = vpack.c.b16 %v6727_v53, %v6726_v3  ;;  %v6687_v23 = vadd.f32 %v6679_v17, %v12327_v30  ;;  %v10512_v30 = vld [vmem:[%s12989_s1 + $0x6f8] sm:$0xff]  ;;  %v10521_v3 = vld [vmem:[%s12989_s1 + $0x740] sm:$0xff] }
 0x78f   : > { %7444 = vmatpush.bf16.msrb.mxu0 %v10512_v30  ;;  %7477 = vmatpush.bf16.msrb.mxu1 %v10516_v63 }
 0x790   : > { %6921 = vmatmul.bf16.gmra.mxu3 %v6731_v43  ;;  %v7586_v7 = vpack.c.bf16 %v6687_v23, %v6687_v23  ;;  %v10513_v43 = vld [vmem:[%s12989_s1 + $0x700] sm:$0xff]  ;;  %v6881_v23 = vadd.f32 %v12688_v40, %v6880_v62 }
 0x792   : > { %v12612_v21 = vunpack.c.l.b16 %v7586_v7  ;;  %v6883_v56 = vpop.f32.mrf.mxu2 }
 0x793   : > { %7445 = vmatpush.bf16.msrb.mxu0 %v10511_v55  ;;  %7478 = vmatpush.bf16.msrb.mxu1 %v10515_v59 }
 0x794   : > { %v7662_v15 = vpack.c.b16 %v12612_v21, %v12610_v18 }
 0x797   : > { %7446 = vmatpush.bf16.msrb.mxu0 %v10510_v26  ;;  %7479 = vmatpush.bf16.msrb.mxu1 %v10514_v31  ;;  %v6884_v26 = vadd.f32 %v12688_v40, %v6883_v56 }
 0x79a   : > { %v6885_v4 = vpop.f32.mrf.mxu2 }
 0x79b   : > { %7480 = vmatpush.bf16.msrb.mxu1 %v10513_v43  ;;  %v6886_v59 = vadd.f32 %v12688_v40, %v6885_v4  ;;  %v7021_v43 = vld [vmem:[#allocation2 + $0xc] sm:$0xf] }
 0x7a0   : > { %7960 = vmatmul.bf16.vlgmr.msra.gmra.mxu3 %v7611_v60  ;;  %v10526_v60 = vld [vmem:[%s12989_s1 + $0x768] sm:$0xff] }
 0x7a1   : > { %7504 = vmatpush.bf16.msrb.mxu2 %v10526_v60 }
 0x7a5   : > { %7505 = vmatpush.bf16.msrb.mxu2 %v10525_v12 }
 0x7a9   : > { %7506 = vmatpush.bf16.msrb.mxu2 %v10524_v0 }
 0x7ad   : > { %7507 = vmatpush.bf16.msrb.mxu2 %v10523_v2  ;;  %v6888_v2 = vpop.f32.mrf.mxu2 }
 0x7b0   : > { %7965 = vmatmul.bf16.gmra.mxu3 %v7612_v34  ;;  %v10509_v34 = vld [vmem:[%s12989_s1 + $0x6e0] sm:$0xff] }
 0x7b1   : > { %7447 = vmatpush.bf16.msrb.mxu0 %v10509_v34  ;;  %7508 = vmatpush.bf16.msrb.mxu2 %v10522_v33 }
 0x7b5   : > { %7448 = vmatpush.bf16.msrb.mxu0 %v10508_v25  ;;  %7509 = vmatpush.bf16.msrb.mxu2 %v10521_v3 }
 0x7b9   : > { %7449 = vmatpush.bf16.msrb.mxu0 %v10507_v61  ;;  %8039 = vmatpush.bf16.msra.mxu2 %v10560_v1 }
 0x7bd   : > { %7450 = vmatpush.bf16.msrb.mxu0 %v10506_v16 }
 0x7c0   : > { %7970 = vmatmul.bf16.gmra.mxu3 %v13006_v27 }
 0x7c1   : > { %7451 = vmatpush.bf16.msrb.mxu0 %v10505_v5 }
 0x7d0   : > { %7975 = vmatmul.bf16.gmra.mxu3 %v13007_v19 }
 0x7e3   : > { %v6907_v41 = vpop.f32.mrf.mxu3 }
 0x7e4   : > { %v12697_v8 = vadd.f32 %v6907_v41, %v6879_v52 }
 0x7e6   : > { %v6927_v17 = vpack.c.bf16 %v12697_v8, %v12697_v8 }
 0x7e8   : > { %v6936_v53 = vshrl.u32 %v6927_v17, 16  ;;  %v6939_v7 = vshll.u32 %v6927_v17, 16 }
 0x7ea   : > { %v6938_v35 = vrot.slane %v6936_v53, 7 }
 0x7eb   : > { %v6909_v46 = vpop.f32.mrf.mxu3 }
 0x7ec   : > { %v6941_v30 = vor.u32 %v6939_v7, %v6938_v35  ;;  %v12711_v36 = vadd.f32 %v6909_v46, %v6881_v23  ;;  %v6942_v27 = vrot.slane %v6938_v35, 4 }
 0x7ee   : > { %v7015_v55 = vsel %vm10759_vm8, %v6941_v30, %v12465_v50  ;;  %v6928_v54 = vpack.c.bf16 %v12711_v36, %v12711_v36 }
 0x7ef   : > { %7016 = vst [vmem:[#allocation2] sm:$0xf] %v7015_v55 }
 0x7f0   : > { %v6944_v60 = vshrl.u32 %v6928_v54, 16  ;;  %v6947_v12 = vshll.u32 %v6928_v54, 16 }
 0x7f2   : > { %v6946_v49 = vrot.slane %v6944_v60, 7 }
 0x7f3   : > { %v6912_v34 = vpop.f32.mrf.mxu3 }
 0x7f4   : > { %v6949_v10 = vor.u32 %v6947_v12, %v6946_v49  ;;  %v6951_v0 = vrot.slane %v6946_v49, 4  ;;  %v12719_v25 = vadd.f32 %v6912_v34, %v6884_v26 }
 0x7f6   : > { %v6950_v19 = vsel %vm10750_vm7, %v6942_v27, %v6949_v10  ;;  %v7019_v50 = vsel %vm10708_vm3, %v6951_v0, %v7018_v57  ;;  %v6929_v61 = vpack.c.bf16 %v12719_v25, %v12719_v25  ;;  %v7042_v63 = vld [vmem:[#allocation2] sm:$0xf]  ;;  %v10544_v0 = vld [vmem:[%s12991_s3 + $0x2b8] sm:$0xff]  ;;  %v6889_v57 = vadd.f32 %v12688_v40, %v6888_v2 }
 0x7f7   : > { %7017 = vst [vmem:[#allocation2 + $0x4] sm:$0xf] %v6950_v19  ;;  %v7055_v62 = vshrl.u32 %v7042_v63, 16  ;;  %v7058_v5 = vshll.u32 %v7042_v63, 16  ;;  %v7150_v56 = vld [vmem:[#allocation2] sm:$0xe]  ;;  %v6890_v19 = vpop.f32.mrf.mxu2  ;;  %7981 = vmatpush.bf16.msra.mxu0 %v10544_v0 }
 0x7f8   : > { %7020 = vst [vmem:[#allocation2 + $0x8] sm:$0x1] %v7019_v50  ;;  %v6953_v16 = vshrl.u32 %v6929_v61, 16  ;;  %v6956_v52 = vshll.u32 %v6929_v61, 16  ;;  %v9879_v30 = vrot.slane %v7150_v56, 9 }
 0x7f9   : > { %v7057_v17 = vrot.slane %v7055_v62, 4  ;;  %v7060_v53 = vrot.slane %v7058_v5, 5 }
 0x7fa   : > { %v6955_v33 = vrot.slane %v6953_v16, 7 }
 0x7fb   : > { %v6914_v41 = vpop.f32.mrf.mxu3  ;;  %v7061_v26 = vor.u32 %v7060_v53, %v7057_v17  ;;  %v7025_v53 = vld [vmem:[#allocation2 + $0x14] sm:$0x1] }
 0x7fc   : > { %v6958_v31 = vor.u32 %v6956_v52, %v6955_v33  ;;  %v12728_v3 = vadd.f32 %v6914_v41, %v6886_v59  ;;  %v6959_v16 = vrot.slane %v6955_v33, 4 }
 0x7fe   : > { %v7022_v23 = vsel %vm10759_vm8, %v6958_v31, %v7021_v43  ;;  %v6930_v35 = vpack.c.bf16 %v12728_v3, %v12728_v3  ;;  %v10501_v7 = vld [vmem:[#allocation2] sm:$0xff]  ;;  %v7062_v43 = vrot.slane %v7061_v26, 4 }
 0x7ff   : > { %v7043_v46 = vld [vmem:[#allocation2 + $0x4] sm:$0xf]  ;;  %7023 = vst [vmem:[#allocation2 + $0xc] sm:$0xf] %v7022_v23  ;;  %v7050_v4 = vld [vmem:[#allocation2 + $0x8] sm:$0x1]  ;;  %7452 = vmatmul.bf16.vlgmr.msrb.gmra.mxu0 %v10501_v7 }
 0x800   : > { %v7168_v55 = vrot.slane %v7043_v46, 5  ;;  %v7064_v54 = vshll.u32 %v7043_v46, 16  ;;  %v6961_v60 = vshrl.u32 %v6930_v35, 16  ;;  %v7068_v49 = vshrl.u32 %v7043_v46, 16  ;;  %v10543_v23 = vld [vmem:[%s12991_s3 + $0x2b0] sm:$0xff] }
 0x801   : > { %v7171_v27 = vrot.slane %v7050_v4, 5  ;;  %v6964_v61 = vshll.u32 %v6930_v35, 16  ;;  %v7074_v52 = vshll.u32 %v7050_v4, 16  ;;  %7982 = vmatpush.bf16.msra.mxu0 %v10543_v23 }
 0x802   : > { %v7169_v12 = vsel %vm10811_vm13, %v9879_v30, %v7168_v55  ;;  %v7170_v34 = vrot.slane %v7168_v55, 4  ;;  %v7066_v10 = vrot.slane %v7064_v54, 5  ;;  %v6963_v50 = vrot.slane %v6961_v60, 7 }
 0x803   : > { %v7070_v63 = vrot.slane %v7068_v49, 4  ;;  %v6917_v62 = vpop.f32.mrf.mxu3  ;;  %v7230_v59 = vunpack.c.l.b16 %v7169_v12  ;;  %v7076_v54 = vrot.slane %v7074_v52, 5  ;;  %v10542_v12 = vld [vmem:[%s12991_s3 + $0x2a8] sm:$0xff] }
 0x804   : > { %v7172_v5 = vsel %vm10811_vm13, %v7170_v34, %v7171_v27  ;;  %v6966_v41 = vor.u32 %v6964_v61, %v6963_v50  ;;  %v6968_v56 = vrot.slane %v6963_v50, 4  ;;  %v12742_v31 = vadd.f32 %v6917_v62, %v6889_v57  ;;  %v6893_v62 = vpop.f32.mrf.mxu2 }
 0x805   : > { %v7231_v17 = vunpack.c.l.b16 %v7172_v5  ;;  %v7071_v2 = vor.u32 %v7070_v63, %v7066_v10  ;;  %v7067_v4 = vsel %vm10830_vm14, %v7062_v43, %v7066_v10  ;;  %v6891_v34 = vadd.f32 %v12688_v40, %v6890_v19  ;;  %7983 = vmatpush.bf16.msra.mxu0 %v10542_v12  ;;  %v12766_v19 = vld [vmem:[%s12991_s3 + $0x2f8] sm:$0xff] }
 0x806   : > { %v6967_v33 = vsel %vm10750_vm7, %v6959_v16, %v6966_v41  ;;  %v7026_v35 = vsel %vm10708_vm3, %v6968_v56, %v7025_v53  ;;  %v6931_v7 = vpack.c.bf16 %v12742_v31, %v12742_v31  ;;  %v7044_v30 = vld [vmem:[#allocation2 + $0xc] sm:$0xf]  ;;  %v7214_v10 = vunpack.c.l.b16 %v7067_v4  ;;  %v7028_v56 = vld [vmem:[#allocation2 + $0x18] sm:$0xf]  ;;  %10569 = vmatpush.bf16.msra.mxu1 %v12766_v19 }
 0x807   : > { %v7238_v46 = vpack.c.b16 %v7231_v17, %v7230_v59  ;;  %7024 = vst [vmem:[#allocation2 + $0x10] sm:$0xf] %v6967_v33  ;;  %v7072_v55 = vrot.slane %v7071_v2, 4  ;;  %v7079_v60 = vshrl.u32 %v7044_v30, 16  ;;  %v7082_v49 = vshll.u32 %v7044_v30, 16  ;;  %v10541_v17 = vld [vmem:[%s12991_s3 + $0x2a0] sm:$0xff] }
 0x808   : > { %7027 = vst [vmem:[#allocation2 + $0x14] sm:$0x1] %v7026_v35  ;;  %v6970_v26 = vshrl.u32 %v6931_v7, 16  ;;  %v6973_v57 = vshll.u32 %v6931_v7, 16  ;;  %v7151_v63 = vld [vmem:[#allocation2 + $0xc] sm:$0xe] }
 0x809   : > { %7510 = vmatmul.bf16.vlgmr.msrb.gmra.mxu2 %v7238_v46  ;;  %v7077_v27 = vsel %vm10830_vm14, %v7072_v55, %v7076_v54  ;;  %v7081_v16 = vrot.slane %v7079_v60, 4  ;;  %v7084_v41 = vrot.slane %v7082_v49, 5  ;;  %v9880_v33 = vrot.slane %v7151_v63, 9  ;;  %7984 = vmatpush.bf16.msra.mxu0 %v10541_v17  ;;  %v12779_v54 = vld [vmem:[%s12991_s3 + $0x2f0] sm:$0xff]  ;;  %v10540_v60 = vld [vmem:[%s12991_s3 + $0x298] sm:$0xff] }
 0x80a   : > { %v6972_v0 = vrot.slane %v6970_v26, 7  ;;  %v7215_v50 = vunpack.c.l.b16 %v7077_v27  ;;  %v6894_v27 = vadd.f32 %v12688_v40, %v6893_v62  ;;  %10570 = vmatpush.bf16.msra.mxu1 %v12779_v54  ;;  %v12795_v62 = vld [vmem:[%s12991_s3 + $0x2e8] sm:$0xff] }
 0x80b   : > { %v6919_v61 = vpop.f32.mrf.mxu3  ;;  %v7085_v4 = vor.u32 %v7084_v41, %v7081_v16 }
 0x80c   : > { %v6975_v5 = vor.u32 %v6973_v57, %v6972_v0  ;;  %v12761_v59 = vadd.f32 %v6919_v61, %v6891_v34  ;;  %v7222_v52 = vpack.c.b16 %v7215_v50, %v7214_v10  ;;  %v6976_v61 = vrot.slane %v6972_v0, 4  ;;  %v10539_v0 = vld [vmem:[%s12991_s3 + $0x290] sm:$0xff] }
 0x80d   : > { %7985 = vmatpush.bf16.msra.mxu0 %v10540_v60 }
 0x80e   : > { %v7029_v53 = vsel %vm10759_vm8, %v6975_v5, %v7028_v56  ;;  %v6932_v43 = vpack.c.bf16 %v12761_v59, %v12761_v59  ;;  %7481 = vmatmul.bf16.vlgmr.msrb.gmra.mxu1 %v7222_v52  ;;  %v10502_v2 = vld [vmem:[#allocation2 + $0xc] sm:$0xff] }
 0x80f   : > { %v7045_v23 = vld [vmem:[#allocation2 + $0x10] sm:$0xf]  ;;  %7030 = vst [vmem:[#allocation2 + $0x18] sm:$0xf] %v7029_v53  ;;  %v7051_v35 = vld [vmem:[#allocation2 + $0x14] sm:$0x1]  ;;  %7457 = vmatmul.bf16.gmra.mxu0 %v10502_v2  ;;  %10571 = vmatpush.bf16.msra.mxu1 %v12795_v62 }
 0x810   : > { %v7175_v7 = vrot.slane %v7045_v23, 5  ;;  %v7088_v46 = vshll.u32 %v7045_v23, 16  ;;  %v6978_v30 = vshrl.u32 %v6932_v43, 16  ;;  %v7092_v55 = vshrl.u32 %v7045_v23, 16 }
 0x811   : > { %v7178_v12 = vrot.slane %v7051_v35, 5  ;;  %v6981_v10 = vshll.u32 %v6932_v43, 16  ;;  %v7098_v52 = vshll.u32 %v7051_v35, 16  ;;  %v7032_v43 = vld [vmem:[#allocation2 + $0x20] sm:$0x1]  ;;  %v7086_v2 = vrot.slane %v7085_v4, 4  ;;  %7986 = vmatpush.bf16.msra.mxu0 %v10539_v0 }
 0x812   : > { %v7176_v26 = vsel %vm10811_vm13, %v9880_v33, %v7175_v7  ;;  %v7177_v49 = vrot.slane %v7175_v7, 4  ;;  %v7090_v34 = vrot.slane %v7088_v46, 5  ;;  %v6980_v57 = vrot.slane %v6978_v30, 7  ;;  %v6895_v33 = vpop.f32.mrf.mxu2 }
 0x813   : > { %v7094_v50 = vrot.slane %v7092_v55, 4  ;;  %v6922_v63 = vpop.f32.mrf.mxu3  ;;  %v7232_v5 = vunpack.c.l.b16 %v7176_v26 }
 0x814   : > { %v7179_v16 = vsel %vm10811_vm13, %v7177_v49, %v7178_v12  ;;  %v6983_v41 = vor.u32 %v6981_v10, %v6980_v57  ;;  %v6985_v56 = vrot.slane %v6980_v57, 4  ;;  %v12790_v17 = vadd.f32 %v6922_v63, %v6894_v27  ;;  %v12812_v57 = vld [vmem:[%s12991_s3 + $0x2e0] sm:$0xff]  ;;  %v10538_v10 = vld [vmem:[%s12991_s3 + $0x288] sm:$0xff] }
 0x815   : > { %v7233_v53 = vunpack.c.l.b16 %v7179_v16  ;;  %v7095_v23 = vor.u32 %v7094_v50, %v7090_v34  ;;  %v7091_v60 = vsel %vm10830_vm14, %v7086_v2, %v7090_v34  ;;  %v7100_v49 = vrot.slane %v7098_v52, 5  ;;  %10572 = vmatpush.bf16.msra.mxu1 %v12812_v57  ;;  %7987 = vmatpush.bf16.msra.mxu0 %v10538_v10 }
 0x816   : > { %v6984_v35 = vsel %vm10750_vm7, %v6976_v61, %v6983_v41  ;;  %v7033_v7 = vsel %vm10708_vm3, %v6985_v56, %v7032_v43  ;;  %v6933_v46 = vpack.c.bf16 %v12790_v17, %v12790_v17  ;;  %v7046_v55 = vld [vmem:[#allocation2 + $0x18] sm:$0xf]  ;;  %v6896_v34 = vadd.f32 %v12688_v40, %v6895_v33  ;;  %v10537_v33 = vld [vmem:[%s12991_s3 + $0x280] sm:$0xff] }
 0x817   : > { %v7239_v30 = vpack.c.b16 %v7233_v53, %v7232_v5  ;;  %7031 = vst [vmem:[#allocation2 + $0x1c] sm:$0xf] %v6984_v35  ;;  %v7096_v26 = vrot.slane %v7095_v23, 4  ;;  %v7103_v4 = vshrl.u32 %v7046_v55, 16  ;;  %v7106_v27 = vshll.u32 %v7046_v55, 16  ;;  %v12826_v40 = vld [vmem:[%s12991_s3 + $0x2d8] sm:$0xff] }
 0x818   : > { %7034 = vst [vmem:[#allocation2 + $0x20] sm:$0x1] %v7033_v7  ;;  %v6987_v12 = vshrl.u32 %v6933_v46, 16  ;;  %v6990_v63 = vshll.u32 %v6933_v46, 16  ;;  %v7216_v16 = vunpack.c.l.b16 %v7091_v60  ;;  %v7152_v41 = vld [vmem:[#allocation2 + $0x18] sm:$0xe] }
 0x819   : > { %7515 = vmatmul.bf16.gmra.mxu2 %v7239_v30  ;;  %v7101_v50 = vsel %vm10830_vm14, %v7096_v26, %v7100_v49  ;;  %v7105_v56 = vrot.slane %v7103_v4, 4  ;;  %v7108_v2 = vrot.slane %v7106_v27, 5  ;;  %v7035_v23 = vld [vmem:[#allocation2 + $0x24] sm:$0xf]  ;;  %v9881_v55 = vrot.slane %v7152_v41, 9  ;;  %10573 = vmatpush.bf16.msra.mxu1 %v12826_v40 }
 0x81a   : > { %v6989_v61 = vrot.slane %v6987_v12, 7  ;;  %v7217_v5 = vunpack.c.l.b16 %v7101_v50  ;;  %7988 = vmatpush.bf16.msra.mxu0 %v10537_v33 }
 0x81b   : > { %v6924_v52 = vpop.f32.mrf.mxu3  ;;  %v7109_v12 = vor.u32 %v7108_v2, %v7105_v56 }
 0x81c   : > { %v6992_v53 = vor.u32 %v6990_v63, %v6989_v61  ;;  %v12821_v0 = vadd.f32 %v6924_v52, %v6896_v34  ;;  %v7223_v43 = vpack.c.b16 %v7217_v5, %v7216_v16 }
 0x81d   : > { %10574 = vmatpush.bf16.msra.mxu1 %v12839_v44 }
 0x81e   : > { %v7036_v35 = vsel %vm10759_vm8, %v6992_v53, %v7035_v23  ;;  %v6934_v7 = vpack.c.bf16 %v12821_v0, %v12821_v0  ;;  %7486 = vmatmul.bf16.gmra.mxu1 %v7223_v43  ;;  %v10503_v46 = vld [vmem:[#allocation2 + $0x18] sm:$0xff]  ;;  %8010 = vmatpush.bf16.msrb.mxu0 %v12766_v19  ;;  %v6993_v53 = vrot.slane %v6989_v61, 4  ;;  %v7110_v19 = vrot.slane %v7109_v12, 4 }
 0x81f   : > { %v7047_v30 = vld [vmem:[#allocation2 + $0x1c] sm:$0xf]  ;;  %7037 = vst [vmem:[#allocation2 + $0x24] sm:$0xf] %v7036_v35  ;;  %v7052_v60 = vld [vmem:[#allocation2 + $0x20] sm:$0x1]  ;;  %7462 = vmatmul.bf16.gmra.mxu0 %v10503_v46 }
 0x820   : > { %v7182_v26 = vrot.slane %v7047_v30, 5  ;;  %v7112_v49 = vshll.u32 %v7047_v30, 16  ;;  %v6995_v4 = vshrl.u32 %v6934_v7, 16  ;;  %v7116_v27 = vshrl.u32 %v7047_v30, 16  ;;  %v10546_v35 = vld [vmem:[%s12991_s3 + $0x2c8] sm:$0xff] }
 0x821   : > { %v7185_v50 = vrot.slane %v7052_v60, 5  ;;  %v6998_v5 = vshll.u32 %v6934_v7, 16  ;;  %v7122_v41 = vshll.u32 %v7052_v60, 16  ;;  %v7039_v46 = vld [vmem:[#allocation2 + $0x2c] sm:$0x1]  ;;  %10575 = vmatpush.bf16.msra.mxu1 %v10546_v35 }
 0x822   : > { %v7183_v10 = vsel %vm10811_vm13, %v9881_v55, %v7182_v26  ;;  %v7184_v34 = vrot.slane %v7182_v26, 4  ;;  %v7114_v63 = vrot.slane %v7112_v49, 5  ;;  %v6997_v16 = vrot.slane %v6995_v4, 7  ;;  %8011 = vmatpush.bf16.msrb.mxu0 %v12779_v54  ;;  %v10545_v54 = vld [vmem:[%s12991_s3 + $0x2c0] sm:$0xff] }
 0x823   : > { %v7118_v52 = vrot.slane %v7116_v27, 4  ;;  %v7234_v23 = vunpack.c.l.b16 %v7183_v10  ;;  %v7124_v60 = vrot.slane %v7122_v41, 5 }
 0x824   : > { %v7186_v56 = vsel %vm10811_vm13, %v7184_v34, %v7185_v50  ;;  %v7000_v43 = vor.u32 %v6998_v5, %v6997_v16  ;;  %v7002_v2 = vrot.slane %v6997_v16, 4  ;;  %v7115_v49 = vsel %vm10830_vm14, %v7110_v19, %v7114_v63 }
 0x825   : > { %v7235_v33 = vunpack.c.l.b16 %v7186_v56  ;;  %v7119_v30 = vor.u32 %v7118_v52, %v7114_v63  ;;  %v7218_v38 = vunpack.c.l.b16 %v7115_v49  ;;  %10576 = vmatpush.bf16.msra.mxu1 %v10545_v54 }
 0x826   : > { %v7001_v61 = vsel %vm10750_vm7, %v6993_v53, %v7000_v43  ;;  %v7040_v7 = vsel %vm10708_vm3, %v7002_v2, %v7039_v46  ;;  %v7048_v26 = vld [vmem:[#allocation2 + $0x24] sm:$0xf]  ;;  %8012 = vmatpush.bf16.msrb.mxu0 %v12795_v62 }
 0x827   : > { %v7240_v55 = vpack.c.b16 %v7235_v33, %v7234_v23  ;;  %7038 = vst [vmem:[#allocation2 + $0x28] sm:$0xf] %v7001_v61  ;;  %v7120_v4 = vrot.slane %v7119_v30, 4  ;;  %v7127_v27 = vshrl.u32 %v7048_v26, 16  ;;  %v7130_v10 = vshll.u32 %v7048_v26, 16 }
 0x828   : > { %7041 = vst [vmem:[#allocation2 + $0x2c] sm:$0x1] %v7040_v7  ;;  %v7153_v34 = vld [vmem:[#allocation2 + $0x24] sm:$0xe] }
 0x829   : > { %7520 = vmatmul.bf16.gmra.mxu2 %v7240_v55  ;;  %v7125_v9 = vsel %vm10830_vm14, %v7120_v4, %v7124_v60  ;;  %v7129_v50 = vrot.slane %v7127_v27, 4  ;;  %v7132_v63 = vrot.slane %v7130_v10, 5  ;;  %v9882_v41 = vrot.slane %v7153_v34, 9 }
 0x82a   : > { %v7219_v12 = vunpack.c.l.b16 %v7125_v9  ;;  %8013 = vmatpush.bf16.msrb.mxu0 %v12812_v57 }
 0x82b   : > { %v7133_v43 = vor.u32 %v7132_v63, %v7129_v50 }
 0x82c   : > { %v7224_v16 = vpack.c.b16 %v7219_v12, %v7218_v38  ;;  %v13008_v12 = vpack.c.b16 %v12142_v32, %v12140_v6  ;;  %v13010_v6 = vpack.c.b16 %v12161_v22, %v12163_v51  ;;  %v10558_v32 = vld [vmem:[%s12991_s3 + $0x328] sm:$0xff]  ;;  %v10556_v22 = vld [vmem:[%s12991_s3 + $0x318] sm:$0xff]  ;;  %v10555_v51 = vld [vmem:[%s12991_s3 + $0x310] sm:$0xff] }
 0x82d   : > { %v7134_v7 = vrot.slane %v7133_v43, 4 }
 0x82e   : > { %7491 = vmatmul.bf16.gmra.mxu1 %v7224_v16  ;;  %v10504_v5 = vld [vmem:[#allocation2 + $0x24] sm:$0xff]  ;;  %8014 = vmatpush.bf16.msrb.mxu0 %v12826_v40 }
 0x82f   : > { %v7049_v52 = vld [vmem:[#allocation2 + $0x28] sm:$0xf]  ;;  %v7053_v53 = vld [vmem:[#allocation2 + $0x2c] sm:$0x1]  ;;  %7467 = vmatmul.bf16.gmra.mxu0 %v10504_v5 }
 0x830   : > { %v7189_v56 = vrot.slane %v7049_v52, 5  ;;  %v7136_v2 = vshll.u32 %v7049_v52, 16  ;;  %v7140_v23 = vshrl.u32 %v7049_v52, 16  ;;  %v7192_v62 = vrot.slane %v7053_v53, 5 }
 0x831   : > { %v7146_v33 = vshll.u32 %v7053_v53, 16 }
 0x832   : > { %v7190_v46 = vsel %vm10811_vm13, %v9882_v41, %v7189_v56  ;;  %v7191_v19 = vrot.slane %v7189_v56, 4  ;;  %v7138_v30 = vrot.slane %v7136_v2, 5  ;;  %v7142_v61 = vrot.slane %v7140_v23, 4  ;;  %8015 = vmatpush.bf16.msrb.mxu0 %v12839_v44 }
 0x833   : > { %v7236_v60 = vunpack.c.l.b16 %v7190_v46  ;;  %v7148_v27 = vrot.slane %v7146_v33, 5  ;;  %v13009_v44 = vpack.c.b16 %v12151_v24, %v12153_v48  ;;  %v13011_v24 = vpack.c.b16 %v12171_v45, %v12169_v11  ;;  %v10557_v48 = vld [vmem:[%s12991_s3 + $0x320] sm:$0xff]  ;;  %v10554_v45 = vld [vmem:[%s12991_s3 + $0x308] sm:$0xff] }
 0x834   : > { %v7193_v57 = vsel %vm10811_vm13, %v7191_v19, %v7192_v62  ;;  %v7143_v55 = vor.u32 %v7142_v61, %v7138_v30  ;;  %v7139_v49 = vsel %vm10830_vm14, %v7134_v7, %v7138_v30 }
 0x835   : > { %v7237_v26 = vunpack.c.l.b16 %v7193_v57  ;;  %v7220_v40 = vunpack.c.l.b16 %v7139_v49 }
 0x836   : > { %v7144_v4 = vrot.slane %v7143_v55, 4  ;;  %8016 = vmatpush.bf16.msrb.mxu0 %v10546_v35  ;;  %v10559_v35 = vld [vmem:[%s12991_s3 + $0x330] sm:$0xff] }
 0x837   : > { %v7241_v10 = vpack.c.b16 %v7237_v26, %v7236_v60  ;;  %8040 = vmatpush.bf16.msra.mxu2 %v10559_v35  ;;  %10578 = vmatpush.bf16.msrb.mxu3 %v10559_v35 }
 0x838   : > { %v7149_v9 = vsel %vm10830_vm14, %v7144_v4, %v7148_v27 }
 0x839   : > { %7525 = vmatmul.bf16.gmra.mxu2 %v7241_v10  ;;  %v7221_v38 = vunpack.c.l.b16 %v7149_v9 }
 0x83a   : > { %8017 = vmatpush.bf16.msrb.mxu0 %v10545_v54 }
 0x83b   : > { %v7225_v37 = vpack.c.b16 %v7221_v38, %v7220_v40  ;;  %8041 = vmatpush.bf16.msra.mxu2 %v10558_v32  ;;  %10579 = vmatpush.bf16.msrb.mxu3 %v10558_v32 }
 0x83e   : > { %7496 = vmatmul.bf16.gmra.mxu1 %v7225_v37 }
 0x83f   : > { %7989 = vmatmul.bf16.vlgmr.msra.gmra.mxu0 %v13008_v12  ;;  %8042 = vmatpush.bf16.msra.mxu2 %v10557_v48 }
 0x840   : > { %10580 = vmatpush.bf16.msrb.mxu3 %v10557_v48 }
 0x843   : > { %8043 = vmatpush.bf16.msra.mxu2 %v10556_v22 }
 0x844   : > { %10581 = vmatpush.bf16.msrb.mxu3 %v10556_v22 }
 0x847   : > { %8044 = vmatpush.bf16.msra.mxu2 %v10555_v51 }
 0x848   : > { %10582 = vmatpush.bf16.msrb.mxu3 %v10555_v51 }
 0x84b   : > { %8045 = vmatpush.bf16.msra.mxu2 %v10554_v45 }
 0x84c   : > { %10583 = vmatpush.bf16.msrb.mxu3 %v10554_v45 }
 0x84e   : > { %8023 = vmatmul.bf16.vlgmr.msra.gmra.mxu1 %v7660_v13  ;;  %v12925_v13 = vld [vmem:[%s12990_s2 + $0x9] ss:$0 sm:$0xff] }
 0x84f   : > { %7994 = vmatmul.bf16.gmra.mxu0 %v13009_v44  ;;  %8046 = vmatpush.bf16.msra.mxu2 %v10553_v28 }
 0x850   : > { %10584 = vmatpush.bf16.msrb.mxu3 %v10553_v28 }
 0x85e   : > { %8028 = vmatmul.bf16.gmra.mxu1 %v7661_v20 }
 0x85f   : > { %7999 = vmatmul.bf16.gmra.mxu0 %v13010_v6 }
 0x86e   : > { %8033 = vmatmul.bf16.gmra.mxu1 %v7662_v15 }
 0x86f   : > { %8004 = vmatmul.bf16.gmra.mxu0 %v13011_v24 }
 0x87c   : > { %v7453_v11 = vpop.f32.mrf.mxu0 }
 0x87d   : > { %v7454_v14 = vadd.f32 %v12925_v13, %v7453_v11 }
 0x87f   : > { %8018 = vmatmul.bf16.vlgmr.msrb.gmra.mxu0 %v7659_v42 }
 0x884   : > { %v7455_v29 = vpop.f32.mrf.mxu0 }
 0x885   : > { %v7456_v42 = vadd.f32 %v12925_v13, %v7455_v29 }
 0x88b   : > { %v7482_v39 = vpop.f32.mrf.mxu1 }
 0x88c   : > { %v7511_v20 = vpop.f32.mrf.mxu2  ;;  %v7483_v18 = vadd.f32 %v7482_v39, %v7454_v14  ;;  %v7458_v21 = vpop.f32.mrf.mxu0 }
 0x88d   : > { %v7459_v53 = vadd.f32 %v12925_v13, %v7458_v21 }
 0x88e   : > { %v7512_v47 = vadd.f32 %v7511_v20, %v7483_v18 }
 0x890   : > { %v7531_v58 = vmax.f32 %v7512_v47, 0.0 }
 0x892   : > { %v7539_v15 = vpack.c.bf16 %v7531_v58, %v7531_v58 }
 0x893   : > { %v7484_v54 = vpop.f32.mrf.mxu1 }
 0x894   : > { %v7513_v34 = vpop.f32.mrf.mxu2  ;;  %v7485_v50 = vadd.f32 %v7484_v54, %v7456_v42  ;;  %v7547_v63 = vunpack.c.l.bf16 %v7539_v15  ;;  %v7460_v5 = vpop.f32.mrf.mxu0 }
 0x895   : > { %v7461_v60 = vadd.f32 %v12925_v13, %v7460_v5 }
 0x896   : > { %v7514_v16 = vadd.f32 %v7513_v34, %v7485_v50  ;;  %v7555_v41 = vadd.f32 %v7547_v63, %v12697_v8 }
 0x898   : > { %v7532_v52 = vmax.f32 %v7514_v16, 0.0  ;;  %v7587_v33 = vpack.c.bf16 %v7555_v41, %v7555_v41 }
 0x89a   : > { %v7540_v56 = vpack.c.bf16 %v7532_v52, %v7532_v52  ;;  %v7675_v7 = vunpack.c.l.b16 %v7587_v33 }
 0x89b   : > { %v7487_v43 = vpop.f32.mrf.mxu1 }
 0x89c   : > { %v7516_v2 = vpop.f32.mrf.mxu2  ;;  %v7548_v23 = vunpack.c.l.bf16 %v7540_v56  ;;  %v7488_v62 = vadd.f32 %v7487_v43, %v7459_v53  ;;  %v7463_v57 = vpop.f32.mrf.mxu0 }
 0x89e   : > { %v7556_v46 = vadd.f32 %v7548_v23, %v12711_v36  ;;  %v7517_v19 = vadd.f32 %v7516_v2, %v7488_v62  ;;  %v7464_v36 = vadd.f32 %v12925_v13, %v7463_v57 }
 0x8a0   : > { %v7588_v30 = vpack.c.bf16 %v7556_v46, %v7556_v46  ;;  %v7533_v61 = vmax.f32 %v7517_v19, 0.0 }
 0x8a2   : > { %v7676_v55 = vunpack.c.l.b16 %v7588_v30  ;;  %v7541_v26 = vpack.c.bf16 %v7533_v61, %v7533_v61 }
 0x8a3   : > { %v7489_v8 = vpop.f32.mrf.mxu1 }
 0x8a4   : > { %v7518_v49 = vpop.f32.mrf.mxu2  ;;  %v7683_v4 = vpack.c.b16 %v7676_v55, %v7675_v7  ;;  %v7490_v27 = vadd.f32 %v7489_v8, %v7461_v60  ;;  %v7549_v10 = vunpack.c.l.bf16 %v7541_v26  ;;  %v7465_v12 = vpop.f32.mrf.mxu0 }
 0x8a5   : > { %v7466_v28 = vadd.f32 %v12925_v13, %v7465_v12 }
 0x8a6   : > { %v7519_v9 = vadd.f32 %v7518_v49, %v7490_v27  ;;  %8047 = vmatmul.bf16.vlgmr.msra.gmra.mxu2 %v7683_v4  ;;  %v7557_v38 = vadd.f32 %v7549_v10, %v12719_v25 }
 0x8a8   : > { %v7534_v40 = vmax.f32 %v7519_v9, 0.0  ;;  %v7589_v32 = vpack.c.bf16 %v7557_v38, %v7557_v38 }
 0x8aa   : > { %v7542_v37 = vpack.c.bf16 %v7534_v40, %v7534_v40  ;;  %v7677_v11 = vunpack.c.l.b16 %v7589_v32 }
 0x8ab   : > { %v7492_v44 = vpop.f32.mrf.mxu1 }
 0x8ac   : > { %v7521_v1 = vpop.f32.mrf.mxu2  ;;  %v7550_v35 = vunpack.c.l.bf16 %v7542_v37  ;;  %v7493_v6 = vadd.f32 %v7492_v44, %v7464_v36  ;;  %v7468_v18 = vpop.f32.mrf.mxu0 }
 0x8ad   : > { %v7961_v37 = vpop.f32.mrf.mxu3 }
 0x8ae   : > { %v7558_v24 = vadd.f32 %v7550_v35, %v12728_v3  ;;  %v7522_v48 = vadd.f32 %v7521_v1, %v7493_v6  ;;  %v7469_v3 = vadd.f32 %v12925_v13, %v7468_v18  ;;  %v12950_v1 = vld [vmem:[%s12992_s4 + $0x3] ss:$0 sm:$0xff] }
 0x8af   : > { %v7962_v6 = vadd.f32 %v12950_v1, %v7961_v37 }
 0x8b0   : > { %v7590_v22 = vpack.c.bf16 %v7558_v24, %v7558_v24  ;;  %v7535_v51 = vmax.f32 %v7522_v48, 0.0 }
 0x8b2   : > { %v7678_v45 = vunpack.c.l.b16 %v7590_v22  ;;  %v7543_v29 = vpack.c.bf16 %v7535_v51, %v7535_v51 }
 0x8b3   : > { %v7494_v25 = vpop.f32.mrf.mxu1 }
 0x8b4   : > { %v7523_v14 = vpop.f32.mrf.mxu2  ;;  %v7495_v39 = vadd.f32 %v7494_v25, %v7466_v28  ;;  %v7684_v20 = vpack.c.b16 %v7678_v45, %v7677_v11  ;;  %v7551_v21 = vunpack.c.l.bf16 %v7543_v29  ;;  %v7470_v41 = vpop.f32.mrf.mxu0  ;;  %v10615_v45 = vld [vmem:[%s10701_s15] sm:$0xff] }
 0x8b5   : > { %v7471_v23 = vadd.f32 %v12925_v13, %v7470_v41  ;;  %v7963_v12 = vpop.f32.mrf.mxu3 }
 0x8b6   : > { %v7524_v47 = vadd.f32 %v7523_v14, %v7495_v39  ;;  %8052 = vmatmul.bf16.gmra.mxu2 %v7684_v20  ;;  %v7559_v42 = vadd.f32 %v7551_v21, %v12742_v31  ;;  %v7964_v11 = vadd.f32 %v12950_v1, %v7963_v12 }
 0x8b8   : > { %v7536_v58 = vmax.f32 %v7524_v47, 0.0  ;;  %v7591_v16 = vpack.c.bf16 %v7559_v42, %v7559_v42  ;;  %v10616_v42 = vld [vmem:[%s10701_s15 + $0x8] sm:$0xff] }
 0x8ba   : > { %v7544_v15 = vpack.c.bf16 %v7536_v58, %v7536_v58  ;;  %v7679_v43 = vunpack.c.l.b16 %v7591_v16 }
 0x8bb   : > { %v7497_v54 = vpop.f32.mrf.mxu1 }
 0x8bc   : > { %v7526_v34 = vpop.f32.mrf.mxu2  ;;  %v7552_v50 = vunpack.c.l.bf16 %v7544_v15  ;;  %v7498_v63 = vadd.f32 %v7497_v54, %v7469_v3  ;;  %v7990_v13 = vpop.f32.mrf.mxu0 }
 0x8bd   : > { %v7991_v32 = vadd.f32 %v7990_v13, %v7962_v6 }
 0x8be   : > { %v7560_v5 = vadd.f32 %v7552_v50, %v12761_v59  ;;  %v7527_v52 = vadd.f32 %v7526_v34, %v7498_v63 }
 0x8c0   : > { %v7592_v53 = vpack.c.bf16 %v7560_v5, %v7560_v5  ;;  %v7537_v56 = vmax.f32 %v7527_v52, 0.0  ;;  %v10617_v5 = vld [vmem:[%s10701_s15 + $0x10] sm:$0xff] }
 0x8c2   : > { %v7680_v2 = vunpack.c.l.b16 %v7592_v53  ;;  %v7545_v62 = vpack.c.bf16 %v7537_v56, %v7537_v56 }
 0x8c3   : > { %v7499_v31 = vpop.f32.mrf.mxu1 }
 0x8c4   : > { %v7528_v33 = vpop.f32.mrf.mxu2  ;;  %v7500_v46 = vadd.f32 %v7499_v31, %v7471_v23  ;;  %v7685_v19 = vpack.c.b16 %v7680_v2, %v7679_v43  ;;  %v7553_v30 = vunpack.c.l.bf16 %v7545_v62  ;;  %v7992_v10 = vpop.f32.mrf.mxu0  ;;  %v10618_v31 = vld [vmem:[%s10701_s15 + $0x18] sm:$0xff] }
 0x8c5   : > { %v7993_v14 = vadd.f32 %v7992_v10, %v7964_v11  ;;  %v10620_v10 = vld [vmem:[%s10701_s15 + $0x28] sm:$0xff] }
 0x8c6   : > { %v7529_v61 = vadd.f32 %v7528_v33, %v7500_v46  ;;  %8057 = vmatmul.bf16.gmra.mxu2 %v7685_v19  ;;  %v7561_v7 = vadd.f32 %v7553_v30, %v12790_v17 }
 0x8c8   : > { %v7538_v57 = vmax.f32 %v7529_v61, 0.0  ;;  %v7593_v60 = vpack.c.bf16 %v7561_v7, %v7561_v7 }
 0x8ca   : > { %v7546_v59 = vpack.c.bf16 %v7538_v57, %v7538_v57  ;;  %v7681_v49 = vunpack.c.l.b16 %v7593_v60 }
 0x8cb   : > { %v8024_v29 = vpop.f32.mrf.mxu1 }
 0x8cc   : > { %v7554_v55 = vunpack.c.l.bf16 %v7546_v59  ;;  %v7995_v9 = vpop.f32.mrf.mxu0 }
 0x8ce   : > { %v7562_v26 = vadd.f32 %v7554_v55, %v12821_v0  ;;  %v7966_v0 = vpop.f32.mrf.mxu3  ;;  %v10619_v55 = vld [vmem:[%s10701_s15 + $0x20] sm:$0xff] }
 0x8cf   : > { %v7967_v18 = vadd.f32 %v12950_v1, %v7966_v0 }
 0x8d0   : > { %v7594_v8 = vpack.c.bf16 %v7562_v26, %v7562_v26 }
 0x8d1   : > { %v7996_v58 = vadd.f32 %v7995_v9, %v7967_v18 }
 0x8d2   : > { %v7682_v4 = vunpack.c.l.b16 %v7594_v8 }
 0x8d3   : > { %v8026_v15 = vpop.f32.mrf.mxu1  ;;  %v8025_v54 = vadd.f32 %v8024_v29, %v7996_v58 }
 0x8d4   : > { %v7686_v27 = vpack.c.b16 %v7682_v4, %v7681_v49  ;;  %v7997_v40 = vpop.f32.mrf.mxu0 }
 0x8d6   : > { %8062 = vmatmul.bf16.vlgmr.msrb.gmra.mxu3 %v7686_v27  ;;  %v7968_v48 = vpop.f32.mrf.mxu3 }
 0x8d7   : > { %v7969_v50 = vadd.f32 %v12950_v1, %v7968_v48 }
 0x8d9   : > { %v7998_v16 = vadd.f32 %v7997_v40, %v7969_v50 }
 0x8db   : > { %v8027_v53 = vadd.f32 %v8026_v15, %v7998_v16  ;;  %v8029_v56 = vpop.f32.mrf.mxu1 }
 0x8dc   : > { %v8000_v38 = vpop.f32.mrf.mxu0 }
 0x8de   : > { %v7971_v47 = vpop.f32.mrf.mxu3 }
 0x8df   : > { %v7972_v2 = vadd.f32 %v12950_v1, %v7971_v47 }
 0x8e1   : > { %v8001_v62 = vadd.f32 %v8000_v38, %v7972_v2 }
 0x8e3   : > { %v8030_v19 = vadd.f32 %v8029_v56, %v8001_v62  ;;  %v8031_v7 = vpop.f32.mrf.mxu1 }
 0x8e4   : > { %v8002_v36 = vpop.f32.mrf.mxu0 }
 0x8e6   : > { %v7973_v41 = vpop.f32.mrf.mxu3 }
 0x8e7   : > { %v7974_v61 = vadd.f32 %v12950_v1, %v7973_v41 }
 0x8e9   : > { %v8003_v59 = vadd.f32 %v8002_v36, %v7974_v61 }
 0x8eb   : > { %v8032_v26 = vadd.f32 %v8031_v7, %v8003_v59  ;;  %v8034_v40 = vpop.f32.mrf.mxu1 }
 0x8ec   : > { %v12943_v17 = vpop.f32.mrf.mxu0 }
 0x8ee   : > { %v7976_v46 = vpop.f32.mrf.mxu3 }
 0x8ef   : > { %v7977_v4 = vadd.f32 %v12950_v1, %v7976_v46 }
 0x8f1   : > { %v8006_v27 = vadd.f32 %v12943_v17, %v7977_v4 }
 0x8f3   : > { %v8035_v38 = vadd.f32 %v8034_v40, %v8006_v27 }
 0x8f4   : > { %v12945_v44 = vpop.f32.mrf.mxu0 }
 0x8f6   : > { %v7978_v8 = vpop.f32.mrf.mxu3 }
 0x8f7   : > { %v7979_v37 = vadd.f32 %v12950_v1, %v7978_v8 }
 0x8f9   : > { %v8008_v0 = vadd.f32 %v12945_v44, %v7979_v37 }
 0x8fc   : > { %v8019_v35 = vpop.f32.mrf.mxu0 }
 0x8fd   : > { %v8020_v24 = vadd.f32 %v8019_v35, %v7991_v32  ;;  %v10621_v35 = vld [vmem:[%s10701_s15 + $0x30] sm:$0xff]  ;;  %v8036_v32 = vpop.f32.mrf.mxu1 }
 0x904   : > { %v8021_v25 = vpop.f32.mrf.mxu0 }
 0x905   : > { %v8022_v39 = vadd.f32 %v8021_v25, %v7993_v14 }
 0x929   : > { %v8048_v22 = vpop.f32.mrf.mxu2 }
 0x92a   : > { %v8049_v51 = vadd.f32 %v8048_v22, %v8020_v24  ;;  %v8037_v24 = vadd.f32 %v8036_v32, %v8008_v0  ;;  %v10622_v22 = vld [vmem:[%s10701_s15 + $0x38] sm:$0xff] }
 0x92c   : > { %v8068_v28 = vadd.f32 %v10615_v45, %v8049_v51 }
 0x92e   : > { %8076 = vst [vmem:[%s12958_s27] sm:$0xff] %v8068_v28 }
 0x931   : > { %v8050_v20 = vpop.f32.mrf.mxu2 }
 0x932   : > { %v8051_v21 = vadd.f32 %v8050_v20, %v8022_v39 }
 0x934   : > { %v8069_v3 = vadd.f32 %v10616_v42, %v8051_v21 }
 0x936   : > { %8077 = vst [vmem:[%s12958_s27 + $0x8] sm:$0xff] %v8069_v3 }
 0x939   : > { %v8053_v34 = vpop.f32.mrf.mxu2 }
 0x93a   : > { %v8054_v63 = vadd.f32 %v8053_v34, %v8025_v54 }
 0x93c   : > { %v8070_v52 = vadd.f32 %v10617_v5, %v8054_v63 }
 0x93e   : > { %8078 = vst [vmem:[%s12958_s27 + $0x10] sm:$0xff] %v8070_v52 }
 0x941   : > { %v8055_v43 = vpop.f32.mrf.mxu2 }
 0x942   : > { %v8056_v23 = vadd.f32 %v8055_v43, %v8027_v53 }
 0x944   : > { %v8071_v33 = vadd.f32 %v10618_v31, %v8056_v23 }
 0x946   : > { %8079 = vst [vmem:[%s12958_s27 + $0x18] sm:$0xff] %v8071_v33 }
 0x949   : > { %v8058_v30 = vpop.f32.mrf.mxu2 }
 0x94a   : > { %v8059_v57 = vadd.f32 %v8058_v30, %v8030_v19 }
 0x94c   : > { %v8072_v60 = vadd.f32 %v10619_v55, %v8059_v57 }
 0x94e   : > { %8080 = vst [vmem:[%s12958_s27 + $0x20] sm:$0xff] %v8072_v60 }
 0x951   : > { %v8060_v49 = vpop.f32.mrf.mxu2 }
 0x952   : > { %v8061_v13 = vadd.f32 %v8060_v49, %v8032_v26 }
 0x954   : > { %v8073_v9 = vadd.f32 %v10620_v10, %v8061_v13 }
 0x956   : > { %8081 = vst [vmem:[%s12958_s27 + $0x28] sm:$0xff] %v8073_v9 }
 0x959   : > { %v8063_v36 = vpop.f32.mrf.mxu3 }
 0x95a   : > { %v8064_v12 = vadd.f32 %v8063_v36, %v8035_v38 }
 0x95c   : > { %v8074_v6 = vadd.f32 %v10621_v35, %v8064_v12 }
 0x95e   : > { %8082 = vst [vmem:[%s12958_s27 + $0x30] sm:$0xff] %v8074_v6 }
 0x961   : > { %v8065_v48 = vpop.f32.mrf.mxu3 }
 0x962   : > { %v8066_v17 = vadd.f32 %v8065_v48, %v8037_v24 }
 0x964   : > { %v8075_v51 = vadd.f32 %v10622_v22, %v8066_v17 }
 0x966   : > { %8083 = vst [vmem:[%s12958_s27 + $0x38] sm:$0xff] %v8075_v51 }
 0x967 PF: > { %s15_s18 = sadd.s32 1, %s10629_s18  }
 0x968   : > { %p12_p4 = scmp.ge.s32.totalorder %s15_s18, 4  }
 0x96a   :  { %14 = sbr.rel (!%p12_p4) target bundleno = 1 (0x1), region = 91 }

</bundles_post_ra>
